<compile_context>
chip_gen: v5e
topology: v5e:2x2
jax: 0.10.0
libtpu: 0.0.40
codegen_flags: <defaults>
</compile_context>

<pallas_src>
import functools

import jax
import jax.numpy as jnp
from jax.experimental import pallas as pl
from jax.experimental.pallas import tpu as pltpu

_NEG = -1.0e30   # finite "masked" logit (avoids -inf -> NaN on fully-masked rows)
_TC = 8          # decoder timesteps per grid step (amortizes grid-step overhead)


def pointer_kernel(keys_ref, h0_ref, c0_ref, madd_ref,
                   win_ref, bin_ref, wgx_ref, wgh_ref, bg_ref,
                   w2_ref, vw_ref,
                   out_ref,
                   din_ref, h_ref, c_ref,
                   *, hp, tc, return_softmax):
    """One grid step = one batch tile x `tc` consecutive decoder timesteps."""
    t_chunk = pl.program_id(1)

    @pl.when(t_chunk == 0)
    def _init():
        din_ref[...] = jnp.zeros_like(din_ref)
        h_ref[...] = h0_ref[...]
        c_ref[...] = c0_ref[...]

    # Recurrent state lives in registers across the (statically unrolled)
    # chunk; VMEM scratch only carries it between chunks / grid steps.
    din = din_ref[...]
    h = h_ref[...]
    c = c_ref[...]

    for t_local in range(tc):
        # 2) input FFNN + sigmoid (decoder input is itself recurrent).
        # NOTE: padded hidden lanes of `din` hold sigmoid(0)=0.5, but every
        # weight row they multiply is zero-padded, so valid lanes stay clean.
        din = jax.nn.sigmoid(
            jnp.dot(din, win_ref[...], preferred_element_type=jnp.float32)
            + bin_ref[...])

        # 4) LSTMCell: two gate matmuls (no concat), pre-summed bias,
        #    PyTorch gate order i, f, g, o blocked along the lane axis.
        gates = (jnp.dot(din, wgx_ref[...], preferred_element_type=jnp.float32)
                 + jnp.dot(h, wgh_ref[...], preferred_element_type=jnp.float32)
                 + bg_ref[...])
        i_g = jax.nn.sigmoid(gates[:, 0 * hp:1 * hp])
        f_g = jax.nn.sigmoid(gates[:, 1 * hp:2 * hp])
        g_g = jnp.tanh(gates[:, 2 * hp:3 * hp])
        o_g = jax.nn.sigmoid(gates[:, 3 * hp:4 * hp])
        c = f_g * c + i_g * g_g
        h = o_g * jnp.tanh(c)

        # 5) content-based attention: v . tanh(keys + W2 h); b1/b2 are folded
        #    into `keys`, v_b and the additive mask into `madd` (wrapper).
        q = jnp.dot(h, w2_ref[...], preferred_element_type=jnp.float32)
        t = jnp.tanh(keys_ref[...] + q[:, None, :])            # (bt, sq, hp)
        ui = jnp.sum(t * vw_ref[...][None, :, :], axis=-1) + madd_ref[...]
        if return_softmax:
            m = jnp.max(ui, axis=-1, keepdims=True)
            e = jnp.exp(ui - m)
            ui = e * pl.reciprocal(jnp.sum(e, axis=-1, keepdims=True),
                                   approx=True)

        out_ref[:, t_local:t_local + 1, :] = ui[:, None, :]

    din_ref[...] = din
    h_ref[...] = h
    c_ref[...] = c


def _round_up(x, m):
    return ((x + m - 1) // m) * m


def _vmem_capacity_bytes():
    try:
        cap = getattr(pltpu.get_tpu_info(), "vmem_capacity_bytes", None)
        if cap:
            return int(cap)
    except Exception:
        pass
    return 64 << 20   # conservative default = v7x per-core VMEM


def _est_vmem_bytes(bt, sq, hp, tc):
    f = 4
    keys = 2 * bt * sq * hp * f                         # double-buffered keys tile
    small_in = 2 * (2 * bt * hp + bt * sq) * f          # h0, c0, additive mask
    weights = 2 * (2 * hp * hp + 2 * hp * 4 * hp + 6 * hp) * f
    out = 2 * bt * tc * sq * f
    scratch = 3 * bt * hp * f
    temps = (bt * 4 * hp + 2 * bt * sq * hp + 4 * bt * hp) * f
    return keys + small_in + weights + out + scratch + temps


def pointer_forward(encoder_outputs, encoder_h_s, encoder_c_s, mask, params,
                    return_softmax=False):
    # TODO(synk): dropout (train-mode only) is not implemented; eval forward.
    B, S, H = encoder_outputs.shape
    f32 = jnp.float32
    hp = _round_up(H, 128)          # lane-aligned hidden width
    sq = _round_up(S, 8)            # sublane-aligned key length (NOT 128)
    tc = _TC
    st = _round_up(S, tc)           # timesteps padded to a chunk multiple

    enc = jnp.asarray(encoder_outputs, f32)
    h0 = jnp.asarray(encoder_h_s, f32)
    c0 = jnp.asarray(encoder_c_s, f32)
    mask_f = jnp.asarray(mask, f32)

    # Hoisted, timestep-invariant key projection (full-MXU-fill XLA matmul);
    # fold the query bias b2 into keys and scalar v_b into the additive mask.
    w1 = jnp.asarray(params["w1"], f32)
    keys = (jnp.einsum("bsh,kh->bsk", enc, w1)
            + jnp.asarray(params["b1"], f32)
            + jnp.asarray(params["b2"], f32))
    madd = (jnp.where(mask_f > 0.5, 0.0, _NEG)
            + jnp.asarray(params["v_b"], f32)[0, 0])

    # --- batch tile selection (generation-aware VMEM budget) ---------------
    bp0 = _round_up(max(B, 8), 8)
    cap = _vmem_capacity_bytes()
    budget = int(0.7 * cap)
    bt = min(128, bp0)
    if bp0 >= 16 and bt >= bp0:     # keep >=2 batch blocks for v7x megacore
        bt = max(8, ((bp0 // 2) // 8) * 8)
    while bt > 8 and _est_vmem_bytes(bt, sq, hp, tc) > budget:
        bt -= 8
    bp = _round_up(bp0, bt)
    n_b = bp // bt

    keys_p = jnp.pad(keys, ((0, bp - B), (0, sq - S), (0, hp - H)))
    h0_p = jnp.pad(h0, ((0, bp - B), (0, hp - H)))
    c0_p = jnp.pad(c0, ((0, bp - B), (0, hp - H)))
    # padded key positions / padded batch rows are fully masked (finite).
    madd_p = jnp.pad(madd, ((0, bp - B), (0, sq - S)), constant_values=_NEG)

    def pad2(a, r, c):
        a = jnp.asarray(a, f32)
        return jnp.pad(a, ((0, r - a.shape[0]), (0, c - a.shape[1])))

    # Weights pre-transposed to (in, out) and zero-padded to lane alignment.
    w_in_t = pad2(jnp.asarray(params["w_in"], f32).T, hp, hp)
    b_in = pad2(params["b_in"], 1, hp)

    def pad_gate_w(w):              # (4H, In) -> (hp, 4*hp), gate-blocked
        w = jnp.asarray(w, f32)
        h4, hin = w.shape
        hq = h4 // 4
        w4 = jnp.pad(w.reshape(4, hq, hin),
                     ((0, 0), (0, hp - hq), (0, hp - hin)))
        return w4.reshape(4 * hp, hp).T

    def pad_gate_b(b):              # (1, 4H) -> (1, 4*hp), gate-blocked
        b4 = jnp.asarray(b, f32).reshape(4, -1)
        return jnp.pad(b4, ((0, 0), (0, hp - b4.shape[1]))).reshape(1, 4 * hp)

    w_gx = pad_gate_w(params["w_ih"])
    w_gh = pad_gate_w(params["w_hh"])
    b_g = pad_gate_b(params["b_ih"]) + pad_gate_b(params["b_hh"])
    w2_t = pad2(jnp.asarray(params["w2"], f32).T, hp, hp)
    v_w = pad2(params["v_w"], 1, hp)

    b3 = lambda b, t: (b, 0, 0)
    b2m = lambda b, t: (b, 0)
    wmap = lambda b, t: (0, 0)

    in_specs = [
        pl.BlockSpec((bt, sq, hp), b3),        # keys (+ b1 + b2)
        pl.BlockSpec((bt, hp), b2m),           # h0
        pl.BlockSpec((bt, hp), b2m),           # c0
        pl.BlockSpec((bt, sq), b2m),           # additive mask (+ v_b)
        pl.BlockSpec((hp, hp), wmap),          # w_in^T
        pl.BlockSpec((1, hp), wmap),           # b_in
        pl.BlockSpec((hp, 4 * hp), wmap),      # w_ih^T (gate-blocked)
        pl.BlockSpec((hp, 4 * hp), wmap),      # w_hh^T (gate-blocked)
        pl.BlockSpec((1, 4 * hp), wmap),       # b_ih + b_hh
        pl.BlockSpec((hp, hp), wmap),          # w2^T
        pl.BlockSpec((1, hp), wmap),           # v_w
    ]
    out_specs = pl.BlockSpec((bt, tc, sq), lambda b, t: (b, t, 0))
    scratch_shapes = [
        pltpu.VMEM((bt, hp), f32),    # decoder_input carry
        pltpu.VMEM((bt, hp), f32),    # h carry
        pltpu.VMEM((bt, hp), f32),    # c carry
    ]

    est = _est_vmem_bytes(bt, sq, hp, tc)
    vmem_limit = int(min(max(est + (16 << 20), 32 << 20), int(0.9 * cap)))

    grid_spec = pltpu.PrefetchScalarGridSpec(
        num_scalar_prefetch=0,
        grid=(n_b, st // tc),
        in_specs=in_specs,
        out_specs=out_specs,
        scratch_shapes=scratch_shapes,
    )
    out_padded = pl.pallas_call(
        functools.partial(pointer_kernel, hp=hp, tc=tc,
                          return_softmax=return_softmax),
        out_shape=jax.ShapeDtypeStruct((bp, st, sq), f32),
        grid_spec=grid_spec,
        compiler_params=pltpu.CompilerParams(
            dimension_semantics=("parallel", "arbitrary"),
            vmem_limit_bytes=vmem_limit),
    )(keys_p, h0_p, c0_p, madd_p,
      w_in_t, b_in, w_gx, w_gh, b_g, w2_t, v_w)

    # batch-major output; just slice the padding away (no transpose needed).
    return out_padded[:B, :S, :S]


def _reference_forward(encoder_outputs, encoder_h_s, encoder_c_s, mask, p,
                       return_softmax=False):
    # Pure-JAX reference mirroring the PyTorch module (correctness check).
    # PyTorch masks with -inf; a finite sentinel is used here (see _NEG).
    B, S, H = encoder_outputs.shape
    key_out = jnp.einsum("bsh,kh->bsk", encoder_outputs, p["w1"]) + p["b1"]
    dec_in = jnp.zeros_like(encoder_h_s)
    h, c = encoder_h_s, encoder_c_s
    rows = []
    for _ in range(S):
        dec_in = jax.nn.sigmoid(dec_in @ p["w_in"].T + p["b_in"])
        gates = dec_in @ p["w_ih"].T + p["b_ih"] + h @ p["w_hh"].T + p["b_hh"]
        i_g = jax.nn.sigmoid(gates[:, 0 * H:1 * H])
        f_g = jax.nn.sigmoid(gates[:, 1 * H:2 * H])
        g_g = jnp.tanh(gates[:, 2 * H:3 * H])
        o_g = jax.nn.sigmoid(gates[:, 3 * H:4 * H])
        c = f_g * c + i_g * g_g
        h = o_g * jnp.tanh(c)
        q = h @ p["w2"].T + p["b2"]
        ui = jnp.sum(jnp.tanh(key_out + q[:, None, :]) * p["v_w"][0], -1) + p["v_b"][0, 0]
        ui = jnp.where(mask > 0.5, ui, _NEG)
        if return_softmax:
            ui = jax.nn.softmax(ui, axis=-1)
        rows.append(ui)
    return jnp.stack(rows, axis=1)


def init_params(key, input_size, hidden_size):
    # Deterministic synthetic init (uniform, PyTorch-like scale).
    H, Hin = hidden_size, input_size
    bound = 1.0 / jnp.sqrt(jnp.float32(H))
    ks = jax.random.split(key, 12)
    u = lambda k, shape: jax.random.uniform(k, shape, jnp.float32, -bound, bound)
    return {
        "w_in": u(ks[0], (H, Hin)), "b_in": u(ks[1], (1, H)),
        "w_ih": u(ks[2], (4 * H, Hin)), "w_hh": u(ks[3], (4 * H, H)),
        "b_ih": u(ks[4], (1, 4 * H)), "b_hh": u(ks[5], (1, 4 * H)),
        "w1": u(ks[6], (H, H)), "b1": u(ks[7], (1, H)),
        "w2": u(ks[8], (H, H)), "b2": u(ks[9], (1, H)),
        "v_w": u(ks[10], (1, H)), "v_b": u(ks[11], (1, 1)),
    }


if __name__ == "__main__":
    import numpy as np

    def run_case(B, S, H, lengths, return_softmax):
        root = jax.random.PRNGKey(0)
        k_enc, k_h, k_c, k_p = jax.random.split(root, 4)
        enc = jax.random.normal(k_enc, (B, S, H), jnp.float32)
        h0 = jax.random.normal(k_h, (B, H), jnp.float32)
        c0 = jax.random.normal(k_c, (B, H), jnp.float32)
        mask = jnp.asarray(
            np.stack([np.arange(S) < l for l in lengths]).astype(np.float32))
        params = init_params(k_p, H, H)   # forward implies input_size == hidden_size

        out = jax.block_until_ready(
            pointer_forward(enc, h0, c0, mask, params, return_softmax))
        ref = jax.block_until_ready(
            _reference_forward(enc, h0, c0, mask, params, return_softmax))
        assert out.shape == (B, S, S)
        tol = 5e-3 if return_softmax else 1e-4   # approx reciprocal in softmax path
        np.testing.assert_allclose(np.asarray(out), np.asarray(ref),
                                   rtol=tol, atol=tol)

    # small demo shapes consistent with the module
    run_case(2, 8, 32, [8, 5], return_softmax=False)
    run_case(2, 8, 32, [8, 5], return_softmax=True)
    # larger batch exercises the parallel batch grid axis (>=2 batch blocks)
    run_case(16, 8, 32, [8, 5] * 8, return_softmax=False)

    print("KERNEL_OK")
</pallas_src>

<mosaic_0001>
module attributes {stable_mosaic.version = 11 : i64} {
  func.func @pointer_kernel(%arg0: i32, %arg1: i32, %arg2: memref<8x8x128xf32, #tpu.memory_space<vmem>>, %arg3: memref<8x128xf32, #tpu.memory_space<vmem>>, %arg4: memref<8x128xf32, #tpu.memory_space<vmem>>, %arg5: memref<8x8xf32, #tpu.memory_space<vmem>>, %arg6: memref<128x128xf32, #tpu.memory_space<vmem>>, %arg7: memref<1x128xf32, #tpu.memory_space<vmem>>, %arg8: memref<128x512xf32, #tpu.memory_space<vmem>>, %arg9: memref<128x512xf32, #tpu.memory_space<vmem>>, %arg10: memref<1x512xf32, #tpu.memory_space<vmem>>, %arg11: memref<128x128xf32, #tpu.memory_space<vmem>>, %arg12: memref<1x128xf32, #tpu.memory_space<vmem>>, %arg13: memref<8x8x8xf32, #tpu.memory_space<vmem>>, %arg14: memref<8x128xf32, #tpu.memory_space<vmem>>, %arg15: memref<8x128xf32, #tpu.memory_space<vmem>>, %arg16: memref<8x128xf32, #tpu.memory_space<vmem>>) attributes {dimension_semantics = [#tpu.dimension_semantics<parallel>, #tpu.dimension_semantics<arbitrary>], iteration_bounds = array<i64: 1, 1>, scalar_prefetch = 0 : i64, scratch_operands = 3 : i64, tpu.core_type = #tpu.core_type<tc>, window_params = [{transform_indices = @transform_0, window_bounds = array<i64: 8, 8, 128>}, {transform_indices = @transform_1, window_bounds = array<i64: 8, 128>}, {transform_indices = @transform_2, window_bounds = array<i64: 8, 128>}, {transform_indices = @transform_3, window_bounds = array<i64: 8, 8>}, {pipeline_mode = #tpu.pipeline_mode<synchronous>, transform_indices = @transform_4, window_bounds = array<i64: 128, 128>}, {pipeline_mode = #tpu.pipeline_mode<synchronous>, transform_indices = @transform_5, window_bounds = array<i64: 1, 128>}, {pipeline_mode = #tpu.pipeline_mode<synchronous>, transform_indices = @transform_6, window_bounds = array<i64: 128, 512>}, {pipeline_mode = #tpu.pipeline_mode<synchronous>, transform_indices = @transform_7, window_bounds = array<i64: 128, 512>}, {pipeline_mode = #tpu.pipeline_mode<synchronous>, transform_indices = @transform_8, window_bounds = array<i64: 1, 512>}, {pipeline_mode = #tpu.pipeline_mode<synchronous>, transform_indices = @transform_9, window_bounds = array<i64: 128, 128>}, {pipeline_mode = #tpu.pipeline_mode<synchronous>, transform_indices = @transform_10, window_bounds = array<i64: 1, 128>}, {transform_indices = @transform_11, window_bounds = array<i64: 8, 8, 8>}]} {
    %c0_i32 = arith.constant 0 : i32
    %0 = arith.cmpi eq, %arg1, %c0_i32 : i32
    %1 = arith.extui %0 : i1 to i32
    %c0_i32_0 = arith.constant 0 : i32
    %2 = arith.cmpi ne, %1, %c0_i32_0 : i32
    scf.if %2 {
      %cst_252 = arith.constant 0.000000e+00 : f32
      %481 = vector.broadcast %cst_252 : f32 to vector<8x128xf32>
      %c0_253 = arith.constant 0 : index
      %c0_254 = arith.constant 0 : index
      %482 = vector.load %arg14[%c0_253, %c0_254] : memref<8x128xf32, #tpu.memory_space<vmem>>, vector<8x128xf32>
      tpu.vector_store %arg14[%c0_253, %c0_254], %481 {strides = array<i32>} : memref<8x128xf32, #tpu.memory_space<vmem>>, vector<8x128xf32>,
      %c0_255 = arith.constant 0 : index
      %c0_256 = arith.constant 0 : index
      %483 = vector.load %arg3[%c0_255, %c0_256] : memref<8x128xf32, #tpu.memory_space<vmem>>, vector<8x128xf32>
      %c0_257 = arith.constant 0 : index
      %c0_258 = arith.constant 0 : index
      %484 = vector.load %arg15[%c0_257, %c0_258] : memref<8x128xf32, #tpu.memory_space<vmem>>, vector<8x128xf32>
      tpu.vector_store %arg15[%c0_257, %c0_258], %483 {strides = array<i32>} : memref<8x128xf32, #tpu.memory_space<vmem>>, vector<8x128xf32>,
      %c0_259 = arith.constant 0 : index
      %c0_260 = arith.constant 0 : index
      %485 = vector.load %arg4[%c0_259, %c0_260] : memref<8x128xf32, #tpu.memory_space<vmem>>, vector<8x128xf32>
      %c0_261 = arith.constant 0 : index
      %c0_262 = arith.constant 0 : index
      %486 = vector.load %arg16[%c0_261, %c0_262] : memref<8x128xf32, #tpu.memory_space<vmem>>, vector<8x128xf32>
      tpu.vector_store %arg16[%c0_261, %c0_262], %485 {strides = array<i32>} : memref<8x128xf32, #tpu.memory_space<vmem>>, vector<8x128xf32>,
    } else {
    }
    %c0 = arith.constant 0 : index
    %c0_1 = arith.constant 0 : index
    %3 = vector.load %arg14[%c0, %c0_1] : memref<8x128xf32, #tpu.memory_space<vmem>>, vector<8x128xf32>
    %c0_2 = arith.constant 0 : index
    %c0_3 = arith.constant 0 : index
    %4 = vector.load %arg15[%c0_2, %c0_3] : memref<8x128xf32, #tpu.memory_space<vmem>>, vector<8x128xf32>
    %c0_4 = arith.constant 0 : index
    %c0_5 = arith.constant 0 : index
    %5 = vector.load %arg16[%c0_4, %c0_5] : memref<8x128xf32, #tpu.memory_space<vmem>>, vector<8x128xf32>
    %c0_6 = arith.constant 0 : index
    %c0_7 = arith.constant 0 : index
    %6 = vector.load %arg6[%c0_6, %c0_7] : memref<128x128xf32, #tpu.memory_space<vmem>>, vector<128x128xf32>
    %cst = arith.constant dense<0.000000e+00> : vector<8x128xf32>
    %7 = tpu.matmul %3, %6, %cst {dimension_numbers = #tpu.dot_dimension_numbers<[1], [0], [0], [1], [0, 0, 1, 1], [], []>} : vector<8x128xf32>, vector<128x128xf32>, vector<8x128xf32> -> vector<8x128xf32>
    %c0_8 = arith.constant 0 : index
    %c0_9 = arith.constant 0 : index
    %8 = vector.load %arg7[%c0_8, %c0_9] : memref<1x128xf32, #tpu.memory_space<vmem>>, vector<1x128xf32>
    %9 = vector.broadcast %8 : vector<1x128xf32> to vector<8x128xf32>
    %10 = arith.addf %7, %9 : vector<8x128xf32>
    %11 = arith.negf %10 : vector<8x128xf32>
    %12 = math.exp %11 : vector<8x128xf32>
    %cst_10 = arith.constant 1.000000e+00 : f32
    %13 = vector.broadcast %cst_10 : f32 to vector<8x128xf32>
    %14 = arith.addf %13, %12 : vector<8x128xf32>
    %15 = arith.divf %13, %14 : vector<8x128xf32>
    %c0_11 = arith.constant 0 : index
    %c0_12 = arith.constant 0 : index
    %16 = vector.load %arg8[%c0_11, %c0_12] : memref<128x512xf32, #tpu.memory_space<vmem>>, vector<128x512xf32>
    %cst_13 = arith.constant dense<0.000000e+00> : vector<8x512xf32>
    %17 = tpu.matmul %15, %16, %cst_13 {dimension_numbers = #tpu.dot_dimension_numbers<[1], [0], [0], [1], [0, 0, 1, 1], [], []>} : vector<8x128xf32>, vector<128x512xf32>, vector<8x512xf32> -> vector<8x512xf32>
    %c0_14 = arith.constant 0 : index
    %c0_15 = arith.constant 0 : index
    %18 = vector.load %arg9[%c0_14, %c0_15] : memref<128x512xf32, #tpu.memory_space<vmem>>, vector<128x512xf32>
    %cst_16 = arith.constant dense<0.000000e+00> : vector<8x512xf32>
    %19 = tpu.matmul %4, %18, %cst_16 {dimension_numbers = #tpu.dot_dimension_numbers<[1], [0], [0], [1], [0, 0, 1, 1], [], []>} : vector<8x128xf32>, vector<128x512xf32>, vector<8x512xf32> -> vector<8x512xf32>
    %20 = arith.addf %17, %19 : vector<8x512xf32>
    %c0_17 = arith.constant 0 : index
    %c0_18 = arith.constant 0 : index
    %21 = vector.load %arg10[%c0_17, %c0_18] : memref<1x512xf32, #tpu.memory_space<vmem>>, vector<1x512xf32>
    %22 = vector.broadcast %21 : vector<1x512xf32> to vector<8x512xf32>
    %23 = arith.addf %20, %22 : vector<8x512xf32>
    %24 = vector.extract_strided_slice %23 {offsets = [0, 0], sizes = [8, 128], strides = [1, 1]} : vector<8x512xf32> to vector<8x128xf32>
    %25 = arith.negf %24 : vector<8x128xf32>
    %26 = math.exp %25 : vector<8x128xf32>
    %cst_19 = arith.constant 1.000000e+00 : f32
    %27 = vector.broadcast %cst_19 : f32 to vector<8x128xf32>
    %28 = arith.addf %27, %26 : vector<8x128xf32>
    %29 = arith.divf %27, %28 : vector<8x128xf32>
    %30 = vector.extract_strided_slice %23 {offsets = [0, 128], sizes = [8, 128], strides = [1, 1]} : vector<8x512xf32> to vector<8x128xf32>
    %31 = arith.negf %30 : vector<8x128xf32>
    %32 = math.exp %31 : vector<8x128xf32>
    %cst_20 = arith.constant 1.000000e+00 : f32
    %33 = vector.broadcast %cst_20 : f32 to vector<8x128xf32>
    %34 = arith.addf %33, %32 : vector<8x128xf32>
    %35 = arith.divf %33, %34 : vector<8x128xf32>
    %36 = vector.extract_strided_slice %23 {offsets = [0, 256], sizes = [8, 128], strides = [1, 1]} : vector<8x512xf32> to vector<8x128xf32>
    %37 = math.tanh %36 : vector<8x128xf32>
    %38 = vector.extract_strided_slice %23 {offsets = [0, 384], sizes = [8, 128], strides = [1, 1]} : vector<8x512xf32> to vector<8x128xf32>
    %39 = arith.negf %38 : vector<8x128xf32>
    %40 = math.exp %39 : vector<8x128xf32>
    %cst_21 = arith.constant 1.000000e+00 : f32
    %41 = vector.broadcast %cst_21 : f32 to vector<8x128xf32>
    %42 = arith.addf %41, %40 : vector<8x128xf32>
    %43 = arith.divf %41, %42 : vector<8x128xf32>
    %44 = arith.mulf %35, %5 : vector<8x128xf32>
    %45 = arith.mulf %29, %37 : vector<8x128xf32>
    %46 = arith.addf %44, %45 : vector<8x128xf32>
    %47 = math.tanh %46 : vector<8x128xf32>
    %48 = arith.mulf %43, %47 : vector<8x128xf32>
    %c0_22 = arith.constant 0 : index
    %c0_23 = arith.constant 0 : index
    %49 = vector.load %arg11[%c0_22, %c0_23] : memref<128x128xf32, #tpu.memory_space<vmem>>, vector<128x128xf32>
    %cst_24 = arith.constant dense<0.000000e+00> : vector<8x128xf32>
    %50 = tpu.matmul %48, %49, %cst_24 {dimension_numbers = #tpu.dot_dimension_numbers<[1], [0], [0], [1], [0, 0, 1, 1], [], []>} : vector<8x128xf32>, vector<128x128xf32>, vector<8x128xf32> -> vector<8x128xf32>
    %c0_25 = arith.constant 0 : index
    %c0_26 = arith.constant 0 : index
    %c0_27 = arith.constant 0 : index
    %51 = vector.load %arg2[%c0_25, %c0_26, %c0_27] : memref<8x8x128xf32, #tpu.memory_space<vmem>>, vector<8x8x128xf32>
    %52 = vector.shape_cast %50 : vector<8x128xf32> to vector<8x1x128xf32>
    %53 = vector.broadcast %52 : vector<8x1x128xf32> to vector<8x8x128xf32>
    %54 = arith.addf %51, %53 : vector<8x8x128xf32>
    %55 = math.tanh %54 : vector<8x8x128xf32>
    %c0_28 = arith.constant 0 : index
    %c0_29 = arith.constant 0 : index
    %56 = vector.load %arg12[%c0_28, %c0_29] : memref<1x128xf32, #tpu.memory_space<vmem>>, vector<1x128xf32>
    %57 = vector.shape_cast %56 : vector<1x128xf32> to vector<1x1x128xf32>
    %58 = vector.broadcast %57 : vector<1x1x128xf32> to vector<8x8x128xf32>
    %59 = arith.mulf %55, %58 : vector<8x8x128xf32>
    %cst_30 = arith.constant dense<0.000000e+00> : vector<8x8xf32>
    %60 = vector.multi_reduction <add>, %59, %cst_30 [2] : vector<8x8x128xf32> to vector<8x8xf32>
    %c0_31 = arith.constant 0 : index
    %c0_32 = arith.constant 0 : index
    %61 = vector.load %arg5[%c0_31, %c0_32] : memref<8x8xf32, #tpu.memory_space<vmem>>, vector<8x8xf32>
    %62 = arith.addf %60, %61 : vector<8x8xf32>
    %63 = vector.shape_cast %62 : vector<8x8xf32> to vector<8x1x8xf32>
    %c0_33 = arith.constant 0 : index
    %c0_34 = arith.constant 0 : index
    %c0_35 = arith.constant 0 : index
    %64 = vector.load %arg13[%c0_33, %c0_34, %c0_35] : memref<8x8x8xf32, #tpu.memory_space<vmem>>, vector<8x1x8xf32>
    tpu.vector_store %arg13[%c0_33, %c0_34, %c0_35], %63 {strides = array<i32>} : memref<8x8x8xf32, #tpu.memory_space<vmem>>, vector<8x1x8xf32>,
    %c0_36 = arith.constant 0 : index
    %c0_37 = arith.constant 0 : index
    %65 = vector.load %arg6[%c0_36, %c0_37] : memref<128x128xf32, #tpu.memory_space<vmem>>, vector<128x128xf32>
    %cst_38 = arith.constant dense<0.000000e+00> : vector<8x128xf32>
    %66 = tpu.matmul %15, %65, %cst_38 {dimension_numbers = #tpu.dot_dimension_numbers<[1], [0], [0], [1], [0, 0, 1, 1], [], []>} : vector<8x128xf32>, vector<128x128xf32>, vector<8x128xf32> -> vector<8x128xf32>
    %c0_39 = arith.constant 0 : index
    %c0_40 = arith.constant 0 : index
    %67 = vector.load %arg7[%c0_39, %c0_40] : memref<1x128xf32, #tpu.memory_space<vmem>>, vector<1x128xf32>
    %68 = vector.broadcast %67 : vector<1x128xf32> to vector<8x128xf32>
    %69 = arith.addf %66, %68 : vector<8x128xf32>
    %70 = arith.negf %69 : vector<8x128xf32>
    %71 = math.exp %70 : vector<8x128xf32>
    %cst_41 = arith.constant 1.000000e+00 : f32
    %72 = vector.broadcast %cst_41 : f32 to vector<8x128xf32>
    %73 = arith.addf %72, %71 : vector<8x128xf32>
    %74 = arith.divf %72, %73 : vector<8x128xf32>
    %c0_42 = arith.constant 0 : index
    %c0_43 = arith.constant 0 : index
    %75 = vector.load %arg8[%c0_42, %c0_43] : memref<128x512xf32, #tpu.memory_space<vmem>>, vector<128x512xf32>
    %cst_44 = arith.constant dense<0.000000e+00> : vector<8x512xf32>
    %76 = tpu.matmul %74, %75, %cst_44 {dimension_numbers = #tpu.dot_dimension_numbers<[1], [0], [0], [1], [0, 0, 1, 1], [], []>} : vector<8x128xf32>, vector<128x512xf32>, vector<8x512xf32> -> vector<8x512xf32>
    %c0_45 = arith.constant 0 : index
    %c0_46 = arith.constant 0 : index
    %77 = vector.load %arg9[%c0_45, %c0_46] : memref<128x512xf32, #tpu.memory_space<vmem>>, vector<128x512xf32>
    %cst_47 = arith.constant dense<0.000000e+00> : vector<8x512xf32>
    %78 = tpu.matmul %48, %77, %cst_47 {dimension_numbers = #tpu.dot_dimension_numbers<[1], [0], [0], [1], [0, 0, 1, 1], [], []>} : vector<8x128xf32>, vector<128x512xf32>, vector<8x512xf32> -> vector<8x512xf32>
    %79 = arith.addf %76, %78 : vector<8x512xf32>
    %c0_48 = arith.constant 0 : index
    %c0_49 = arith.constant 0 : index
    %80 = vector.load %arg10[%c0_48, %c0_49] : memref<1x512xf32, #tpu.memory_space<vmem>>, vector<1x512xf32>
    %81 = vector.broadcast %80 : vector<1x512xf32> to vector<8x512xf32>
    %82 = arith.addf %79, %81 : vector<8x512xf32>
    %83 = vector.extract_strided_slice %82 {offsets = [0, 0], sizes = [8, 128], strides = [1, 1]} : vector<8x512xf32> to vector<8x128xf32>
    %84 = arith.negf %83 : vector<8x128xf32>
    %85 = math.exp %84 : vector<8x128xf32>
    %cst_50 = arith.constant 1.000000e+00 : f32
    %86 = vector.broadcast %cst_50 : f32 to vector<8x128xf32>
    %87 = arith.addf %86, %85 : vector<8x128xf32>
    %88 = arith.divf %86, %87 : vector<8x128xf32>
    %89 = vector.extract_strided_slice %82 {offsets = [0, 128], sizes = [8, 128], strides = [1, 1]} : vector<8x512xf32> to vector<8x128xf32>
    %90 = arith.negf %89 : vector<8x128xf32>
    %91 = math.exp %90 : vector<8x128xf32>
    %cst_51 = arith.constant 1.000000e+00 : f32
    %92 = vector.broadcast %cst_51 : f32 to vector<8x128xf32>
    %93 = arith.addf %92, %91 : vector<8x128xf32>
    %94 = arith.divf %92, %93 : vector<8x128xf32>
    %95 = vector.extract_strided_slice %82 {offsets = [0, 256], sizes = [8, 128], strides = [1, 1]} : vector<8x512xf32> to vector<8x128xf32>
    %96 = math.tanh %95 : vector<8x128xf32>
    %97 = vector.extract_strided_slice %82 {offsets = [0, 384], sizes = [8, 128], strides = [1, 1]} : vector<8x512xf32> to vector<8x128xf32>
    %98 = arith.negf %97 : vector<8x128xf32>
    %99 = math.exp %98 : vector<8x128xf32>
    %cst_52 = arith.constant 1.000000e+00 : f32
    %100 = vector.broadcast %cst_52 : f32 to vector<8x128xf32>
    %101 = arith.addf %100, %99 : vector<8x128xf32>
    %102 = arith.divf %100, %101 : vector<8x128xf32>
    %103 = arith.mulf %94, %46 : vector<8x128xf32>
    %104 = arith.mulf %88, %96 : vector<8x128xf32>
    %105 = arith.addf %103, %104 : vector<8x128xf32>
    %106 = math.tanh %105 : vector<8x128xf32>
    %107 = arith.mulf %102, %106 : vector<8x128xf32>
    %c0_53 = arith.constant 0 : index
    %c0_54 = arith.constant 0 : index
    %108 = vector.load %arg11[%c0_53, %c0_54] : memref<128x128xf32, #tpu.memory_space<vmem>>, vector<128x128xf32>
    %cst_55 = arith.constant dense<0.000000e+00> : vector<8x128xf32>
    %109 = tpu.matmul %107, %108, %cst_55 {dimension_numbers = #tpu.dot_dimension_numbers<[1], [0], [0], [1], [0, 0, 1, 1], [], []>} : vector<8x128xf32>, vector<128x128xf32>, vector<8x128xf32> -> vector<8x128xf32>
    %c0_56 = arith.constant 0 : index
    %c0_57 = arith.constant 0 : index
    %c0_58 = arith.constant 0 : index
    %110 = vector.load %arg2[%c0_56, %c0_57, %c0_58] : memref<8x8x128xf32, #tpu.memory_space<vmem>>, vector<8x8x128xf32>
    %111 = vector.shape_cast %109 : vector<8x128xf32> to vector<8x1x128xf32>
    %112 = vector.broadcast %111 : vector<8x1x128xf32> to vector<8x8x128xf32>
    %113 = arith.addf %110, %112 : vector<8x8x128xf32>
    %114 = math.tanh %113 : vector<8x8x128xf32>
    %c0_59 = arith.constant 0 : index
    %c0_60 = arith.constant 0 : index
    %115 = vector.load %arg12[%c0_59, %c0_60] : memref<1x128xf32, #tpu.memory_space<vmem>>, vector<1x128xf32>
    %116 = vector.shape_cast %115 : vector<1x128xf32> to vector<1x1x128xf32>
    %117 = vector.broadcast %116 : vector<1x1x128xf32> to vector<8x8x128xf32>
    %118 = arith.mulf %114, %117 : vector<8x8x128xf32>
    %cst_61 = arith.constant dense<0.000000e+00> : vector<8x8xf32>
    %119 = vector.multi_reduction <add>, %118, %cst_61 [2] : vector<8x8x128xf32> to vector<8x8xf32>
    %c0_62 = arith.constant 0 : index
    %c0_63 = arith.constant 0 : index
    %120 = vector.load %arg5[%c0_62, %c0_63] : memref<8x8xf32, #tpu.memory_space<vmem>>, vector<8x8xf32>
    %121 = arith.addf %119, %120 : vector<8x8xf32>
    %122 = vector.shape_cast %121 : vector<8x8xf32> to vector<8x1x8xf32>
    %c0_64 = arith.constant 0 : index
    %c1 = arith.constant 1 : index
    %c0_65 = arith.constant 0 : index
    %123 = vector.load %arg13[%c0_64, %c1, %c0_65] : memref<8x8x8xf32, #tpu.memory_space<vmem>>, vector<8x1x8xf32>
    tpu.vector_store %arg13[%c0_64, %c1, %c0_65], %122 {strides = array<i32>} : memref<8x8x8xf32, #tpu.memory_space<vmem>>, vector<8x1x8xf32>,
    %c0_66 = arith.constant 0 : index
    %c0_67 = arith.constant 0 : index
    %124 = vector.load %arg6[%c0_66, %c0_67] : memref<128x128xf32, #tpu.memory_space<vmem>>, vector<128x128xf32>
    %cst_68 = arith.constant dense<0.000000e+00> : vector<8x128xf32>
    %125 = tpu.matmul %74, %124, %cst_68 {dimension_numbers = #tpu.dot_dimension_numbers<[1], [0], [0], [1], [0, 0, 1, 1], [], []>} : vector<8x128xf32>, vector<128x128xf32>, vector<8x128xf32> -> vector<8x128xf32>
    %c0_69 = arith.constant 0 : index
    %c0_70 = arith.constant 0 : index
    %126 = vector.load %arg7[%c0_69, %c0_70] : memref<1x128xf32, #tpu.memory_space<vmem>>, vector<1x128xf32>
    %127 = vector.broadcast %126 : vector<1x128xf32> to vector<8x128xf32>
    %128 = arith.addf %125, %127 : vector<8x128xf32>
    %129 = arith.negf %128 : vector<8x128xf32>
    %130 = math.exp %129 : vector<8x128xf32>
    %cst_71 = arith.constant 1.000000e+00 : f32
    %131 = vector.broadcast %cst_71 : f32 to vector<8x128xf32>
    %132 = arith.addf %131, %130 : vector<8x128xf32>
    %133 = arith.divf %131, %132 : vector<8x128xf32>
    %c0_72 = arith.constant 0 : index
    %c0_73 = arith.constant 0 : index
    %134 = vector.load %arg8[%c0_72, %c0_73] : memref<128x512xf32, #tpu.memory_space<vmem>>, vector<128x512xf32>
    %cst_74 = arith.constant dense<0.000000e+00> : vector<8x512xf32>
    %135 = tpu.matmul %133, %134, %cst_74 {dimension_numbers = #tpu.dot_dimension_numbers<[1], [0], [0], [1], [0, 0, 1, 1], [], []>} : vector<8x128xf32>, vector<128x512xf32>, vector<8x512xf32> -> vector<8x512xf32>
    %c0_75 = arith.constant 0 : index
    %c0_76 = arith.constant 0 : index
    %136 = vector.load %arg9[%c0_75, %c0_76] : memref<128x512xf32, #tpu.memory_space<vmem>>, vector<128x512xf32>
    %cst_77 = arith.constant dense<0.000000e+00> : vector<8x512xf32>
    %137 = tpu.matmul %107, %136, %cst_77 {dimension_numbers = #tpu.dot_dimension_numbers<[1], [0], [0], [1], [0, 0, 1, 1], [], []>} : vector<8x128xf32>, vector<128x512xf32>, vector<8x512xf32> -> vector<8x512xf32>
    %138 = arith.addf %135, %137 : vector<8x512xf32>
    %c0_78 = arith.constant 0 : index
    %c0_79 = arith.constant 0 : index
    %139 = vector.load %arg10[%c0_78, %c0_79] : memref<1x512xf32, #tpu.memory_space<vmem>>, vector<1x512xf32>
    %140 = vector.broadcast %139 : vector<1x512xf32> to vector<8x512xf32>
    %141 = arith.addf %138, %140 : vector<8x512xf32>
    %142 = vector.extract_strided_slice %141 {offsets = [0, 0], sizes = [8, 128], strides = [1, 1]} : vector<8x512xf32> to vector<8x128xf32>
    %143 = arith.negf %142 : vector<8x128xf32>
    %144 = math.exp %143 : vector<8x128xf32>
    %cst_80 = arith.constant 1.000000e+00 : f32
    %145 = vector.broadcast %cst_80 : f32 to vector<8x128xf32>
    %146 = arith.addf %145, %144 : vector<8x128xf32>
    %147 = arith.divf %145, %146 : vector<8x128xf32>
    %148 = vector.extract_strided_slice %141 {offsets = [0, 128], sizes = [8, 128], strides = [1, 1]} : vector<8x512xf32> to vector<8x128xf32>
    %149 = arith.negf %148 : vector<8x128xf32>
    %150 = math.exp %149 : vector<8x128xf32>
    %cst_81 = arith.constant 1.000000e+00 : f32
    %151 = vector.broadcast %cst_81 : f32 to vector<8x128xf32>
    %152 = arith.addf %151, %150 : vector<8x128xf32>
    %153 = arith.divf %151, %152 : vector<8x128xf32>
    %154 = vector.extract_strided_slice %141 {offsets = [0, 256], sizes = [8, 128], strides = [1, 1]} : vector<8x512xf32> to vector<8x128xf32>
    %155 = math.tanh %154 : vector<8x128xf32>
    %156 = vector.extract_strided_slice %141 {offsets = [0, 384], sizes = [8, 128], strides = [1, 1]} : vector<8x512xf32> to vector<8x128xf32>
    %157 = arith.negf %156 : vector<8x128xf32>
    %158 = math.exp %157 : vector<8x128xf32>
    %cst_82 = arith.constant 1.000000e+00 : f32
    %159 = vector.broadcast %cst_82 : f32 to vector<8x128xf32>
    %160 = arith.addf %159, %158 : vector<8x128xf32>
    %161 = arith.divf %159, %160 : vector<8x128xf32>
    %162 = arith.mulf %153, %105 : vector<8x128xf32>
    %163 = arith.mulf %147, %155 : vector<8x128xf32>
    %164 = arith.addf %162, %163 : vector<8x128xf32>
    %165 = math.tanh %164 : vector<8x128xf32>
    %166 = arith.mulf %161, %165 : vector<8x128xf32>
    %c0_83 = arith.constant 0 : index
    %c0_84 = arith.constant 0 : index
    %167 = vector.load %arg11[%c0_83, %c0_84] : memref<128x128xf32, #tpu.memory_space<vmem>>, vector<128x128xf32>
    %cst_85 = arith.constant dense<0.000000e+00> : vector<8x128xf32>
    %168 = tpu.matmul %166, %167, %cst_85 {dimension_numbers = #tpu.dot_dimension_numbers<[1], [0], [0], [1], [0, 0, 1, 1], [], []>} : vector<8x128xf32>, vector<128x128xf32>, vector<8x128xf32> -> vector<8x128xf32>
    %c0_86 = arith.constant 0 : index
    %c0_87 = arith.constant 0 : index
    %c0_88 = arith.constant 0 : index
    %169 = vector.load %arg2[%c0_86, %c0_87, %c0_88] : memref<8x8x128xf32, #tpu.memory_space<vmem>>, vector<8x8x128xf32>
    %170 = vector.shape_cast %168 : vector<8x128xf32> to vector<8x1x128xf32>
    %171 = vector.broadcast %170 : vector<8x1x128xf32> to vector<8x8x128xf32>
    %172 = arith.addf %169, %171 : vector<8x8x128xf32>
    %173 = math.tanh %172 : vector<8x8x128xf32>
    %c0_89 = arith.constant 0 : index
    %c0_90 = arith.constant 0 : index
    %174 = vector.load %arg12[%c0_89, %c0_90] : memref<1x128xf32, #tpu.memory_space<vmem>>, vector<1x128xf32>
    %175 = vector.shape_cast %174 : vector<1x128xf32> to vector<1x1x128xf32>
    %176 = vector.broadcast %175 : vector<1x1x128xf32> to vector<8x8x128xf32>
    %177 = arith.mulf %173, %176 : vector<8x8x128xf32>
    %cst_91 = arith.constant dense<0.000000e+00> : vector<8x8xf32>
    %178 = vector.multi_reduction <add>, %177, %cst_91 [2] : vector<8x8x128xf32> to vector<8x8xf32>
    %c0_92 = arith.constant 0 : index
    %c0_93 = arith.constant 0 : index
    %179 = vector.load %arg5[%c0_92, %c0_93] : memref<8x8xf32, #tpu.memory_space<vmem>>, vector<8x8xf32>
    %180 = arith.addf %178, %179 : vector<8x8xf32>
    %181 = vector.shape_cast %180 : vector<8x8xf32> to vector<8x1x8xf32>
    %c0_94 = arith.constant 0 : index
    %c2 = arith.constant 2 : index
    %c0_95 = arith.constant 0 : index
    %182 = vector.load %arg13[%c0_94, %c2, %c0_95] : memref<8x8x8xf32, #tpu.memory_space<vmem>>, vector<8x1x8xf32>
    tpu.vector_store %arg13[%c0_94, %c2, %c0_95], %181 {strides = array<i32>} : memref<8x8x8xf32, #tpu.memory_space<vmem>>, vector<8x1x8xf32>,
    %c0_96 = arith.constant 0 : index
    %c0_97 = arith.constant 0 : index
    %183 = vector.load %arg6[%c0_96, %c0_97] : memref<128x128xf32, #tpu.memory_space<vmem>>, vector<128x128xf32>
    %cst_98 = arith.constant dense<0.000000e+00> : vector<8x128xf32>
    %184 = tpu.matmul %133, %183, %cst_98 {dimension_numbers = #tpu.dot_dimension_numbers<[1], [0], [0], [1], [0, 0, 1, 1], [], []>} : vector<8x128xf32>, vector<128x128xf32>, vector<8x128xf32> -> vector<8x128xf32>
    %c0_99 = arith.constant 0 : index
    %c0_100 = arith.constant 0 : index
    %185 = vector.load %arg7[%c0_99, %c0_100] : memref<1x128xf32, #tpu.memory_space<vmem>>, vector<1x128xf32>
    %186 = vector.broadcast %185 : vector<1x128xf32> to vector<8x128xf32>
    %187 = arith.addf %184, %186 : vector<8x128xf32>
    %188 = arith.negf %187 : vector<8x128xf32>
    %189 = math.exp %188 : vector<8x128xf32>
    %cst_101 = arith.constant 1.000000e+00 : f32
    %190 = vector.broadcast %cst_101 : f32 to vector<8x128xf32>
    %191 = arith.addf %190, %189 : vector<8x128xf32>
    %192 = arith.divf %190, %191 : vector<8x128xf32>
    %c0_102 = arith.constant 0 : index
    %c0_103 = arith.constant 0 : index
    %193 = vector.load %arg8[%c0_102, %c0_103] : memref<128x512xf32, #tpu.memory_space<vmem>>, vector<128x512xf32>
    %cst_104 = arith.constant dense<0.000000e+00> : vector<8x512xf32>
    %194 = tpu.matmul %192, %193, %cst_104 {dimension_numbers = #tpu.dot_dimension_numbers<[1], [0], [0], [1], [0, 0, 1, 1], [], []>} : vector<8x128xf32>, vector<128x512xf32>, vector<8x512xf32> -> vector<8x512xf32>
    %c0_105 = arith.constant 0 : index
    %c0_106 = arith.constant 0 : index
    %195 = vector.load %arg9[%c0_105, %c0_106] : memref<128x512xf32, #tpu.memory_space<vmem>>, vector<128x512xf32>
    %cst_107 = arith.constant dense<0.000000e+00> : vector<8x512xf32>
    %196 = tpu.matmul %166, %195, %cst_107 {dimension_numbers = #tpu.dot_dimension_numbers<[1], [0], [0], [1], [0, 0, 1, 1], [], []>} : vector<8x128xf32>, vector<128x512xf32>, vector<8x512xf32> -> vector<8x512xf32>
    %197 = arith.addf %194, %196 : vector<8x512xf32>
    %c0_108 = arith.constant 0 : index
    %c0_109 = arith.constant 0 : index
    %198 = vector.load %arg10[%c0_108, %c0_109] : memref<1x512xf32, #tpu.memory_space<vmem>>, vector<1x512xf32>
    %199 = vector.broadcast %198 : vector<1x512xf32> to vector<8x512xf32>
    %200 = arith.addf %197, %199 : vector<8x512xf32>
    %201 = vector.extract_strided_slice %200 {offsets = [0, 0], sizes = [8, 128], strides = [1, 1]} : vector<8x512xf32> to vector<8x128xf32>
    %202 = arith.negf %201 : vector<8x128xf32>
    %203 = math.exp %202 : vector<8x128xf32>
    %cst_110 = arith.constant 1.000000e+00 : f32
    %204 = vector.broadcast %cst_110 : f32 to vector<8x128xf32>
    %205 = arith.addf %204, %203 : vector<8x128xf32>
    %206 = arith.divf %204, %205 : vector<8x128xf32>
    %207 = vector.extract_strided_slice %200 {offsets = [0, 128], sizes = [8, 128], strides = [1, 1]} : vector<8x512xf32> to vector<8x128xf32>
    %208 = arith.negf %207 : vector<8x128xf32>
    %209 = math.exp %208 : vector<8x128xf32>
    %cst_111 = arith.constant 1.000000e+00 : f32
    %210 = vector.broadcast %cst_111 : f32 to vector<8x128xf32>
    %211 = arith.addf %210, %209 : vector<8x128xf32>
    %212 = arith.divf %210, %211 : vector<8x128xf32>
    %213 = vector.extract_strided_slice %200 {offsets = [0, 256], sizes = [8, 128], strides = [1, 1]} : vector<8x512xf32> to vector<8x128xf32>
    %214 = math.tanh %213 : vector<8x128xf32>
    %215 = vector.extract_strided_slice %200 {offsets = [0, 384], sizes = [8, 128], strides = [1, 1]} : vector<8x512xf32> to vector<8x128xf32>
    %216 = arith.negf %215 : vector<8x128xf32>
    %217 = math.exp %216 : vector<8x128xf32>
    %cst_112 = arith.constant 1.000000e+00 : f32
    %218 = vector.broadcast %cst_112 : f32 to vector<8x128xf32>
    %219 = arith.addf %218, %217 : vector<8x128xf32>
    %220 = arith.divf %218, %219 : vector<8x128xf32>
    %221 = arith.mulf %212, %164 : vector<8x128xf32>
    %222 = arith.mulf %206, %214 : vector<8x128xf32>
    %223 = arith.addf %221, %222 : vector<8x128xf32>
    %224 = math.tanh %223 : vector<8x128xf32>
    %225 = arith.mulf %220, %224 : vector<8x128xf32>
    %c0_113 = arith.constant 0 : index
    %c0_114 = arith.constant 0 : index
    %226 = vector.load %arg11[%c0_113, %c0_114] : memref<128x128xf32, #tpu.memory_space<vmem>>, vector<128x128xf32>
    %cst_115 = arith.constant dense<0.000000e+00> : vector<8x128xf32>
    %227 = tpu.matmul %225, %226, %cst_115 {dimension_numbers = #tpu.dot_dimension_numbers<[1], [0], [0], [1], [0, 0, 1, 1], [], []>} : vector<8x128xf32>, vector<128x128xf32>, vector<8x128xf32> -> vector<8x128xf32>
    %c0_116 = arith.constant 0 : index
    %c0_117 = arith.constant 0 : index
    %c0_118 = arith.constant 0 : index
    %228 = vector.load %arg2[%c0_116, %c0_117, %c0_118] : memref<8x8x128xf32, #tpu.memory_space<vmem>>, vector<8x8x128xf32>
    %229 = vector.shape_cast %227 : vector<8x128xf32> to vector<8x1x128xf32>
    %230 = vector.broadcast %229 : vector<8x1x128xf32> to vector<8x8x128xf32>
    %231 = arith.addf %228, %230 : vector<8x8x128xf32>
    %232 = math.tanh %231 : vector<8x8x128xf32>
    %c0_119 = arith.constant 0 : index
    %c0_120 = arith.constant 0 : index
    %233 = vector.load %arg12[%c0_119, %c0_120] : memref<1x128xf32, #tpu.memory_space<vmem>>, vector<1x128xf32>
    %234 = vector.shape_cast %233 : vector<1x128xf32> to vector<1x1x128xf32>
    %235 = vector.broadcast %234 : vector<1x1x128xf32> to vector<8x8x128xf32>
    %236 = arith.mulf %232, %235 : vector<8x8x128xf32>
    %cst_121 = arith.constant dense<0.000000e+00> : vector<8x8xf32>
    %237 = vector.multi_reduction <add>, %236, %cst_121 [2] : vector<8x8x128xf32> to vector<8x8xf32>
    %c0_122 = arith.constant 0 : index
    %c0_123 = arith.constant 0 : index
    %238 = vector.load %arg5[%c0_122, %c0_123] : memref<8x8xf32, #tpu.memory_space<vmem>>, vector<8x8xf32>
    %239 = arith.addf %237, %238 : vector<8x8xf32>
    %240 = vector.shape_cast %239 : vector<8x8xf32> to vector<8x1x8xf32>
    %c0_124 = arith.constant 0 : index
    %c3 = arith.constant 3 : index
    %c0_125 = arith.constant 0 : index
    %241 = vector.load %arg13[%c0_124, %c3, %c0_125] : memref<8x8x8xf32, #tpu.memory_space<vmem>>, vector<8x1x8xf32>
    tpu.vector_store %arg13[%c0_124, %c3, %c0_125], %240 {strides = array<i32>} : memref<8x8x8xf32, #tpu.memory_space<vmem>>, vector<8x1x8xf32>,
    %c0_126 = arith.constant 0 : index
    %c0_127 = arith.constant 0 : index
    %242 = vector.load %arg6[%c0_126, %c0_127] : memref<128x128xf32, #tpu.memory_space<vmem>>, vector<128x128xf32>
    %cst_128 = arith.constant dense<0.000000e+00> : vector<8x128xf32>
    %243 = tpu.matmul %192, %242, %cst_128 {dimension_numbers = #tpu.dot_dimension_numbers<[1], [0], [0], [1], [0, 0, 1, 1], [], []>} : vector<8x128xf32>, vector<128x128xf32>, vector<8x128xf32> -> vector<8x128xf32>
    %c0_129 = arith.constant 0 : index
    %c0_130 = arith.constant 0 : index
    %244 = vector.load %arg7[%c0_129, %c0_130] : memref<1x128xf32, #tpu.memory_space<vmem>>, vector<1x128xf32>
    %245 = vector.broadcast %244 : vector<1x128xf32> to vector<8x128xf32>
    %246 = arith.addf %243, %245 : vector<8x128xf32>
    %247 = arith.negf %246 : vector<8x128xf32>
    %248 = math.exp %247 : vector<8x128xf32>
    %cst_131 = arith.constant 1.000000e+00 : f32
    %249 = vector.broadcast %cst_131 : f32 to vector<8x128xf32>
    %250 = arith.addf %249, %248 : vector<8x128xf32>
    %251 = arith.divf %249, %250 : vector<8x128xf32>
    %c0_132 = arith.constant 0 : index
    %c0_133 = arith.constant 0 : index
    %252 = vector.load %arg8[%c0_132, %c0_133] : memref<128x512xf32, #tpu.memory_space<vmem>>, vector<128x512xf32>
    %cst_134 = arith.constant dense<0.000000e+00> : vector<8x512xf32>
    %253 = tpu.matmul %251, %252, %cst_134 {dimension_numbers = #tpu.dot_dimension_numbers<[1], [0], [0], [1], [0, 0, 1, 1], [], []>} : vector<8x128xf32>, vector<128x512xf32>, vector<8x512xf32> -> vector<8x512xf32>
    %c0_135 = arith.constant 0 : index
    %c0_136 = arith.constant 0 : index
    %254 = vector.load %arg9[%c0_135, %c0_136] : memref<128x512xf32, #tpu.memory_space<vmem>>, vector<128x512xf32>
    %cst_137 = arith.constant dense<0.000000e+00> : vector<8x512xf32>
    %255 = tpu.matmul %225, %254, %cst_137 {dimension_numbers = #tpu.dot_dimension_numbers<[1], [0], [0], [1], [0, 0, 1, 1], [], []>} : vector<8x128xf32>, vector<128x512xf32>, vector<8x512xf32> -> vector<8x512xf32>
    %256 = arith.addf %253, %255 : vector<8x512xf32>
    %c0_138 = arith.constant 0 : index
    %c0_139 = arith.constant 0 : index
    %257 = vector.load %arg10[%c0_138, %c0_139] : memref<1x512xf32, #tpu.memory_space<vmem>>, vector<1x512xf32>
    %258 = vector.broadcast %257 : vector<1x512xf32> to vector<8x512xf32>
    %259 = arith.addf %256, %258 : vector<8x512xf32>
    %260 = vector.extract_strided_slice %259 {offsets = [0, 0], sizes = [8, 128], strides = [1, 1]} : vector<8x512xf32> to vector<8x128xf32>
    %261 = arith.negf %260 : vector<8x128xf32>
    %262 = math.exp %261 : vector<8x128xf32>
    %cst_140 = arith.constant 1.000000e+00 : f32
    %263 = vector.broadcast %cst_140 : f32 to vector<8x128xf32>
    %264 = arith.addf %263, %262 : vector<8x128xf32>
    %265 = arith.divf %263, %264 : vector<8x128xf32>
    %266 = vector.extract_strided_slice %259 {offsets = [0, 128], sizes = [8, 128], strides = [1, 1]} : vector<8x512xf32> to vector<8x128xf32>
    %267 = arith.negf %266 : vector<8x128xf32>
    %268 = math.exp %267 : vector<8x128xf32>
    %cst_141 = arith.constant 1.000000e+00 : f32
    %269 = vector.broadcast %cst_141 : f32 to vector<8x128xf32>
    %270 = arith.addf %269, %268 : vector<8x128xf32>
    %271 = arith.divf %269, %270 : vector<8x128xf32>
    %272 = vector.extract_strided_slice %259 {offsets = [0, 256], sizes = [8, 128], strides = [1, 1]} : vector<8x512xf32> to vector<8x128xf32>
    %273 = math.tanh %272 : vector<8x128xf32>
    %274 = vector.extract_strided_slice %259 {offsets = [0, 384], sizes = [8, 128], strides = [1, 1]} : vector<8x512xf32> to vector<8x128xf32>
    %275 = arith.negf %274 : vector<8x128xf32>
    %276 = math.exp %275 : vector<8x128xf32>
    %cst_142 = arith.constant 1.000000e+00 : f32
    %277 = vector.broadcast %cst_142 : f32 to vector<8x128xf32>
    %278 = arith.addf %277, %276 : vector<8x128xf32>
    %279 = arith.divf %277, %278 : vector<8x128xf32>
    %280 = arith.mulf %271, %223 : vector<8x128xf32>
    %281 = arith.mulf %265, %273 : vector<8x128xf32>
    %282 = arith.addf %280, %281 : vector<8x128xf32>
    %283 = math.tanh %282 : vector<8x128xf32>
    %284 = arith.mulf %279, %283 : vector<8x128xf32>
    %c0_143 = arith.constant 0 : index
    %c0_144 = arith.constant 0 : index
    %285 = vector.load %arg11[%c0_143, %c0_144] : memref<128x128xf32, #tpu.memory_space<vmem>>, vector<128x128xf32>
    %cst_145 = arith.constant dense<0.000000e+00> : vector<8x128xf32>
    %286 = tpu.matmul %284, %285, %cst_145 {dimension_numbers = #tpu.dot_dimension_numbers<[1], [0], [0], [1], [0, 0, 1, 1], [], []>} : vector<8x128xf32>, vector<128x128xf32>, vector<8x128xf32> -> vector<8x128xf32>
    %c0_146 = arith.constant 0 : index
    %c0_147 = arith.constant 0 : index
    %c0_148 = arith.constant 0 : index
    %287 = vector.load %arg2[%c0_146, %c0_147, %c0_148] : memref<8x8x128xf32, #tpu.memory_space<vmem>>, vector<8x8x128xf32>
    %288 = vector.shape_cast %286 : vector<8x128xf32> to vector<8x1x128xf32>
    %289 = vector.broadcast %288 : vector<8x1x128xf32> to vector<8x8x128xf32>
    %290 = arith.addf %287, %289 : vector<8x8x128xf32>
    %291 = math.tanh %290 : vector<8x8x128xf32>
    %c0_149 = arith.constant 0 : index
    %c0_150 = arith.constant 0 : index
    %292 = vector.load %arg12[%c0_149, %c0_150] : memref<1x128xf32, #tpu.memory_space<vmem>>, vector<1x128xf32>
    %293 = vector.shape_cast %292 : vector<1x128xf32> to vector<1x1x128xf32>
    %294 = vector.broadcast %293 : vector<1x1x128xf32> to vector<8x8x128xf32>
    %295 = arith.mulf %291, %294 : vector<8x8x128xf32>
    %cst_151 = arith.constant dense<0.000000e+00> : vector<8x8xf32>
    %296 = vector.multi_reduction <add>, %295, %cst_151 [2] : vector<8x8x128xf32> to vector<8x8xf32>
    %c0_152 = arith.constant 0 : index
    %c0_153 = arith.constant 0 : index
    %297 = vector.load %arg5[%c0_152, %c0_153] : memref<8x8xf32, #tpu.memory_space<vmem>>, vector<8x8xf32>
    %298 = arith.addf %296, %297 : vector<8x8xf32>
    %299 = vector.shape_cast %298 : vector<8x8xf32> to vector<8x1x8xf32>
    %c0_154 = arith.constant 0 : index
    %c4 = arith.constant 4 : index
    %c0_155 = arith.constant 0 : index
    %300 = vector.load %arg13[%c0_154, %c4, %c0_155] : memref<8x8x8xf32, #tpu.memory_space<vmem>>, vector<8x1x8xf32>
    tpu.vector_store %arg13[%c0_154, %c4, %c0_155], %299 {strides = array<i32>} : memref<8x8x8xf32, #tpu.memory_space<vmem>>, vector<8x1x8xf32>,
    %c0_156 = arith.constant 0 : index
    %c0_157 = arith.constant 0 : index
    %301 = vector.load %arg6[%c0_156, %c0_157] : memref<128x128xf32, #tpu.memory_space<vmem>>, vector<128x128xf32>
    %cst_158 = arith.constant dense<0.000000e+00> : vector<8x128xf32>
    %302 = tpu.matmul %251, %301, %cst_158 {dimension_numbers = #tpu.dot_dimension_numbers<[1], [0], [0], [1], [0, 0, 1, 1], [], []>} : vector<8x128xf32>, vector<128x128xf32>, vector<8x128xf32> -> vector<8x128xf32>
    %c0_159 = arith.constant 0 : index
    %c0_160 = arith.constant 0 : index
    %303 = vector.load %arg7[%c0_159, %c0_160] : memref<1x128xf32, #tpu.memory_space<vmem>>, vector<1x128xf32>
    %304 = vector.broadcast %303 : vector<1x128xf32> to vector<8x128xf32>
    %305 = arith.addf %302, %304 : vector<8x128xf32>
    %306 = arith.negf %305 : vector<8x128xf32>
    %307 = math.exp %306 : vector<8x128xf32>
    %cst_161 = arith.constant 1.000000e+00 : f32
    %308 = vector.broadcast %cst_161 : f32 to vector<8x128xf32>
    %309 = arith.addf %308, %307 : vector<8x128xf32>
    %310 = arith.divf %308, %309 : vector<8x128xf32>
    %c0_162 = arith.constant 0 : index
    %c0_163 = arith.constant 0 : index
    %311 = vector.load %arg8[%c0_162, %c0_163] : memref<128x512xf32, #tpu.memory_space<vmem>>, vector<128x512xf32>
    %cst_164 = arith.constant dense<0.000000e+00> : vector<8x512xf32>
    %312 = tpu.matmul %310, %311, %cst_164 {dimension_numbers = #tpu.dot_dimension_numbers<[1], [0], [0], [1], [0, 0, 1, 1], [], []>} : vector<8x128xf32>, vector<128x512xf32>, vector<8x512xf32> -> vector<8x512xf32>
    %c0_165 = arith.constant 0 : index
    %c0_166 = arith.constant 0 : index
    %313 = vector.load %arg9[%c0_165, %c0_166] : memref<128x512xf32, #tpu.memory_space<vmem>>, vector<128x512xf32>
    %cst_167 = arith.constant dense<0.000000e+00> : vector<8x512xf32>
    %314 = tpu.matmul %284, %313, %cst_167 {dimension_numbers = #tpu.dot_dimension_numbers<[1], [0], [0], [1], [0, 0, 1, 1], [], []>} : vector<8x128xf32>, vector<128x512xf32>, vector<8x512xf32> -> vector<8x512xf32>
    %315 = arith.addf %312, %314 : vector<8x512xf32>
    %c0_168 = arith.constant 0 : index
    %c0_169 = arith.constant 0 : index
    %316 = vector.load %arg10[%c0_168, %c0_169] : memref<1x512xf32, #tpu.memory_space<vmem>>, vector<1x512xf32>
    %317 = vector.broadcast %316 : vector<1x512xf32> to vector<8x512xf32>
    %318 = arith.addf %315, %317 : vector<8x512xf32>
    %319 = vector.extract_strided_slice %318 {offsets = [0, 0], sizes = [8, 128], strides = [1, 1]} : vector<8x512xf32> to vector<8x128xf32>
    %320 = arith.negf %319 : vector<8x128xf32>
    %321 = math.exp %320 : vector<8x128xf32>
    %cst_170 = arith.constant 1.000000e+00 : f32
    %322 = vector.broadcast %cst_170 : f32 to vector<8x128xf32>
    %323 = arith.addf %322, %321 : vector<8x128xf32>
    %324 = arith.divf %322, %323 : vector<8x128xf32>
    %325 = vector.extract_strided_slice %318 {offsets = [0, 128], sizes = [8, 128], strides = [1, 1]} : vector<8x512xf32> to vector<8x128xf32>
    %326 = arith.negf %325 : vector<8x128xf32>
    %327 = math.exp %326 : vector<8x128xf32>
    %cst_171 = arith.constant 1.000000e+00 : f32
    %328 = vector.broadcast %cst_171 : f32 to vector<8x128xf32>
    %329 = arith.addf %328, %327 : vector<8x128xf32>
    %330 = arith.divf %328, %329 : vector<8x128xf32>
    %331 = vector.extract_strided_slice %318 {offsets = [0, 256], sizes = [8, 128], strides = [1, 1]} : vector<8x512xf32> to vector<8x128xf32>
    %332 = math.tanh %331 : vector<8x128xf32>
    %333 = vector.extract_strided_slice %318 {offsets = [0, 384], sizes = [8, 128], strides = [1, 1]} : vector<8x512xf32> to vector<8x128xf32>
    %334 = arith.negf %333 : vector<8x128xf32>
    %335 = math.exp %334 : vector<8x128xf32>
    %cst_172 = arith.constant 1.000000e+00 : f32
    %336 = vector.broadcast %cst_172 : f32 to vector<8x128xf32>
    %337 = arith.addf %336, %335 : vector<8x128xf32>
    %338 = arith.divf %336, %337 : vector<8x128xf32>
    %339 = arith.mulf %330, %282 : vector<8x128xf32>
    %340 = arith.mulf %324, %332 : vector<8x128xf32>
    %341 = arith.addf %339, %340 : vector<8x128xf32>
    %342 = math.tanh %341 : vector<8x128xf32>
    %343 = arith.mulf %338, %342 : vector<8x128xf32>
    %c0_173 = arith.constant 0 : index
    %c0_174 = arith.constant 0 : index
    %344 = vector.load %arg11[%c0_173, %c0_174] : memref<128x128xf32, #tpu.memory_space<vmem>>, vector<128x128xf32>
    %cst_175 = arith.constant dense<0.000000e+00> : vector<8x128xf32>
    %345 = tpu.matmul %343, %344, %cst_175 {dimension_numbers = #tpu.dot_dimension_numbers<[1], [0], [0], [1], [0, 0, 1, 1], [], []>} : vector<8x128xf32>, vector<128x128xf32>, vector<8x128xf32> -> vector<8x128xf32>
    %c0_176 = arith.constant 0 : index
    %c0_177 = arith.constant 0 : index
    %c0_178 = arith.constant 0 : index
    %346 = vector.load %arg2[%c0_176, %c0_177, %c0_178] : memref<8x8x128xf32, #tpu.memory_space<vmem>>, vector<8x8x128xf32>
    %347 = vector.shape_cast %345 : vector<8x128xf32> to vector<8x1x128xf32>
    %348 = vector.broadcast %347 : vector<8x1x128xf32> to vector<8x8x128xf32>
    %349 = arith.addf %346, %348 : vector<8x8x128xf32>
    %350 = math.tanh %349 : vector<8x8x128xf32>
    %c0_179 = arith.constant 0 : index
    %c0_180 = arith.constant 0 : index
    %351 = vector.load %arg12[%c0_179, %c0_180] : memref<1x128xf32, #tpu.memory_space<vmem>>, vector<1x128xf32>
    %352 = vector.shape_cast %351 : vector<1x128xf32> to vector<1x1x128xf32>
    %353 = vector.broadcast %352 : vector<1x1x128xf32> to vector<8x8x128xf32>
    %354 = arith.mulf %350, %353 : vector<8x8x128xf32>
    %cst_181 = arith.constant dense<0.000000e+00> : vector<8x8xf32>
    %355 = vector.multi_reduction <add>, %354, %cst_181 [2] : vector<8x8x128xf32> to vector<8x8xf32>
    %c0_182 = arith.constant 0 : index
    %c0_183 = arith.constant 0 : index
    %356 = vector.load %arg5[%c0_182, %c0_183] : memref<8x8xf32, #tpu.memory_space<vmem>>, vector<8x8xf32>
    %357 = arith.addf %355, %356 : vector<8x8xf32>
    %358 = vector.shape_cast %357 : vector<8x8xf32> to vector<8x1x8xf32>
    %c0_184 = arith.constant 0 : index
    %c5 = arith.constant 5 : index
    %c0_185 = arith.constant 0 : index
    %359 = vector.load %arg13[%c0_184, %c5, %c0_185] : memref<8x8x8xf32, #tpu.memory_space<vmem>>, vector<8x1x8xf32>
    tpu.vector_store %arg13[%c0_184, %c5, %c0_185], %358 {strides = array<i32>} : memref<8x8x8xf32, #tpu.memory_space<vmem>>, vector<8x1x8xf32>,
    %c0_186 = arith.constant 0 : index
    %c0_187 = arith.constant 0 : index
    %360 = vector.load %arg6[%c0_186, %c0_187] : memref<128x128xf32, #tpu.memory_space<vmem>>, vector<128x128xf32>
    %cst_188 = arith.constant dense<0.000000e+00> : vector<8x128xf32>
    %361 = tpu.matmul %310, %360, %cst_188 {dimension_numbers = #tpu.dot_dimension_numbers<[1], [0], [0], [1], [0, 0, 1, 1], [], []>} : vector<8x128xf32>, vector<128x128xf32>, vector<8x128xf32> -> vector<8x128xf32>
    %c0_189 = arith.constant 0 : index
    %c0_190 = arith.constant 0 : index
    %362 = vector.load %arg7[%c0_189, %c0_190] : memref<1x128xf32, #tpu.memory_space<vmem>>, vector<1x128xf32>
    %363 = vector.broadcast %362 : vector<1x128xf32> to vector<8x128xf32>
    %364 = arith.addf %361, %363 : vector<8x128xf32>
    %365 = arith.negf %364 : vector<8x128xf32>
    %366 = math.exp %365 : vector<8x128xf32>
    %cst_191 = arith.constant 1.000000e+00 : f32
    %367 = vector.broadcast %cst_191 : f32 to vector<8x128xf32>
    %368 = arith.addf %367, %366 : vector<8x128xf32>
    %369 = arith.divf %367, %368 : vector<8x128xf32>
    %c0_192 = arith.constant 0 : index
    %c0_193 = arith.constant 0 : index
    %370 = vector.load %arg8[%c0_192, %c0_193] : memref<128x512xf32, #tpu.memory_space<vmem>>, vector<128x512xf32>
    %cst_194 = arith.constant dense<0.000000e+00> : vector<8x512xf32>
    %371 = tpu.matmul %369, %370, %cst_194 {dimension_numbers = #tpu.dot_dimension_numbers<[1], [0], [0], [1], [0, 0, 1, 1], [], []>} : vector<8x128xf32>, vector<128x512xf32>, vector<8x512xf32> -> vector<8x512xf32>
    %c0_195 = arith.constant 0 : index
    %c0_196 = arith.constant 0 : index
    %372 = vector.load %arg9[%c0_195, %c0_196] : memref<128x512xf32, #tpu.memory_space<vmem>>, vector<128x512xf32>
    %cst_197 = arith.constant dense<0.000000e+00> : vector<8x512xf32>
    %373 = tpu.matmul %343, %372, %cst_197 {dimension_numbers = #tpu.dot_dimension_numbers<[1], [0], [0], [1], [0, 0, 1, 1], [], []>} : vector<8x128xf32>, vector<128x512xf32>, vector<8x512xf32> -> vector<8x512xf32>
    %374 = arith.addf %371, %373 : vector<8x512xf32>
    %c0_198 = arith.constant 0 : index
    %c0_199 = arith.constant 0 : index
    %375 = vector.load %arg10[%c0_198, %c0_199] : memref<1x512xf32, #tpu.memory_space<vmem>>, vector<1x512xf32>
    %376 = vector.broadcast %375 : vector<1x512xf32> to vector<8x512xf32>
    %377 = arith.addf %374, %376 : vector<8x512xf32>
    %378 = vector.extract_strided_slice %377 {offsets = [0, 0], sizes = [8, 128], strides = [1, 1]} : vector<8x512xf32> to vector<8x128xf32>
    %379 = arith.negf %378 : vector<8x128xf32>
    %380 = math.exp %379 : vector<8x128xf32>
    %cst_200 = arith.constant 1.000000e+00 : f32
    %381 = vector.broadcast %cst_200 : f32 to vector<8x128xf32>
    %382 = arith.addf %381, %380 : vector<8x128xf32>
    %383 = arith.divf %381, %382 : vector<8x128xf32>
    %384 = vector.extract_strided_slice %377 {offsets = [0, 128], sizes = [8, 128], strides = [1, 1]} : vector<8x512xf32> to vector<8x128xf32>
    %385 = arith.negf %384 : vector<8x128xf32>
    %386 = math.exp %385 : vector<8x128xf32>
    %cst_201 = arith.constant 1.000000e+00 : f32
    %387 = vector.broadcast %cst_201 : f32 to vector<8x128xf32>
    %388 = arith.addf %387, %386 : vector<8x128xf32>
    %389 = arith.divf %387, %388 : vector<8x128xf32>
    %390 = vector.extract_strided_slice %377 {offsets = [0, 256], sizes = [8, 128], strides = [1, 1]} : vector<8x512xf32> to vector<8x128xf32>
    %391 = math.tanh %390 : vector<8x128xf32>
    %392 = vector.extract_strided_slice %377 {offsets = [0, 384], sizes = [8, 128], strides = [1, 1]} : vector<8x512xf32> to vector<8x128xf32>
    %393 = arith.negf %392 : vector<8x128xf32>
    %394 = math.exp %393 : vector<8x128xf32>
    %cst_202 = arith.constant 1.000000e+00 : f32
    %395 = vector.broadcast %cst_202 : f32 to vector<8x128xf32>
    %396 = arith.addf %395, %394 : vector<8x128xf32>
    %397 = arith.divf %395, %396 : vector<8x128xf32>
    %398 = arith.mulf %389, %341 : vector<8x128xf32>
    %399 = arith.mulf %383, %391 : vector<8x128xf32>
    %400 = arith.addf %398, %399 : vector<8x128xf32>
    %401 = math.tanh %400 : vector<8x128xf32>
    %402 = arith.mulf %397, %401 : vector<8x128xf32>
    %c0_203 = arith.constant 0 : index
    %c0_204 = arith.constant 0 : index
    %403 = vector.load %arg11[%c0_203, %c0_204] : memref<128x128xf32, #tpu.memory_space<vmem>>, vector<128x128xf32>
    %cst_205 = arith.constant dense<0.000000e+00> : vector<8x128xf32>
    %404 = tpu.matmul %402, %403, %cst_205 {dimension_numbers = #tpu.dot_dimension_numbers<[1], [0], [0], [1], [0, 0, 1, 1], [], []>} : vector<8x128xf32>, vector<128x128xf32>, vector<8x128xf32> -> vector<8x128xf32>
    %c0_206 = arith.constant 0 : index
    %c0_207 = arith.constant 0 : index
    %c0_208 = arith.constant 0 : index
    %405 = vector.load %arg2[%c0_206, %c0_207, %c0_208] : memref<8x8x128xf32, #tpu.memory_space<vmem>>, vector<8x8x128xf32>
    %406 = vector.shape_cast %404 : vector<8x128xf32> to vector<8x1x128xf32>
    %407 = vector.broadcast %406 : vector<8x1x128xf32> to vector<8x8x128xf32>
    %408 = arith.addf %405, %407 : vector<8x8x128xf32>
    %409 = math.tanh %408 : vector<8x8x128xf32>
    %c0_209 = arith.constant 0 : index
    %c0_210 = arith.constant 0 : index
    %410 = vector.load %arg12[%c0_209, %c0_210] : memref<1x128xf32, #tpu.memory_space<vmem>>, vector<1x128xf32>
    %411 = vector.shape_cast %410 : vector<1x128xf32> to vector<1x1x128xf32>
    %412 = vector.broadcast %411 : vector<1x1x128xf32> to vector<8x8x128xf32>
    %413 = arith.mulf %409, %412 : vector<8x8x128xf32>
    %cst_211 = arith.constant dense<0.000000e+00> : vector<8x8xf32>
    %414 = vector.multi_reduction <add>, %413, %cst_211 [2] : vector<8x8x128xf32> to vector<8x8xf32>
    %c0_212 = arith.constant 0 : index
    %c0_213 = arith.constant 0 : index
    %415 = vector.load %arg5[%c0_212, %c0_213] : memref<8x8xf32, #tpu.memory_space<vmem>>, vector<8x8xf32>
    %416 = arith.addf %414, %415 : vector<8x8xf32>
    %417 = vector.shape_cast %416 : vector<8x8xf32> to vector<8x1x8xf32>
    %c0_214 = arith.constant 0 : index
    %c6 = arith.constant 6 : index
    %c0_215 = arith.constant 0 : index
    %418 = vector.load %arg13[%c0_214, %c6, %c0_215] : memref<8x8x8xf32, #tpu.memory_space<vmem>>, vector<8x1x8xf32>
    tpu.vector_store %arg13[%c0_214, %c6, %c0_215], %417 {strides = array<i32>} : memref<8x8x8xf32, #tpu.memory_space<vmem>>, vector<8x1x8xf32>,
    %c0_216 = arith.constant 0 : index
    %c0_217 = arith.constant 0 : index
    %419 = vector.load %arg6[%c0_216, %c0_217] : memref<128x128xf32, #tpu.memory_space<vmem>>, vector<128x128xf32>
    %cst_218 = arith.constant dense<0.000000e+00> : vector<8x128xf32>
    %420 = tpu.matmul %369, %419, %cst_218 {dimension_numbers = #tpu.dot_dimension_numbers<[1], [0], [0], [1], [0, 0, 1, 1], [], []>} : vector<8x128xf32>, vector<128x128xf32>, vector<8x128xf32> -> vector<8x128xf32>
    %c0_219 = arith.constant 0 : index
    %c0_220 = arith.constant 0 : index
    %421 = vector.load %arg7[%c0_219, %c0_220] : memref<1x128xf32, #tpu.memory_space<vmem>>, vector<1x128xf32>
    %422 = vector.broadcast %421 : vector<1x128xf32> to vector<8x128xf32>
    %423 = arith.addf %420, %422 : vector<8x128xf32>
    %424 = arith.negf %423 : vector<8x128xf32>
    %425 = math.exp %424 : vector<8x128xf32>
    %cst_221 = arith.constant 1.000000e+00 : f32
    %426 = vector.broadcast %cst_221 : f32 to vector<8x128xf32>
    %427 = arith.addf %426, %425 : vector<8x128xf32>
    %428 = arith.divf %426, %427 : vector<8x128xf32>
    %c0_222 = arith.constant 0 : index
    %c0_223 = arith.constant 0 : index
    %429 = vector.load %arg8[%c0_222, %c0_223] : memref<128x512xf32, #tpu.memory_space<vmem>>, vector<128x512xf32>
    %cst_224 = arith.constant dense<0.000000e+00> : vector<8x512xf32>
    %430 = tpu.matmul %428, %429, %cst_224 {dimension_numbers = #tpu.dot_dimension_numbers<[1], [0], [0], [1], [0, 0, 1, 1], [], []>} : vector<8x128xf32>, vector<128x512xf32>, vector<8x512xf32> -> vector<8x512xf32>
    %c0_225 = arith.constant 0 : index
    %c0_226 = arith.constant 0 : index
    %431 = vector.load %arg9[%c0_225, %c0_226] : memref<128x512xf32, #tpu.memory_space<vmem>>, vector<128x512xf32>
    %cst_227 = arith.constant dense<0.000000e+00> : vector<8x512xf32>
    %432 = tpu.matmul %402, %431, %cst_227 {dimension_numbers = #tpu.dot_dimension_numbers<[1], [0], [0], [1], [0, 0, 1, 1], [], []>} : vector<8x128xf32>, vector<128x512xf32>, vector<8x512xf32> -> vector<8x512xf32>
    %433 = arith.addf %430, %432 : vector<8x512xf32>
    %c0_228 = arith.constant 0 : index
    %c0_229 = arith.constant 0 : index
    %434 = vector.load %arg10[%c0_228, %c0_229] : memref<1x512xf32, #tpu.memory_space<vmem>>, vector<1x512xf32>
    %435 = vector.broadcast %434 : vector<1x512xf32> to vector<8x512xf32>
    %436 = arith.addf %433, %435 : vector<8x512xf32>
    %437 = vector.extract_strided_slice %436 {offsets = [0, 0], sizes = [8, 128], strides = [1, 1]} : vector<8x512xf32> to vector<8x128xf32>
    %438 = arith.negf %437 : vector<8x128xf32>
    %439 = math.exp %438 : vector<8x128xf32>
    %cst_230 = arith.constant 1.000000e+00 : f32
    %440 = vector.broadcast %cst_230 : f32 to vector<8x128xf32>
    %441 = arith.addf %440, %439 : vector<8x128xf32>
    %442 = arith.divf %440, %441 : vector<8x128xf32>
    %443 = vector.extract_strided_slice %436 {offsets = [0, 128], sizes = [8, 128], strides = [1, 1]} : vector<8x512xf32> to vector<8x128xf32>
    %444 = arith.negf %443 : vector<8x128xf32>
    %445 = math.exp %444 : vector<8x128xf32>
    %cst_231 = arith.constant 1.000000e+00 : f32
    %446 = vector.broadcast %cst_231 : f32 to vector<8x128xf32>
    %447 = arith.addf %446, %445 : vector<8x128xf32>
    %448 = arith.divf %446, %447 : vector<8x128xf32>
    %449 = vector.extract_strided_slice %436 {offsets = [0, 256], sizes = [8, 128], strides = [1, 1]} : vector<8x512xf32> to vector<8x128xf32>
    %450 = math.tanh %449 : vector<8x128xf32>
    %451 = vector.extract_strided_slice %436 {offsets = [0, 384], sizes = [8, 128], strides = [1, 1]} : vector<8x512xf32> to vector<8x128xf32>
    %452 = arith.negf %451 : vector<8x128xf32>
    %453 = math.exp %452 : vector<8x128xf32>
    %cst_232 = arith.constant 1.000000e+00 : f32
    %454 = vector.broadcast %cst_232 : f32 to vector<8x128xf32>
    %455 = arith.addf %454, %453 : vector<8x128xf32>
    %456 = arith.divf %454, %455 : vector<8x128xf32>
    %457 = arith.mulf %448, %400 : vector<8x128xf32>
    %458 = arith.mulf %442, %450 : vector<8x128xf32>
    %459 = arith.addf %457, %458 : vector<8x128xf32>
    %460 = math.tanh %459 : vector<8x128xf32>
    %461 = arith.mulf %456, %460 : vector<8x128xf32>
    %c0_233 = arith.constant 0 : index
    %c0_234 = arith.constant 0 : index
    %462 = vector.load %arg11[%c0_233, %c0_234] : memref<128x128xf32, #tpu.memory_space<vmem>>, vector<128x128xf32>
    %cst_235 = arith.constant dense<0.000000e+00> : vector<8x128xf32>
    %463 = tpu.matmul %461, %462, %cst_235 {dimension_numbers = #tpu.dot_dimension_numbers<[1], [0], [0], [1], [0, 0, 1, 1], [], []>} : vector<8x128xf32>, vector<128x128xf32>, vector<8x128xf32> -> vector<8x128xf32>
    %c0_236 = arith.constant 0 : index
    %c0_237 = arith.constant 0 : index
    %c0_238 = arith.constant 0 : index
    %464 = vector.load %arg2[%c0_236, %c0_237, %c0_238] : memref<8x8x128xf32, #tpu.memory_space<vmem>>, vector<8x8x128xf32>
    %465 = vector.shape_cast %463 : vector<8x128xf32> to vector<8x1x128xf32>
    %466 = vector.broadcast %465 : vector<8x1x128xf32> to vector<8x8x128xf32>
    %467 = arith.addf %464, %466 : vector<8x8x128xf32>
    %468 = math.tanh %467 : vector<8x8x128xf32>
    %c0_239 = arith.constant 0 : index
    %c0_240 = arith.constant 0 : index
    %469 = vector.load %arg12[%c0_239, %c0_240] : memref<1x128xf32, #tpu.memory_space<vmem>>, vector<1x128xf32>
    %470 = vector.shape_cast %469 : vector<1x128xf32> to vector<1x1x128xf32>
    %471 = vector.broadcast %470 : vector<1x1x128xf32> to vector<8x8x128xf32>
    %472 = arith.mulf %468, %471 : vector<8x8x128xf32>
    %cst_241 = arith.constant dense<0.000000e+00> : vector<8x8xf32>
    %473 = vector.multi_reduction <add>, %472, %cst_241 [2] : vector<8x8x128xf32> to vector<8x8xf32>
    %c0_242 = arith.constant 0 : index
    %c0_243 = arith.constant 0 : index
    %474 = vector.load %arg5[%c0_242, %c0_243] : memref<8x8xf32, #tpu.memory_space<vmem>>, vector<8x8xf32>
    %475 = arith.addf %473, %474 : vector<8x8xf32>
    %476 = vector.shape_cast %475 : vector<8x8xf32> to vector<8x1x8xf32>
    %c0_244 = arith.constant 0 : index
    %c7 = arith.constant 7 : index
    %c0_245 = arith.constant 0 : index
    %477 = vector.load %arg13[%c0_244, %c7, %c0_245] : memref<8x8x8xf32, #tpu.memory_space<vmem>>, vector<8x1x8xf32>
    tpu.vector_store %arg13[%c0_244, %c7, %c0_245], %476 {strides = array<i32>} : memref<8x8x8xf32, #tpu.memory_space<vmem>>, vector<8x1x8xf32>,
    %c0_246 = arith.constant 0 : index
    %c0_247 = arith.constant 0 : index
    %478 = vector.load %arg14[%c0_246, %c0_247] : memref<8x128xf32, #tpu.memory_space<vmem>>, vector<8x128xf32>
    tpu.vector_store %arg14[%c0_246, %c0_247], %428 {strides = array<i32>} : memref<8x128xf32, #tpu.memory_space<vmem>>, vector<8x128xf32>,
    %c0_248 = arith.constant 0 : index
    %c0_249 = arith.constant 0 : index
    %479 = vector.load %arg15[%c0_248, %c0_249] : memref<8x128xf32, #tpu.memory_space<vmem>>, vector<8x128xf32>
    tpu.vector_store %arg15[%c0_248, %c0_249], %461 {strides = array<i32>} : memref<8x128xf32, #tpu.memory_space<vmem>>, vector<8x128xf32>,
    %c0_250 = arith.constant 0 : index
    %c0_251 = arith.constant 0 : index
    %480 = vector.load %arg16[%c0_250, %c0_251] : memref<8x128xf32, #tpu.memory_space<vmem>>, vector<8x128xf32>
    tpu.vector_store %arg16[%c0_250, %c0_251], %459 {strides = array<i32>} : memref<8x128xf32, #tpu.memory_space<vmem>>, vector<8x128xf32>,
    return
  }
  func.func @transform_0(%arg0: i32, %arg1: i32) -> (i32, i32, i32) {
    %c0_i32 = arith.constant 0 : i32
    %c0_i32_0 = arith.constant 0 : i32
    %c0_i32_1 = arith.constant 0 : i32
    return %arg0, %c0_i32, %c0_i32_0 : i32, i32, i32
  }
  func.func @transform_1(%arg0: i32, %arg1: i32) -> (i32, i32) {
    %c0_i32 = arith.constant 0 : i32
    %c0_i32_0 = arith.constant 0 : i32
    return %arg0, %c0_i32 : i32, i32
  }
  func.func @transform_2(%arg0: i32, %arg1: i32) -> (i32, i32) {
    %c0_i32 = arith.constant 0 : i32
    %c0_i32_0 = arith.constant 0 : i32
    return %arg0, %c0_i32 : i32, i32
  }
  func.func @transform_3(%arg0: i32, %arg1: i32) -> (i32, i32) {
    %c0_i32 = arith.constant 0 : i32
    %c0_i32_0 = arith.constant 0 : i32
    return %arg0, %c0_i32 : i32, i32
  }
  func.func @transform_4(%arg0: i32, %arg1: i32) -> (i32, i32) {
    %c0_i32 = arith.constant 0 : i32
    %c0_i32_0 = arith.constant 0 : i32
    %c0_i32_1 = arith.constant 0 : i32
    return %c0_i32, %c0_i32_0 : i32, i32
  }
  func.func @transform_5(%arg0: i32, %arg1: i32) -> (i32, i32) {
    %c0_i32 = arith.constant 0 : i32
    %c0_i32_0 = arith.constant 0 : i32
    %c0_i32_1 = arith.constant 0 : i32
    return %c0_i32, %c0_i32_0 : i32, i32
  }
  func.func @transform_6(%arg0: i32, %arg1: i32) -> (i32, i32) {
    %c0_i32 = arith.constant 0 : i32
    %c0_i32_0 = arith.constant 0 : i32
    %c0_i32_1 = arith.constant 0 : i32
    return %c0_i32, %c0_i32_0 : i32, i32
  }
  func.func @transform_7(%arg0: i32, %arg1: i32) -> (i32, i32) {
    %c0_i32 = arith.constant 0 : i32
    %c0_i32_0 = arith.constant 0 : i32
    %c0_i32_1 = arith.constant 0 : i32
    return %c0_i32, %c0_i32_0 : i32, i32
  }
  func.func @transform_8(%arg0: i32, %arg1: i32) -> (i32, i32) {
    %c0_i32 = arith.constant 0 : i32
    %c0_i32_0 = arith.constant 0 : i32
    %c0_i32_1 = arith.constant 0 : i32
    return %c0_i32, %c0_i32_0 : i32, i32
  }
  func.func @transform_9(%arg0: i32, %arg1: i32) -> (i32, i32) {
    %c0_i32 = arith.constant 0 : i32
    %c0_i32_0 = arith.constant 0 : i32
    %c0_i32_1 = arith.constant 0 : i32
    return %c0_i32, %c0_i32_0 : i32, i32
  }
  func.func @transform_10(%arg0: i32, %arg1: i32) -> (i32, i32) {
    %c0_i32 = arith.constant 0 : i32
    %c0_i32_0 = arith.constant 0 : i32
    %c0_i32_1 = arith.constant 0 : i32
    return %c0_i32, %c0_i32_0 : i32, i32
  }
  func.func @transform_11(%arg0: i32, %arg1: i32) -> (i32, i32, i32) {
    %c0_i32 = arith.constant 0 : i32
    %c0_i32_0 = arith.constant 0 : i32
    return %arg0, %arg1, %c0_i32 : i32, i32, i32
  }
}

</mosaic_0001>

<bundles_post_ra>
// kernel: tpu_custom_call.1
= control target key start
LH: loop header
LB: loop body
LE: loop exit
PB: predicated region body
PF: predicated region fallthrough
CT: control target
= control target key end

     0   :  { %16 = vsyncpa [#allocation6], 0  ;;  %s7869_s0 = inlined_call_operand.hbm [shape: f32[8,8,128], index: 0, kind: input, shape index: {}]   ;;  %s7870_s1 = inlined_call_operand.hbm [shape: f32[8,128], index: 1, kind: input, shape index: {}]   ;;  %s7871_s2 = inlined_call_operand.hbm [shape: f32[8,128], index: 2, kind: input, shape index: {}]   ;;  %s7872_s3 = inlined_call_operand.hbm [shape: f32[8,8], index: 3, kind: input, shape index: {}]   ;;  %s7873_s4 = inlined_call_operand.hbm [shape: f32[128,128], index: 4, kind: input, shape index: {}]   ;;  %s7874_s5 = inlined_call_operand.vmem [shape: f32[1,128], index: 5, kind: input, shape index: {}]   ;;  %s7875_s6 = inlined_call_operand.hbm [shape: f32[128,512], index: 6, kind: input, shape index: {}]   ;;  %s7876_s7 = inlined_call_operand.hbm [shape: f32[128,512], index: 7, kind: input, shape index: {}]   ;;  %s7877_s8 = inlined_call_operand.vmem [shape: f32[1,512], index: 8, kind: input, shape index: {}]   ;;  %s7878_s9 = inlined_call_operand.hbm [shape: f32[128,128], index: 9, kind: input, shape index: {}]   ;;  %s7879_s10 = inlined_call_operand.vmem [shape: f32[1,128], index: 10, kind: input, shape index: {}]   ;;  %s7880_s11 = inlined_call_operand.hbm [shape: f32[8,8,8], index: 11, kind: output, shape index: {}]  }
   0x1   :  { %17 = vsyncpa [#allocation9], 0 }
   0x2   :  { %18 = vsyncpa [#allocation12], 0 }
   0x3   :  { %19 = vsyncpa [#allocation15], 0 }
   0x4   :  { %20 = vsyncpa [#allocation18], 0  ;;  %s40_s19 = sshll.u32 %s7870_s1, 4  ;;  %s41_s19 = int_to_ptr.hbm [resolvable:$true] %s40_s19 }
   0x5   :  { %21 = vsyncpa [#allocation7], 0  ;;  %s6162_s20 = smov [#allocation8]   ;;  %s62_s24 = sshll.u32 %s7872_s3, 4  ;;  %s63_s24 = int_to_ptr.hbm [resolvable:$true] %s62_s24 }
   0x6   :  { %s42_s21 = sshll.u32 %s6162_s20, 4  ;;  %s6163_s25 = smov [#allocation11]   ;;  %s43_s21 = int_to_ptr.vmem [resolvable:$true] %s42_s21 }
   0x7   :  { %45 = dma.hbm_to_vmem [thread:$0]  %s41_s19, 128, %s43_s21, [#allocation9]  }
   0x8   :  { %s64_s26 = sshll.u32 %s6163_s25, 4  ;;  %s87_s29 = sshll.u32 %s7875_s6, 4  ;;  %s65_s26 = int_to_ptr.vmem [resolvable:$true] %s64_s26  ;;  %s88_s29 = int_to_ptr.hbm [resolvable:$true] %s87_s29 }
   0x9   :  { %67 = dma.hbm_to_vmem [thread:$0]  %s63_s24, 128, %s65_s26, [#allocation12]  }
   0xa   :  { %s6164_s1 = smov [#allocation14]   ;;  %s26_s14 = sshll.u32 %s7869_s0, 4  ;;  %s27_s14 = int_to_ptr.hbm [resolvable:$true] %s26_s14 }
   0xb   :  { %s89_s30 = sshll.u32 %s6164_s1, 4  ;;  %s6165_s15 = smov 512   ;;  %s90_s30 = int_to_ptr.vmem [resolvable:$true] %s89_s30 }
   0xc   :  { %s6166_s3 = smov 32   ;;  %s6167_s16 = smov [#allocation5]  }
   0xd   :  { %95 = dma.hbm_to_vmem [thread:$0]  %s88_s29, 8192, %s90_s30, [#allocation15], %s6165_s15, %s6165_s15, %s6166_s3  }
   0xe   :  { %s28_s17 = sshll.u32 %s6167_s16, 4  ;;  %s6168_s6 = smov 128   ;;  %s29_s17 = int_to_ptr.vmem [resolvable:$true] %s28_s17 }
   0xf   :  { %s6169_s18 = smov 8   ;;  %s51_s0 = sshll.u32 %s7871_s2, 4  ;;  %s52_s0 = int_to_ptr.hbm [resolvable:$true] %s51_s0 }
  0x10   :  { %34 = dma.hbm_to_vmem [thread:$0]  %s27_s14, 1024, %s29_s17, [#allocation6], %s6168_s6, %s6168_s6, %s6169_s18  }
  0x11   :  { %s6170_s21 = smov [#allocation10]   ;;  %s72_s25 = sshll.u32 %s7873_s4, 4  ;;  %s73_s25 = int_to_ptr.hbm [resolvable:$true] %s72_s25 }
  0x12   :  { %s53_s22 = sshll.u32 %s6170_s21, 4  ;;  %s6171_s26 = smov [#allocation13]   ;;  %s54_s22 = int_to_ptr.vmem [resolvable:$true] %s53_s22 }
  0x13   :  { %56 = dma.hbm_to_vmem [thread:$0]  %s52_s0, 128, %s54_s22, [#allocation9]  }
  0x14   :  { %s74_s27 = sshll.u32 %s6171_s26, 4  ;;  %s100_s1 = sshll.u32 %s7876_s7, 4  ;;  %s75_s27 = int_to_ptr.vmem [resolvable:$true] %s74_s27  ;;  %s101_s1 = int_to_ptr.hbm [resolvable:$true] %s100_s1 }
  0x15   :  { %80 = dma.hbm_to_vmem [thread:$0]  %s73_s25, 2048, %s75_s27, [#allocation12], %s6168_s6, %s6168_s6, %s6169_s18  }
  0x16   :  { %s115_s12 = sshll.u32 %s7878_s9, 4  ;;  %s6172_s13 = smov [#allocation16]   ;;  %s116_s12 = int_to_ptr.hbm [resolvable:$true] %s115_s12 }
  0x17   :  { %s102_s4 = sshll.u32 %s6172_s13, 4  ;;  %s6173_s14 = smov [#allocation17]   ;;  %s103_s4 = int_to_ptr.vmem [resolvable:$true] %s102_s4 }
  0x18   :  { %108 = dma.hbm_to_vmem [thread:$0]  %s101_s1, 8192, %s103_s4, [#allocation15], %s6165_s15, %s6165_s15, %s6166_s3  }
  0x19   :  { %s117_s7 = sshll.u32 %s6173_s14, 4  ;;  %s118_s7 = int_to_ptr.vmem [resolvable:$true] %s117_s7 }
  0x1a   :  { %123 = dma.hbm_to_vmem [thread:$0]  %s116_s12, 2048, %s118_s7, [#allocation18], %s6168_s6, %s6168_s6, %s6169_s18  }
  0x1b   :  { %6150 = dma.done.wait [#allocation6], 1024  }
  0x1c   :  { %6151 = vsyncadd [#allocation6], 4294966272 }
  0x1d   :  { %6152 = dma.done.wait [#allocation9], 256  }
  0x1e   :  { %6153 = vsyncadd [#allocation9], 4294967040 }
  0x1f   :  { %6154 = dma.done.wait [#allocation12], 2176  }
  0x20   :  { %6155 = vsyncadd [#allocation12], 4294965120 }
  0x21   :  { %6156 = dma.done.wait [#allocation15], 16384  }
  0x22   :  { %6157 = vsyncadd [#allocation15], 4294950912 }
  0x23   :  { %6158 = dma.done.wait [#allocation18], 2048  }
  0x24   :  { %6159 = vsyncadd [#allocation18], 4294965248  ;;  %v6276_v0 = vld [vmem:[#allocation13 + $0x78] sm:$0xff]  ;;  %v6278_v1 = vld [vmem:[#allocation13 + $0x70] sm:$0xff]  ;;  %v7881_v2 = vlaneseq  ;;  %v6174_v61 = vmov 0.0   ;;  %s5510_s7 = sshll.u32 %s7880_s11, 4  ;;  %s5511_s7 = int_to_ptr.hbm [resolvable:$true] %s5510_s7 }
  0x25   :  { %190 = vmatpush.msra.mxu0 %v6276_v0  ;;  %v6281_v3 = vld [vmem:[#allocation13 + $0x68] sm:$0xff]  ;;  %v6285_v5 = vld [vmem:[#allocation13 + $0x60] sm:$0xff]  ;;  %v6288_v6 = vld [vmem:[#allocation11] sm:$0xff] }
  0x26   :  { %v710_v4 = vshrl.u32 %v7881_v2, 7  ;;  %v6290_v7 = vld [vmem:[#allocation16 + $0x1e8] sm:$0xff]  ;;  %v6292_v8 = vld [vmem:[#allocation13 + $0x58] sm:$0xff]  ;;  %v6300_v11 = vld [vmem:[#allocation13 + $0x50] sm:$0xff]  ;;  %v6303_v12 = vperm.slane %v6288_v6, 0  ;;  %v722_v15 = vperm.slane %v6288_v6, 2 }
  0x27   :  { %191 = vmatpush.msra.mxu0 %v6278_v1  ;;  %377 = vmatpush.msra.mxu2 %v6290_v7  ;;  %v6295_v9 = vld [vmem:[#allocation16 + $0x1c8] sm:$0xff]  ;;  %v6309_v14 = vld [vmem:[#allocation16 + $0x1e0] sm:$0xff]  ;;  %v355_v17 = vld [vmem:[#allocation16 + $0x1f0] sm:$0xff]  ;;  %v6342_v29 = vperm.slane %v6288_v6, 3  ;;  %v6357_v36 = vperm.slane %v6288_v6, 5  ;;  %v6376_v45 = vperm.slane %v6288_v6, 4 }
  0x28   :  { %5574 = vset.pattern.permute.xlu2 %v710_v4  ;;  %5576 = vset.pattern.permute.xlu1 %v710_v4  ;;  %v6298_v10 = vld [vmem:[#allocation16 + $0x1a8] sm:$0xff]  ;;  %v6319_v19 = vld [vmem:[#allocation16 + $0x1c0] sm:$0xff]  ;;  %v351_v21 = vld [vmem:[#allocation16 + $0x1d0] sm:$0xff]  ;;  %v6394_v57 = vperm.slane %v6288_v6, 7  ;;  %v6400_v62 = vperm.slane %v6288_v6, 6 }
  0x29   :  { %192 = vmatpush.msra.mxu0 %v6281_v3  ;;  %5575 = vset.pattern.permute.xlu0 %v710_v4  ;;  %v6307_v13 = vld [vmem:[#allocation16 + $0x188] sm:$0xff]  ;;  %v6321_v20 = vld [vmem:[#allocation13 + $0x40] sm:$0xff]  ;;  %v6330_v24 = vld [vmem:[#allocation13 + $0x38] sm:$0xff] }
  0x2a   :  { %378 = vmatpush.msra.mxu2 %v6295_v9  ;;  %v6312_v16 = vld [vmem:[#allocation13 + $0x48] sm:$0xff]  ;;  %357 = vmatpush.msra.mxu1 %v6309_v14  ;;  %v6328_v23 = vld [vmem:[#allocation16 + $0x1a0] sm:$0xff]  ;;  %v347_v25 = vld [vmem:[#allocation16 + $0x1b0] sm:$0xff] }
  0x2b   :  { %193 = vmatpush.msra.mxu0 %v6285_v5  ;;  %v6317_v18 = vld [vmem:[#allocation16 + $0x168] sm:$0xff]  ;;  %397 = vmatpush.msra.mxu3 %v355_v17  ;;  %v6337_v27 = vld [vmem:[#allocation16 + $0x180] sm:$0xff]  ;;  %v6339_v28 = vld [vmem:[#allocation13 + $0x30] sm:$0xff] }
  0x2c   :  { %379 = vmatpush.msra.mxu2 %v6298_v10  ;;  %v6326_v22 = vld [vmem:[#allocation16 + $0x148] sm:$0xff]  ;;  %358 = vmatpush.msra.mxu1 %v6319_v19  ;;  %v343_v30 = vld [vmem:[#allocation16 + $0x190] sm:$0xff]  ;;  %v6353_v33 = vld [vmem:[#allocation16 + $0x160] sm:$0xff] }
  0x2d   :  { %194 = vmatpush.msra.mxu0 %v6292_v8  ;;  %v6335_v26 = vld [vmem:[#allocation16 + $0x128] sm:$0xff]  ;;  %398 = vmatpush.msra.mxu3 %v351_v21  ;;  %v339_v35 = vld [vmem:[#allocation16 + $0x170] sm:$0xff]  ;;  %v6359_v37 = vld [vmem:[#allocation13 + $0x20] sm:$0xff] }
  0x2e   :  { %380 = vmatpush.msra.mxu2 %v6307_v13  ;;  %359 = vmatpush.msra.mxu1 %v6328_v23  ;;  %v6347_v31 = vld [vmem:[#allocation16 + $0x108] sm:$0xff]  ;;  %v6365_v39 = vld [vmem:[#allocation16 + $0x140] sm:$0xff]  ;;  %v6367_v40 = vld [vmem:[#allocation13 + $0x18] sm:$0xff] }
  0x2f   :  { %195 = vmatpush.msra.mxu0 %v6300_v11  ;;  %399 = vmatpush.msra.mxu3 %v347_v25  ;;  %v6349_v32 = vld [vmem:[#allocation13 + $0x28] sm:$0xff]  ;;  %v335_v41 = vld [vmem:[#allocation16 + $0x150] sm:$0xff]  ;;  %v6371_v43 = vld [vmem:[#allocation16 + $0x120] sm:$0xff] }
  0x30   :  { %713 = vperm.xlu2 %5574, %v6303_v12   ;;  %727 = vperm.xlu1 %5576, %v722_v15   ;;  %v322_v34 = vld [vmem:[#allocation16 + $0xe8] sm:$0xff]  ;;  %v6373_v44 = vld [vmem:[#allocation13 + $0x10] sm:$0xff]  ;;  %v6383_v50 = vld [vmem:[#allocation16 + $0x100] sm:$0xff] }
  0x31   :  { %196 = vmatpush.msra.mxu0 %v6312_v16  ;;  %381 = vmatpush.msra.mxu2 %v6317_v18  ;;  %v318_v38 = vld [vmem:[#allocation16 + $0xc8] sm:$0xff]  ;;  %v331_v46 = vld [vmem:[#allocation16 + $0x130] sm:$0xff]  ;;  %v6386_v52 = vld [vmem:[#allocation13] sm:$0xff] }
  0x32   :  { %360 = vmatpush.msra.mxu1 %v6337_v27  ;;  %400 = vmatpush.msra.mxu3 %v343_v30  ;;  %v314_v42 = vld [vmem:[#allocation16 + $0xa8] sm:$0xff]  ;;  %v327_v51 = vld [vmem:[#allocation16 + $0x110] sm:$0xff]  ;;  %v321_v53 = vld [vmem:[#allocation16 + $0xe0] sm:$0xff] }
  0x33   :  { %197 = vmatpush.msra.mxu0 %v6321_v20  ;;  %382 = vmatpush.msra.mxu2 %v6326_v22  ;;  %v6380_v47 = vld [vmem:[#allocation13 + $0x8] sm:$0xff]  ;;  %v6391_v55 = vld [vmem:[#allocation16 + $0x1f8] sm:$0xff]  ;;  %v323_v56 = vld [vmem:[#allocation16 + $0xf0] sm:$0xff] }
  0x34   :  { %361 = vmatpush.msra.mxu1 %v6353_v33  ;;  %401 = vmatpush.msra.mxu3 %v339_v35  ;;  %v310_v48 = vld [vmem:[#allocation16 + $0x88] sm:$0xff]  ;;  %v6397_v58 = vld [vmem:[#allocation16 + $0x1d8] sm:$0xff]  ;;  %v317_v15 = vld [vmem:[#allocation16 + $0xc0] sm:$0xff] }
  0x35   :  { %198 = vmatpush.msra.mxu0 %v6330_v24  ;;  %383 = vmatpush.msra.mxu2 %v6335_v26  ;;  %v306_v49 = vld [vmem:[#allocation16 + $0x68] sm:$0xff]  ;;  %v6402_v63 = vld [vmem:[#allocation16 + $0x1b8] sm:$0xff]  ;;  %v319_v17 = vld [vmem:[#allocation16 + $0xd0] sm:$0xff] }
  0x36   :  { %362 = vmatpush.msra.mxu1 %v6365_v39  ;;  %402 = vmatpush.msra.mxu3 %v335_v41  ;;  %v302_v54 = vld [vmem:[#allocation16 + $0x48] sm:$0xff]  ;;  %v313_v21 = vld [vmem:[#allocation16 + $0xa0] sm:$0xff]  ;;  %v6405_v25 = vld [vmem:[#allocation16 + $0x198] sm:$0xff] }
  0x37   :  { %199 = vmatpush.msra.mxu0 %v6339_v28  ;;  %384 = vmatpush.msra.mxu2 %v6347_v31  ;;  %v298_v59 = vld [vmem:[#allocation16 + $0x28] sm:$0xff]  ;;  %v309_v35 = vld [vmem:[#allocation16 + $0x80] sm:$0xff]  ;;  %v267_v2 = vld [vmem:[#allocation14 + $0x130] sm:$0xff] }
  0x38   :  { %734 = vperm.xlu2 %5574, %v6342_v29   ;;  %748 = vperm.xlu1 %5576, %v6357_v36   ;;  %v294_v60 = vld [vmem:[#allocation16 + $0x8] sm:$0xff] }
  0x39   :  { %200 = vmatpush.msra.mxu0 %v6349_v32  ;;  %385 = vmatpush.msra.mxu2 %v322_v34  ;;  %v290_v4 = vld [vmem:[#allocation14 + $0x1e8] sm:$0xff]  ;;  %v315_v34 = vld [vmem:[#allocation16 + $0xb0] sm:$0xff] }
  0x3a   :  { %363 = vmatpush.msra.mxu1 %v6371_v43  ;;  %403 = vmatpush.msra.mxu3 %v331_v46  ;;  %v286_v30 = vld [vmem:[#allocation14 + $0x1c8] sm:$0xff]  ;;  %v305_v46 = vld [vmem:[#allocation16 + $0x60] sm:$0xff] }
  0x3b   :  { %201 = vmatpush.msra.mxu0 %v6359_v37  ;;  %386 = vmatpush.msra.mxu2 %v318_v38  ;;  %v6411_v38 = vld [vmem:[#allocation16 + $0x178] sm:$0xff]  ;;  %v282_v41 = vld [vmem:[#allocation14 + $0x1a8] sm:$0xff] }
  0x3c   :  { %364 = vmatpush.msra.mxu1 %v6383_v50  ;;  %404 = vmatpush.msra.mxu3 %v327_v51  ;;  %v278_v51 = vld [vmem:[#allocation14 + $0x188] sm:$0xff] }
  0x3d   :  { %202 = vmatpush.msra.mxu0 %v6367_v40  ;;  %387 = vmatpush.msra.mxu2 %v314_v42  ;;  %v311_v42 = vld [vmem:[#allocation16 + $0x90] sm:$0xff] }
  0x3e   :  { %365 = vmatpush.msra.mxu1 %v321_v53  ;;  %405 = vmatpush.msra.mxu3 %v323_v56  ;;  %v307_v53 = vld [vmem:[#allocation16 + $0x70] sm:$0xff]  ;;  %v274_v56 = vld [vmem:[#allocation14 + $0x168] sm:$0xff] }
  0x3f   :  { %203 = vmatpush.msra.mxu0 %v6373_v44  ;;  %388 = vmatpush.msra.mxu2 %v310_v48  ;;  %v6415_v48 = vperm.slane %v6288_v6, 1  ;;  %v6424_v6 = vld [vmem:[#allocation16 + $0x118] sm:$0xff] }
  0x40   :  { %741 = vperm.xlu2 %5574, %v6376_v45   ;;  %762 = vperm.xlu1 %5576, %v6394_v57  }
  0x41   :  { %204 = vmatpush.msra.mxu0 %v6380_v47  ;;  %389 = vmatpush.msra.mxu2 %v306_v49  ;;  %v6417_v49 = vld [vmem:[#allocation16 + $0x158] sm:$0xff] }
  0x42   :  { %366 = vmatpush.msra.mxu1 %v317_v15  ;;  %406 = vmatpush.msra.mxu3 %v319_v17  ;;  %v324_v15 = vld [vmem:[#allocation16 + $0xf8] sm:$0xff]  ;;  %v266_v17 = vld [vmem:[#allocation14 + $0x128] sm:$0xff] }
  0x43   :  { %205 = vmatpush.msra.mxu0 %v6386_v52  ;;  %390 = vmatpush.msra.mxu2 %v302_v54  ;;  %v6420_v54 = vld [vmem:[#allocation16 + $0x138] sm:$0xff] }
  0x44   :  { %206 = vmatmul.f32.vlgmr.msra.gmra.mxu0 %v6174_v61  ;;  %367 = vmatpush.msra.mxu1 %v313_v21  ;;  %v303_v61 = vld [vmem:[#allocation16 + $0x50] sm:$0xff] }
  0x45   :  { %417 = vmatpush.msrb.mxu0 %v6391_v55  ;;  %391 = vmatpush.msra.mxu2 %v298_v59  ;;  %v301_v59 = vld [vmem:[#allocation16 + $0x40] sm:$0xff]  ;;  %v299_v21 = vld [vmem:[#allocation16 + $0x30] sm:$0xff] }
  0x46   :  { %407 = vmatpush.msra.mxu3 %v315_v34  ;;  %368 = vmatpush.msra.mxu1 %v309_v35  ;;  %v320_v34 = vld [vmem:[#allocation16 + $0xd8] sm:$0xff]  ;;  %v262_v35 = vld [vmem:[#allocation14 + $0x108] sm:$0xff] }
  0x47   :  { %418 = vmatpush.msrb.mxu0 %v6397_v58  ;;  %392 = vmatpush.msra.mxu2 %v294_v60  ;;  %v270_v60 = vld [vmem:[#allocation14 + $0x148] sm:$0xff] }
  0x48   :  { %755 = vperm.xlu2 %5574, %v6400_v62   ;;  %408 = vmatpush.msra.mxu3 %v311_v42  ;;  %v316_v42 = vld [vmem:[#allocation16 + $0xb8] sm:$0xff] }
  0x49   :  { %419 = vmatpush.msrb.mxu0 %v6402_v63  ;;  %457 = vmatpush.msrb.mxu2 %v290_v4  ;;  %v297_v4 = vld [vmem:[#allocation16 + $0x20] sm:$0xff] }
  0x4a   :  { %369 = vmatpush.msra.mxu1 %v305_v46  ;;  %409 = vmatpush.msra.mxu3 %v307_v53  ;;  %v258_v46 = vld [vmem:[#allocation14 + $0xe8] sm:$0xff] }
  0x4b   :  { %420 = vmatpush.msrb.mxu0 %v6405_v25  ;;  %458 = vmatpush.msrb.mxu2 %v286_v30  ;;  %v293_v30 = vld [vmem:[#allocation16] sm:$0xff]  ;;  %v254_v53 = vld [vmem:[#allocation14 + $0xc8] sm:$0xff] }
  0x4c   :  { %1382 = vperm.xlu1 %5576, %v6303_v12   ;;  %370 = vmatpush.msra.mxu1 %v301_v59  ;;  %v250_v59 = vld [vmem:[#allocation14 + $0xa8] sm:$0xff] }
  0x4d   :  { %421 = vmatpush.msrb.mxu0 %v6411_v38  ;;  %459 = vmatpush.msrb.mxu2 %v282_v41  ;;  %v295_v41 = vld [vmem:[#allocation16 + $0x10] sm:$0xff] }
  0x4e   :  { %410 = vmatpush.msra.mxu3 %v303_v61  ;;  %371 = vmatpush.msra.mxu1 %v297_v4  ;;  %v246_v61 = vld [vmem:[#allocation14 + $0x88] sm:$0xff]  ;;  %v300_v4 = vld [vmem:[#allocation16 + $0x38] sm:$0xff] }
  0x4f   :  { %422 = vmatpush.msrb.mxu0 %v6417_v49  ;;  %460 = vmatpush.msrb.mxu2 %v278_v51  ;;  %v312_v51 = vld [vmem:[#allocation16 + $0x98] sm:$0xff] }
  0x50   :  { %1389 = vperm.xlu2 %5574, %v6415_v48   ;;  %411 = vmatpush.msra.mxu3 %v299_v21  ;;  %v291_v21 = vld [vmem:[#allocation14 + $0x1f0] sm:$0xff] }
  0x51   :  { %423 = vmatpush.msrb.mxu0 %v6420_v54  ;;  %461 = vmatpush.msrb.mxu2 %v274_v56  ;;  %v308_v56 = vld [vmem:[#allocation16 + $0x78] sm:$0xff] }
  0x52   :  { %372 = vmatpush.msra.mxu1 %v293_v30  ;;  %412 = vmatpush.msra.mxu3 %v295_v41  ;;  %v6449_v30 = vld [vmem:[#allocation14 + $0x1f8] sm:$0xff]  ;;  %v287_v41 = vld [vmem:[#allocation14 + $0x1d0] sm:$0xff] }
  0x53   :  { %424 = vmatpush.msrb.mxu0 %v6424_v6  ;;  %462 = vmatpush.msrb.mxu2 %v270_v60  ;;  %v304_v60 = vld [vmem:[#allocation16 + $0x58] sm:$0xff] }
  0x54   :  { %1403 = vperm.xlu1 %5576, %v6342_v29   ;;  %477 = vmatpush.msrb.mxu3 %v291_v21  ;;  %v163_v21 = vld [vmem:[#allocation8] sm:$0xff] }
  0x55   :  { %425 = vmatpush.msrb.mxu0 %v324_v15  ;;  %463 = vmatpush.msrb.mxu2 %v266_v17  ;;  %v296_v15 = vld [vmem:[#allocation16 + $0x18] sm:$0xff]  ;;  %v6447_v17 = vld [vmem:[#allocation14 + $0x1e0] sm:$0xff] }
  0x56   :  { %437 = vmatpush.msrb.mxu1 %v6447_v17  ;;  %478 = vmatpush.msrb.mxu3 %v287_v41  ;;  %v275_v41 = vld [vmem:[#allocation14 + $0x170] sm:$0xff] }
  0x57   :  { %426 = vmatpush.msrb.mxu0 %v320_v34  ;;  %464 = vmatpush.msrb.mxu2 %v262_v35  ;;  %v242_v34 = vld [vmem:[#allocation14 + $0x68] sm:$0xff]  ;;  %v6454_v35 = vld [vmem:[#allocation14 + $0x1c0] sm:$0xff] }
  0x58   :  { %1410 = vperm.xlu2 %5574, %v6376_v45   ;;  %438 = vmatpush.msrb.mxu1 %v6454_v35 }
  0x59   :  { %427 = vmatpush.msrb.mxu0 %v316_v42  ;;  %465 = vmatpush.msrb.mxu2 %v258_v46  ;;  %v6456_v42 = vld [vmem:[#allocation14 + $0x1d8] sm:$0xff]  ;;  %v238_v46 = vld [vmem:[#allocation14 + $0x48] sm:$0xff] }
  0x5a   :  { %393 = vmatmul.f32.vlgmr.msra.gmra.mxu2 %v163_v21  ;;  %373 = vmatmul.f32.vlgmr.msra.gmra.mxu1 %v163_v21 }
  0x5b   :  { %428 = vmatpush.msrb.mxu0 %v312_v51  ;;  %466 = vmatpush.msrb.mxu2 %v254_v53  ;;  %v6460_v51 = vld [vmem:[#allocation14 + $0x1a0] sm:$0xff]  ;;  %v283_v53 = vld [vmem:[#allocation14 + $0x1b0] sm:$0xff] }
  0x5c   :  { %1417 = vperm.xlu1 %5576, %v6357_v36   ;;  %439 = vmatpush.msrb.mxu1 %v6460_v51 }
  0x5d   :  { %429 = vmatpush.msrb.mxu0 %v308_v56  ;;  %467 = vmatpush.msrb.mxu2 %v250_v59  ;;  %v6462_v56 = vld [vmem:[#allocation14 + $0x1b8] sm:$0xff]  ;;  %v234_v59 = vld [vmem:[#allocation14 + $0x28] sm:$0xff] }
  0x5e   :  { %479 = vmatpush.msrb.mxu3 %v283_v53  ;;  %v6478_v53 = vld [vmem:[#allocation14 + $0x140] sm:$0xff] }
  0x5f   :  { %430 = vmatpush.msrb.mxu0 %v304_v60  ;;  %468 = vmatpush.msrb.mxu2 %v246_v61  ;;  %v6466_v60 = vld [vmem:[#allocation14 + $0x180] sm:$0xff]  ;;  %v279_v61 = vld [vmem:[#allocation14 + $0x190] sm:$0xff] }
  0x60   :  { %1424 = vperm.xlu2 %5574, %v6400_v62   ;;  %440 = vmatpush.msrb.mxu1 %v6466_v60 }
  0x61   :  { %431 = vmatpush.msrb.mxu0 %v300_v4  ;;  %469 = vmatpush.msrb.mxu2 %v242_v34  ;;  %v6468_v4 = vld [vmem:[#allocation14 + $0x198] sm:$0xff]  ;;  %v6472_v34 = vld [vmem:[#allocation14 + $0x160] sm:$0xff] }
  0x62   :  { %480 = vmatpush.msrb.mxu3 %v279_v61  ;;  %7904 = vst [vmem:[#allocation26_spill] sm:$0xff] %v6472_v34  ;;  %441 = vmatpush.msrb.mxu1 %v6472_v34  ;;  %v6480_v61 = vld [vmem:[#allocation14 + $0x158] sm:$0xff] }
  0x63   :  { %432 = vmatpush.msrb.mxu0 %v296_v15  ;;  %470 = vmatpush.msrb.mxu2 %v238_v46  ;;  %v230_v15 = vld [vmem:[#allocation14 + $0x8] sm:$0xff]  ;;  %v6475_v46 = vld [vmem:[#allocation14 + $0x178] sm:$0xff]  ;;  %7906 = vst [vmem:[#allocation28_spill] sm:$0xff] %v6480_v61 }
  0x64   :  { %1431 = vperm.xlu1 %5576, %v6394_v57   ;;  %7905 = vst [vmem:[#allocation27_spill] sm:$0xff] %v6475_v46  ;;  %481 = vmatpush.msrb.mxu3 %v275_v41  ;;  %v6487_v34 = vld [vmem:[#allocation14 + $0x138] sm:$0xff]  ;;  %v6492_v41 = vld [vmem:[#allocation14 + $0x100] sm:$0xff] }
  0x65   :  { %497 = vmatpush.msra.mxu0 %v6449_v30  ;;  %471 = vmatpush.msrb.mxu2 %v234_v59  ;;  %v271_v59 = vld [vmem:[#allocation14 + $0x150] sm:$0xff]  ;;  %7907 = vst [vmem:[#allocation29_spill] sm:$0xff] %v6487_v34 }
  0x66   :  { %442 = vmatpush.msrb.mxu1 %v6478_v53  ;;  %482 = vmatpush.msrb.mxu3 %v271_v59  ;;  %v6499_v59 = vld [vmem:[#allocation14 + $0xe0] sm:$0xff] }
  0x67   :  { %498 = vmatpush.msra.mxu0 %v6456_v42  ;;  %472 = vmatpush.msrb.mxu2 %v230_v15  ;;  %v6485_v15 = vld [vmem:[#allocation14 + $0x120] sm:$0xff] }
  0x68   :  { %2055 = vperm.xlu2 %5574, %v6415_v48   ;;  %443 = vmatpush.msrb.mxu1 %v6485_v15 }
  0x69   :  { %499 = vmatpush.msra.mxu0 %v6462_v56  ;;  %859 = vmatpush.msra.mxu2 %v6276_v0  ;;  %v263_v0 = vld [vmem:[#allocation14 + $0x110] sm:$0xff] }
  0x6a   :  { %483 = vmatpush.msrb.mxu3 %v267_v2  ;;  %444 = vmatpush.msrb.mxu1 %v6492_v41  ;;  %v6506_v2 = vld [vmem:[#allocation14 + $0xc0] sm:$0xff] }
  0x6b   :  { %500 = vmatpush.msra.mxu0 %v6468_v4  ;;  %860 = vmatpush.msra.mxu2 %v6278_v1  ;;  %v259_v1 = vld [vmem:[#allocation14 + $0xf0] sm:$0xff] }
  0x6c   :  { %2048 = vperm.xlu1 %5576, %v6303_v12   ;;  %484 = vmatpush.msrb.mxu3 %v263_v0  ;;  %v6513_v0 = vld [vmem:[#allocation14 + $0xa0] sm:$0xff] }
  0x6d   :  { %501 = vmatpush.msra.mxu0 %v6475_v46  ;;  %v6494_v46 = vld [vmem:[#allocation14 + $0x118] sm:$0xff]  ;;  %861 = vmatpush.msra.mxu2 %v6281_v3  ;;  %v255_v3 = vld [vmem:[#allocation14 + $0xd0] sm:$0xff] }
  0x6e   :  { %7908 = vst [vmem:[#allocation30_spill] sm:$0xff] %v6494_v46  ;;  %445 = vmatpush.msrb.mxu1 %v6499_v59  ;;  %485 = vmatpush.msrb.mxu3 %v259_v1  ;;  %v6520_v1 = vld [vmem:[#allocation14 + $0x80] sm:$0xff] }
  0x6f   :  { %502 = vmatpush.msra.mxu0 %v6480_v61  ;;  %v6501_v61 = vld [vmem:[#allocation14 + $0xf8] sm:$0xff]  ;;  %862 = vmatpush.msra.mxu2 %v6285_v5  ;;  %v251_v5 = vld [vmem:[#allocation14 + $0xb0] sm:$0xff] }
  0x70   :  { %2076 = vperm.xlu2 %5574, %v6376_v45   ;;  %7909 = vst [vmem:[#allocation31_spill] sm:$0xff] %v6501_v61  ;;  %446 = vmatpush.msrb.mxu1 %v6506_v2 }
  0x71   :  { %503 = vmatpush.msra.mxu0 %v6487_v34  ;;  %v6508_v34 = vld [vmem:[#allocation14 + $0xd8] sm:$0xff]  ;;  %863 = vmatpush.msra.mxu2 %v6292_v8  ;;  %v247_v8 = vld [vmem:[#allocation14 + $0x90] sm:$0xff] }
  0x72   :  { %7910 = vst [vmem:[#allocation32_spill] sm:$0xff] %v6508_v34  ;;  %486 = vmatpush.msrb.mxu3 %v255_v3  ;;  %447 = vmatpush.msrb.mxu1 %v6513_v0  ;;  %v241_v3 = vld [vmem:[#allocation14 + $0x60] sm:$0xff] }
  0x73   :  { %504 = vmatpush.msra.mxu0 %v6494_v46  ;;  %v6515_v46 = vld [vmem:[#allocation14 + $0xb8] sm:$0xff]  ;;  %864 = vmatpush.msra.mxu2 %v6300_v11 }
  0x74   :  { %2069 = vperm.xlu1 %5576, %v6342_v29   ;;  %7911 = vst [vmem:[#allocation33_spill] sm:$0xff] %v6515_v46  ;;  %487 = vmatpush.msrb.mxu3 %v251_v5  ;;  %v6528_v11 = vld [vmem:[#allocation14 + $0x78] sm:$0xff]  ;;  %v6530_v5 = vld [vmem:[#allocation14 + $0x40] sm:$0xff] }
  0x75   :  { %505 = vmatpush.msra.mxu0 %v6501_v61  ;;  %v6522_v61 = vld [vmem:[#allocation14 + $0x98] sm:$0xff]  ;;  %865 = vmatpush.msra.mxu2 %v6312_v16  ;;  %7913 = vst [vmem:[#allocation35_spill] sm:$0xff] %v6530_v5 }
  0x76   :  { %7912 = vst [vmem:[#allocation34_spill] sm:$0xff] %v6522_v61  ;;  %448 = vmatpush.msrb.mxu1 %v6520_v1  ;;  %488 = vmatpush.msrb.mxu3 %v247_v8  ;;  %v6532_v16 = vld [vmem:[#allocation14 + $0x58] sm:$0xff]  ;;  %v6536_v8 = vld [vmem:[#allocation14 + $0x20] sm:$0xff] }
  0x77   :  { %506 = vmatpush.msra.mxu0 %v6508_v34  ;;  %v243_v34 = vld [vmem:[#allocation14 + $0x70] sm:$0xff]  ;;  %866 = vmatpush.msra.mxu2 %v6321_v20  ;;  %v6539_v20 = vld [vmem:[#allocation14 + $0x38] sm:$0xff] }
  0x78   :  { %2090 = vperm.xlu2 %5574, %v6400_v62   ;;  %413 = vmatmul.f32.vlgmr.msra.gmra.mxu3 %v163_v21 }
  0x79   :  { %507 = vmatpush.msra.mxu0 %v6515_v46  ;;  %v239_v46 = vld [vmem:[#allocation14 + $0x50] sm:$0xff]  ;;  %449 = vmatpush.msrb.mxu1 %v241_v3 }
  0x7a   :  { %433 = vmatmul.f32.vlgmr.msrb.gmra.mxu0 %v163_v21  ;;  %489 = vmatpush.msrb.mxu3 %v243_v34  ;;  %v5580_v21 = vld [vmem:[%s7874_s5] ss:$0 sm:$0xff]  ;;  %v6546_v34 = vld [vmem:[#allocation14] sm:$0xff]  ;;  %v231_v3 = vld [vmem:[#allocation14 + $0x10] sm:$0xff] }
  0x7b   :  { %508 = vmatpush.msra.mxu0 %v6522_v61  ;;  %867 = vmatpush.msra.mxu2 %v6330_v24  ;;  %v235_v61 = vld [vmem:[#allocation14 + $0x30] sm:$0xff]  ;;  %v6549_v24 = vld [vmem:[#allocation14 + $0x18] sm:$0xff] }
  0x7c   :  { %2083 = vperm.xlu1 %5576, %v6357_v36   ;;  %450 = vmatpush.msrb.mxu1 %v6530_v5 }
  0x7d   :  { %509 = vmatpush.msra.mxu0 %v6528_v11  ;;  %490 = vmatpush.msrb.mxu3 %v239_v46 }
  0x7e   :  { %868 = vmatpush.msra.mxu2 %v6339_v28  ;;  %451 = vmatpush.msrb.mxu1 %v6536_v8 }
  0x7f   :  { %510 = vmatpush.msra.mxu0 %v6532_v16  ;;  %491 = vmatpush.msrb.mxu3 %v235_v61  ;;  %v6682_v61 = vld [vmem:[#allocation17 + $0x8] sm:$0xff] }
  0x80   :  { %2721 = vperm.xlu2 %5574, %v6415_v48   ;;  %869 = vmatpush.msra.mxu2 %v6349_v32  ;;  %v6602_v32 = vld [vmem:[#allocation17 + $0x78] sm:$0xff] }
  0x81   :  { %511 = vmatpush.msra.mxu0 %v6539_v20  ;;  %452 = vmatpush.msrb.mxu1 %v6546_v34 }
  0x82   :  { %492 = vmatpush.msrb.mxu3 %v231_v3  ;;  %870 = vmatpush.msra.mxu2 %v6359_v37  ;;  %v6611_v37 = vld [vmem:[#allocation17 + $0x68] sm:$0xff]  ;;  %v6690_v3 = vld [vmem:[#allocation16 + $0xb8] sm:$0xff] }
  0x83   :  { %512 = vmatpush.msra.mxu0 %v6549_v24  ;;  %610 = vmatpush.msra.mxu1 %v6602_v32  ;;  %7919 = vst [vmem:[#allocation41_spill] sm:$0xff] %v6690_v3 }
  0x84   :  { %2097 = vperm.xlu1 %5576, %v6394_v57   ;;  %871 = vmatpush.msra.mxu2 %v6367_v40  ;;  %v6620_v40 = vld [vmem:[#allocation17 + $0x58] sm:$0xff] }
  0x85   :  { %1046 = vmatpush.msrb.mxu0 %v6290_v7  ;;  %1026 = vmatpush.msra.mxu3 %v6309_v14 }
  0x86   :  { %872 = vmatpush.msra.mxu2 %v6373_v44  ;;  %v6634_v44 = vld [vmem:[#allocation17 + $0x38] sm:$0xff] }
  0x87   :  { %1047 = vmatpush.msrb.mxu0 %v6295_v9  ;;  %1027 = vmatpush.msra.mxu3 %v6319_v19 }
  0x88   :  { %2742 = vperm.xlu2 %5574, %v6376_v45   ;;  %873 = vmatpush.msra.mxu2 %v6380_v47  ;;  %v6636_v47 = vld [vmem:[#allocation16 + $0xe8] sm:$0xff] }
  0x89   :  { %1048 = vmatpush.msrb.mxu0 %v6298_v10  ;;  %1028 = vmatpush.msra.mxu3 %v6328_v23 }
  0x8a   :  { %874 = vmatpush.msra.mxu2 %v6386_v52  ;;  %v6646_v52 = vld [vmem:[#allocation17 + $0x28] sm:$0xff] }
  0x8b   :  { %1049 = vmatpush.msrb.mxu0 %v6307_v13  ;;  %1029 = vmatpush.msra.mxu3 %v6337_v27 }
  0x8c   :  { %2714 = vperm.xlu1 %5576, %v6303_v12  }
  0x8d   :  { %1050 = vmatpush.msrb.mxu0 %v6317_v18  ;;  %1030 = vmatpush.msra.mxu3 %v6353_v33  ;;  %v6609_v33 = vld [vmem:[#allocation17 + $0x70] sm:$0xff] }
  0x8e   :  { %611 = vmatpush.msra.mxu1 %v6609_v33 }
  0x8f   :  { %1051 = vmatpush.msrb.mxu0 %v6326_v22  ;;  %1031 = vmatpush.msra.mxu3 %v6365_v39  ;;  %v6614_v39 = vld [vmem:[#allocation17 + $0x60] sm:$0xff] }
  0x90   :  { %2756 = vperm.xlu2 %5574, %v6400_v62   ;;  %612 = vmatpush.msra.mxu1 %v6611_v37 }
  0x91   :  { %1052 = vmatpush.msrb.mxu0 %v6335_v26  ;;  %1032 = vmatpush.msra.mxu3 %v6371_v43  ;;  %v6628_v43 = vld [vmem:[#allocation17 + $0x48] sm:$0xff] }
  0x92   :  { %613 = vmatpush.msra.mxu1 %v6614_v39 }
  0x93   :  { %1053 = vmatpush.msrb.mxu0 %v6347_v31  ;;  %1033 = vmatpush.msra.mxu3 %v6383_v50  ;;  %v6642_v50 = vld [vmem:[#allocation16 + $0xc8] sm:$0xff] }
  0x94   :  { %2735 = vperm.xlu1 %5576, %v6342_v29   ;;  %614 = vmatpush.msra.mxu1 %v6620_v40 }
  0x95   :  { %1054 = vmatpush.msrb.mxu0 %v6636_v47 }
  0x97   :  { %1055 = vmatpush.msrb.mxu0 %v6642_v50 }
  0x98   :  { %3387 = vperm.xlu2 %5574, %v6415_v48  }
  0x9c   :  { %2749 = vperm.xlu1 %5576, %v6357_v36  }
  0xa0   :  { %3401 = vperm.xlu2 %5574, %v6342_v29  }
  0xa4   :  { %2763 = vperm.xlu1 %5576, %v6394_v57  }
  0xa8   :  { %3415 = vperm.xlu2 %5574, %v6357_v36  }
  0xac   :  { %3380 = vperm.xlu1 %5576, %v6303_v12  }
  0xb0   :  { %3429 = vperm.xlu2 %5574, %v6394_v57  }
  0xb4   :  { %3408 = vperm.xlu1 %5576, %v6376_v45  }
  0xb8   :  { %4046 = vperm.xlu2 %5574, %v6303_v12  }
  0xbc   :  { %3422 = vperm.xlu1 %5576, %v6400_v62  }
  0xc0   :  { %4067 = vperm.xlu2 %5574, %v6342_v29  }
  0xc1   :  { %v207_v46 = vpop.f32.mrf.mxu0 }
  0xc2   :  { %v208_v5 = vadd.f32 %v5580_v21, %v207_v46  ;;  %v6686_v21 = vld [vmem:[#allocation16 + $0x28] sm:$0xff]  ;;  %v6694_v46 = vld [vmem:[#allocation17] sm:$0xff] }
  0xc3   :  { %7918 = vst [vmem:[#allocation40_spill] sm:$0xff] %v6686_v21 }
  0xc4   :  { %v5527_v28 = vmul.f32 -1.442695, %v208_v5  ;;  %4053 = vperm.xlu1 %5576, %v6415_v48   ;;  %v6684_v5 = vld [vmem:[#allocation16 + $0xa0] sm:$0xff] }
  0xc5   :  { %7917 = vst [vmem:[#allocation39_spill] sm:$0xff] %v6684_v5 }
  0xc6   :  { %5596 = vpow2.f32 %v5527_v28  ;;  %v6696_v28 = vld [vmem:[#allocation16 + $0x80] sm:$0xff] }
  0xc7   :  { %7920 = vst [vmem:[#allocation42_spill] sm:$0xff] %v6696_v28 }
  0xc8   :  { %4081 = vperm.xlu2 %5574, %v6357_v36  }
  0xcc   :  { %v5597_v7 = vpop.eup %5596  ;;  %4074 = vperm.xlu1 %5576, %v6376_v45  }
  0xcd   :  { %v213_v9 = vadd.f32 1.0, %v5597_v7  ;;  %v6698_v7 = vld [vmem:[#allocation16 + $0x8] sm:$0xff] }
  0xce   :  { %7921 = vst [vmem:[#allocation43_spill] sm:$0xff] %v6698_v7 }
  0xcf   :  { %5598 = vrcp.f32 %v213_v9  ;;  %v225_v18 = vand.u32 2147483648, %v213_v9  ;;  %v223_v22 = vand.u32 2147483647, %v213_v9  ;;  %vm219_vm1 = vweird.f32 %v213_v9 }
  0xd0   :  { %4095 = vperm.xlu2 %5574, %v6394_v57  }
  0xd1   :  { %v226_v26 = vor.u32 1.1754944e-38, %v225_v18  ;;  %vm224_vm3 = vcmp.eq.f32.partialorder %v223_v22, 8.507059e+37  ;;  %v6710_v18 = vld [vmem:[#allocation16 + $0x60] sm:$0xff] }
  0xd2   :  { %7924 = vst [vmem:[#allocation46_spill] sm:$0xff] %v6710_v18 }
  0xd4   :  { %4088 = vperm.xlu1 %5576, %v6400_v62  }
  0xd5   :  { %v5599_v10 = vpop.eup %5598 }
  0xd6   :  { %v215_v13 = vmul.f32 %v5599_v10, %v213_v9  ;;  %vm220_vm0 = vweird.f32 %v5599_v10  ;;  %v6702_v9 = vld [vmem:[#allocation16 + $0x98] sm:$0xff] }
  0xd7   :  { %vm221_vm2 = vmor %vm219_vm1, %vm220_vm0  ;;  %7922 = vst [vmem:[#allocation44_spill] sm:$0xff] %v6702_v9 }
  0xd8   :  { %v216_v14 = vsub.f32 1.0, %v215_v13  ;;  %4712 = vperm.xlu2 %5574, %v6303_v12   ;;  %v6706_v13 = vld [vmem:[#allocation14 + $0x1e8] sm:$0xff] }
  0xd9   :  { %7923 = vst [vmem:[#allocation45_spill] sm:$0xff] %v6706_v13 }
  0xda   :  { %v217_v19 = vmul.f32 %v5599_v10, %v216_v14  ;;  %v374_v14 = vpop.f32.mrf.mxu1 }
  0xdc   :  { %v218_v23 = vadd.f32 %v5599_v10, %v217_v19  ;;  %4719 = vperm.xlu1 %5576, %v6415_v48   ;;  %v6712_v19 = vld [vmem:[#allocation16 + $0x78] sm:$0xff] }
  0xdd   :  { %7925 = vst [vmem:[#allocation47_spill] sm:$0xff] %v6712_v19 }
  0xde   :  { %v222_v27 = vsel %vm221_vm2, %v5599_v10, %v218_v23  ;;  %v6704_v10 = vld [vmem:[#allocation16 + $0x1f0] sm:$0xff] }
  0xdf   :  { %v227_v31 = vsel %vm224_vm3, %v226_v26, %v222_v27  ;;  %v1020_v23 = vld [vmem:[#allocation16 + $0x1d0] sm:$0xff]  ;;  %v955_v26 = vld [vmem:[#allocation14 + $0x1c8] sm:$0xff]  ;;  %v970_v27 = vld [vmem:[#allocation16 + $0x40] sm:$0xff] }
  0xe0   :  { %453 = vmatmul.f32.vlgmr.msrb.gmra.mxu1 %v227_v31  ;;  %473 = vmatmul.f32.vlgmr.msrb.gmra.mxu2 %v227_v31 }
  0xe1   :  { %493 = vmatmul.f32.vlgmr.msrb.gmra.mxu3 %v227_v31  ;;  %513 = vmatmul.f32.vlgmr.msra.gmra.mxu0 %v227_v31 }
  0xe2   :  { %1086 = vmatpush.msrb.mxu2 %v6391_v55  ;;  %4733 = vperm.xlu2 %5574, %v6342_v29   ;;  %v6648_v55 = vld [vmem:[#allocation16 + $0xa8] sm:$0xff] }
  0xe3   :  { %1056 = vmatpush.msrb.mxu0 %v6648_v55 }
  0xe4   :  { %1087 = vmatpush.msrb.mxu2 %v6397_v58  ;;  %4740 = vperm.xlu1 %5576, %v6376_v45   ;;  %v6654_v58 = vld [vmem:[#allocation16 + $0x88] sm:$0xff] }
  0xe5   :  { %1057 = vmatpush.msrb.mxu0 %v6654_v58 }
  0xe6   :  { %1088 = vmatpush.msrb.mxu2 %v6402_v63  ;;  %v6658_v63 = vld [vmem:[#allocation17 + $0x18] sm:$0xff] }
  0xe8   :  { %875 = vmatmul.f32.vlgmr.msra.gmra.mxu2 %v227_v31  ;;  %v973_v31 = vld [vmem:[#allocation16 + $0x58] sm:$0xff] }
  0xe9   :  { %1089 = vmatpush.msrb.mxu2 %v6405_v25  ;;  %v6660_v25 = vld [vmem:[#allocation16 + $0xe0] sm:$0xff] }
  0xea   :  { %4747 = vperm.xlu2 %5574, %v6357_v36   ;;  %1034 = vmatpush.msra.mxu3 %v6660_v25 }
  0xeb   :  { %1090 = vmatpush.msrb.mxu2 %v6411_v38  ;;  %v6664_v38 = vld [vmem:[#allocation16 + $0x68] sm:$0xff] }
  0xec   :  { %4754 = vperm.xlu1 %5576, %v6400_v62   ;;  %1058 = vmatpush.msrb.mxu0 %v6664_v38 }
  0xed   :  { %1091 = vmatpush.msrb.mxu2 %v6417_v49  ;;  %v6670_v49 = vld [vmem:[#allocation17 + $0x10] sm:$0xff] }
  0xef   :  { %1092 = vmatpush.msrb.mxu2 %v6420_v54  ;;  %v6672_v54 = vld [vmem:[#allocation16 + $0xc0] sm:$0xff] }
  0xf0   :  { %7914 = vst [vmem:[#allocation36_spill] sm:$0xff] %v6672_v54  ;;  %1035 = vmatpush.msra.mxu3 %v6672_v54 }
  0xf1   :  { %1093 = vmatpush.msrb.mxu2 %v6424_v6  ;;  %v6674_v6 = vld [vmem:[#allocation16 + $0x48] sm:$0xff] }
  0xf2   :  { %4761 = vperm.xlu2 %5574, %v6394_v57   ;;  %7915 = vst [vmem:[#allocation37_spill] sm:$0xff] %v6674_v6  ;;  %1059 = vmatpush.msrb.mxu0 %v6674_v6 }
  0xf3   :  { %1036 = vmatpush.msra.mxu3 %v6684_v5  ;;  %v1012_v5 = vld [vmem:[#allocation16 + $0x190] sm:$0xff] }
  0xf4   :  { %5385 = vperm.xlu1 %5576, %v6415_v48   ;;  %v6666_v48 = vld [vmem:[#allocation16 + $0xf8] sm:$0xff]  ;;  %1060 = vmatpush.msrb.mxu0 %v6686_v21  ;;  %v947_v21 = vld [vmem:[#allocation14 + $0x188] sm:$0xff] }
  0xf5   :  { %1094 = vmatpush.msrb.mxu2 %v6666_v48  ;;  %1037 = vmatpush.msra.mxu3 %v6696_v28  ;;  %v1016_v28 = vld [vmem:[#allocation16 + $0x1b0] sm:$0xff] }
  0xf6   :  { %1061 = vmatpush.msrb.mxu0 %v6698_v7  ;;  %v951_v7 = vld [vmem:[#allocation14 + $0x1a8] sm:$0xff] }
  0xf7   :  { %v434_v22 = vpop.f32.mrf.mxu0  ;;  %1038 = vmatpush.msra.mxu3 %v6710_v18  ;;  %v962_v18 = vld [vmem:[#allocation16] sm:$0xff] }
  0xf8   :  { %1126 = vmatpush.msra.mxu0 %v6706_v13 }
  0xf9   :  { %1039 = vmatpush.msra.mxu3 %v970_v27 }
  0xfa   :  { %5378 = vperm.xlu2 %5574, %v6303_v12   ;;  %v6625_v12 = vld [vmem:[#allocation17 + $0x50] sm:$0xff]  ;;  %1127 = vmatpush.msra.mxu0 %v955_v26  ;;  %v943_v26 = vld [vmem:[#allocation14 + $0x168] sm:$0xff] }
  0xfb   :  { %615 = vmatpush.msra.mxu1 %v6625_v12 }
  0xfc   :  { %5406 = vperm.xlu1 %5576, %v6376_v45   ;;  %v6678_v45 = vld [vmem:[#allocation16 + $0xd8] sm:$0xff]  ;;  %1128 = vmatpush.msra.mxu0 %v951_v7 }
  0xfd   :  { %616 = vmatpush.msra.mxu1 %v6628_v43  ;;  %7916 = vst [vmem:[#allocation38_spill] sm:$0xff] %v6678_v45  ;;  %1095 = vmatpush.msrb.mxu2 %v6678_v45  ;;  %v394_v45 = vpop.f32.mrf.mxu2 }
  0xfe   :  { %1129 = vmatpush.msra.mxu0 %v947_v21 }
  0xff   :  { %1096 = vmatpush.msrb.mxu2 %v6690_v3  ;;  %v966_v3 = vld [vmem:[#allocation16 + $0x20] sm:$0xff] }
 0x100   :  { %1040 = vmatpush.msra.mxu3 %v966_v3  ;;  %1130 = vmatpush.msra.mxu0 %v943_v26  ;;  %v935_v3 = vld [vmem:[#allocation14 + $0x128] sm:$0xff] }
 0x101   :  { %1097 = vmatpush.msrb.mxu2 %v6702_v9  ;;  %v969_v9 = vld [vmem:[#allocation16 + $0x38] sm:$0xff] }
 0x102   :  { %5399 = vperm.xlu2 %5574, %v6342_v29   ;;  %v6631_v29 = vld [vmem:[#allocation17 + $0x40] sm:$0xff]  ;;  %1041 = vmatpush.msra.mxu3 %v962_v18  ;;  %v996_v18 = vld [vmem:[#allocation16 + $0x110] sm:$0xff] }
 0x103   :  { %617 = vmatpush.msra.mxu1 %v6631_v29  ;;  %1098 = vmatpush.msrb.mxu2 %v6712_v19  ;;  %v965_v19 = vld [vmem:[#allocation16 + $0x18] sm:$0xff] }
 0x104   :  { %5420 = vperm.xlu1 %5576, %v6400_v62   ;;  %v6723_v62 = vld [vmem:[%s7877_s8] sm:$0xf]  ;;  %1106 = vmatpush.msrb.mxu3 %v6447_v17 }
 0x105   :  { %618 = vmatpush.msra.mxu1 %v6634_v44  ;;  %1099 = vmatpush.msrb.mxu2 %v973_v31  ;;  %v519_v27 = vperm.slane %v6723_v62, 0  ;;  %v1004_v31 = vld [vmem:[#allocation16 + $0x150] sm:$0xff]  ;;  %v522_v54 = vperm.slane %v6723_v62, 3  ;;  %v931_v17 = vld [vmem:[#allocation14 + $0x108] sm:$0xff] }
 0x106   :  { %1107 = vmatpush.msrb.mxu3 %v6454_v35 }
 0x107   :  { %1100 = vmatpush.msrb.mxu2 %v969_v9 }
 0x108   :  { %1108 = vmatpush.msrb.mxu3 %v6460_v51  ;;  %v988_v51 = vld [vmem:[#allocation16 + $0xd0] sm:$0xff] }
 0x109   :  { %1101 = vmatpush.msrb.mxu2 %v965_v19 }
 0x10a   :  { %5413 = vperm.xlu2 %5574, %v6357_v36   ;;  %v6640_v36 = vld [vmem:[#allocation17 + $0x30] sm:$0xff]  ;;  %1109 = vmatpush.msrb.mxu3 %v6466_v60  ;;  %v919_v60 = vld [vmem:[#allocation14 + $0xa8] sm:$0xff] }
 0x10b   :  { %619 = vmatpush.msra.mxu1 %v6640_v36  ;;  %1166 = vmatpush.msra.mxu2 %v6449_v30  ;;  %v992_v30 = vld [vmem:[#allocation16 + $0xf0] sm:$0xff] }
 0x10d   :  { %620 = vmatpush.msra.mxu1 %v6646_v52  ;;  %1167 = vmatpush.msra.mxu2 %v6456_v42 }
 0x10f   :  { %1168 = vmatpush.msra.mxu2 %v6462_v56  ;;  %v7927_v56 = vld [vmem:[#allocation27_spill] sm:$0xff] }
 0x111   :  { %1169 = vmatpush.msra.mxu2 %v6468_v4  ;;  %v5581_v4 = vld [vmem:[%s7874_s5] ss:$0 sm:$0xff] }
 0x112   :  { %5427 = vperm.xlu2 %5574, %v6394_v57   ;;  %v6652_v57 = vld [vmem:[#allocation17 + $0x20] sm:$0xff] }
 0x113   :  { %621 = vmatpush.msra.mxu1 %v6652_v57  ;;  %1170 = vmatpush.msra.mxu2 %v7927_v56 }
 0x115   :  { %622 = vmatpush.msra.mxu1 %v6658_v63 }
 0x117   :  { %623 = vmatpush.msra.mxu1 %v6670_v49 }
 0x119   :  { %624 = vmatpush.msra.mxu1 %v6682_v61 }
 0x11b   :  { %625 = vmatpush.msra.mxu1 %v6694_v46 }
 0x11d   :  { %1066 = vmatpush.msrb.mxu1 %v6704_v10 }
 0x11f   :  { %1067 = vmatpush.msrb.mxu1 %v1020_v23  ;;  %v1008_v23 = vld [vmem:[#allocation16 + $0x170] sm:$0xff] }
 0x121   :  { %1068 = vmatpush.msrb.mxu1 %v1016_v28  ;;  %v939_v28 = vld [vmem:[#allocation14 + $0x148] sm:$0xff] }
 0x122   :  { %1131 = vmatpush.msra.mxu0 %v939_v28  ;;  %v7928_v28 = vld [vmem:[#allocation28_spill] sm:$0xff] }
 0x123   :  { %1069 = vmatpush.msrb.mxu1 %v1012_v5  ;;  %v1000_v5 = vld [vmem:[#allocation16 + $0x130] sm:$0xff]  ;;  %1171 = vmatpush.msra.mxu2 %v7928_v28 }
 0x124   :  { %1132 = vmatpush.msra.mxu0 %v935_v3  ;;  %v7929_v3 = vld [vmem:[#allocation29_spill] sm:$0xff] }
 0x125   :  { %1070 = vmatpush.msrb.mxu1 %v1008_v23  ;;  %v923_v23 = vld [vmem:[#allocation14 + $0xc8] sm:$0xff]  ;;  %1172 = vmatpush.msra.mxu2 %v7929_v3 }
 0x126   :  { %1133 = vmatpush.msra.mxu0 %v931_v17  ;;  %v911_v17 = vld [vmem:[#allocation14 + $0x68] sm:$0xff] }
 0x127   :  { %1071 = vmatpush.msrb.mxu1 %v1004_v31  ;;  %v414_v31 = vpop.f32.mrf.mxu3  ;;  %v7935_v3 = vld [vmem:[#allocation35_spill] sm:$0xff] }
 0x129   :  { %1072 = vmatpush.msrb.mxu1 %v1000_v5  ;;  %v915_v5 = vld [vmem:[#allocation14 + $0x88] sm:$0xff] }
 0x12b   :  { %1073 = vmatpush.msrb.mxu1 %v996_v18 }
 0x12d   :  { %1074 = vmatpush.msrb.mxu1 %v992_v30  ;;  %v907_v30 = vld [vmem:[#allocation14 + $0x48] sm:$0xff] }
 0x12f   :  { %1075 = vmatpush.msrb.mxu1 %v988_v51 }
 0x15d   :  { %v454_v13 = vpop.f32.mrf.mxu1 }
 0x15e   :  { %v455_v7 = vadd.f32 %v454_v13, %v374_v14  ;;  %v514_v6 = vpop.f32.mrf.mxu0  ;;  %v520_v14 = vperm.slane %v6723_v62, 1 }
 0x15f   :  { %v515_v21 = vadd.f32 %v514_v6, %v434_v22  ;;  %v927_v22 = vld [vmem:[#allocation14 + $0xe8] sm:$0xff] }
 0x160   :  { %v527_v9 = vadd.f32 %v519_v27, %v455_v7  ;;  %1134 = vmatpush.msra.mxu0 %v927_v22  ;;  %v984_v27 = vld [vmem:[#allocation16 + $0xb0] sm:$0xff]  ;;  %v7931_v22 = vld [vmem:[#allocation31_spill] sm:$0xff] }
 0x161   :  { %v530_v19 = vadd.f32 %v522_v54, %v515_v21  ;;  %v7926_v54 = vld [vmem:[#allocation26_spill] sm:$0xff]  ;;  %v980_v7 = vld [vmem:[#allocation16 + $0x90] sm:$0xff]  ;;  %1076 = vmatpush.msrb.mxu1 %v984_v27  ;;  %v899_v27 = vld [vmem:[#allocation14 + $0x8] sm:$0xff] }
 0x162   :  { %v5528_v13 = vmul.f32 -1.442695, %v527_v9  ;;  %1110 = vmatpush.msrb.mxu3 %v7926_v54  ;;  %1135 = vmatpush.msra.mxu0 %v923_v23  ;;  %v7932_v54 = vld [vmem:[#allocation32_spill] sm:$0xff] }
 0x163   :  { %v5530_v6 = vmul.f32 -1.442695, %v530_v19  ;;  %v474_v35 = vpop.f32.mrf.mxu2  ;;  %1077 = vmatpush.msrb.mxu1 %v980_v7  ;;  %v964_v23 = vld [vmem:[#allocation16 + $0x10] sm:$0xff]  ;;  %v521_v7 = vperm.slane %v6723_v62, 2 }
 0x164   :  { %5600 = vpow2.f32 %v5528_v13  ;;  %v475_v42 = vadd.f32 %v474_v35, %v394_v45  ;;  %1111 = vmatpush.msrb.mxu3 %v6478_v53  ;;  %1136 = vmatpush.msra.mxu0 %v919_v60  ;;  %v976_v53 = vld [vmem:[#allocation16 + $0x70] sm:$0xff]  ;;  %v494_v56 = vpop.f32.mrf.mxu3  ;;  %v7933_v60 = vld [vmem:[#allocation33_spill] sm:$0xff] }
 0x165   :  { %5602 = vpow2.f32 %v5530_v6  ;;  %1078 = vmatpush.msrb.mxu1 %v976_v53  ;;  %v495_v28 = vadd.f32 %v494_v56, %v414_v31 }
 0x166   :  { %v528_v26 = vadd.f32 %v520_v14, %v475_v42  ;;  %1112 = vmatpush.msrb.mxu3 %v6485_v15  ;;  %1137 = vmatpush.msra.mxu0 %v915_v5  ;;  %v7930_v14 = vld [vmem:[#allocation30_spill] sm:$0xff]  ;;  %v972_v15 = vld [vmem:[#allocation16 + $0x50] sm:$0xff] }
 0x167   :  { %1173 = vmatpush.msra.mxu2 %v7930_v14  ;;  %v968_v42 = vld [vmem:[#allocation16 + $0x30] sm:$0xff]  ;;  %1079 = vmatpush.msrb.mxu1 %v972_v15  ;;  %v7934_v5 = vld [vmem:[#allocation34_spill] sm:$0xff] }
 0x168   :  { %v5529_v45 = vmul.f32 -1.442695, %v528_v26  ;;  %1113 = vmatpush.msrb.mxu3 %v6492_v41  ;;  %1138 = vmatpush.msra.mxu0 %v911_v17  ;;  %v903_v41 = vld [vmem:[#allocation14 + $0x28] sm:$0xff]  ;;  %v6756_v26 = vpop.permute.xlu2 %713 }
 0x169   :  { %1174 = vmatpush.msra.mxu2 %v7931_v22  ;;  %1080 = vmatpush.msrb.mxu1 %v968_v42 }
 0x16a   :  { %v5601_v21 = vpop.eup %5600  ;;  %5604 = vpow2.f32 %v5529_v45  ;;  %1114 = vmatpush.msrb.mxu3 %v6499_v59  ;;  %1139 = vmatpush.msra.mxu0 %v907_v30  ;;  %v910_v45 = vld [vmem:[#allocation14 + $0x60] sm:$0xff] }
 0x16b   :  { %v5603_v9 = vpop.eup %5602  ;;  %v6745_v18 = vadd.f32 1.0, %v5601_v21  ;;  %v876_v19 = vpop.f32.mrf.mxu2  ;;  %1175 = vmatpush.msra.mxu2 %v7932_v54  ;;  %1081 = vmatpush.msrb.mxu1 %v964_v23 }
 0x16c   :  { %v877_v13 = vadd.f32 %v5581_v4, %v876_v19  ;;  %v6751_v6 = vadd.f32 1.0, %v5603_v9  ;;  %1115 = vmatpush.msrb.mxu3 %v6506_v2  ;;  %1140 = vmatpush.msra.mxu0 %v903_v41  ;;  %v529_v9 = vadd.f32 %v521_v7, %v495_v28 }
 0x16d   :  { %5606 = vrcp.f32 %v6745_v18  ;;  %1176 = vmatpush.msra.mxu2 %v7933_v60  ;;  %v546_v14 = vand.u32 2147483648, %v6745_v18  ;;  %vm540_vm5 = vweird.f32 %v6745_v18 }
 0x16e   :  { %v5531_v35 = vmul.f32 -1.442695, %v877_v13  ;;  %1116 = vmatpush.msrb.mxu3 %v6513_v0  ;;  %1141 = vmatpush.msra.mxu0 %v899_v27  ;;  %vm579_vm13 = vweird.f32 %v6751_v6 }
 0x16f   :  { %1177 = vmatpush.msra.mxu2 %v7934_v5  ;;  %v547_v42 = vor.u32 1.1754944e-38, %v546_v14  ;;  %v585_v5 = vand.u32 2147483648, %v6751_v6 }
 0x170   :  { %v5605_v51 = vpop.eup %5604  ;;  %5608 = vpow2.f32 %v5531_v35  ;;  %1117 = vmatpush.msrb.mxu3 %v6520_v1  ;;  %v6772_v13 = vpop.permute.xlu2 %734 }
 0x171   :  { %v553_v59 = vadd.f32 1.0, %v5605_v51  ;;  %5610 = vrcp.f32 %v6751_v6  ;;  %1178 = vmatpush.msra.mxu2 %v6528_v11  ;;  %v165_v51 = vld [vmem:[#allocation10] sm:$0xff] }
 0x172   :  { %1118 = vmatpush.msrb.mxu3 %v910_v45 }
 0x173   :  { %v5607_v2 = vpop.eup %5606  ;;  %5612 = vrcp.f32 %v553_v59  ;;  %1179 = vmatpush.msra.mxu2 %v6532_v16  ;;  %v544_v16 = vand.u32 2147483647, %v6745_v18  ;;  %v563_v35 = vand.u32 2147483647, %v553_v59  ;;  %vm559_vm8 = vweird.f32 %v553_v59 }
 0x174   :  { %v536_v4 = vmul.f32 %v5607_v2, %v6745_v18  ;;  %1119 = vmatpush.msrb.mxu3 %v7935_v3  ;;  %vm541_vm4 = vweird.f32 %v5607_v2  ;;  %5614 = vtanh.f32 %v529_v9  ;;  %v586_v9 = vor.u32 1.1754944e-38, %v585_v5  ;;  %v1513_v5 = vld [vmem:[#allocation13 + $0x40] sm:$0xff] }
 0x175   :  { %1180 = vmatpush.msra.mxu2 %v6539_v20  ;;  %vm542_vm6 = vmor %vm540_vm5, %vm541_vm4  ;;  %vm545_vm9 = vcmp.eq.f32.partialorder %v544_v16, 8.507059e+37  ;;  %vm564_vm11 = vcmp.eq.f32.partialorder %v563_v35, 8.507059e+37  ;;  %v1520_v16 = vld [vmem:[#allocation13 + $0x78] sm:$0xff] }
 0x176   :  { %v5609_v0 = vpop.eup %5608  ;;  %v537_v21 = vsub.f32 1.0, %v536_v4  ;;  %1120 = vmatpush.msrb.mxu3 %v6536_v8  ;;  %v565_v8 = vand.u32 2147483648, %v553_v59  ;;  %v6785_v4 = vpop.permute.xlu1 %727 }
 0x177   :  { %v5611_v53 = vpop.eup %5610  ;;  %v6768_v17 = vadd.f32 1.0, %v5609_v0  ;;  %1181 = vmatpush.msra.mxu2 %v6549_v24  ;;  %v583_v0 = vand.u32 2147483647, %v6751_v6 }
 0x178   :  { %v538_v19 = vmul.f32 %v5607_v2, %v537_v21  ;;  %v575_v11 = vmul.f32 %v5611_v53, %v6751_v6  ;;  %1121 = vmatpush.msrb.mxu3 %v6546_v34  ;;  %v566_v41 = vor.u32 1.1754944e-38, %v565_v8  ;;  %vm580_vm12 = vweird.f32 %v5611_v53  ;;  %v956_v6 = vld [vmem:[#allocation14 + $0x1d0] sm:$0xff] }
 0x179   :  { %v5613_v1 = vpop.eup %5612  ;;  %5616 = vrcp.f32 %v6768_v17  ;;  %vm581_vm14 = vmor %vm579_vm13, %vm580_vm12  ;;  %vm584_vm15 = vcmp.eq.f32.partialorder %v583_v0, 8.507059e+37  ;;  %v1519_v8 = vld [vmem:[#allocation13 + $0x70] sm:$0xff]  ;;  %vm888_vm1 = vweird.f32 %v6768_v17 }
 0x17a   :  { %v555_v62 = vmul.f32 %v5613_v1, %v553_v59  ;;  %v539_v31 = vadd.f32 %v5607_v2, %v538_v19  ;;  %vm560_vm7 = vweird.f32 %v5613_v1  ;;  %v576_v22 = vsub.f32 1.0, %v575_v11  ;;  %v5615_v54 = vpop.eup %5614  ;;  %v928_v0 = vld [vmem:[#allocation14 + $0xf0] sm:$0xff] }
 0x17b   :  { %vm561_vm10 = vmor %vm559_vm8, %vm560_vm7 }
 0x17c   :  { %v556_v15 = vsub.f32 1.0, %v555_v62  ;;  %v543_v30 = vsel %vm542_vm6, %v5607_v2, %v539_v31  ;;  %v577_v56 = vmul.f32 %v5611_v53, %v576_v22  ;;  %v6783_v2 = vpop.permute.xlu2 %741  ;;  %v952_v22 = vld [vmem:[#allocation14 + $0x1b0] sm:$0xff] }
 0x17d   :  { %v548_v18 = vsel %vm545_vm9, %v547_v42, %v543_v30  ;;  %v5884_v30 = vld [vmem:[#allocation11] sm:$0xff]  ;;  %v1518_v42 = vld [vmem:[#allocation13 + $0x68] sm:$0xff] }
 0x17e   :  { %v557_v20 = vmul.f32 %v5613_v1, %v556_v15  ;;  %v590_v45 = vmul.f32 %v5615_v54, %v548_v18  ;;  %v578_v7 = vadd.f32 %v5611_v53, %v577_v56  ;;  %v6798_v14 = vpop.permute.xlu1 %748  ;;  %v960_v15 = vld [vmem:[#allocation14 + $0x1f0] sm:$0xff]  ;;  %v715_v35 = vperm.slane %v5884_v30, 1  ;;  %v1517_v18 = vld [vmem:[#allocation13 + $0x60] sm:$0xff] }
 0x17f   :  { %v6781_v24 = vpop.eup %5616 }
 0x180   :  { %v558_v34 = vadd.f32 %v5613_v1, %v557_v20  ;;  %v884_v28 = vmul.f32 %v6781_v24, %v6768_v17  ;;  %v582_v3 = vsel %vm581_vm14, %v5611_v53, %v578_v7  ;;  %vm889_vm0 = vweird.f32 %v6781_v24  ;;  %720 = vperm.xlu0 %5575, %v715_v35   ;;  %v932_v7 = vld [vmem:[#allocation14 + $0x110] sm:$0xff] }
 0x181   :  { %v894_v20 = vand.u32 2147483648, %v6768_v17  ;;  %vm6806_vm2 = vmor %vm888_vm1, %vm889_vm0 }
 0x182   :  { %v562_v23 = vsel %vm561_vm10, %v5613_v1, %v558_v34  ;;  %v885_v21 = vsub.f32 1.0, %v884_v28  ;;  %v587_v1 = vsel %vm584_vm15, %v586_v9, %v582_v3  ;;  %v892_v34 = vand.u32 2147483647, %v6768_v17  ;;  %v1514_v28 = vld [vmem:[#allocation13 + $0x48] sm:$0xff]  ;;  %v924_v3 = vld [vmem:[#allocation14 + $0xd0] sm:$0xff] }
 0x183   :  { %v567_v27 = vsel %vm564_vm11, %v566_v41, %v562_v23  ;;  %v895_v17 = vor.u32 1.1754944e-38, %v894_v20  ;;  %v1505_v20 = vld [vmem:[#allocation13] sm:$0xff]  ;;  %v1685_v41 = vld [vmem:[#allocation16 + $0x1c8] sm:$0xff] }
 0x184   :  { %v589_v60 = vmul.f32 %v567_v27, %v165_v51  ;;  %v886_v62 = vmul.f32 %v6781_v24, %v885_v21  ;;  %v6796_v31 = vpop.permute.xlu2 %755  ;;  %v948_v51 = vld [vmem:[#allocation14 + $0x190] sm:$0xff]  ;;  %vm893_vm3 = vcmp.eq.f32.partialorder %v892_v34, 8.507059e+37  ;;  %v1516_v27 = vld [vmem:[#allocation13 + $0x58] sm:$0xff] }
 0x185   :  { %v1512_v21 = vld [vmem:[#allocation13 + $0x38] sm:$0xff] }
 0x186   :  { %v6787_v59 = vadd.f32 %v590_v45, %v589_v60  ;;  %v887_v53 = vadd.f32 %v6781_v24, %v886_v62  ;;  %v6819_v60 = vpop.permute.xlu1 %762  ;;  %v1515_v45 = vld [vmem:[#allocation13 + $0x50] sm:$0xff] }
 0x187   :  { %v916_v62 = vld [vmem:[#allocation14 + $0x90] sm:$0xff] }
 0x188   :  { %5618 = vtanh.f32 %v6787_v59  ;;  %v891_v54 = vsel %vm6806_vm2, %v6781_v24, %v887_v53  ;;  %v6822_v24 = vperm.slane %v5884_v30, 2  ;;  %v900_v53 = vld [vmem:[#allocation14 + $0x10] sm:$0xff] }
 0x189   :  { %v6817_v56 = vsel %vm893_vm3, %v895_v17, %v891_v54 }
 0x18a   :  { %1396 = vperm.xlu0 %5575, %v6822_v24  }
 0x18c   :  { %v6815_v23 = vpop.permute.xlu2 %1389 }
 0x18e   :  { %v5619_v19 = vpop.eup %5618 }
 0x18f   :  { %v593_v11 = vmul.f32 %v5619_v19, %v587_v1  ;;  %v6833_v19 = vpop.permute.xlu1 %1382  ;;  %v920_v1 = vld [vmem:[#allocation14 + $0xb0] sm:$0xff] }
 0x191   :  { %626 = vmatmul.f32.vlgmr.msra.gmra.mxu1 %v593_v11  ;;  %1042 = vmatmul.f32.vlgmr.msra.gmra.mxu3 %v593_v11 }
 0x192   :  { %1062 = vmatmul.f32.vlgmr.msrb.gmra.mxu0 %v593_v11  ;;  %1102 = vmatmul.f32.vlgmr.msrb.gmra.mxu2 %v593_v11 }
 0x193   :  { %1146 = vmatpush.msra.mxu1 %v960_v15  ;;  %1525 = vmatpush.msrb.mxu0 %v1520_v16  ;;  %v908_v15 = vld [vmem:[#allocation14 + $0x50] sm:$0xff] }
 0x194   :  { %1279 = vmatpush.msra.mxu3 %v6602_v32  ;;  %v944_v32 = vld [vmem:[#allocation14 + $0x170] sm:$0xff]  ;;  %v6830_v9 = vpop.permute.xlu2 %1410  ;;  %2062 = vperm.xlu0 %5575, %v6822_v24  }
 0x195   :  { %1147 = vmatpush.msra.mxu1 %v956_v6  ;;  %1526 = vmatpush.msrb.mxu0 %v1519_v8  ;;  %v1507_v16 = vld [vmem:[#allocation13 + $0x10] sm:$0xff]  ;;  %v1506_v8 = vld [vmem:[#allocation13 + $0x8] sm:$0xff] }
 0x196   :  { %1280 = vmatpush.msra.mxu3 %v6609_v33  ;;  %v940_v33 = vld [vmem:[#allocation14 + $0x150] sm:$0xff] }
 0x197   :  { %1148 = vmatpush.msra.mxu1 %v952_v22  ;;  %1527 = vmatpush.msrb.mxu0 %v1518_v42 }
 0x198   :  { %1281 = vmatpush.msra.mxu3 %v6611_v37  ;;  %v936_v37 = vld [vmem:[#allocation14 + $0x130] sm:$0xff] }
 0x199   :  { %1149 = vmatpush.msra.mxu1 %v948_v51  ;;  %1528 = vmatpush.msrb.mxu0 %v1517_v18  ;;  %v1681_v51 = vld [vmem:[#allocation16 + $0x1a8] sm:$0xff] }
 0x19a   :  { %1082 = vmatmul.f32.vlgmr.msrb.gmra.mxu1 %v593_v11  ;;  %1122 = vmatmul.f32.vlgmr.msrb.gmra.mxu3 %v6817_v56  ;;  %v912_v11 = vld [vmem:[#allocation14 + $0x70] sm:$0xff]  ;;  %v1677_v18 = vld [vmem:[#allocation16 + $0x188] sm:$0xff] }
 0x19b   :  { %1142 = vmatmul.f32.vlgmr.msra.gmra.mxu0 %v6817_v56  ;;  %1150 = vmatpush.msra.mxu1 %v944_v32  ;;  %v1688_v32 = vld [vmem:[#allocation16 + $0x1e0] sm:$0xff] }
 0x19c   :  { %1182 = vmatmul.f32.vlgmr.msra.gmra.mxu2 %v6817_v56  ;;  %1529 = vmatpush.msrb.mxu0 %v1516_v27  ;;  %v6840_v6 = vpop.permute.xlu2 %1424  ;;  %v1691_v27 = vld [vmem:[#allocation16 + $0x1f8] sm:$0xff] }
 0x19d   :  { %1151 = vmatpush.msra.mxu1 %v940_v33  ;;  %1282 = vmatpush.msra.mxu3 %v6614_v39  ;;  %v1511_v39 = vld [vmem:[#allocation13 + $0x30] sm:$0xff]  ;;  %v1684_v33 = vld [vmem:[#allocation16 + $0x1c0] sm:$0xff] }
 0x19e   :  { %1530 = vmatpush.msrb.mxu0 %v1515_v45  ;;  %2728 = vperm.xlu0 %5575, %v6822_v24   ;;  %v1687_v45 = vld [vmem:[#allocation16 + $0x1d8] sm:$0xff] }
 0x19f   :  { %1152 = vmatpush.msra.mxu1 %v936_v37  ;;  %1283 = vmatpush.msra.mxu3 %v6620_v40  ;;  %v1510_v40 = vld [vmem:[#allocation13 + $0x28] sm:$0xff]  ;;  %v1680_v37 = vld [vmem:[#allocation16 + $0x1a0] sm:$0xff] }
 0x1a0   :  { %1531 = vmatpush.msrb.mxu0 %v1514_v28  ;;  %v1665_v28 = vld [vmem:[#allocation16 + $0x128] sm:$0xff] }
 0x1a1   :  { %1153 = vmatpush.msra.mxu1 %v932_v7  ;;  %1284 = vmatpush.msra.mxu3 %v6625_v12  ;;  %v1509_v12 = vld [vmem:[#allocation13 + $0x20] sm:$0xff]  ;;  %v1683_v7 = vld [vmem:[#allocation16 + $0x1b8] sm:$0xff] }
 0x1a2   :  { %1532 = vmatpush.msrb.mxu0 %v1513_v5  ;;  %v1676_v5 = vld [vmem:[#allocation16 + $0x180] sm:$0xff] }
 0x1a3   :  { %1154 = vmatpush.msra.mxu1 %v928_v0  ;;  %1285 = vmatpush.msra.mxu3 %v6628_v43  ;;  %v1508_v43 = vld [vmem:[#allocation13 + $0x18] sm:$0xff]  ;;  %v1661_v0 = vld [vmem:[#allocation16 + $0x108] sm:$0xff] }
 0x1a4   :  { %1533 = vmatpush.msrb.mxu0 %v1512_v21  ;;  %v1679_v21 = vld [vmem:[#allocation16 + $0x198] sm:$0xff] }
 0x1a5   :  { %1155 = vmatpush.msra.mxu1 %v924_v3  ;;  %1286 = vmatpush.msra.mxu3 %v6631_v29  ;;  %v904_v29 = vld [vmem:[#allocation14 + $0x30] sm:$0xff] }
 0x1a6   :  { %1534 = vmatpush.msrb.mxu0 %v1511_v39  ;;  %3394 = vperm.xlu0 %5575, %v6822_v24  }
 0x1a7   :  { %1156 = vmatpush.msra.mxu1 %v920_v1  ;;  %1287 = vmatpush.msra.mxu3 %v6634_v44  ;;  %v6843_v44 = vpop.permute.xlu1 %1403  ;;  %v1672_v1 = vld [vmem:[#allocation16 + $0x160] sm:$0xff] }
 0x1a8   :  { %1535 = vmatpush.msrb.mxu0 %v1510_v40  ;;  %v1675_v40 = vld [vmem:[#allocation16 + $0x178] sm:$0xff] }
 0x1a9   :  { %1157 = vmatpush.msra.mxu1 %v916_v62  ;;  %1288 = vmatpush.msra.mxu3 %v6640_v36  ;;  %v1689_v36 = vld [vmem:[#allocation16 + $0x1e8] sm:$0xff]  ;;  %v1668_v62 = vld [vmem:[#allocation16 + $0x140] sm:$0xff] }
 0x1aa   :  { %1536 = vmatpush.msrb.mxu0 %v1509_v12  ;;  %1712 = vmatpush.msrb.mxu2 %v1689_v36  ;;  %v1671_v12 = vld [vmem:[#allocation16 + $0x158] sm:$0xff] }
 0x1ab   :  { %1158 = vmatpush.msra.mxu1 %v912_v11  ;;  %1289 = vmatpush.msra.mxu3 %v6646_v52  ;;  %v6852_v52 = vpop.permute.xlu2 %2055  ;;  %v1664_v11 = vld [vmem:[#allocation16 + $0x120] sm:$0xff]  ;;  %v7943_v36 = vld [vmem:[#allocation41_spill] sm:$0xff] }
 0x1ac   :  { %1537 = vmatpush.msrb.mxu0 %v1508_v43  ;;  %1713 = vmatpush.msrb.mxu2 %v1685_v41  ;;  %v1667_v43 = vld [vmem:[#allocation16 + $0x138] sm:$0xff]  ;;  %v630_v41 = vld [vmem:[#allocation5] sm:$0xff] }
 0x1ad   :  { %1159 = vmatpush.msra.mxu1 %v908_v15  ;;  %1290 = vmatpush.msra.mxu3 %v6652_v57  ;;  %v1660_v15 = vld [vmem:[#allocation16 + $0x100] sm:$0xff] }
 0x1ae   :  { %1538 = vmatpush.msrb.mxu0 %v1507_v16  ;;  %4060 = vperm.xlu0 %5575, %v6822_v24   ;;  %v1663_v16 = vld [vmem:[#allocation16 + $0x118] sm:$0xff] }
 0x1af   :  { %1160 = vmatpush.msra.mxu1 %v904_v29  ;;  %1291 = vmatpush.msra.mxu3 %v6658_v63  ;;  %v6855_v57 = vpop.permute.xlu1 %1417  ;;  %v7939_v29 = vld [vmem:[#allocation36_spill] sm:$0xff] }
 0x1b0   :  { %1539 = vmatpush.msrb.mxu0 %v1506_v8  ;;  %1714 = vmatpush.msrb.mxu2 %v1681_v51  ;;  %v7940_v8 = vld [vmem:[#allocation38_spill] sm:$0xff] }
 0x1b1   :  { %1161 = vmatpush.msra.mxu1 %v900_v53  ;;  %1292 = vmatpush.msra.mxu3 %v6670_v49  ;;  %v7942_v53 = vld [vmem:[#allocation39_spill] sm:$0xff] }
 0x1b2   :  { %1540 = vmatpush.msrb.mxu0 %v1505_v20  ;;  %1162 = vmatmul.f32.vlgmr.msra.gmra.mxu1 %v6817_v56  ;;  %v7944_v20 = vld [vmem:[#allocation43_spill] sm:$0xff] }
 0x1b3   :  { %1541 = vmatmul.f32.vlgmr.msrb.gmra.mxu0 %v6817_v56  ;;  %1293 = vmatpush.msra.mxu3 %v6682_v61  ;;  %v6859_v63 = vpop.permute.xlu2 %2076  ;;  %v1673_v56 = vld [vmem:[#allocation16 + $0x168] sm:$0xff] }
 0x1b4   :  { %1715 = vmatpush.msrb.mxu2 %v1677_v18  ;;  %1692 = vmatpush.msrb.mxu1 %v1688_v32 }
 0x1b5   :  { %1294 = vmatpush.msra.mxu3 %v6694_v46  ;;  %1752 = vmatpush.msra.mxu0 %v1691_v27 }
 0x1b6   :  { %4726 = vperm.xlu0 %5575, %v6822_v24   ;;  %1716 = vmatpush.msrb.mxu2 %v1673_v56 }
 0x1b7   :  { %1732 = vmatpush.msrb.mxu3 %v6704_v10  ;;  %v6861_v30 = vpop.permute.xlu1 %1431  ;;  %1693 = vmatpush.msrb.mxu1 %v1684_v33  ;;  %v7947_v33 = vld [vmem:[#allocation45_spill] sm:$0xff] }
 0x1b8   :  { %1753 = vmatpush.msra.mxu0 %v1687_v45  ;;  %v632_v45 = vld [vmem:[#allocation5 + $0x10] sm:$0xff] }
 0x1b9   :  { %1694 = vmatpush.msrb.mxu1 %v1680_v37 }
 0x1ba   :  { %1754 = vmatpush.msra.mxu0 %v1683_v7  ;;  %v7948_v7 = vld [vmem:[#allocation46_spill] sm:$0xff] }
 0x1bb   :  { %v6864_v49 = vpop.permute.xlu2 %2090  ;;  %1695 = vmatpush.msrb.mxu1 %v1676_v5  ;;  %v7949_v5 = vld [vmem:[#allocation47_spill] sm:$0xff] }
 0x1bc   :  { %1755 = vmatpush.msra.mxu0 %v1679_v21 }
 0x1bd   :  { %1696 = vmatpush.msrb.mxu1 %v1672_v1 }
 0x1be   :  { %5392 = vperm.xlu0 %5575, %v6822_v24   ;;  %v1669_v24 = vld [vmem:[#allocation16 + $0x148] sm:$0xff]  ;;  %1756 = vmatpush.msra.mxu0 %v1675_v40 }
 0x1bf   :  { %v6866_v61 = vpop.permute.xlu1 %2048  ;;  %1717 = vmatpush.msrb.mxu2 %v1669_v24  ;;  %1697 = vmatpush.msrb.mxu1 %v1668_v62  ;;  %v634_v24 = vld [vmem:[#allocation5 + $0x20] sm:$0xff]  ;;  %v631_v62 = vld [vmem:[#allocation5 + $0x8] sm:$0xff] }
 0x1c0   :  { %1757 = vmatpush.msra.mxu0 %v1671_v12 }
 0x1c1   :  { %1718 = vmatpush.msrb.mxu2 %v1665_v28  ;;  %1698 = vmatpush.msrb.mxu1 %v1664_v11  ;;  %v1686_v11 = vld [vmem:[#allocation16 + $0x1d0] sm:$0xff] }
 0x1c2   :  { %1758 = vmatpush.msra.mxu0 %v1667_v43  ;;  %1733 = vmatpush.msrb.mxu3 %v1686_v11  ;;  %v1674_v11 = vld [vmem:[#allocation16 + $0x170] sm:$0xff] }
 0x1c3   :  { %v6869_v35 = vpop.permute.xlu2 %2721  ;;  %1719 = vmatpush.msrb.mxu2 %v1661_v0  ;;  %1699 = vmatpush.msrb.mxu1 %v1660_v15  ;;  %v1621_v15 = vld [vmem:[#allocation14 + $0x1c8] sm:$0xff] }
 0x1c4   :  { %1759 = vmatpush.msra.mxu0 %v1663_v16  ;;  %v1636_v16 = vld [vmem:[#allocation16 + $0x40] sm:$0xff] }
 0x1c5   :  { %1720 = vmatpush.msrb.mxu2 %v6636_v47  ;;  %1700 = vmatpush.msrb.mxu1 %v6660_v25  ;;  %v7945_v25 = vld [vmem:[#allocation42_spill] sm:$0xff] }
 0x1c6   :  { %1760 = vmatpush.msra.mxu0 %v6666_v48  ;;  %v7946_v48 = vld [vmem:[#allocation44_spill] sm:$0xff] }
 0x1c7   :  { %v6871_v46 = vpop.permute.xlu1 %2069  ;;  %1721 = vmatpush.msrb.mxu2 %v6642_v50  ;;  %1701 = vmatpush.msrb.mxu1 %v7939_v29 }
 0x1c8   :  { %1761 = vmatpush.msra.mxu0 %v7940_v8 }
 0x1c9   :  { %1722 = vmatpush.msrb.mxu2 %v6648_v55  ;;  %v7938_v55 = vld [vmem:[#allocation37_spill] sm:$0xff]  ;;  %1702 = vmatpush.msrb.mxu1 %v7942_v53 }
 0x1ca   :  { %1762 = vmatpush.msra.mxu0 %v7943_v36 }
 0x1cb   :  { %v6873_v22 = vpop.permute.xlu2 %2742  ;;  %1723 = vmatpush.msrb.mxu2 %v6654_v58  ;;  %v7941_v58 = vld [vmem:[#allocation40_spill] sm:$0xff]  ;;  %1703 = vmatpush.msrb.mxu1 %v7945_v25 }
 0x1cc   :  { %1763 = vmatpush.msra.mxu0 %v7946_v48  ;;  %v1682_v25 = vld [vmem:[#allocation16 + $0x1b0] sm:$0xff]  ;;  %v1617_v48 = vld [vmem:[#allocation14 + $0x1a8] sm:$0xff] }
 0x1cd   :  { %1724 = vmatpush.msrb.mxu2 %v6664_v38  ;;  %1704 = vmatpush.msrb.mxu1 %v7948_v7 }
 0x1ce   :  { %1764 = vmatpush.msra.mxu0 %v7949_v5  ;;  %1734 = vmatpush.msrb.mxu3 %v1682_v25 }
 0x1cf   :  { %v6875_v10 = vpop.permute.xlu1 %2083  ;;  %1725 = vmatpush.msrb.mxu2 %v7938_v55  ;;  %v1639_v55 = vld [vmem:[#allocation16 + $0x58] sm:$0xff]  ;;  %1705 = vmatpush.msrb.mxu1 %v1636_v16  ;;  %v1609_v16 = vld [vmem:[#allocation14 + $0x168] sm:$0xff] }
 0x1d0   :  { %1765 = vmatpush.msra.mxu0 %v1639_v55 }
 0x1d1   :  { %1726 = vmatpush.msrb.mxu2 %v7941_v58  ;;  %v635_v58 = vld [vmem:[#allocation5 + $0x28] sm:$0xff] }
 0x1d3   :  { %v6877_v42 = vpop.permute.xlu2 %2756  ;;  %1727 = vmatpush.msrb.mxu2 %v7944_v20  ;;  %v6931_v20 = vld [vmem:[%s7877_s8] sm:$0xf] }
 0x1d4   :  { %v1189_v7 = vperm.slane %v6931_v20, 1 }
 0x1d5   :  { %1792 = vmatpush.msra.mxu2 %v7947_v33  ;;  %v1632_v33 = vld [vmem:[#allocation16 + $0x20] sm:$0xff] }
 0x1d6   :  { %1706 = vmatpush.msrb.mxu1 %v1632_v33 }
 0x1d7   :  { %v6879_v34 = vpop.permute.xlu1 %2097  ;;  %1793 = vmatpush.msra.mxu2 %v1621_v15  ;;  %v1624_v15 = vld [vmem:[#allocation14 + $0x1e0] sm:$0xff] }
 0x1d9   :  { %1794 = vmatpush.msra.mxu2 %v1617_v48  ;;  %v1605_v48 = vld [vmem:[#allocation14 + $0x148] sm:$0xff] }
 0x1db   :  { %v6881_v54 = vpop.permute.xlu2 %3387 }
 0x1df   :  { %v6883_v17 = vpop.permute.xlu1 %2714 }
 0x1e3   :  { %v6885_v3 = vpop.permute.xlu2 %3401 }
 0x1e7   :  { %v6887_v39 = vpop.permute.xlu1 %2735 }
 0x1eb   :  { %v6893_v47 = vpop.permute.xlu2 %3415 }
 0x1ef   :  { %v6896_v50 = vpop.permute.xlu1 %2749 }
 0x1f3   :  { %v6922_v0 = vpop.permute.xlu2 %3429 }
 0x1f4   :  { %7950 = vst [vmem:[#allocation26_spill] sm:$0xff] %v6922_v0  ;;  %v2297_v0 = vld [vmem:[#allocation16 + $0x18] sm:$0xff] }
 0x1f7   :  { %v6924_v43 = vpop.permute.xlu1 %2763 }
 0x1fb   :  { %v6945_v33 = vpop.permute.xlu2 %4046 }
 0x1fc   :  { %7951 = vst [vmem:[#allocation27_spill] sm:$0xff] %v6945_v33 }
 0x20e   :  { %v6907_v38 = vpop.f32.mrf.mxu1 }
 0x20f   :  { %v6911_v51 = vpop.f32.mrf.mxu0  ;;  %v646_v18 = vperm.slane %v6907_v38, 0  ;;  %v642_v32 = vrot.slane %v6907_v38, 4  ;;  %v640_v56 = vrot.slane %v6907_v38, 2  ;;  %v639_v27 = vrot.slane %v6907_v38, 1 }
 0x210   :  { %v643_v37 = vrot.slane %v6907_v38, 5  ;;  %v641_v28 = vrot.slane %v6907_v38, 3 }
 0x211   :  { %v662_v21 = vadd.f32 %v646_v18, %v630_v41  ;;  %v650_v1 = vperm.slane %v642_v32, 0  ;;  %v648_v40 = vperm.slane %v640_v56, 0  ;;  %v647_v12 = vperm.slane %v639_v27, 0  ;;  %v633_v56 = vld [vmem:[#allocation5 + $0x18] sm:$0xff] }
 0x212   :  { %v651_v53 = vperm.slane %v643_v37, 0  ;;  %v649_v41 = vperm.slane %v641_v28, 0  ;;  %v644_v27 = vrot.slane %v6907_v38, 6  ;;  %v1678_v37 = vld [vmem:[#allocation16 + $0x190] sm:$0xff]  ;;  %v1613_v28 = vld [vmem:[#allocation14 + $0x188] sm:$0xff] }
 0x213   :  { %5620 = vtanh.f32 %v662_v21  ;;  %v666_v29 = vadd.f32 %v650_v1, %v634_v24  ;;  %v664_v8 = vadd.f32 %v648_v40, %v632_v45  ;;  %v663_v32 = vadd.f32 %v647_v12, %v631_v62  ;;  %v1635_v24 = vld [vmem:[#allocation16 + $0x38] sm:$0xff]  ;;  %v6939_v45 = vld [vmem:[%s7879_s10] ss:$0 sm:$0xff]  ;;  %1735 = vmatpush.msrb.mxu3 %v1678_v37  ;;  %1795 = vmatpush.msra.mxu2 %v1613_v28  ;;  %v1628_v1 = vld [vmem:[#allocation16] sm:$0xff]  ;;  %v6947_v28 = vpop.permute.xlu1 %3380 }
 0x214   :  { %v6926_v36 = vpop.f32.mrf.mxu3  ;;  %1766 = vmatpush.msra.mxu0 %v1635_v24  ;;  %v667_v5 = vadd.f32 %v651_v53, %v635_v58  ;;  %v645_v21 = vrot.slane %v6907_v38, 7  ;;  %v1631_v40 = vld [vmem:[#allocation16 + $0x18] sm:$0xff]  ;;  %v665_v12 = vadd.f32 %v649_v41, %v633_v56  ;;  %1707 = vmatpush.msrb.mxu1 %v1628_v1  ;;  %v652_v25 = vperm.slane %v644_v27, 0  ;;  %v1670_v53 = vld [vmem:[#allocation16 + $0x150] sm:$0xff]  ;;  %v1620_v41 = vld [vmem:[#allocation14 + $0x1c0] sm:$0xff] }
 0x215   :  { %v6933_v18 = vpop.f32.mrf.mxu2  ;;  %5622 = vtanh.f32 %v666_v29  ;;  %1736 = vmatpush.msrb.mxu3 %v1674_v11  ;;  %v1627_v38 = vld [vmem:[#allocation14 + $0x1f8] sm:$0xff]  ;;  %1796 = vmatpush.msra.mxu2 %v1609_v16  ;;  %v637_v37 = vld [vmem:[#allocation5 + $0x38] sm:$0xff]  ;;  %v1188_v1 = vperm.slane %v6931_v20, 0 }
 0x216   :  { %5624 = vtanh.f32 %v664_v8  ;;  %1767 = vmatpush.msra.mxu0 %v1631_v40  ;;  %v636_v8 = vld [vmem:[#allocation5 + $0x30] sm:$0xff]  ;;  %1772 = vmatpush.msra.mxu1 %v1624_v15  ;;  %v1616_v11 = vld [vmem:[#allocation14 + $0x1a0] sm:$0xff]  ;;  %v1601_v15 = vld [vmem:[#allocation14 + $0x128] sm:$0xff] }
 0x217   :  { %5626 = vtanh.f32 %v663_v32  ;;  %1737 = vmatpush.msrb.mxu3 %v1670_v53  ;;  %v1623_v32 = vld [vmem:[#allocation14 + $0x1d8] sm:$0xff]  ;;  %1797 = vmatpush.msra.mxu2 %v1605_v48  ;;  %v668_v16 = vadd.f32 %v652_v25, %v636_v8  ;;  %v1597_v53 = vld [vmem:[#allocation14 + $0x108] sm:$0xff] }
 0x218   :  { %v1143_v62 = vpop.f32.mrf.mxu0  ;;  %1832 = vmatpush.msrb.mxu0 %v1627_v38  ;;  %5628 = vtanh.f32 %v667_v5  ;;  %1773 = vmatpush.msra.mxu1 %v1620_v41  ;;  %v1191_v38 = vperm.slane %v6931_v20, 3 }
 0x219   :  { %v5621_v55 = vpop.eup %5620  ;;  %v1144_v29 = vadd.f32 %v1143_v62, %v6911_v51  ;;  %v653_v51 = vperm.slane %v645_v21, 0  ;;  %5630 = vtanh.f32 %v665_v12  ;;  %v1666_v62 = vld [vmem:[#allocation16 + $0x130] sm:$0xff]  ;;  %v1612_v12 = vld [vmem:[#allocation14 + $0x180] sm:$0xff]  ;;  %1798 = vmatpush.msra.mxu2 %v1601_v15 }
 0x21a   :  { %v682_v58 = vmul.f32 %v5621_v55, %v6939_v45  ;;  %1833 = vmatpush.msrb.mxu0 %v1623_v32  ;;  %1738 = vmatpush.msrb.mxu3 %v1666_v62  ;;  %v1619_v55 = vld [vmem:[#allocation14 + $0x1b8] sm:$0xff]  ;;  %v1608_v32 = vld [vmem:[#allocation14 + $0x160] sm:$0xff] }
 0x21b   :  { %v5623_v56 = vpop.eup %5622  ;;  %v1197_v24 = vadd.f32 %v1189_v7, %v1144_v29  ;;  %1774 = vmatpush.msra.mxu1 %v1616_v11  ;;  %1799 = vmatpush.msra.mxu2 %v1597_v53  ;;  %v1611_v62 = vld [vmem:[#allocation14 + $0x178] sm:$0xff]  ;;  %v6960_v53 = vpop.permute.xlu1 %3408 }
 0x21c   :  { %v5625_v27 = vpop.eup %5624  ;;  %690 = vadd.xlane.f32.xlu0 %v682_v58  ;;  %v686_v40 = vmul.f32 %v5623_v56, %v6939_v45  ;;  %v1662_v58 = vld [vmem:[#allocation16 + $0x110] sm:$0xff]  ;;  %v669_v56 = vadd.f32 %v653_v51, %v637_v37  ;;  %1834 = vmatpush.msrb.mxu0 %v1619_v55 }
 0x21d   :  { %v5533_v7 = vmul.f32 -1.442695, %v1197_v24  ;;  %v1123_v5 = vpop.f32.mrf.mxu3  ;;  %v684_v21 = vmul.f32 %v5625_v27, %v6939_v45  ;;  %v5627_v41 = vpop.eup %5626  ;;  %v1615_v24 = vld [vmem:[#allocation14 + $0x198] sm:$0xff]  ;;  %1739 = vmatpush.msrb.mxu3 %v1662_v58  ;;  %v1593_v27 = vld [vmem:[#allocation14 + $0xe8] sm:$0xff]  ;;  %1775 = vmatpush.msra.mxu1 %v1612_v12  ;;  %v1654_v51 = vld [vmem:[#allocation16 + $0xd0] sm:$0xff] }
 0x21e   :  { %v1124_v29 = vadd.f32 %v1123_v5, %v6926_v36  ;;  %698 = vadd.xlane.f32.xlu2 %v686_v40  ;;  %v1658_v36 = vld [vmem:[#allocation16 + $0xf0] sm:$0xff]  ;;  %v5629_v40 = vpop.eup %5628  ;;  %v683_v37 = vmul.f32 %v5627_v41, %v6939_v45  ;;  %1835 = vmatpush.msrb.mxu0 %v1615_v24  ;;  %v1600_v12 = vld [vmem:[#allocation14 + $0x120] sm:$0xff] }
 0x21f   :  { %5632 = vpow2.f32 %v5533_v7  ;;  %v1183_v48 = vpop.f32.mrf.mxu2  ;;  %694 = vadd.xlane.f32.xlu1 %v684_v21  ;;  %v5631_v11 = vpop.eup %5630  ;;  %1740 = vmatpush.msrb.mxu3 %v1658_v36  ;;  %v687_v21 = vmul.f32 %v5629_v40, %v6939_v45  ;;  %v1650_v58 = vld [vmem:[#allocation16 + $0xb0] sm:$0xff]  ;;  %v1596_v36 = vld [vmem:[#allocation14 + $0x100] sm:$0xff] }
 0x220   :  { %v1196_v8 = vadd.f32 %v1188_v1, %v1124_v29  ;;  %v1184_v25 = vadd.f32 %v1183_v48, %v6933_v18  ;;  %5634 = vtanh.f32 %v668_v16  ;;  %v1604_v1 = vld [vmem:[#allocation14 + $0x140] sm:$0xff]  ;;  %1776 = vmatpush.msra.mxu1 %v1608_v32  ;;  %1800 = vmatpush.msra.mxu2 %v1593_v27  ;;  %v1589_v18 = vld [vmem:[#allocation14 + $0xc8] sm:$0xff]  ;;  %v1607_v16 = vld [vmem:[#allocation14 + $0x158] sm:$0xff]  ;;  %v6957_v29 = vpop.permute.xlu2 %4067 }
 0x221   :  { %5636 = vtanh.f32 %v669_v56  ;;  %1836 = vmatpush.msrb.mxu0 %v1611_v62  ;;  %7952 = vst [vmem:[#allocation28_spill] sm:$0xff] %v6957_v29  ;;  %1741 = vmatpush.msrb.mxu3 %v1654_v51  ;;  %v1585_v48 = vld [vmem:[#allocation14 + $0xa8] sm:$0xff]  ;;  %v1603_v56 = vld [vmem:[#allocation14 + $0x138] sm:$0xff]  ;;  %v1642_v62 = vld [vmem:[#allocation16 + $0x70] sm:$0xff] }
 0x222   :  { %v5532_v7 = vmul.f32 -1.442695, %v1196_v8  ;;  %v1199_v5 = vadd.f32 %v1191_v38, %v1184_v25  ;;  %v685_v38 = vmul.f32 %v5631_v11, %v6939_v45  ;;  %1777 = vmatpush.msra.mxu1 %v1604_v1  ;;  %1801 = vmatpush.msra.mxu2 %v1589_v18  ;;  %v1083_v8 = vpop.f32.mrf.mxu1  ;;  %v1646_v25 = vld [vmem:[#allocation16 + $0x90] sm:$0xff]  ;;  %v1581_v32 = vld [vmem:[#allocation14 + $0x88] sm:$0xff]  ;;  %v1599_v27 = vld [vmem:[#allocation14 + $0x118] sm:$0xff] }
 0x223   :  { %1837 = vmatpush.msrb.mxu0 %v1607_v16  ;;  %1742 = vmatpush.msrb.mxu3 %v1650_v58  ;;  %v1595_v1 = vld [vmem:[#allocation14 + $0xf8] sm:$0xff]  ;;  %v1638_v18 = vld [vmem:[#allocation16 + $0x50] sm:$0xff]  ;;  %v1573_v58 = vld [vmem:[#allocation14 + $0x48] sm:$0xff] }
 0x224   :  { %5638 = vpow2.f32 %v5532_v7  ;;  %v5534_v15 = vmul.f32 -1.442695, %v1199_v5  ;;  %692 = vadd.xlane.f32.xlu0 %v683_v37  ;;  %1778 = vmatpush.msra.mxu1 %v1600_v12  ;;  %v1592_v5 = vld [vmem:[#allocation14 + $0xe0] sm:$0xff]  ;;  %v1577_v37 = vld [vmem:[#allocation14 + $0x68] sm:$0xff]  ;;  %v1591_v12 = vld [vmem:[#allocation14 + $0xd8] sm:$0xff] }
 0x225   :  { %v5633_v55 = vpop.eup %5632  ;;  %1802 = vmatpush.msra.mxu2 %v1585_v48  ;;  %1838 = vmatpush.msrb.mxu0 %v1603_v56  ;;  %v1634_v56 = vld [vmem:[#allocation16 + $0x30] sm:$0xff] }
 0x226   :  { %v6962_v41 = vadd.f32 1.0, %v5633_v55  ;;  %5640 = vpow2.f32 %v5534_v15  ;;  %700 = vadd.xlane.f32.xlu2 %v687_v21  ;;  %v5635_v24 = vpop.eup %5634  ;;  %1743 = vmatpush.msrb.mxu3 %v1646_v25  ;;  %v1588_v21 = vld [vmem:[#allocation14 + $0xc0] sm:$0xff]  ;;  %v5583_v55 = vld [vmem:[%s7874_s5] ss:$0 sm:$0xff] }
 0x227   :  { %696 = vadd.xlane.f32.xlu1 %v685_v38  ;;  %v5637_v40 = vpop.eup %5636  ;;  %v688_v7 = vmul.f32 %v5635_v24, %v6939_v45  ;;  %1779 = vmatpush.msra.mxu1 %v1596_v36  ;;  %v1584_v24 = vld [vmem:[#allocation14 + $0xa0] sm:$0xff] }
 0x228   :  { %5642 = vrcp.f32 %v6962_v41  ;;  %1803 = vmatpush.msra.mxu2 %v1581_v32  ;;  %1839 = vmatpush.msrb.mxu0 %v1599_v27  ;;  %v689_v38 = vmul.f32 %v5637_v40, %v6939_v45  ;;  %v6977_v25 = vpop.permute.xlu2 %4081  ;;  %v1190_v45 = vperm.slane %v6931_v20, 2  ;;  %v1569_v27 = vld [vmem:[#allocation14 + $0x28] sm:$0xff]  ;;  %v1587_v40 = vld [vmem:[#allocation14 + $0xb8] sm:$0xff]  ;;  %v1576_v20 = vld [vmem:[#allocation14 + $0x60] sm:$0xff]  ;;  %vm1228_vm5 = vweird.f32 %v6962_v41 }
 0x229   :  { %1744 = vmatpush.msrb.mxu3 %v1642_v62  ;;  %1780 = vmatpush.msra.mxu1 %v1592_v5  ;;  %7953 = vst [vmem:[#allocation29_spill] sm:$0xff] %v6977_v25  ;;  %v6983_v62 = vpop.permute.xlu1 %3422  ;;  %v1630_v5 = vld [vmem:[#allocation16 + $0x10] sm:$0xff]  ;;  %v1583_v25 = vld [vmem:[#allocation14 + $0x98] sm:$0xff] }
 0x22a   :  { %v5639_v11 = vpop.eup %5638  ;;  %1804 = vmatpush.msra.mxu2 %v1577_v37  ;;  %1840 = vmatpush.msrb.mxu0 %v1595_v1  ;;  %v1580_v37 = vld [vmem:[#allocation14 + $0x80] sm:$0xff] }
 0x22b   :  { %v6966_v51 = vadd.f32 1.0, %v5639_v11  ;;  %1745 = vmatpush.msrb.mxu3 %v1638_v18  ;;  %1781 = vmatpush.msra.mxu1 %v1588_v21 }
 0x22c   :  { %v5641_v15 = vpop.eup %5640  ;;  %702 = vadd.xlane.f32.xlu0 %v688_v7  ;;  %1805 = vmatpush.msra.mxu2 %v1573_v58 }
 0x22d   :  { %5644 = vrcp.f32 %v6966_v51  ;;  %v6969_v16 = vadd.f32 1.0, %v5641_v15  ;;  %1841 = vmatpush.msrb.mxu0 %v1591_v12  ;;  %1746 = vmatpush.msrb.mxu3 %v1634_v56  ;;  %v1565_v15 = vld [vmem:[#allocation14 + $0x8] sm:$0xff]  ;;  %v1234_v56 = vand.u32 2147483648, %v6962_v41  ;;  %vm1209_vm8 = vweird.f32 %v6966_v51 }
 0x22e   :  { %v6975_v48 = vpop.eup %5642  ;;  %1782 = vmatpush.msra.mxu1 %v1584_v24  ;;  %1806 = vmatpush.msra.mxu2 %v1569_v27  ;;  %v1232_v27 = vand.u32 2147483647, %v6962_v41 }
 0x22f   :  { %v1224_v36 = vmul.f32 %v6975_v48, %v6962_v41  ;;  %5646 = vrcp.f32 %v6969_v16  ;;  %v1163_v32 = vpop.f32.mrf.mxu1  ;;  %704 = vadd.xlane.f32.xlu1 %v689_v38  ;;  %1842 = vmatpush.msrb.mxu0 %v1587_v40  ;;  %vm1229_vm4 = vweird.f32 %v6975_v48  ;;  %vm1248_vm13 = vweird.f32 %v6969_v16 }
 0x230   :  { %v1164_v11 = vadd.f32 %v1163_v32, %v1083_v8  ;;  %v1542_v7 = vpop.f32.mrf.mxu0  ;;  %1747 = vmatpush.msrb.mxu3 %v1630_v5  ;;  %1783 = vmatpush.msra.mxu1 %v1580_v37  ;;  %v1579_v8 = vld [vmem:[#allocation14 + $0x78] sm:$0xff]  ;;  %vm6998_vm6 = vmor %vm1228_vm5, %vm1229_vm4  ;;  %v1213_v5 = vand.u32 2147483647, %v6966_v51  ;;  %v1564_v37 = vld [vmem:[#allocation14] sm:$0xff]  ;;  %vm1233_vm9 = vcmp.eq.f32.partialorder %v1232_v27, 8.507059e+37  ;;  %v7017_v27 = vpop.permute.xlu0 %720  ;;  %vm830_vm4 = vcmask 57344  }
 0x231   :  { %v1225_v1 = vsub.f32 1.0, %v1224_v36  ;;  %v1543_v18 = vadd.f32 %v5583_v55, %v1542_v7  ;;  %1807 = vmatpush.msra.mxu2 %v1565_v15  ;;  %1843 = vmatpush.msrb.mxu0 %v1583_v25  ;;  %v1572_v55 = vld [vmem:[#allocation14 + $0x40] sm:$0xff]  ;;  %v1575_v36 = vld [vmem:[#allocation14 + $0x58] sm:$0xff] }
 0x232   :  { %v1198_v29 = vadd.f32 %v1190_v45, %v1164_v11  ;;  %1784 = vmatpush.msra.mxu1 %v1576_v20  ;;  %v1568_v25 = vld [vmem:[#allocation14 + $0x20] sm:$0xff]  ;;  %v1571_v11 = vld [vmem:[#allocation14 + $0x38] sm:$0xff]  ;;  %vm1214_vm11 = vcmp.eq.f32.partialorder %v1213_v5, 8.507059e+37 }
 0x233   :  { %v5645_v21 = vpop.eup %5644  ;;  %v1226_v38 = vmul.f32 %v6975_v48, %v1225_v1  ;;  %v5535_v33 = vmul.f32 -1.442695, %v1543_v18  ;;  %1844 = vmatpush.msrb.mxu0 %v1579_v8  ;;  %v7007_v1 = vpop.permute.xlu2 %4095  ;;  %v1235_v18 = vor.u32 1.1754944e-38, %v1234_v56  ;;  %v1567_v20 = vld [vmem:[#allocation14 + $0x18] sm:$0xff] }
 0x234   :  { %v1205_v58 = vmul.f32 %v5645_v21, %v6966_v51  ;;  %1785 = vmatpush.msra.mxu1 %v1572_v55  ;;  %vm1210_vm7 = vweird.f32 %v5645_v21  ;;  %7956 = vst [vmem:[#allocation30_spill] sm:$0xff] %v7007_v1 }
 0x235   :  { %v6988_v12 = vpop.eup %5646  ;;  %v1227_v24 = vadd.f32 %v6975_v48, %v1226_v38  ;;  %5648 = vpow2.f32 %v5535_v33  ;;  %v1215_v33 = vand.u32 2147483648, %v6966_v51  ;;  %1845 = vmatpush.msrb.mxu0 %v1575_v36  ;;  %v7009_v38 = vpop.permute.xlu1 %4053  ;;  %vm1211_vm10 = vmor %vm1209_vm8, %vm1210_vm7 }
 0x236   :  { %v1206_v32 = vsub.f32 1.0, %v1205_v58  ;;  %v1244_v45 = vmul.f32 %v6988_v12, %v6969_v16  ;;  %5650 = vtanh.f32 %v1198_v29  ;;  %1786 = vmatpush.msra.mxu1 %v1568_v25  ;;  %7957 = vst [vmem:[#allocation31_spill] sm:$0xff] %v7009_v38  ;;  %vm1249_vm12 = vweird.f32 %v6988_v12  ;;  %v5896_v38 = vld [vmem:[#allocation16 + $0x38] sm:$0xff] }
 0x237   :  { %v1231_v41 = vsel %vm6998_vm6, %v6975_v48, %v1227_v24  ;;  %1846 = vmatpush.msrb.mxu0 %v1571_v11  ;;  %v1216_v58 = vor.u32 1.1754944e-38, %v1215_v33  ;;  %vm1250_vm14 = vmor %vm1248_vm13, %vm1249_vm12 }
 0x238   :  { %v1207_v7 = vmul.f32 %v5645_v21, %v1206_v32  ;;  %v1245_v15 = vsub.f32 1.0, %v1244_v45  ;;  %v1236_v48 = vsel %vm1233_vm9, %v1235_v18, %v1231_v41  ;;  %1787 = vmatpush.msra.mxu1 %v1564_v37 }
 0x239   :  { %1847 = vmatpush.msrb.mxu0 %v1567_v20  ;;  %v1258_v45 = vmul.f32 %v1236_v48, %v6787_v59  ;;  %v1252_v59 = vand.u32 2147483647, %v6969_v16  ;;  %v2186_v48 = vld [vmem:[#allocation13 + $0x78] sm:$0xff] }
 0x23a   :  { %v1208_v29 = vadd.f32 %v5645_v21, %v1207_v7  ;;  %v1246_v36 = vmul.f32 %v6988_v12, %v1245_v15 }
 0x23b   :  { %v5649_v8 = vpop.eup %5648  ;;  %v7023_v33 = vpop.permute.xlu2 %4712  ;;  %vm1253_vm15 = vcmp.eq.f32.partialorder %v1252_v59, 8.507059e+37  ;;  %v1614_v59 = vld [vmem:[#allocation14 + $0x190] sm:$0xff] }
 0x23c   :  { %v1212_v55 = vsel %vm1211_vm10, %v5645_v21, %v1208_v29  ;;  %v1548_v24 = vadd.f32 1.0, %v5649_v8  ;;  %v5651_v56 = vpop.eup %5650  ;;  %v1247_v40 = vadd.f32 %v6988_v12, %v1246_v36  ;;  %v1254_v21 = vand.u32 2147483648, %v6969_v16  ;;  %7958 = vst [vmem:[#allocation32_spill] sm:$0xff] %v7023_v33  ;;  %v1622_v16 = vld [vmem:[#allocation14 + $0x1d0] sm:$0xff] }
 0x23d   :  { %v1217_v32 = vsel %vm1214_vm11, %v1216_v58, %v1212_v55  ;;  %v7027_v7 = vpop.permute.xlu1 %4074  ;;  %v1626_v58 = vld [vmem:[#allocation14 + $0x1f0] sm:$0xff]  ;;  %v7030_v55 = vpop.permute.xlu0 %1396 }
 0x23e   :  { %v1259_v25 = vmul.f32 %v5651_v56, %v1217_v32  ;;  %5652 = vrcp.f32 %v1548_v24  ;;  %7959 = vst [vmem:[#allocation33_spill] sm:$0xff] %v7027_v7  ;;  %v1251_v41 = vsel %vm1250_vm14, %v6988_v12, %v1247_v40  ;;  %v1255_v37 = vor.u32 1.1754944e-38, %v1254_v21  ;;  %v2185_v56 = vld [vmem:[#allocation13 + $0x70] sm:$0xff]  ;;  %v2184_v40 = vld [vmem:[#allocation13 + $0x68] sm:$0xff] }
 0x23f   :  { %v1560_v32 = vand.u32 2147483648, %v1548_v24  ;;  %vm1554_vm1 = vweird.f32 %v1548_v24  ;;  %v1558_v21 = vand.u32 2147483647, %v1548_v24  ;;  %v5893_v33 = vld [vmem:[#allocation16 + $0x1b0] sm:$0xff] }
 0x240   :  { %v7015_v51 = vadd.f32 %v1259_v25, %v1258_v45  ;;  %v1256_v20 = vsel %vm1253_vm15, %v1255_v37, %v1251_v41  ;;  %v1618_v25 = vld [vmem:[#allocation14 + $0x1b0] sm:$0xff] }
 0x241   :  { %v1561_v37 = vor.u32 1.1754944e-38, %v1560_v32  ;;  %vm1559_vm3 = vcmp.eq.f32.partialorder %v1558_v21, 8.507059e+37  ;;  %v1594_v32 = vld [vmem:[#allocation14 + $0xf0] sm:$0xff] }
 0x242   :  { %5654 = vtanh.f32 %v7015_v51  ;;  %v2177_v21 = vld [vmem:[#allocation13 + $0x30] sm:$0xff] }
 0x243   :  { %v7032_v12 = vpop.permute.xlu2 %4733 }
 0x244   :  { %v5653_v11 = vpop.eup %5652  ;;  %7960 = vst [vmem:[#allocation34_spill] sm:$0xff] %v7032_v12 }
 0x245   :  { %v1550_v5 = vmul.f32 %v5653_v11, %v1548_v24  ;;  %vm1555_vm0 = vweird.f32 %v5653_v11  ;;  %v7034_v45 = vpop.permute.xlu1 %4088  ;;  %v2181_v24 = vld [vmem:[#allocation13 + $0x50] sm:$0xff] }
 0x246   :  { %7961 = vst [vmem:[#allocation35_spill] sm:$0xff] %v7034_v45  ;;  %vm1556_vm2 = vmor %vm1554_vm1, %vm1555_vm0  ;;  %v1303_v45 = vld [vmem:[#allocation5 + $0x20] sm:$0xff] }
 0x247   :  { %v1551_v18 = vsub.f32 1.0, %v1550_v5  ;;  %v2183_v5 = vld [vmem:[#allocation13 + $0x60] sm:$0xff] }
 0x248   :  { %v5655_v15 = vpop.eup %5654 }
 0x249   :  { %v1262_v29 = vmul.f32 %v5655_v15, %v1256_v20  ;;  %v1552_v8 = vmul.f32 %v5653_v11, %v1551_v18  ;;  %v1610_v18 = vld [vmem:[#allocation14 + $0x170] sm:$0xff]  ;;  %v2182_v20 = vld [vmem:[#allocation13 + $0x58] sm:$0xff] }
 0x24b   :  { %1295 = vmatmul.f32.vlgmr.msra.gmra.mxu3 %v1262_v29  ;;  %1708 = vmatmul.f32.vlgmr.msrb.gmra.mxu1 %v1262_v29  ;;  %v1553_v36 = vadd.f32 %v5653_v11, %v1552_v8  ;;  %v1606_v8 = vld [vmem:[#allocation14 + $0x150] sm:$0xff] }
 0x24c   :  { %1728 = vmatmul.f32.vlgmr.msrb.gmra.mxu2 %v1262_v29  ;;  %1768 = vmatmul.f32.vlgmr.msra.gmra.mxu0 %v1262_v29 }
 0x24d   :  { %1812 = vmatpush.msra.mxu3 %v1626_v58  ;;  %2191 = vmatpush.msrb.mxu2 %v2186_v48  ;;  %v1557_v41 = vsel %vm1556_vm2, %v5653_v11, %v1553_v36  ;;  %v7036_v58 = vpop.permute.xlu0 %2062  ;;  %v1602_v11 = vld [vmem:[#allocation14 + $0x130] sm:$0xff]  ;;  %v7038_v48 = vpop.permute.xlu2 %4747 }
 0x24e   :  { %v1562_v15 = vsel %vm1559_vm3, %v1561_v37, %v1557_v41  ;;  %7962 = vst [vmem:[#allocation37_spill] sm:$0xff] %v7038_v48  ;;  %v1598_v36 = vld [vmem:[#allocation14 + $0x110] sm:$0xff]  ;;  %v2176_v41 = vld [vmem:[#allocation13 + $0x28] sm:$0xff] }
 0x24f   :  { %1813 = vmatpush.msra.mxu3 %v1622_v16  ;;  %2192 = vmatpush.msrb.mxu2 %v2185_v56  ;;  %v2180_v16 = vld [vmem:[#allocation13 + $0x48] sm:$0xff]  ;;  %v7040_v56 = vpop.permute.xlu1 %4719  ;;  %v1582_v37 = vld [vmem:[#allocation14 + $0x90] sm:$0xff] }
 0x250   :  { %7963 = vst [vmem:[#allocation36_spill] sm:$0xff] %v7040_v56 }
 0x251   :  { %1814 = vmatpush.msra.mxu3 %v1618_v25  ;;  %2193 = vmatpush.msrb.mxu2 %v2184_v40  ;;  %v2178_v25 = vld [vmem:[#allocation13 + $0x38] sm:$0xff]  ;;  %v1590_v40 = vld [vmem:[#allocation14 + $0xd0] sm:$0xff] }
 0x253   :  { %1815 = vmatpush.msra.mxu3 %v1614_v59  ;;  %2194 = vmatpush.msrb.mxu2 %v2183_v5  ;;  %v1586_v59 = vld [vmem:[#allocation14 + $0xb0] sm:$0xff] }
 0x254   :  { %1748 = vmatmul.f32.vlgmr.msrb.gmra.mxu3 %v1262_v29  ;;  %1788 = vmatmul.f32.vlgmr.msra.gmra.mxu1 %v1562_v15  ;;  %v2179_v29 = vld [vmem:[#allocation13 + $0x40] sm:$0xff] }
 0x255   :  { %1808 = vmatmul.f32.vlgmr.msra.gmra.mxu2 %v1562_v15  ;;  %1816 = vmatpush.msra.mxu3 %v1610_v18  ;;  %v7042_v5 = vpop.permute.xlu0 %2728  ;;  %v7044_v18 = vpop.permute.xlu2 %4761 }
 0x256   :  { %1848 = vmatmul.f32.vlgmr.msrb.gmra.mxu0 %v1562_v15  ;;  %2195 = vmatpush.msrb.mxu2 %v2182_v20  ;;  %7964 = vst [vmem:[#allocation38_spill] sm:$0xff] %v7044_v18  ;;  %v2175_v20 = vld [vmem:[#allocation13 + $0x20] sm:$0xff] }
 0x257   :  { %1817 = vmatpush.msra.mxu3 %v1606_v8  ;;  %v7046_v8 = vpop.permute.xlu1 %4740 }
 0x258   :  { %2196 = vmatpush.msrb.mxu2 %v2181_v24  ;;  %7965 = vst [vmem:[#allocation40_spill] sm:$0xff] %v7046_v8  ;;  %v1578_v24 = vld [vmem:[#allocation14 + $0x70] sm:$0xff] }
 0x259   :  { %1818 = vmatpush.msra.mxu3 %v1602_v11  ;;  %v2174_v11 = vld [vmem:[#allocation13 + $0x18] sm:$0xff] }
 0x25a   :  { %2197 = vmatpush.msrb.mxu2 %v2180_v16  ;;  %v1574_v16 = vld [vmem:[#allocation14 + $0x50] sm:$0xff] }
 0x25b   :  { %1819 = vmatpush.msra.mxu3 %v1598_v36  ;;  %v2173_v36 = vld [vmem:[#allocation13 + $0x10] sm:$0xff] }
 0x25c   :  { %2198 = vmatpush.msrb.mxu2 %v2179_v29  ;;  %v1570_v29 = vld [vmem:[#allocation14 + $0x30] sm:$0xff] }
 0x25d   :  { %1820 = vmatpush.msra.mxu3 %v1594_v32  ;;  %v2172_v32 = vld [vmem:[#allocation13 + $0x8] sm:$0xff] }
 0x25e   :  { %2199 = vmatpush.msrb.mxu2 %v2178_v25  ;;  %v1566_v25 = vld [vmem:[#allocation14 + $0x10] sm:$0xff] }
 0x25f   :  { %1821 = vmatpush.msra.mxu3 %v1590_v40  ;;  %v7048_v40 = vpop.permute.xlu0 %3394 }
 0x260   :  { %2200 = vmatpush.msrb.mxu2 %v2177_v21  ;;  %v2171_v21 = vld [vmem:[#allocation13] sm:$0xff] }
 0x261   :  { %1822 = vmatpush.msra.mxu3 %v1586_v59  ;;  %v7050_v59 = vpop.permute.xlu2 %5378 }
 0x262   :  { %2201 = vmatpush.msrb.mxu2 %v2176_v41  ;;  %7966 = vst [vmem:[#allocation39_spill] sm:$0xff] %v7050_v59  ;;  %v7052_v41 = vpop.permute.xlu1 %4754 }
 0x263   :  { %1823 = vmatpush.msra.mxu3 %v1582_v37  ;;  %7967 = vst [vmem:[#allocation41_spill] sm:$0xff] %v7052_v41  ;;  %v6175_v37 = vmov 0  }
 0x264   :  { %2202 = vmatpush.msrb.mxu2 %v2175_v20  ;;  %5577 = vset.pattern.permute.xlu0 %v6175_v37 }
 0x265   :  { %1824 = vmatpush.msra.mxu3 %v1578_v24  ;;  %5579 = vset.pattern.permute.xlu1 %v6175_v37 }
 0x266   :  { %2203 = vmatpush.msrb.mxu2 %v2174_v11  ;;  %5578 = vset.pattern.permute.xlu2 %v6175_v37 }
 0x267   :  { %1825 = vmatpush.msra.mxu3 %v1574_v16  ;;  %v7054_v20 = vpop.permute.xlu0 %4060 }
 0x268   :  { %2204 = vmatpush.msrb.mxu2 %v2173_v36  ;;  %7968 = vst [vmem:[#allocation43_spill] sm:$0xff] %v7054_v20  ;;  %v5895_v20 = vld [vmem:[#allocation16 + $0x20] sm:$0xff] }
 0x269   :  { %1826 = vmatpush.msra.mxu3 %v1570_v29  ;;  %v7056_v24 = vpop.permute.xlu2 %5399 }
 0x26a   :  { %2205 = vmatpush.msrb.mxu2 %v2172_v32  ;;  %7969 = vst [vmem:[#allocation42_spill] sm:$0xff] %v7056_v24  ;;  %v7058_v11 = vpop.permute.xlu1 %5385 }
 0x26b   :  { %1827 = vmatpush.msra.mxu3 %v1566_v25  ;;  %7970 = vst [vmem:[#allocation44_spill] sm:$0xff] %v7058_v11 }
 0x26c   :  { %2206 = vmatpush.msrb.mxu2 %v2171_v21  ;;  %1828 = vmatmul.f32.vlgmr.msra.gmra.mxu3 %v1562_v15 }
 0x26d   :  { %2207 = vmatmul.f32.vlgmr.msrb.gmra.mxu2 %v1562_v15 }
 0x26f   :  { %v7060_v16 = vpop.permute.xlu0 %4726 }
 0x270   :  { %7971 = vst [vmem:[#allocation45_spill] sm:$0xff] %v7060_v16 }
 0x271   :  { %v7062_v36 = vpop.permute.xlu2 %5413 }
 0x272   :  { %7972 = vst [vmem:[#allocation46_spill] sm:$0xff] %v7062_v36  ;;  %v7064_v29 = vpop.permute.xlu1 %5406 }
 0x273   :  { %7973 = vst [vmem:[#allocation47_spill] sm:$0xff] %v7064_v29 }
 0x277   :  { %v7066_v32 = vpop.permute.xlu0 %5392 }
 0x278   :  { %7974 = vst [vmem:[#allocation48_spill] sm:$0xff] %v7066_v32 }
 0x279   :  { %v7068_v25 = vpop.permute.xlu2 %5427 }
 0x27a   :  { %7975 = vst [vmem:[#allocation49_spill] sm:$0xff] %v7068_v25  ;;  %v7070_v15 = vpop.permute.xlu1 %5420 }
 0x27b   :  { %7976 = vst [vmem:[#allocation50_spill] sm:$0xff] %v7070_v15  ;;  %v5892_v15 = vld [vmem:[#allocation16 + $0x58] sm:$0xff] }
 0x28f   :  { %v691_v21 = vpop.xlane.xlu0 %690 }
 0x290   :  { %v772_v37 = vadd.f32 %v6756_v26, %v691_v21 }
 0x291   :  { %v699_v59 = vpop.xlane.xlu2 %698 }
 0x292   :  { %v695_v18 = vpop.xlane.xlu1 %694  ;;  %789 = vperm.xlu0 %5577, %v772_v37   ;;  %v776_v25 = vadd.f32 %v6783_v2, %v699_v59  ;;  %v1942_v2 = vld [vmem:[#allocation17 + $0x68] sm:$0xff] }
 0x293   :  { %v774_v24 = vadd.f32 %v6785_v4, %v695_v18  ;;  %v2347_v59 = vld [vmem:[#allocation16 + $0x1a8] sm:$0xff] }
 0x295   :  { %795 = vperm.xlu1 %5579, %v774_v24   ;;  %v2355_v24 = vld [vmem:[#allocation16 + $0x1e8] sm:$0xff] }
 0x296   :  { %2378 = vmatpush.msra.mxu0 %v2355_v24  ;;  %v1937_v24 = vld [vmem:[#allocation17 + $0x40] sm:$0xff] }
 0x297   :  { %v693_v11 = vpop.xlane.xlu0 %692 }
 0x298   :  { %v773_v36 = vadd.f32 %v7017_v27, %v693_v11  ;;  %v1944_v27 = vld [vmem:[#allocation17 + $0x78] sm:$0xff]  ;;  %v1943_v11 = vld [vmem:[#allocation17 + $0x70] sm:$0xff] }
 0x299   :  { %v701_v41 = vpop.xlane.xlu2 %700  ;;  %1945 = vmatpush.msrb.mxu1 %v1944_v27  ;;  %v2349_v27 = vld [vmem:[#allocation16 + $0x1b8] sm:$0xff] }
 0x29a   :  { %v777_v29 = vadd.f32 %v6798_v14, %v701_v41  ;;  %v697_v32 = vpop.xlane.xlu1 %696  ;;  %792 = vperm.xlu2 %5578, %v773_v36   ;;  %v2351_v14 = vld [vmem:[#allocation16 + $0x1c8] sm:$0xff]  ;;  %v7080_v36 = vld [vmem:[#allocation16 + $0x1e0] sm:$0xff] }
 0x29b   :  { %v775_v26 = vadd.f32 %v6772_v13, %v697_v32  ;;  %1946 = vmatpush.msrb.mxu1 %v1943_v11  ;;  %2379 = vmatpush.msra.mxu0 %v2351_v14  ;;  %v1941_v13 = vld [vmem:[#allocation17 + $0x60] sm:$0xff]  ;;  %v2343_v41 = vld [vmem:[#allocation16 + $0x188] sm:$0xff]  ;;  %v1939_v32 = vld [vmem:[#allocation17 + $0x50] sm:$0xff] }
 0x29c   :  { %804 = vperm.xlu0 %5577, %v777_v29   ;;  %2358 = vmatpush.msrb.mxu3 %v7080_v36  ;;  %v7083_v29 = vld [vmem:[#allocation16 + $0x1f8] sm:$0xff]  ;;  %v2342_v11 = vld [vmem:[#allocation16 + $0x180] sm:$0xff]  ;;  %v2327_v14 = vld [vmem:[#allocation16 + $0x108] sm:$0xff] }
 0x29d   :  { %801 = vperm.xlu1 %5579, %v776_v25   ;;  %1947 = vmatpush.msrb.mxu1 %v1942_v2  ;;  %v2350_v25 = vld [vmem:[#allocation16 + $0x1c0] sm:$0xff]  ;;  %v2345_v2 = vld [vmem:[#allocation16 + $0x198] sm:$0xff] }
 0x29e   :  { %2380 = vmatpush.msra.mxu0 %v2347_v59  ;;  %2418 = vmatpush.msra.mxu2 %v7083_v29  ;;  %v1936_v59 = vld [vmem:[#allocation17 + $0x38] sm:$0xff] }
 0x29f   :  { %v703_v4 = vpop.xlane.xlu0 %702  ;;  %1948 = vmatpush.msrb.mxu1 %v1941_v13  ;;  %2359 = vmatpush.msrb.mxu3 %v2350_v25  ;;  %v2338_v13 = vld [vmem:[#allocation16 + $0x160] sm:$0xff]  ;;  %v2319_v25 = vld [vmem:[#allocation16 + $0xc8] sm:$0xff] }
 0x2a0   :  { %v778_v18 = vadd.f32 %v6796_v31, %v703_v4  ;;  %2381 = vmatpush.msra.mxu0 %v2343_v41  ;;  %v2339_v31 = vld [vmem:[#allocation16 + $0x168] sm:$0xff]  ;;  %v2346_v4 = vld [vmem:[#allocation16 + $0x1a0] sm:$0xff] }
 0x2a1   :  { %2360 = vmatpush.msrb.mxu3 %v2346_v4  ;;  %v2323_v41 = vld [vmem:[#allocation16 + $0xe8] sm:$0xff]  ;;  %v5885_v4 = vld [vmem:[#allocation16 + $0x120] sm:$0xff] }
 0x2a2   :  { %v705_v21 = vpop.xlane.xlu1 %704  ;;  %798 = vperm.xlu2 %5578, %v775_v26   ;;  %2382 = vmatpush.msra.mxu0 %v2339_v31  ;;  %v2335_v26 = vld [vmem:[#allocation16 + $0x148] sm:$0xff]  ;;  %v1935_v31 = vld [vmem:[#allocation17 + $0x30] sm:$0xff] }
 0x2a3   :  { %v779_v37 = vadd.f32 %v6819_v60, %v705_v21  ;;  %v1940_v60 = vld [vmem:[#allocation17 + $0x58] sm:$0xff]  ;;  %2361 = vmatpush.msrb.mxu3 %v2342_v11  ;;  %v5887_v11 = vld [vmem:[#allocation16 + $0x100] sm:$0xff] }
 0x2a4   :  { %1949 = vmatpush.msrb.mxu1 %v1940_v60  ;;  %v2353_v21 = vld [vmem:[#allocation16 + $0x1d8] sm:$0xff]  ;;  %2383 = vmatpush.msra.mxu0 %v2335_v26 }
 0x2a5   :  { %810 = vperm.xlu1 %5579, %v779_v37   ;;  %2419 = vmatpush.msra.mxu2 %v2353_v21  ;;  %v1938_v37 = vld [vmem:[#allocation17 + $0x48] sm:$0xff]  ;;  %v2341_v60 = vld [vmem:[#allocation16 + $0x178] sm:$0xff] }
 0x2a6   :  { %1950 = vmatpush.msrb.mxu1 %v1939_v32  ;;  %2362 = vmatpush.msrb.mxu3 %v2338_v13  ;;  %v2334_v32 = vld [vmem:[#allocation16 + $0x140] sm:$0xff]  ;;  %v2337_v26 = vld [vmem:[#allocation16 + $0x158] sm:$0xff]  ;;  %v1934_v21 = vld [vmem:[#allocation17 + $0x28] sm:$0xff] }
 0x2a7   :  { %2420 = vmatpush.msra.mxu2 %v2349_v27  ;;  %v1933_v27 = vld [vmem:[#allocation17 + $0x20] sm:$0xff]  ;;  %v2307_v13 = vld [vmem:[#allocation16 + $0x68] sm:$0xff] }
 0x2a8   :  { %1951 = vmatpush.msrb.mxu1 %v1938_v37  ;;  %2363 = vmatpush.msrb.mxu3 %v2334_v32  ;;  %v2315_v37 = vld [vmem:[#allocation16 + $0xa8] sm:$0xff] }
 0x2a9   :  { %2421 = vmatpush.msra.mxu2 %v2345_v2  ;;  %v1932_v2 = vld [vmem:[#allocation17 + $0x18] sm:$0xff]  ;;  %v2303_v32 = vld [vmem:[#allocation16 + $0x48] sm:$0xff] }
 0x2aa   :  { %807 = vperm.xlu2 %5578, %v778_v18   ;;  %v2331_v18 = vld [vmem:[#allocation16 + $0x128] sm:$0xff]  ;;  %1952 = vmatpush.msrb.mxu1 %v1937_v24 }
 0x2ab   :  { %2384 = vmatpush.msra.mxu0 %v2331_v18  ;;  %2422 = vmatpush.msra.mxu2 %v2341_v60  ;;  %v5886_v18 = vld [vmem:[#allocation16 + $0x138] sm:$0xff]  ;;  %v2311_v24 = vld [vmem:[#allocation16 + $0x88] sm:$0xff]  ;;  %v1931_v60 = vld [vmem:[#allocation17 + $0x10] sm:$0xff] }
 0x2ac   :  { %1953 = vmatpush.msrb.mxu1 %v1936_v59  ;;  %2364 = vmatpush.msrb.mxu3 %v5885_v4  ;;  %v2322_v59 = vld [vmem:[#allocation16 + $0xe0] sm:$0xff]  ;;  %v2299_v4 = vld [vmem:[#allocation16 + $0x28] sm:$0xff] }
 0x2ad   :  { %2385 = vmatpush.msra.mxu0 %v2327_v14  ;;  %2423 = vmatpush.msra.mxu2 %v2337_v26  ;;  %v5888_v14 = vld [vmem:[#allocation16 + $0x118] sm:$0xff] }
 0x2ae   :  { %1954 = vmatpush.msrb.mxu1 %v1935_v31  ;;  %2365 = vmatpush.msrb.mxu3 %v5887_v11  ;;  %v2318_v31 = vld [vmem:[#allocation16 + $0xc0] sm:$0xff] }
 0x2af   :  { %2386 = vmatpush.msra.mxu0 %v2323_v41  ;;  %2424 = vmatpush.msra.mxu2 %v5886_v18  ;;  %v2325_v41 = vld [vmem:[#allocation16 + $0xf8] sm:$0xff]  ;;  %v2310_v11 = vld [vmem:[#allocation16 + $0x80] sm:$0xff] }
 0x2b0   :  { %1955 = vmatpush.msrb.mxu1 %v1934_v21  ;;  %2366 = vmatpush.msrb.mxu3 %v2322_v59  ;;  %v1930_v21 = vld [vmem:[#allocation17 + $0x8] sm:$0xff]  ;;  %v2356_v59 = vld [vmem:[#allocation16 + $0x1f0] sm:$0xff] }
 0x2b1   :  { %2387 = vmatpush.msra.mxu0 %v2319_v25  ;;  %2425 = vmatpush.msra.mxu2 %v5888_v14  ;;  %v2321_v25 = vld [vmem:[#allocation16 + $0xd8] sm:$0xff]  ;;  %v2295_v14 = vld [vmem:[#allocation16 + $0x8] sm:$0xff] }
 0x2b2   :  { %1956 = vmatpush.msrb.mxu1 %v1933_v27  ;;  %2367 = vmatpush.msrb.mxu3 %v2318_v31  ;;  %v2317_v27 = vld [vmem:[#allocation16 + $0xb8] sm:$0xff] }
 0x2b3   :  { %2388 = vmatpush.msra.mxu0 %v2315_v37  ;;  %2426 = vmatpush.msra.mxu2 %v2325_v41  ;;  %v2314_v37 = vld [vmem:[#allocation16 + $0xa0] sm:$0xff]  ;;  %v7091_v41 = vld [vmem:[%s7877_s8] sm:$0xf]  ;;  %v2309_v31 = vld [vmem:[#allocation16 + $0x78] sm:$0xff] }
 0x2b4   :  { %1957 = vmatpush.msrb.mxu1 %v1932_v2  ;;  %2368 = vmatpush.msrb.mxu3 %v2314_v37  ;;  %v2313_v2 = vld [vmem:[#allocation16 + $0x98] sm:$0xff]  ;;  %v1857_v1 = vperm.slane %v7091_v41, 3 }
 0x2b5   :  { %2389 = vmatpush.msra.mxu0 %v2311_v24  ;;  %2427 = vmatpush.msra.mxu2 %v2321_v25  ;;  %v1929_v24 = vld [vmem:[#allocation17] sm:$0xff]  ;;  %v1299_v25 = vld [vmem:[#allocation5] sm:$0xff] }
 0x2b6   :  { %1958 = vmatpush.msrb.mxu1 %v1931_v60  ;;  %2369 = vmatpush.msrb.mxu3 %v2310_v11  ;;  %v2306_v60 = vld [vmem:[#allocation16 + $0x60] sm:$0xff]  ;;  %v5889_v11 = vld [vmem:[#allocation16 + $0x1d0] sm:$0xff] }
 0x2b7   :  { %2390 = vmatpush.msra.mxu0 %v2307_v13  ;;  %2428 = vmatpush.msra.mxu2 %v2317_v27  ;;  %v2291_v13 = vld [vmem:[#allocation14 + $0x1e8] sm:$0xff] }
 0x2b8   :  { %1959 = vmatpush.msrb.mxu1 %v1930_v21  ;;  %2370 = vmatpush.msrb.mxu3 %v2306_v60 }
 0x2b9   :  { %2391 = vmatpush.msra.mxu0 %v2303_v32  ;;  %2429 = vmatpush.msra.mxu2 %v2313_v2  ;;  %v1854_v2 = vperm.slane %v7091_v41, 0 }
 0x2ba   :  { %1960 = vmatpush.msrb.mxu1 %v1929_v24 }
 0x2bb   :  { %2392 = vmatpush.msra.mxu0 %v2299_v4  ;;  %2430 = vmatpush.msra.mxu2 %v2309_v31  ;;  %v5891_v31 = vld [vmem:[#allocation16 + $0x40] sm:$0xff] }
 0x2bc   :  { %2398 = vmatpush.msra.mxu1 %v2356_v59  ;;  %v1301_v59 = vld [vmem:[#allocation5 + $0x10] sm:$0xff]  ;;  %2371 = vmatpush.msrb.mxu3 %v5891_v31 }
 0x2bd   :  { %2393 = vmatpush.msra.mxu0 %v2295_v14  ;;  %v5890_v14 = vld [vmem:[#allocation14 + $0x1c8] sm:$0xff]  ;;  %2431 = vmatpush.msra.mxu2 %v5892_v15 }
 0x2be   :  { %2399 = vmatpush.msra.mxu1 %v5889_v11  ;;  %v5894_v11 = vld [vmem:[#allocation14 + $0x1a8] sm:$0xff]  ;;  %2372 = vmatpush.msrb.mxu3 %v5895_v20 }
 0x2bf   :  { %2458 = vmatpush.msrb.mxu0 %v2291_v13  ;;  %2432 = vmatpush.msra.mxu2 %v5896_v38  ;;  %v7110_v38 = vld [vmem:[%s7879_s10] ss:$0 sm:$0xff] }
 0x2c0   :  { %2400 = vmatpush.msra.mxu1 %v5893_v33 }
 0x2c1   :  { %2459 = vmatpush.msrb.mxu0 %v5890_v14  ;;  %2433 = vmatpush.msra.mxu2 %v2297_v0  ;;  %v2271_v0 = vld [vmem:[#allocation14 + $0x148] sm:$0xff] }
 0x2c3   :  { %2460 = vmatpush.msrb.mxu0 %v5894_v11 }
 0x2c8   :  { %v1709_v26 = vpop.f32.mrf.mxu1 }
 0x2c9   :  { %v7086_v18 = vpop.f32.mrf.mxu0 }
 0x2ce   :  { %v7093_v32 = vpop.f32.mrf.mxu3 }
 0x2cf   :  { %v7095_v21 = vpop.f32.mrf.mxu2  ;;  %v1315_v37 = vperm.slane %v7093_v32, 0  ;;  %v1309_v4 = vrot.slane %v7093_v32, 2  ;;  %v1308_v27 = vrot.slane %v7093_v32, 1  ;;  %v1311_v24 = vrot.slane %v7093_v32, 4 }
 0x2d0   :  { %v1312_v13 = vrot.slane %v7093_v32, 5  ;;  %v1310_v60 = vrot.slane %v7093_v32, 3 }
 0x2d1   :  { %v1789_v48 = vpop.f32.mrf.mxu1  ;;  %v1331_v8 = vadd.f32 %v1315_v37, %v1299_v25  ;;  %v1317_v12 = vperm.slane %v1309_v4, 0  ;;  %v1316_v16 = vperm.slane %v1308_v27, 0  ;;  %v1319_v56 = vperm.slane %v1311_v24, 0  ;;  %v5897_v25 = vld [vmem:[#allocation5 + $0x8] sm:$0xff]  ;;  %v2279_v24 = vld [vmem:[#allocation14 + $0x188] sm:$0xff] }
 0x2d2   :  { %v1790_v14 = vadd.f32 %v1789_v48, %v1709_v26  ;;  %v1320_v7 = vperm.slane %v1312_v13, 0  ;;  %v1304_v4 = vld [vmem:[#allocation5 + $0x28] sm:$0xff]  ;;  %v1318_v48 = vperm.slane %v1310_v60, 0  ;;  %v1314_v26 = vrot.slane %v7093_v32, 7  ;;  %v2294_v13 = vld [vmem:[#allocation16] sm:$0xff]  ;;  %2461 = vmatpush.msrb.mxu0 %v2279_v24  ;;  %v2275_v60 = vld [vmem:[#allocation14 + $0x168] sm:$0xff] }
 0x2d3   :  { %v1849_v31 = vpop.f32.mrf.mxu0  ;;  %5656 = vtanh.f32 %v1331_v8  ;;  %v1333_v15 = vadd.f32 %v1317_v12, %v1301_v59  ;;  %v1332_v37 = vadd.f32 %v5897_v25, %v1316_v16  ;;  %v2344_v27 = vld [vmem:[#allocation16 + $0x190] sm:$0xff]  ;;  %v1335_v12 = vadd.f32 %v1319_v56, %v1303_v45  ;;  %v1302_v8 = vld [vmem:[#allocation5 + $0x18] sm:$0xff]  ;;  %2373 = vmatpush.msrb.mxu3 %v2294_v13  ;;  %v2293_v25 = vld [vmem:[#allocation14 + $0x1f8] sm:$0xff] }
 0x2d4   :  { %v1862_v33 = vadd.f32 %v1854_v2, %v1790_v14  ;;  %v1850_v11 = vadd.f32 %v1849_v31, %v7086_v18  ;;  %2401 = vmatpush.msra.mxu1 %v2344_v27  ;;  %v1336_v18 = vadd.f32 %v1320_v7, %v1304_v4  ;;  %v2340_v2 = vld [vmem:[#allocation16 + $0x170] sm:$0xff]  ;;  %v2290_v59 = vld [vmem:[#allocation14 + $0x1e0] sm:$0xff]  ;;  %v1855_v14 = vperm.slane %v7091_v41, 1  ;;  %2462 = vmatpush.msrb.mxu0 %v2275_v60  ;;  %v2263_v60 = vld [vmem:[#allocation14 + $0x108] sm:$0xff] }
 0x2d5   :  { %5658 = vtanh.f32 %v1333_v15  ;;  %v1313_v31 = vrot.slane %v7093_v32, 6  ;;  %2438 = vmatpush.msra.mxu3 %v2290_v59  ;;  %v1334_v15 = vadd.f32 %v1318_v48, %v1302_v8  ;;  %v1322_v27 = vperm.slane %v1314_v26, 0  ;;  %2498 = vmatpush.msrb.mxu2 %v2293_v25  ;;  %v2286_v7 = vld [vmem:[#allocation14 + $0x1c0] sm:$0xff]  ;;  %v2289_v32 = vld [vmem:[#allocation14 + $0x1d8] sm:$0xff]  ;;  %v2267_v48 = vld [vmem:[#allocation14 + $0x128] sm:$0xff] }
 0x2d6   :  { %v5536_v20 = vmul.f32 -1.442695, %v1862_v33  ;;  %v1865_v16 = vadd.f32 %v1857_v1, %v1850_v11  ;;  %5660 = vtanh.f32 %v1332_v37  ;;  %2402 = vmatpush.msra.mxu1 %v2340_v2  ;;  %v2336_v1 = vld [vmem:[#allocation16 + $0x150] sm:$0xff]  ;;  %2463 = vmatpush.msrb.mxu0 %v2271_v0  ;;  %v2282_v11 = vld [vmem:[#allocation14 + $0x1a0] sm:$0xff]  ;;  %v2285_v8 = vld [vmem:[#allocation14 + $0x1b8] sm:$0xff] }
 0x2d7   :  { %2439 = vmatpush.msra.mxu3 %v2286_v7  ;;  %2499 = vmatpush.msrb.mxu2 %v2289_v32  ;;  %v2332_v33 = vld [vmem:[#allocation16 + $0x130] sm:$0xff]  ;;  %v1321_v2 = vperm.slane %v1313_v31, 0  ;;  %v2278_v59 = vld [vmem:[#allocation14 + $0x180] sm:$0xff]  ;;  %v2277_v31 = vld [vmem:[#allocation14 + $0x178] sm:$0xff] }
 0x2d8   :  { %5662 = vpow2.f32 %v5536_v20  ;;  %v5538_v45 = vmul.f32 -1.442695, %v1865_v16  ;;  %v1809_v56 = vpop.f32.mrf.mxu2  ;;  %2403 = vmatpush.msra.mxu1 %v2336_v1  ;;  %2464 = vmatpush.msrb.mxu0 %v2267_v48  ;;  %v2324_v7 = vld [vmem:[#allocation16 + $0xf0] sm:$0xff]  ;;  %v2274_v0 = vld [vmem:[#allocation14 + $0x160] sm:$0xff] }
 0x2d9   :  { %v5657_v37 = vpop.eup %5656  ;;  %v1810_v4 = vadd.f32 %v1809_v56, %v7095_v21  ;;  %5664 = vtanh.f32 %v1335_v12  ;;  %2440 = vmatpush.msra.mxu3 %v2282_v11  ;;  %v5898_v12 = vld [vmem:[#allocation5 + $0x38] sm:$0xff]  ;;  %2500 = vmatpush.msrb.mxu2 %v2285_v8  ;;  %v2255_v11 = vld [vmem:[#allocation14 + $0xc8] sm:$0xff] }
 0x2da   :  { %v1351_v24 = vmul.f32 %v5657_v37, %v7110_v38  ;;  %5666 = vtanh.f32 %v1336_v18  ;;  %2404 = vmatpush.msra.mxu1 %v2332_v33  ;;  %v1338_v16 = vadd.f32 %v5898_v12, %v1322_v27  ;;  %v2328_v18 = vld [vmem:[#allocation16 + $0x110] sm:$0xff]  ;;  %2465 = vmatpush.msrb.mxu0 %v2263_v60  ;;  %v2270_v33 = vld [vmem:[#allocation14 + $0x140] sm:$0xff]  ;;  %v2251_v12 = vld [vmem:[#allocation14 + $0xa8] sm:$0xff] }
 0x2db   :  { %v5659_v26 = vpop.eup %5658  ;;  %5668 = vpow2.f32 %v5538_v45  ;;  %v1863_v13 = vadd.f32 %v1855_v14, %v1810_v4  ;;  %v1305_v45 = vld [vmem:[#allocation5 + $0x30] sm:$0xff]  ;;  %2441 = vmatpush.msra.mxu3 %v2278_v59 }
 0x2dc   :  { %v5661_v20 = vpop.eup %5660  ;;  %1359 = vadd.xlane.f32.xlu0 %v1351_v24  ;;  %v1353_v21 = vmul.f32 %v5659_v26, %v7110_v38  ;;  %5670 = vtanh.f32 %v1334_v15  ;;  %2405 = vmatpush.msra.mxu1 %v2328_v18  ;;  %v2281_v14 = vld [vmem:[#allocation14 + $0x198] sm:$0xff]  ;;  %v2259_v15 = vld [vmem:[#allocation14 + $0xe8] sm:$0xff]  ;;  %v1337_v32 = vadd.f32 %v1321_v2, %v1305_v45  ;;  %v2320_v24 = vld [vmem:[#allocation16 + $0xd0] sm:$0xff] }
 0x2dd   :  { %v5537_v25 = vmul.f32 -1.442695, %v1863_v13  ;;  %v1352_v56 = vmul.f32 %v5661_v20, %v7110_v38  ;;  %2501 = vmatpush.msrb.mxu2 %v2281_v14  ;;  %2442 = vmatpush.msra.mxu3 %v2274_v0  ;;  %v2273_v26 = vld [vmem:[#allocation14 + $0x158] sm:$0xff]  ;;  %v2316_v20 = vld [vmem:[#allocation16 + $0xb0] sm:$0xff] }
 0x2de   :  { %v5663_v1 = vpop.eup %5662  ;;  %1363 = vadd.xlane.f32.xlu1 %v1353_v21  ;;  %2406 = vmatpush.msra.mxu1 %v2324_v7  ;;  %v2266_v21 = vld [vmem:[#allocation14 + $0x120] sm:$0xff]  ;;  %v2269_v2 = vld [vmem:[#allocation14 + $0x138] sm:$0xff] }
 0x2df   :  { %v5665_v37 = vpop.eup %5664  ;;  %v7118_v27 = vadd.f32 1.0, %v5663_v1  ;;  %5672 = vpow2.f32 %v5537_v25  ;;  %1361 = vadd.xlane.f32.xlu2 %v1352_v56  ;;  %2466 = vmatpush.msrb.mxu0 %v2259_v15  ;;  %v2312_v25 = vld [vmem:[#allocation16 + $0x90] sm:$0xff]  ;;  %v2262_v56 = vld [vmem:[#allocation14 + $0x100] sm:$0xff]  ;;  %v2247_v1 = vld [vmem:[#allocation14 + $0x88] sm:$0xff]  ;;  %v1749_v15 = vpop.f32.mrf.mxu3 }
 0x2e0   :  { %v5667_v4 = vpop.eup %5666  ;;  %5674 = vtanh.f32 %v1338_v16  ;;  %v1355_v8 = vmul.f32 %v5665_v37, %v7110_v38  ;;  %2502 = vmatpush.msrb.mxu2 %v2277_v31  ;;  %2407 = vmatpush.msra.mxu1 %v2320_v24  ;;  %v2265_v7 = vld [vmem:[#allocation14 + $0x118] sm:$0xff]  ;;  %v2308_v37 = vld [vmem:[#allocation16 + $0x70] sm:$0xff]  ;;  %v2258_v31 = vld [vmem:[#allocation14 + $0xe0] sm:$0xff] }
 0x2e1   :  { %v5669_v48 = vpop.eup %5668  ;;  %5676 = vrcp.f32 %v7118_v27  ;;  %2443 = vmatpush.msra.mxu3 %v2270_v33  ;;  %2467 = vmatpush.msrb.mxu0 %v2255_v11  ;;  %v1356_v16 = vmul.f32 %v5667_v4, %v7110_v38  ;;  %v2261_v24 = vld [vmem:[#allocation14 + $0xf8] sm:$0xff]  ;;  %v2304_v33 = vld [vmem:[#allocation16 + $0x50] sm:$0xff]  ;;  %vm1875_vm7 = vweird.f32 %v7118_v27 }
 0x2e2   :  { %v5671_v13 = vpop.eup %5670  ;;  %5678 = vtanh.f32 %v1337_v32  ;;  %2503 = vmatpush.msrb.mxu2 %v2273_v26  ;;  %v7123_v59 = vadd.f32 1.0, %v5669_v48  ;;  %2408 = vmatpush.msra.mxu1 %v2316_v20  ;;  %v2243_v32 = vld [vmem:[#allocation14 + $0x68] sm:$0xff]  ;;  %v2254_v26 = vld [vmem:[#allocation14 + $0xc0] sm:$0xff]  ;;  %v2257_v20 = vld [vmem:[#allocation14 + $0xd8] sm:$0xff] }
 0x2e3   :  { %v1354_v60 = vmul.f32 %v5671_v13, %v7110_v38  ;;  %2444 = vmatpush.msra.mxu3 %v2266_v21  ;;  %2468 = vmatpush.msrb.mxu0 %v2251_v12  ;;  %v2239_v13 = vld [vmem:[#allocation14 + $0x48] sm:$0xff]  ;;  %v2300_v21 = vld [vmem:[#allocation16 + $0x30] sm:$0xff]  ;;  %v2250_v12 = vld [vmem:[#allocation14 + $0xa0] sm:$0xff] }
 0x2e4   :  { %1367 = vadd.xlane.f32.xlu0 %v1355_v8  ;;  %2504 = vmatpush.msrb.mxu2 %v2269_v2  ;;  %vm1914_vm14 = vweird.f32 %v7123_v59 }
 0x2e5   :  { %v5673_v18 = vpop.eup %5672  ;;  %2409 = vmatpush.msra.mxu1 %v2312_v25  ;;  %2445 = vmatpush.msra.mxu3 %v2262_v56  ;;  %v1856_v56 = vperm.slane %v7091_v41, 2 }
 0x2e6   :  { %v5675_v45 = vpop.eup %5674  ;;  %v7126_v14 = vadd.f32 1.0, %v5673_v18  ;;  %1369 = vadd.xlane.f32.xlu1 %v1356_v16  ;;  %2469 = vmatpush.msrb.mxu0 %v2247_v1  ;;  %v5585_v16 = vld [vmem:[%s7874_s5] ss:$0 sm:$0xff]  ;;  %v2246_v1 = vld [vmem:[#allocation14 + $0x80] sm:$0xff] }
 0x2e7   :  { %v7128_v0 = vpop.eup %5676  ;;  %1365 = vadd.xlane.f32.xlu2 %v1354_v60  ;;  %2505 = vmatpush.msrb.mxu2 %v2265_v7  ;;  %v1358_v48 = vmul.f32 %v5675_v45, %v7110_v38  ;;  %v2235_v18 = vld [vmem:[#allocation14 + $0x28] sm:$0xff]  ;;  %v2253_v60 = vld [vmem:[#allocation14 + $0xb8] sm:$0xff]  ;;  %v2296_v45 = vld [vmem:[#allocation16 + $0x10] sm:$0xff] }
 0x2e8   :  { %v1871_v4 = vmul.f32 %v7128_v0, %v7118_v27  ;;  %5680 = vrcp.f32 %v7126_v14  ;;  %v5679_v11 = vpop.eup %5678  ;;  %2410 = vmatpush.msra.mxu1 %v2308_v37  ;;  %2446 = vmatpush.msra.mxu3 %v2258_v31  ;;  %vm1876_vm5 = vweird.f32 %v7128_v0  ;;  %vm1894_vm8 = vweird.f32 %v7126_v14 }
 0x2e9   :  { %5682 = vrcp.f32 %v7123_v59  ;;  %2470 = vmatpush.msrb.mxu0 %v2243_v32  ;;  %2506 = vmatpush.msrb.mxu2 %v2261_v24  ;;  %v1357_v2 = vmul.f32 %v5679_v11, %v7110_v38  ;;  %v2249_v32 = vld [vmem:[#allocation14 + $0x98] sm:$0xff]  ;;  %v7977_v24 = vlaneseq  ;;  %vm7164_vm9 = vmor %vm1875_vm7, %vm1876_vm5 }
 0x2ea   :  { %v1872_v8 = vsub.f32 1.0, %v1871_v4  ;;  %2411 = vmatpush.msra.mxu1 %v2304_v33  ;;  %2447 = vmatpush.msra.mxu3 %v2254_v26  ;;  %v2231_v4 = vld [vmem:[#allocation14 + $0x8] sm:$0xff] }
 0x2eb   :  { %2471 = vmatpush.msrb.mxu0 %v2239_v13  ;;  %2507 = vmatpush.msrb.mxu2 %v2257_v20  ;;  %v7148_v33 = vand.u32 127, %v7977_v24  ;;  %v1900_v13 = vand.u32 2147483648, %v7126_v14  ;;  %v2237_v24 = vld [vmem:[#allocation14 + $0x38] sm:$0xff] }
 0x2ec   :  { %1373 = vadd.xlane.f32.xlu0 %v1358_v48  ;;  %2412 = vmatpush.msra.mxu1 %v2300_v21  ;;  %v1873_v38 = vmul.f32 %v7128_v0, %v1872_v8  ;;  %v2242_v48 = vld [vmem:[#allocation14 + $0x60] sm:$0xff]  ;;  %v2245_v8 = vld [vmem:[#allocation14 + $0x78] sm:$0xff] }
 0x2ed   :  { %2448 = vmatpush.msra.mxu3 %v2250_v12  ;;  %2472 = vmatpush.msrb.mxu0 %v2235_v18 }
 0x2ee   :  { %v7139_v25 = vpop.eup %5680  ;;  %2508 = vmatpush.msrb.mxu2 %v2253_v60  ;;  %2413 = vmatpush.msra.mxu1 %v2296_v45  ;;  %v2241_v45 = vld [vmem:[#allocation14 + $0x58] sm:$0xff] }
 0x2ef   :  { %v7142_v7 = vpop.eup %5682  ;;  %v1890_v37 = vmul.f32 %v7139_v25, %v7126_v14  ;;  %v1829_v31 = vpop.f32.mrf.mxu3  ;;  %1371 = vadd.xlane.f32.xlu2 %v1357_v2  ;;  %2449 = vmatpush.msra.mxu3 %v2246_v1  ;;  %v2238_v2 = vld [vmem:[#allocation14 + $0x40] sm:$0xff]  ;;  %vm1895_vm6 = vweird.f32 %v7139_v25  ;;  %v1881_v1 = vand.u32 2147483648, %v7118_v27 }
 0x2f0   :  { %v1830_v41 = vadd.f32 %v1829_v31, %v1749_v15  ;;  %v2208_v11 = vpop.f32.mrf.mxu2  ;;  %v1910_v21 = vmul.f32 %v7142_v7, %v7123_v59  ;;  %v1898_v15 = vand.u32 2147483647, %v7126_v14  ;;  %2473 = vmatpush.msrb.mxu0 %v2231_v4  ;;  %2509 = vmatpush.msrb.mxu2 %v2249_v32  ;;  %v2234_v31 = vld [vmem:[#allocation14 + $0x20] sm:$0xff]  ;;  %vm1896_vm10 = vmor %vm1894_vm8, %vm1895_vm6  ;;  %vm1915_vm13 = vweird.f32 %v7142_v7 }
 0x2f1   :  { %v1891_v26 = vsub.f32 1.0, %v1890_v37  ;;  %v2209_v20 = vadd.f32 %v5585_v16, %v2208_v11  ;;  %v1874_v16 = vadd.f32 %v7128_v0, %v1873_v38  ;;  %2450 = vmatpush.msra.mxu3 %v2242_v48  ;;  %v2230_v14 = vld [vmem:[#allocation14] sm:$0xff]  ;;  %vm1916_vm15 = vmor %vm1914_vm14, %vm1915_vm13 }
 0x2f2   :  { %v1864_v12 = vadd.f32 %v1856_v56, %v1830_v41  ;;  %v1879_v56 = vand.u32 2147483647, %v7118_v27  ;;  %2510 = vmatpush.msrb.mxu2 %v2245_v8  ;;  %v1911_v27 = vsub.f32 1.0, %v1910_v21  ;;  %v1901_v41 = vor.u32 1.1754944e-38, %v1900_v13 }
 0x2f3   :  { %v1892_v18 = vmul.f32 %v7139_v25, %v1891_v26  ;;  %v5539_v60 = vmul.f32 -1.442695, %v2209_v20  ;;  %2451 = vmatpush.msra.mxu3 %v2238_v2  ;;  %v1878_v11 = vsel %vm7164_vm9, %v7128_v0, %v1874_v16  ;;  %vm1899_vm11 = vcmp.eq.f32.partialorder %v1898_v15, 8.507059e+37  ;;  %v2233_v26 = vld [vmem:[#allocation14 + $0x18] sm:$0xff] }
 0x2f4   :  { %5684 = vtanh.f32 %v1864_v12  ;;  %v793_v37 = vpop.permute.xlu2 %792  ;;  %2511 = vmatpush.msrb.mxu2 %v2241_v45  ;;  %v1882_v20 = vor.u32 1.1754944e-38, %v1881_v1  ;;  %vm1880_vm12 = vcmp.eq.f32.partialorder %v1879_v56, 8.507059e+37  ;;  %v1912_v13 = vmul.f32 %v7142_v7, %v1911_v27 }
 0x2f5   :  { %v1893_v38 = vadd.f32 %v7139_v25, %v1892_v18  ;;  %5686 = vpow2.f32 %v5539_v60  ;;  %v815_v32 = vperm.slane %v793_v37, %v7148_v33  ;;  %2452 = vmatpush.msra.mxu3 %v2234_v31  ;;  %v1920_v56 = vand.u32 2147483648, %v7123_v59 }
 0x2f6   :  { %2512 = vmatpush.msrb.mxu2 %v2237_v24  ;;  %v1883_v12 = vsel %vm1880_vm12, %v1882_v20, %v1878_v11  ;;  %v1913_v45 = vadd.f32 %v7142_v7, %v1912_v13 }
 0x2f7   :  { %v1897_v48 = vsel %vm1896_vm10, %v7139_v25, %v1893_v38  ;;  %832 = vst.msk [vmem:[#allocation19 + $0x8] sm:$0x1] %vm830_vm4, %v815_v32  ;;  %2453 = vmatpush.msra.mxu3 %v2230_v14  ;;  %v1921_v37 = vor.u32 1.1754944e-38, %v1920_v56 }
 0x2f8   :  { %v1902_v8 = vsel %vm1899_vm11, %v1901_v41, %v1897_v48  ;;  %2513 = vmatpush.msrb.mxu2 %v2233_v26  ;;  %v1917_v1 = vsel %vm1916_vm15, %v7142_v7, %v1913_v45  ;;  %v2852_v26 = vld [vmem:[#allocation13 + $0x78] sm:$0xff]  ;;  %v2849_v45 = vld [vmem:[#allocation13 + $0x60] sm:$0xff] }
 0x2f9   :  { %v1924_v0 = vmul.f32 %v1902_v8, %v7015_v51  ;;  %v1918_v51 = vand.u32 2147483647, %v7123_v59  ;;  %v2292_v59 = vld [vmem:[#allocation14 + $0x1f0] sm:$0xff] }
 0x2fa   :  { %v5685_v21 = vpop.eup %5684  ;;  %v2288_v8 = vld [vmem:[#allocation14 + $0x1d0] sm:$0xff] }
 0x2fb   :  { %v5687_v2 = vpop.eup %5686  ;;  %v1925_v18 = vmul.f32 %v5685_v21, %v1883_v12  ;;  %vm1919_vm0 = vcmp.eq.f32.partialorder %v1918_v51, 8.507059e+37  ;;  %v2851_v21 = vld [vmem:[#allocation13 + $0x70] sm:$0xff] }
 0x2fc   :  { %v2214_v25 = vadd.f32 1.0, %v5687_v2  ;;  %v799_v15 = vpop.permute.xlu2 %798  ;;  %v1922_v14 = vsel %vm1919_vm0, %v1921_v37, %v1917_v1  ;;  %v2284_v2 = vld [vmem:[#allocation14 + $0x1b0] sm:$0xff] }
 0x2fd   :  { %v7179_v16 = vadd.f32 %v1925_v18, %v1924_v0  ;;  %v817_v60 = vperm.slane %v799_v15, %v7148_v33  ;;  %v2850_v0 = vld [vmem:[#allocation13 + $0x68] sm:$0xff]  ;;  %v2276_v37 = vld [vmem:[#allocation14 + $0x170] sm:$0xff] }
 0x2fe   :  { %5688 = vrcp.f32 %v2214_v25  ;;  %v2226_v12 = vand.u32 2147483648, %v2214_v25  ;;  %vm2220_vm2 = vweird.f32 %v2214_v25  ;;  %v2224_v15 = vand.u32 2147483647, %v2214_v25 }
 0x2ff   :  { %5690 = vtanh.f32 %v7179_v16  ;;  %834 = vst.msk [vmem:[#allocation19 + $0x18] sm:$0x1] %vm830_vm4, %v817_v60  ;;  %v2280_v60 = vld [vmem:[#allocation14 + $0x190] sm:$0xff] }
 0x300   :  { %v2227_v51 = vor.u32 1.1754944e-38, %v2226_v12  ;;  %vm2225_vm5 = vcmp.eq.f32.partialorder %v2224_v15, 8.507059e+37  ;;  %v2842_v12 = vld [vmem:[#allocation13 + $0x28] sm:$0xff]  ;;  %v2840_v15 = vld [vmem:[#allocation13 + $0x18] sm:$0xff] }
 0x304   :  { %v5689_v31 = vpop.eup %5688  ;;  %v808_v4 = vpop.permute.xlu2 %807 }
 0x305   :  { %v790_v38 = vpop.permute.xlu0 %789  ;;  %v5691_v32 = vpop.eup %5690  ;;  %v2216_v24 = vmul.f32 %v5689_v31, %v2214_v25  ;;  %v820_v27 = vperm.slane %v808_v4, %v7148_v33  ;;  %vm2221_vm1 = vweird.f32 %v5689_v31 }
 0x306   :  { %v814_v41 = vperm.slane %v790_v38, %v7148_v33  ;;  %v1928_v11 = vmul.f32 %v5691_v32, %v1922_v14  ;;  %vm2222_vm3 = vmor %vm2220_vm2, %vm2221_vm1  ;;  %v2846_v14 = vld [vmem:[#allocation13 + $0x48] sm:$0xff] }
 0x307   :  { %v2217_v48 = vsub.f32 1.0, %v2216_v24  ;;  %837 = vst.msk [vmem:[#allocation19 + $0x30] sm:$0x1] %vm830_vm4, %v820_v27  ;;  %v796_v20 = vpop.permute.xlu1 %795  ;;  %v2848_v24 = vld [vmem:[#allocation13 + $0x58] sm:$0xff]  ;;  %v2847_v27 = vld [vmem:[#allocation13 + $0x50] sm:$0xff] }
 0x308   :  { %831 = vst.msk [vmem:[#allocation19] sm:$0x1] %vm830_vm4, %v814_v41  ;;  %1961 = vmatmul.f32.vlgmr.msrb.gmra.mxu1 %v1928_v11  ;;  %2374 = vmatmul.f32.vlgmr.msrb.gmra.mxu3 %v1928_v11  ;;  %v816_v7 = vperm.slane %v796_v20, %v7148_v33  ;;  %v2268_v41 = vld [vmem:[#allocation14 + $0x130] sm:$0xff]  ;;  %v2844_v20 = vld [vmem:[#allocation13 + $0x38] sm:$0xff] }
 0x309   :  { %2394 = vmatmul.f32.vlgmr.msra.gmra.mxu0 %v1928_v11  ;;  %2434 = vmatmul.f32.vlgmr.msra.gmra.mxu2 %v1928_v11  ;;  %v2218_v13 = vmul.f32 %v5689_v31, %v2217_v48  ;;  %v2264_v48 = vld [vmem:[#allocation14 + $0x110] sm:$0xff] }
 0x30a   :  { %2478 = vmatpush.msrb.mxu1 %v2292_v59  ;;  %2857 = vmatpush.msra.mxu0 %v2852_v26  ;;  %833 = vst.msk [vmem:[#allocation19 + $0x10] sm:$0x1] %vm830_vm4, %v816_v7  ;;  %v2845_v59 = vld [vmem:[#allocation13 + $0x40] sm:$0xff] }
 0x30b   :  { %v2219_v18 = vadd.f32 %v5689_v31, %v2218_v13  ;;  %v2252_v13 = vld [vmem:[#allocation14 + $0xb0] sm:$0xff] }
 0x30c   :  { %2479 = vmatpush.msrb.mxu1 %v2288_v8  ;;  %2858 = vmatpush.msra.mxu0 %v2851_v21  ;;  %v2256_v8 = vld [vmem:[#allocation14 + $0xd0] sm:$0xff] }
 0x30d   :  { %v2223_v56 = vsel %vm2222_vm3, %v5689_v31, %v2219_v18  ;;  %v2272_v31 = vld [vmem:[#allocation14 + $0x150] sm:$0xff] }
 0x30e   :  { %2480 = vmatpush.msrb.mxu1 %v2284_v2  ;;  %2859 = vmatpush.msra.mxu0 %v2850_v0  ;;  %v805_v1 = vpop.permute.xlu0 %804  ;;  %v2228_v32 = vsel %vm2225_vm5, %v2227_v51, %v2223_v56  ;;  %v2843_v21 = vld [vmem:[#allocation13 + $0x30] sm:$0xff]  ;;  %v2841_v0 = vld [vmem:[#allocation13 + $0x20] sm:$0xff]  ;;  %v2838_v51 = vld [vmem:[#allocation13 + $0x8] sm:$0xff] }
 0x30f   :  { %v802_v4 = vpop.permute.xlu1 %801  ;;  %v819_v38 = vperm.slane %v805_v1, %v7148_v33  ;;  %v2248_v2 = vld [vmem:[#allocation14 + $0x90] sm:$0xff] }
 0x310   :  { %2481 = vmatpush.msrb.mxu1 %v2280_v60  ;;  %2860 = vmatpush.msra.mxu0 %v2849_v45  ;;  %v818_v25 = vperm.slane %v802_v4, %v7148_v33  ;;  %v2244_v18 = vld [vmem:[#allocation14 + $0x70] sm:$0xff]  ;;  %v2610_v4 = vld [vmem:[#allocation17 + $0x78] sm:$0xff] }
 0x311   :  { %2414 = vmatmul.f32.vlgmr.msra.gmra.mxu1 %v1928_v11  ;;  %2454 = vmatmul.f32.vlgmr.msra.gmra.mxu3 %v2228_v32  ;;  %836 = vst.msk [vmem:[#allocation19 + $0x28] sm:$0x1] %vm830_vm4, %v819_v38  ;;  %v2260_v11 = vld [vmem:[#allocation14 + $0xf0] sm:$0xff]  ;;  %v3021_v38 = vld [vmem:[#allocation16 + $0x1e8] sm:$0xff] }
 0x312   :  { %2474 = vmatmul.f32.vlgmr.msrb.gmra.mxu0 %v2228_v32  ;;  %2482 = vmatpush.msrb.mxu1 %v2276_v37  ;;  %835 = vst.msk [vmem:[#allocation19 + $0x20] sm:$0x1] %vm830_vm4, %v818_v25  ;;  %v2240_v60 = vld [vmem:[#allocation14 + $0x50] sm:$0xff]  ;;  %v2837_v37 = vld [vmem:[#allocation13] sm:$0xff] }
 0x313   :  { %2514 = vmatmul.f32.vlgmr.msrb.gmra.mxu2 %v2228_v32  ;;  %2861 = vmatpush.msra.mxu0 %v2848_v24  ;;  %v2839_v45 = vld [vmem:[#allocation13 + $0x10] sm:$0xff] }
 0x314   :  { %2483 = vmatpush.msrb.mxu1 %v2272_v31  ;;  %v2236_v56 = vld [vmem:[#allocation14 + $0x30] sm:$0xff]  ;;  %2611 = vmatpush.msrb.mxu3 %v2610_v4  ;;  %v3004_v4 = vld [vmem:[#allocation16 + $0x160] sm:$0xff] }
 0x315   :  { %2862 = vmatpush.msra.mxu0 %v2847_v27  ;;  %v2232_v1 = vld [vmem:[#allocation14 + $0x10] sm:$0xff]  ;;  %3044 = vmatpush.msra.mxu2 %v3021_v38  ;;  %v2989_v38 = vld [vmem:[#allocation16 + $0xe8] sm:$0xff] }
 0x316   :  { %2484 = vmatpush.msrb.mxu1 %v2268_v41 }
 0x317   :  { %2863 = vmatpush.msra.mxu0 %v2846_v14  ;;  %v811_v26 = vpop.permute.xlu1 %810 }
 0x318   :  { %2485 = vmatpush.msrb.mxu1 %v2264_v48  ;;  %v821_v7 = vperm.slane %v811_v26, %v7148_v33 }
 0x319   :  { %2864 = vmatpush.msra.mxu0 %v2845_v59 }
 0x31a   :  { %2486 = vmatpush.msrb.mxu1 %v2260_v11  ;;  %838 = vst.msk [vmem:[#allocation19 + $0x38] sm:$0x1] %vm830_vm4, %v821_v7  ;;  %v3017_v7 = vld [vmem:[#allocation16 + $0x1c8] sm:$0xff] }
 0x31b   :  { %2865 = vmatpush.msra.mxu0 %v2844_v20  ;;  %3045 = vmatpush.msra.mxu2 %v3017_v7  ;;  %v2597_v7 = vld [vmem:[#allocation17 + $0x10] sm:$0xff] }
 0x31c   :  { %2487 = vmatpush.msrb.mxu1 %v2256_v8  ;;  %v2607_v8 = vld [vmem:[#allocation17 + $0x60] sm:$0xff] }
 0x31d   :  { %2866 = vmatpush.msra.mxu0 %v2843_v21  ;;  %v3009_v21 = vld [vmem:[#allocation16 + $0x188] sm:$0xff] }
 0x31e   :  { %2488 = vmatpush.msrb.mxu1 %v2252_v13  ;;  %v3016_v13 = vld [vmem:[#allocation16 + $0x1c0] sm:$0xff] }
 0x31f   :  { %2867 = vmatpush.msra.mxu0 %v2842_v12  ;;  %v3001_v12 = vld [vmem:[#allocation16 + $0x148] sm:$0xff] }
 0x320   :  { %2489 = vmatpush.msrb.mxu1 %v2248_v2  ;;  %v3019_v2 = vld [vmem:[#allocation16 + $0x1d8] sm:$0xff] }
 0x321   :  { %2868 = vmatpush.msra.mxu0 %v2841_v0  ;;  %v2604_v0 = vld [vmem:[#allocation17 + $0x48] sm:$0xff] }
 0x322   :  { %2490 = vmatpush.msrb.mxu1 %v2244_v18  ;;  %v3012_v18 = vld [vmem:[#allocation16 + $0x1a0] sm:$0xff] }
 0x323   :  { %2869 = vmatpush.msra.mxu0 %v2840_v15  ;;  %v2997_v15 = vld [vmem:[#allocation16 + $0x128] sm:$0xff] }
 0x324   :  { %2491 = vmatpush.msrb.mxu1 %v2240_v60  ;;  %v3015_v60 = vld [vmem:[#allocation16 + $0x1b8] sm:$0xff] }
 0x325   :  { %2870 = vmatpush.msra.mxu0 %v2839_v45  ;;  %v2603_v45 = vld [vmem:[#allocation17 + $0x40] sm:$0xff] }
 0x326   :  { %2492 = vmatpush.msrb.mxu1 %v2236_v56  ;;  %v3008_v56 = vld [vmem:[#allocation16 + $0x180] sm:$0xff] }
 0x327   :  { %2871 = vmatpush.msra.mxu0 %v2838_v51  ;;  %v2993_v51 = vld [vmem:[#allocation16 + $0x108] sm:$0xff] }
 0x328   :  { %2493 = vmatpush.msrb.mxu1 %v2232_v1  ;;  %v3011_v1 = vld [vmem:[#allocation16 + $0x198] sm:$0xff] }
 0x329   :  { %2872 = vmatpush.msra.mxu0 %v2837_v37  ;;  %2494 = vmatmul.f32.vlgmr.msrb.gmra.mxu1 %v2228_v32  ;;  %v2602_v37 = vld [vmem:[#allocation17 + $0x38] sm:$0xff] }
 0x32a   :  { %2873 = vmatmul.f32.vlgmr.msra.gmra.mxu0 %v2228_v32  ;;  %3024 = vmatpush.msra.mxu1 %v7080_v36 }
 0x32b   :  { %3084 = vmatpush.msrb.mxu0 %v7083_v29 }
 0x32c   :  { %3025 = vmatpush.msra.mxu1 %v3016_v13 }
 0x32d   :  { %3085 = vmatpush.msrb.mxu0 %v3019_v2  ;;  %v1967_v2 = vld [vmem:[#allocation5 + $0x10] sm:$0xff] }
 0x32e   :  { %3026 = vmatpush.msra.mxu1 %v3012_v18 }
 0x32f   :  { %3086 = vmatpush.msrb.mxu0 %v3015_v60 }
 0x330   :  { %3027 = vmatpush.msra.mxu1 %v3008_v56 }
 0x331   :  { %3087 = vmatpush.msrb.mxu0 %v3011_v1  ;;  %v2976_v1 = vld [vmem:[#allocation16 + $0x80] sm:$0xff] }
 0x332   :  { %3028 = vmatpush.msra.mxu1 %v3004_v4 }
 0x34f   :  { %v1360_v24 = vpop.xlane.xlu0 %1359 }
 0x350   :  { %v1441_v25 = vadd.f32 %v6833_v19, %v1360_v24  ;;  %v3007_v24 = vld [vmem:[#allocation16 + $0x178] sm:$0xff] }
 0x351   :  { %v1364_v31 = vpop.xlane.xlu1 %1363  ;;  %3088 = vmatpush.msrb.mxu0 %v3007_v24  ;;  %v2979_v24 = vld [vmem:[#allocation16 + $0x98] sm:$0xff] }
 0x352   :  { %v1443_v27 = vadd.f32 %v7030_v55, %v1364_v31  ;;  %v1362_v41 = vpop.xlane.xlu2 %1361  ;;  %1458 = vperm.xlu2 %5578, %v1441_v25   ;;  %v2601_v25 = vld [vmem:[#allocation17 + $0x30] sm:$0xff]  ;;  %v3000_v31 = vld [vmem:[#allocation16 + $0x140] sm:$0xff] }
 0x353   :  { %v1442_v14 = vadd.f32 %v6815_v23, %v1362_v41  ;;  %v2609_v23 = vld [vmem:[#allocation17 + $0x70] sm:$0xff]  ;;  %3029 = vmatpush.msra.mxu1 %v3000_v31  ;;  %v3003_v41 = vld [vmem:[#allocation16 + $0x158] sm:$0xff] }
 0x354   :  { %1464 = vperm.xlu1 %5579, %v1443_v27   ;;  %2612 = vmatpush.msrb.mxu3 %v2609_v23  ;;  %v2985_v27 = vld [vmem:[#allocation16 + $0xc8] sm:$0xff]  ;;  %v2991_v23 = vld [vmem:[#allocation16 + $0xf8] sm:$0xff] }
 0x355   :  { %1461 = vperm.xlu0 %5577, %v1442_v14   ;;  %3089 = vmatpush.msrb.mxu0 %v3003_v41  ;;  %v2600_v14 = vld [vmem:[#allocation17 + $0x28] sm:$0xff] }
 0x357   :  { %v1368_v32 = vpop.xlane.xlu0 %1367 }
 0x358   :  { %v1445_v36 = vadd.f32 %v6830_v9, %v1368_v32  ;;  %v2608_v9 = vld [vmem:[#allocation17 + $0x68] sm:$0xff]  ;;  %v2996_v32 = vld [vmem:[#allocation16 + $0x120] sm:$0xff] }
 0x359   :  { %v1370_v11 = vpop.xlane.xlu1 %1369  ;;  %2613 = vmatpush.msrb.mxu3 %v2608_v9  ;;  %3030 = vmatpush.msra.mxu1 %v2996_v32  ;;  %v2984_v9 = vld [vmem:[#allocation16 + $0xc0] sm:$0xff]  ;;  %v2957_v32 = vld [vmem:[#allocation14 + $0x1e8] sm:$0xff] }
 0x35a   :  { %v1366_v29 = vpop.xlane.xlu2 %1365  ;;  %v1446_v55 = vadd.f32 %v6855_v57, %v1370_v11  ;;  %v5900_v57 = vld [vmem:[#allocation16 + $0x168] sm:$0xff] }
 0x35b   :  { %v1444_v48 = vadd.f32 %v6843_v44, %v1366_v29  ;;  %v3013_v44 = vld [vmem:[#allocation16 + $0x1a8] sm:$0xff]  ;;  %2614 = vmatpush.msrb.mxu3 %v2607_v8  ;;  %v2999_v29 = vld [vmem:[#allocation16 + $0x138] sm:$0xff] }
 0x35c   :  { %1470 = vperm.xlu1 %5579, %v1445_v36   ;;  %3046 = vmatpush.msra.mxu2 %v3013_v44  ;;  %v2981_v36 = vld [vmem:[#allocation16 + $0xa8] sm:$0xff] }
 0x35d   :  { %1467 = vperm.xlu2 %5578, %v1444_v48   ;;  %3090 = vmatpush.msrb.mxu0 %v2999_v29  ;;  %v2599_v48 = vld [vmem:[#allocation17 + $0x20] sm:$0xff]  ;;  %v2977_v11 = vld [vmem:[#allocation16 + $0x88] sm:$0xff]  ;;  %v2975_v29 = vld [vmem:[#allocation16 + $0x78] sm:$0xff] }
 0x35e   :  { %3047 = vmatpush.msra.mxu2 %v3009_v21  ;;  %v2969_v44 = vld [vmem:[#allocation16 + $0x48] sm:$0xff]  ;;  %v2987_v21 = vld [vmem:[#allocation16 + $0xd8] sm:$0xff] }
 0x35f   :  { %v1374_v59 = vpop.xlane.xlu0 %1373  ;;  %v1965_v8 = vld [vmem:[#allocation5] sm:$0xff] }
 0x360   :  { %v1448_v19 = vadd.f32 %v6861_v30, %v1374_v59  ;;  %v5899_v30 = vld [vmem:[#allocation17 + $0x58] sm:$0xff]  ;;  %3048 = vmatpush.msra.mxu2 %v5900_v57  ;;  %v2992_v59 = vld [vmem:[#allocation16 + $0x100] sm:$0xff] }
 0x361   :  { %2615 = vmatpush.msrb.mxu3 %v5899_v30  ;;  %3031 = vmatpush.msra.mxu1 %v2992_v59  ;;  %v2596_v30 = vld [vmem:[#allocation17 + $0x8] sm:$0xff]  ;;  %v2980_v57 = vld [vmem:[#allocation16 + $0xa0] sm:$0xff]  ;;  %v3018_v59 = vld [vmem:[#allocation16 + $0x1d0] sm:$0xff] }
 0x362   :  { %v1372_v26 = vpop.xlane.xlu2 %1371  ;;  %3049 = vmatpush.msra.mxu2 %v3001_v12  ;;  %v1966_v12 = vld [vmem:[#allocation5 + $0x8] sm:$0xff] }
 0x363   :  { %v1447_v20 = vadd.f32 %v6840_v6, %v1372_v26  ;;  %v2605_v6 = vld [vmem:[#allocation17 + $0x50] sm:$0xff]  ;;  %v2598_v26 = vld [vmem:[#allocation17 + $0x18] sm:$0xff] }
 0x364   :  { %1479 = vperm.xlu1 %5579, %v1448_v19   ;;  %2616 = vmatpush.msrb.mxu3 %v2605_v6  ;;  %v2995_v19 = vld [vmem:[#allocation16 + $0x118] sm:$0xff]  ;;  %v2965_v6 = vld [vmem:[#allocation16 + $0x28] sm:$0xff] }
 0x365   :  { %1476 = vperm.xlu0 %5577, %v1447_v20   ;;  %1473 = vperm.xlu2 %5578, %v1446_v55   ;;  %v2988_v55 = vld [vmem:[#allocation16 + $0xe0] sm:$0xff]  ;;  %v2973_v20 = vld [vmem:[#allocation16 + $0x68] sm:$0xff] }
 0x366   :  { %2617 = vmatpush.msrb.mxu3 %v2604_v0  ;;  %3050 = vmatpush.msra.mxu2 %v2997_v15  ;;  %v2983_v0 = vld [vmem:[#allocation16 + $0xb8] sm:$0xff] }
 0x367   :  { %3091 = vmatpush.msrb.mxu0 %v2995_v19  ;;  %3032 = vmatpush.msra.mxu1 %v2988_v55  ;;  %v2953_v55 = vld [vmem:[#allocation14 + $0x1c8] sm:$0xff] }
 0x368   :  { %2618 = vmatpush.msrb.mxu3 %v2603_v45  ;;  %3051 = vmatpush.msra.mxu2 %v2993_v51  ;;  %v2595_v51 = vld [vmem:[#allocation17] sm:$0xff] }
 0x369   :  { %3092 = vmatpush.msrb.mxu0 %v2991_v23  ;;  %3033 = vmatpush.msra.mxu1 %v2984_v9  ;;  %v2971_v23 = vld [vmem:[#allocation16 + $0x58] sm:$0xff]  ;;  %v7227_v9 = vld [vmem:[%s7877_s8] sm:$0xf] }
 0x36a   :  { %2619 = vmatpush.msrb.mxu3 %v2602_v37  ;;  %3052 = vmatpush.msra.mxu2 %v2989_v38  ;;  %v2961_v38 = vld [vmem:[#allocation16 + $0x8] sm:$0xff] }
 0x36b   :  { %3093 = vmatpush.msrb.mxu0 %v2987_v21  ;;  %3034 = vmatpush.msra.mxu1 %v2980_v57  ;;  %v2949_v21 = vld [vmem:[#allocation14 + $0x1a8] sm:$0xff]  ;;  %v5901_v57 = vld [vmem:[#allocation5 + $0x18] sm:$0xff] }
 0x36c   :  { %2620 = vmatpush.msrb.mxu3 %v2601_v25  ;;  %3053 = vmatpush.msra.mxu2 %v2985_v27  ;;  %v3022_v25 = vld [vmem:[#allocation16 + $0x1f0] sm:$0xff] }
 0x36d   :  { %3094 = vmatpush.msrb.mxu0 %v2983_v0  ;;  %3035 = vmatpush.msra.mxu1 %v2976_v1  ;;  %v2964_v0 = vld [vmem:[#allocation16 + $0x20] sm:$0xff] }
 0x36e   :  { %2621 = vmatpush.msrb.mxu3 %v2600_v14  ;;  %3054 = vmatpush.msra.mxu2 %v2981_v36  ;;  %v2972_v36 = vld [vmem:[#allocation16 + $0x60] sm:$0xff] }
 0x36f   :  { %3095 = vmatpush.msrb.mxu0 %v2979_v24  ;;  %3036 = vmatpush.msra.mxu1 %v2972_v36 }
 0x370   :  { %2622 = vmatpush.msrb.mxu3 %v2599_v48  ;;  %3055 = vmatpush.msra.mxu2 %v2977_v11  ;;  %v1969_v48 = vld [vmem:[#allocation5 + $0x20] sm:$0xff] }
 0x371   :  { %3096 = vmatpush.msrb.mxu0 %v2975_v29  ;;  %v2959_v29 = vld [vmem:[#allocation14 + $0x1f8] sm:$0xff] }
 0x372   :  { %2623 = vmatpush.msrb.mxu3 %v2598_v26  ;;  %3056 = vmatpush.msra.mxu2 %v2973_v20  ;;  %v2968_v20 = vld [vmem:[#allocation16 + $0x40] sm:$0xff] }
 0x373   :  { %3037 = vmatpush.msra.mxu1 %v2968_v20  ;;  %3097 = vmatpush.msrb.mxu0 %v2971_v23  ;;  %v2955_v20 = vld [vmem:[#allocation14 + $0x1d8] sm:$0xff]  ;;  %v2520_v23 = vperm.slane %v7227_v9, 0 }
 0x374   :  { %2624 = vmatpush.msrb.mxu3 %v2597_v7  ;;  %3057 = vmatpush.msra.mxu2 %v2969_v44 }
 0x375   :  { %3038 = vmatpush.msra.mxu1 %v2964_v0 }
 0x376   :  { %2625 = vmatpush.msrb.mxu3 %v2596_v30  ;;  %3058 = vmatpush.msra.mxu2 %v2965_v6 }
 0x378   :  { %2626 = vmatpush.msrb.mxu3 %v2595_v51  ;;  %3059 = vmatpush.msra.mxu2 %v2961_v38  ;;  %v2521_v51 = vperm.slane %v7227_v9, 1  ;;  %v2963_v38 = vld [vmem:[#allocation16 + $0x18] sm:$0xff] }
 0x37a   :  { %3064 = vmatpush.msra.mxu3 %v3022_v25  ;;  %3124 = vmatpush.msrb.mxu2 %v2957_v32 }
 0x37c   :  { %3065 = vmatpush.msra.mxu3 %v3018_v59  ;;  %3125 = vmatpush.msrb.mxu2 %v2953_v55  ;;  %v2952_v59 = vld [vmem:[#allocation14 + $0x1c0] sm:$0xff] }
 0x37e   :  { %3126 = vmatpush.msrb.mxu2 %v2949_v21  ;;  %v2998_v21 = vld [vmem:[#allocation16 + $0x130] sm:$0xff] }
 0x385   :  { %v7212_v13 = vpop.f32.mrf.mxu1 }
 0x386   :  { %v7214_v18 = vpop.f32.mrf.mxu0  ;;  %v1981_v15 = vperm.slane %v7212_v13, 0  ;;  %v1974_v60 = vrot.slane %v7212_v13, 1  ;;  %v1975_v45 = vrot.slane %v7212_v13, 2  ;;  %v1976_v56 = vrot.slane %v7212_v13, 3 }
 0x387   :  { %v1977_v37 = vrot.slane %v7212_v13, 4  ;;  %v1978_v4 = vrot.slane %v7212_v13, 5 }
 0x388   :  { %v1997_v31 = vadd.f32 %v1981_v15, %v1965_v8  ;;  %v1982_v27 = vperm.slane %v1974_v60, 0  ;;  %v1983_v41 = vperm.slane %v1975_v45, 0  ;;  %v1984_v14 = vperm.slane %v1976_v56, 0  ;;  %v3014_v8 = vld [vmem:[#allocation16 + $0x1b0] sm:$0xff]  ;;  %v2967_v15 = vld [vmem:[#allocation16 + $0x38] sm:$0xff]  ;;  %v2945_v56 = vld [vmem:[#allocation14 + $0x188] sm:$0xff] }
 0x389   :  { %v1985_v26 = vperm.slane %v1977_v37, 0  ;;  %v1986_v44 = vperm.slane %v1978_v4, 0  ;;  %v7235_v60 = vld [vmem:[%s7879_s10] ss:$0 sm:$0xff]  ;;  %3066 = vmatpush.msra.mxu3 %v3014_v8  ;;  %v3010_v45 = vld [vmem:[#allocation16 + $0x190] sm:$0xff]  ;;  %v1980_v37 = vrot.slane %v7212_v13, 7  ;;  %3098 = vmatpush.msrb.mxu0 %v2967_v15 }
 0x38a   :  { %5692 = vtanh.f32 %v1997_v31  ;;  %v1998_v11 = vadd.f32 %v1982_v27, %v1966_v12  ;;  %v1999_v19 = vadd.f32 %v1983_v41, %v1967_v2  ;;  %v2000_v6 = vadd.f32 %v5901_v57, %v1984_v14  ;;  %v1970_v12 = vld [vmem:[#allocation5 + $0x28] sm:$0xff]  ;;  %v2960_v4 = vld [vmem:[#allocation16] sm:$0xff]  ;;  %3127 = vmatpush.msrb.mxu2 %v2945_v56  ;;  %v2941_v41 = vld [vmem:[#allocation14 + $0x168] sm:$0xff] }
 0x38b   :  { %v7222_v7 = vpop.f32.mrf.mxu3  ;;  %v1979_v2 = vrot.slane %v7212_v13, 6  ;;  %v2001_v1 = vadd.f32 %v1985_v26, %v1969_v48  ;;  %v2002_v25 = vadd.f32 %v1986_v44, %v1970_v12  ;;  %3067 = vmatpush.msra.mxu3 %v3010_v45  ;;  %v3006_v31 = vld [vmem:[#allocation16 + $0x170] sm:$0xff]  ;;  %v2956_v27 = vld [vmem:[#allocation14 + $0x1e0] sm:$0xff]  ;;  %3039 = vmatpush.msra.mxu1 %v2960_v4  ;;  %v1988_v55 = vperm.slane %v1980_v37, 0  ;;  %v2933_v45 = vld [vmem:[#allocation14 + $0x128] sm:$0xff] }
 0x38c   :  { %v7229_v30 = vpop.f32.mrf.mxu2  ;;  %5694 = vtanh.f32 %v1998_v11  ;;  %3099 = vmatpush.msrb.mxu0 %v2963_v38  ;;  %v3002_v48 = vld [vmem:[#allocation16 + $0x150] sm:$0xff]  ;;  %v2937_v11 = vld [vmem:[#allocation14 + $0x148] sm:$0xff]  ;;  %3128 = vmatpush.msrb.mxu2 %v2941_v41  ;;  %v1972_v8 = vld [vmem:[#allocation5 + $0x38] sm:$0xff] }
 0x38d   :  { %5696 = vtanh.f32 %v1999_v19  ;;  %v1987_v36 = vperm.slane %v1979_v2, 0  ;;  %3068 = vmatpush.msra.mxu3 %v3006_v31  ;;  %3104 = vmatpush.msrb.mxu1 %v2956_v27  ;;  %v5902_v2 = vld [vmem:[#allocation5 + $0x30] sm:$0xff]  ;;  %v2948_v15 = vld [vmem:[#allocation14 + $0x1a0] sm:$0xff]  ;;  %v2994_v37 = vld [vmem:[#allocation16 + $0x110] sm:$0xff] }
 0x38e   :  { %5698 = vtanh.f32 %v2000_v6  ;;  %3164 = vmatpush.msra.mxu0 %v2959_v29  ;;  %3129 = vmatpush.msrb.mxu2 %v2937_v11  ;;  %v2929_v31 = vld [vmem:[#allocation14 + $0x108] sm:$0xff] }
 0x38f   :  { %v2475_v24 = vpop.f32.mrf.mxu0  ;;  %5700 = vtanh.f32 %v2001_v1  ;;  %3069 = vmatpush.msra.mxu3 %v3002_v48  ;;  %v2003_v0 = vadd.f32 %v5902_v2, %v1987_v36  ;;  %3105 = vmatpush.msrb.mxu1 %v2952_v59  ;;  %v2951_v1 = vld [vmem:[#allocation14 + $0x1b8] sm:$0xff]  ;;  %v2940_v36 = vld [vmem:[#allocation14 + $0x160] sm:$0xff]  ;;  %v2925_v11 = vld [vmem:[#allocation14 + $0xe8] sm:$0xff]  ;;  %v2415_v2 = vpop.f32.mrf.mxu1 }
 0x390   :  { %v5693_v14 = vpop.eup %5692  ;;  %v2476_v32 = vadd.f32 %v2475_v24, %v7214_v18  ;;  %5702 = vtanh.f32 %v2002_v25  ;;  %3165 = vmatpush.msra.mxu0 %v2955_v20  ;;  %v2004_v24 = vadd.f32 %v1988_v55, %v1972_v8  ;;  %v2944_v25 = vld [vmem:[#allocation14 + $0x180] sm:$0xff]  ;;  %3130 = vmatpush.msrb.mxu2 %v2933_v45  ;;  %v2939_v8 = vld [vmem:[#allocation14 + $0x158] sm:$0xff]  ;;  %v2978_v45 = vld [vmem:[#allocation16 + $0x90] sm:$0xff] }
 0x391   :  { %v2017_v13 = vmul.f32 %v5693_v14, %v7235_v60  ;;  %3070 = vmatpush.msra.mxu3 %v2998_v21  ;;  %3106 = vmatpush.msrb.mxu1 %v2948_v15  ;;  %v2990_v14 = vld [vmem:[#allocation16 + $0xf0] sm:$0xff]  ;;  %v2936_v20 = vld [vmem:[#allocation14 + $0x140] sm:$0xff]  ;;  %v2935_v15 = vld [vmem:[#allocation14 + $0x138] sm:$0xff] }
 0x392   :  { %v5695_v19 = vpop.eup %5694  ;;  %v2529_v26 = vadd.f32 %v2521_v51, %v2476_v32  ;;  %v2523_v51 = vperm.slane %v7227_v9, 3  ;;  %3166 = vmatpush.msra.mxu0 %v2951_v1  ;;  %3131 = vmatpush.msrb.mxu2 %v2929_v31  ;;  %v2913_v1 = vld [vmem:[#allocation14 + $0x88] sm:$0xff]  ;;  %v2924_v31 = vld [vmem:[#allocation14 + $0xe0] sm:$0xff] }
 0x393   :  { %v5697_v18 = vpop.eup %5696  ;;  %2025 = vadd.xlane.f32.xlu2 %v2017_v13  ;;  %v2018_v44 = vmul.f32 %v5695_v19, %v7235_v60  ;;  %3071 = vmatpush.msra.mxu3 %v2994_v37  ;;  %v2943_v19 = vld [vmem:[#allocation14 + $0x178] sm:$0xff] }
 0x394   :  { %v5541_v57 = vmul.f32 -1.442695, %v2529_v26  ;;  %v2455_v6 = vpop.f32.mrf.mxu3  ;;  %v2019_v12 = vmul.f32 %v5697_v18, %v7235_v60  ;;  %v5699_v4 = vpop.eup %5698  ;;  %3107 = vmatpush.msrb.mxu1 %v2944_v25  ;;  %3132 = vmatpush.msrb.mxu2 %v2925_v11 }
 0x395   :  { %v2456_v56 = vadd.f32 %v2455_v6, %v7222_v7  ;;  %2027 = vadd.xlane.f32.xlu0 %v2018_v44  ;;  %v2947_v7 = vld [vmem:[#allocation14 + $0x198] sm:$0xff]  ;;  %v5701_v32 = vpop.eup %5700  ;;  %v2020_v59 = vmul.f32 %v5699_v4, %v7235_v60  ;;  %3072 = vmatpush.msra.mxu3 %v2990_v14  ;;  %v2921_v44 = vld [vmem:[#allocation14 + $0xc8] sm:$0xff]  ;;  %v2932_v6 = vld [vmem:[#allocation14 + $0x120] sm:$0xff] }
 0x396   :  { %5704 = vpow2.f32 %v5541_v57  ;;  %v2515_v38 = vpop.f32.mrf.mxu2  ;;  %2029 = vadd.xlane.f32.xlu1 %v2019_v12  ;;  %v5703_v29 = vpop.eup %5702  ;;  %3167 = vmatpush.msra.mxu0 %v2947_v7  ;;  %v2021_v55 = vmul.f32 %v5701_v32, %v7235_v60  ;;  %v2982_v57 = vld [vmem:[#allocation16 + $0xb0] sm:$0xff]  ;;  %v2909_v7 = vld [vmem:[#allocation14 + $0x68] sm:$0xff]  ;;  %v2927_v14 = vld [vmem:[#allocation14 + $0xf8] sm:$0xff] }
 0x397   :  { %v2528_v27 = vadd.f32 %v2520_v23, %v2456_v56  ;;  %v2516_v41 = vadd.f32 %v2515_v38, %v7229_v30  ;;  %5706 = vtanh.f32 %v2003_v0  ;;  %v2986_v30 = vld [vmem:[#allocation16 + $0xd0] sm:$0xff]  ;;  %3108 = vmatpush.msrb.mxu1 %v2940_v36  ;;  %v2022_v23 = vmul.f32 %v5703_v29, %v7235_v60  ;;  %v2917_v0 = vld [vmem:[#allocation14 + $0xa8] sm:$0xff]  ;;  %3133 = vmatpush.msrb.mxu2 %v2921_v44  ;;  %v2928_v56 = vld [vmem:[#allocation14 + $0x100] sm:$0xff] }
 0x398   :  { %5708 = vtanh.f32 %v2004_v24  ;;  %3168 = vmatpush.msra.mxu0 %v2943_v19  ;;  %3073 = vmatpush.msra.mxu3 %v2986_v30  ;;  %v2931_v38 = vld [vmem:[#allocation14 + $0x118] sm:$0xff]  ;;  %v2974_v24 = vld [vmem:[#allocation16 + $0x70] sm:$0xff]  ;;  %v5587_v36 = vld [vmem:[%s7874_s5] ss:$0 sm:$0xff]  ;;  %v2522_v30 = vperm.slane %v7227_v9, 2 }
 0x399   :  { %v5540_v13 = vmul.f32 -1.442695, %v2528_v27  ;;  %v2531_v48 = vadd.f32 %v2523_v51, %v2516_v41  ;;  %3109 = vmatpush.msrb.mxu1 %v2936_v20  ;;  %3134 = vmatpush.msrb.mxu2 %v2917_v0  ;;  %v2970_v29 = vld [vmem:[#allocation16 + $0x50] sm:$0xff]  ;;  %v2919_v44 = vld [vmem:[#allocation14 + $0xb8] sm:$0xff]  ;;  %v2897_v0 = vld [vmem:[#allocation14 + $0x8] sm:$0xff] }
 0x39a   :  { %3169 = vmatpush.msra.mxu0 %v2939_v8  ;;  %3074 = vmatpush.msra.mxu3 %v2982_v57  ;;  %v2915_v9 = vld [vmem:[#allocation14 + $0x98] sm:$0xff] }
 0x39b   :  { %5710 = vpow2.f32 %v5540_v13  ;;  %v5542_v26 = vmul.f32 -1.442695, %v2531_v48  ;;  %2031 = vadd.xlane.f32.xlu2 %v2020_v59  ;;  %3110 = vmatpush.msrb.mxu1 %v2932_v6  ;;  %v2920_v13 = vld [vmem:[#allocation14 + $0xc0] sm:$0xff]  ;;  %v2923_v59 = vld [vmem:[#allocation14 + $0xd8] sm:$0xff]  ;;  %v2962_v6 = vld [vmem:[#allocation16 + $0x10] sm:$0xff] }
 0x39c   :  { %v5705_v18 = vpop.eup %5704  ;;  %3170 = vmatpush.msra.mxu0 %v2935_v15  ;;  %3075 = vmatpush.msra.mxu3 %v2978_v45 }
 0x39d   :  { %v7250_v21 = vadd.f32 1.0, %v5705_v18  ;;  %5712 = vpow2.f32 %v5542_v26  ;;  %2033 = vadd.xlane.f32.xlu0 %v2021_v55  ;;  %v5707_v12 = vpop.eup %5706  ;;  %3111 = vmatpush.msrb.mxu1 %v2928_v56  ;;  %v2966_v26 = vld [vmem:[#allocation16 + $0x30] sm:$0xff]  ;;  %v2916_v55 = vld [vmem:[#allocation14 + $0xa0] sm:$0xff] }
 0x39e   :  { %2035 = vadd.xlane.f32.xlu1 %v2022_v23  ;;  %v5709_v51 = vpop.eup %5708  ;;  %v2023_v4 = vmul.f32 %v5707_v12, %v7235_v60  ;;  %3135 = vmatpush.msrb.mxu2 %v2913_v1  ;;  %v2901_v23 = vld [vmem:[#allocation14 + $0x28] sm:$0xff]  ;;  %v2912_v12 = vld [vmem:[#allocation14 + $0x80] sm:$0xff] }
 0x39f   :  { %5714 = vrcp.f32 %v7250_v21  ;;  %v2024_v41 = vmul.f32 %v5709_v51, %v7235_v60  ;;  %3171 = vmatpush.msra.mxu0 %v2931_v38  ;;  %3076 = vmatpush.msra.mxu3 %v2974_v24  ;;  %v2905_v60 = vld [vmem:[#allocation14 + $0x48] sm:$0xff]  ;;  %v2908_v51 = vld [vmem:[#allocation14 + $0x60] sm:$0xff]  ;;  %vm2560_vm7 = vweird.f32 %v7250_v21  ;;  %v2566_v38 = vand.u32 2147483648, %v7250_v21 }
 0x3a0   :  { %3112 = vmatpush.msrb.mxu1 %v2924_v31  ;;  %3136 = vmatpush.msrb.mxu2 %v2909_v7 }
 0x3a1   :  { %v5711_v37 = vpop.eup %5710  ;;  %3172 = vmatpush.msra.mxu0 %v2927_v14  ;;  %3077 = vmatpush.msra.mxu3 %v2970_v29  ;;  %v2564_v14 = vand.u32 2147483647, %v7250_v21  ;;  %v2907_v29 = vld [vmem:[#allocation14 + $0x58] sm:$0xff] }
 0x3a2   :  { %v7254_v25 = vadd.f32 1.0, %v5711_v37  ;;  %3113 = vmatpush.msrb.mxu1 %v2920_v13  ;;  %3137 = vmatpush.msrb.mxu2 %v2905_v60  ;;  %v2911_v37 = vld [vmem:[#allocation14 + $0x78] sm:$0xff] }
 0x3a3   :  { %v5713_v27 = vpop.eup %5712  ;;  %2037 = vadd.xlane.f32.xlu2 %v2023_v4  ;;  %3173 = vmatpush.msra.mxu0 %v2923_v59  ;;  %v2900_v59 = vld [vmem:[#allocation14 + $0x20] sm:$0xff]  ;;  %vm2565_vm11 = vcmp.eq.f32.partialorder %v2564_v14, 8.507059e+37 }
 0x3a4   :  { %5716 = vrcp.f32 %v7254_v25  ;;  %v7258_v32 = vadd.f32 1.0, %v5713_v27  ;;  %3078 = vmatpush.msra.mxu3 %v2966_v26  ;;  %3114 = vmatpush.msrb.mxu1 %v2916_v55  ;;  %v2904_v27 = vld [vmem:[#allocation14 + $0x40] sm:$0xff]  ;;  %v2547_v60 = vand.u32 2147483648, %v7254_v25  ;;  %v2567_v26 = vor.u32 1.1754944e-38, %v2566_v38 }
 0x3a5   :  { %v7263_v48 = vpop.eup %5714  ;;  %2039 = vadd.xlane.f32.xlu0 %v2024_v41  ;;  %3138 = vmatpush.msrb.mxu2 %v2901_v23  ;;  %vm2541_vm10 = vweird.f32 %v7254_v25  ;;  %v2899_v23 = vld [vmem:[#allocation14 + $0x18] sm:$0xff] }
 0x3a6   :  { %v2556_v11 = vmul.f32 %v7263_v48, %v7250_v21  ;;  %5718 = vrcp.f32 %v7258_v32  ;;  %v2495_v19 = vpop.f32.mrf.mxu1  ;;  %3174 = vmatpush.msra.mxu0 %v2919_v44  ;;  %vm2561_vm6 = vweird.f32 %v7263_v48  ;;  %3079 = vmatpush.msra.mxu3 %v2962_v6  ;;  %vm2580_vm15 = vweird.f32 %v7258_v32 }
 0x3a7   :  { %v2496_v20 = vadd.f32 %v2495_v19, %v2415_v2  ;;  %v2874_v18 = vpop.f32.mrf.mxu0  ;;  %3115 = vmatpush.msrb.mxu1 %v2912_v12  ;;  %3139 = vmatpush.msrb.mxu2 %v2897_v0  ;;  %vm7283_vm8 = vmor %vm2560_vm7, %vm2561_vm6  ;;  %v2545_v19 = vand.u32 2147483647, %v7254_v25 }
 0x3a8   :  { %v2557_v8 = vsub.f32 1.0, %v2556_v11  ;;  %v2875_v57 = vadd.f32 %v5587_v36, %v2874_v18  ;;  %3175 = vmatpush.msra.mxu0 %v2915_v9 }
 0x3a9   :  { %v2530_v56 = vadd.f32 %v2522_v30, %v2496_v20  ;;  %3116 = vmatpush.msrb.mxu1 %v2908_v51  ;;  %v2903_v30 = vld [vmem:[#allocation14 + $0x38] sm:$0xff]  ;;  %v2896_v20 = vld [vmem:[#allocation14] sm:$0xff]  ;;  %vm2546_vm13 = vcmp.eq.f32.partialorder %v2545_v19, 8.507059e+37 }
 0x3aa   :  { %v5717_v15 = vpop.eup %5716  ;;  %v2558_v45 = vmul.f32 %v7263_v48, %v2557_v8  ;;  %v5543_v2 = vmul.f32 -1.442695, %v2875_v57  ;;  %3176 = vmatpush.msra.mxu0 %v2911_v37  ;;  %v2548_v8 = vor.u32 1.1754944e-38, %v2547_v60  ;;  %v2958_v60 = vld [vmem:[#allocation14 + $0x1f0] sm:$0xff] }
 0x3ab   :  { %v2537_v1 = vmul.f32 %v5717_v15, %v7254_v25  ;;  %vm2542_vm9 = vweird.f32 %v5717_v15  ;;  %3117 = vmatpush.msrb.mxu1 %v2904_v27 }
 0x3ac   :  { %v7272_v4 = vpop.eup %5718  ;;  %v2559_v24 = vadd.f32 %v7263_v48, %v2558_v45  ;;  %5720 = vpow2.f32 %v5543_v2  ;;  %v1459_v31 = vpop.permute.xlu2 %1458  ;;  %3177 = vmatpush.msra.mxu0 %v2907_v29  ;;  %vm2543_vm12 = vmor %vm2541_vm10, %vm2542_vm9 }
 0x3ad   :  { %v2538_v41 = vsub.f32 1.0, %v2537_v1  ;;  %v2576_v7 = vmul.f32 %v7272_v4, %v7258_v32  ;;  %v1481_v36 = vperm.slane %v1459_v31, %v7148_v33  ;;  %5722 = vtanh.f32 %v2530_v56  ;;  %3118 = vmatpush.msrb.mxu1 %v2900_v59  ;;  %v3518_v59 = vld [vmem:[#allocation13 + $0x78] sm:$0xff] }
 0x3ae   :  { %v2563_v21 = vsel %vm7283_vm8, %v7263_v48, %v2559_v24  ;;  %3178 = vmatpush.msra.mxu0 %v2903_v30  ;;  %vm2581_vm14 = vweird.f32 %v7272_v4  ;;  %v2586_v1 = vand.u32 2147483648, %v7258_v32  ;;  %v3516_v30 = vld [vmem:[#allocation13 + $0x68] sm:$0xff] }
 0x3af   :  { %v2539_v11 = vmul.f32 %v5717_v15, %v2538_v41  ;;  %1497 = vst.msk [vmem:[#allocation19 + $0x1] sm:$0x1] %vm830_vm4, %v1481_v36  ;;  %v2577_v55 = vsub.f32 1.0, %v2576_v7  ;;  %v2568_v57 = vsel %vm2565_vm11, %v2567_v26, %v2563_v21  ;;  %3119 = vmatpush.msrb.mxu1 %v2896_v20  ;;  %vm2582_vm0 = vmor %vm2580_vm15, %vm2581_vm14  ;;  %v2950_v21 = vld [vmem:[#allocation14 + $0x1b0] sm:$0xff] }
 0x3b0   :  { %3179 = vmatpush.msra.mxu0 %v2899_v23  ;;  %v2590_v25 = vmul.f32 %v2568_v57, %v7179_v16  ;;  %v2584_v16 = vand.u32 2147483647, %v7258_v32  ;;  %v2587_v31 = vor.u32 1.1754944e-38, %v2586_v1  ;;  %v2954_v32 = vld [vmem:[#allocation14 + $0x1d0] sm:$0xff]  ;;  %v3515_v23 = vld [vmem:[#allocation13 + $0x60] sm:$0xff] }
 0x3b1   :  { %v2540_v18 = vadd.f32 %v5717_v15, %v2539_v11  ;;  %v2578_v0 = vmul.f32 %v7272_v4, %v2577_v55  ;;  %v2930_v1 = vld [vmem:[#allocation14 + $0x110] sm:$0xff] }
 0x3b2   :  { %v5721_v44 = vpop.eup %5720  ;;  %vm2585_vm1 = vcmp.eq.f32.partialorder %v2584_v16, 8.507059e+37 }
 0x3b3   :  { %v2544_v48 = vsel %vm2543_vm12, %v5717_v15, %v2540_v18  ;;  %v7295_v6 = vadd.f32 1.0, %v5721_v44  ;;  %v5723_v12 = vpop.eup %5722  ;;  %v2579_v15 = vadd.f32 %v7272_v4, %v2578_v0  ;;  %v2946_v18 = vld [vmem:[#allocation14 + $0x190] sm:$0xff] }
 0x3b4   :  { %v2549_v9 = vsel %vm2546_vm13, %v2548_v8, %v2544_v48 }
 0x3b5   :  { %v2591_v45 = vmul.f32 %v5723_v12, %v2549_v9  ;;  %5724 = vrcp.f32 %v7295_v6  ;;  %v2583_v24 = vsel %vm2582_vm0, %v7272_v4, %v2579_v15  ;;  %v3517_v4 = vld [vmem:[#allocation13 + $0x70] sm:$0xff]  ;;  %v2892_v19 = vand.u32 2147483648, %v7295_v6  ;;  %v3514_v9 = vld [vmem:[#allocation13 + $0x58] sm:$0xff] }
 0x3b6   :  { %v2588_v14 = vsel %vm2585_vm1, %v2587_v31, %v2583_v24  ;;  %vm2886_vm3 = vweird.f32 %v7295_v6  ;;  %v2890_v26 = vand.u32 2147483647, %v7295_v6  ;;  %v2942_v12 = vld [vmem:[#allocation14 + $0x170] sm:$0xff]  ;;  %v3510_v24 = vld [vmem:[#allocation13 + $0x38] sm:$0xff] }
 0x3b7   :  { %v7300_v56 = vadd.f32 %v2591_v45, %v2590_v25  ;;  %v1468_v2 = vpop.permute.xlu2 %1467  ;;  %v2938_v25 = vld [vmem:[#allocation14 + $0x150] sm:$0xff] }
 0x3b8   :  { %v1484_v51 = vperm.slane %v1468_v2, %v7148_v33  ;;  %vm2891_vm6 = vcmp.eq.f32.partialorder %v2890_v26, 8.507059e+37  ;;  %v3513_v45 = vld [vmem:[#allocation13 + $0x50] sm:$0xff] }
 0x3b9   :  { %5726 = vtanh.f32 %v7300_v56  ;;  %v2934_v2 = vld [vmem:[#allocation14 + $0x130] sm:$0xff] }
 0x3ba   :  { %1500 = vst.msk [vmem:[#allocation19 + $0x19] sm:$0x1] %vm830_vm4, %v1484_v51  ;;  %v3512_v51 = vld [vmem:[#allocation13 + $0x48] sm:$0xff]  ;;  %v2922_v31 = vld [vmem:[#allocation14 + $0xd0] sm:$0xff] }
 0x3bb   :  { %v5725_v37 = vpop.eup %5724  ;;  %v2898_v26 = vld [vmem:[#allocation14 + $0x10] sm:$0xff] }
 0x3bc   :  { %v2882_v38 = vmul.f32 %v5725_v37, %v7295_v6  ;;  %vm2887_vm2 = vweird.f32 %v5725_v37  ;;  %v2893_v6 = vor.u32 1.1754944e-38, %v2892_v19  ;;  %v3505_v19 = vld [vmem:[#allocation13 + $0x10] sm:$0xff] }
 0x3bd   :  { %vm7317_vm5 = vmor %vm2886_vm3, %vm2887_vm2 }
 0x3be   :  { %v2883_v27 = vsub.f32 1.0, %v2882_v38  ;;  %v2926_v38 = vld [vmem:[#allocation14 + $0xf0] sm:$0xff] }
 0x3bf   :  { %v5727_v41 = vpop.eup %5726  ;;  %v1474_v7 = vpop.permute.xlu2 %1473 }
 0x3c0   :  { %v1486_v36 = vperm.slane %v1474_v7, %v7148_v33  ;;  %v2594_v29 = vmul.f32 %v5727_v41, %v2588_v14  ;;  %v2884_v13 = vmul.f32 %v5725_v37, %v2883_v27  ;;  %v3509_v27 = vld [vmem:[#allocation13 + $0x30] sm:$0xff]  ;;  %v3508_v7 = vld [vmem:[#allocation13 + $0x28] sm:$0xff] }
 0x3c1   :  { %v2918_v41 = vld [vmem:[#allocation14 + $0xb0] sm:$0xff] }
 0x3c2   :  { %1502 = vst.msk [vmem:[#allocation19 + $0x29] sm:$0x1] %vm830_vm4, %v1486_v36  ;;  %2627 = vmatmul.f32.vlgmr.msrb.gmra.mxu3 %v2594_v29  ;;  %3040 = vmatmul.f32.vlgmr.msra.gmra.mxu1 %v2594_v29  ;;  %v2885_v11 = vadd.f32 %v5725_v37, %v2884_v13  ;;  %v2914_v36 = vld [vmem:[#allocation14 + $0x90] sm:$0xff] }
 0x3c3   :  { %3060 = vmatmul.f32.vlgmr.msra.gmra.mxu2 %v2594_v29  ;;  %3100 = vmatmul.f32.vlgmr.msrb.gmra.mxu0 %v2594_v29 }
 0x3c4   :  { %3144 = vmatpush.msrb.mxu3 %v2958_v60  ;;  %3523 = vmatpush.msra.mxu2 %v3518_v59  ;;  %v2889_v57 = vsel %vm7317_vm5, %v5725_v37, %v2885_v11  ;;  %v3511_v37 = vld [vmem:[#allocation13 + $0x40] sm:$0xff]  ;;  %v2906_v11 = vld [vmem:[#allocation14 + $0x50] sm:$0xff] }
 0x3c5   :  { %v2894_v0 = vsel %vm2891_vm6, %v2893_v6, %v2889_v57  ;;  %v3507_v60 = vld [vmem:[#allocation13 + $0x20] sm:$0xff] }
 0x3c6   :  { %3145 = vmatpush.msrb.mxu3 %v2954_v32  ;;  %3524 = vmatpush.msra.mxu2 %v3517_v4  ;;  %v1465_v55 = vpop.permute.xlu1 %1464  ;;  %v2910_v32 = vld [vmem:[#allocation14 + $0x70] sm:$0xff]  ;;  %v3506_v4 = vld [vmem:[#allocation13 + $0x18] sm:$0xff] }
 0x3c7   :  { %v1483_v44 = vperm.slane %v1465_v55, %v7148_v33  ;;  %v1462_v8 = vpop.permute.xlu0 %1461  ;;  %v3503_v55 = vld [vmem:[#allocation13] sm:$0xff] }
 0x3c8   :  { %3146 = vmatpush.msrb.mxu3 %v2950_v21  ;;  %3525 = vmatpush.msra.mxu2 %v3516_v30  ;;  %v1482_v48 = vperm.slane %v1462_v8, %v7148_v33  ;;  %v2902_v21 = vld [vmem:[#allocation14 + $0x30] sm:$0xff]  ;;  %v3504_v30 = vld [vmem:[#allocation13 + $0x8] sm:$0xff] }
 0x3c9   :  { %1499 = vst.msk [vmem:[#allocation19 + $0x11] sm:$0x1] %vm830_vm4, %v1483_v44 }
 0x3ca   :  { %3147 = vmatpush.msrb.mxu3 %v2946_v18  ;;  %3526 = vmatpush.msra.mxu2 %v3515_v23  ;;  %1498 = vst.msk [vmem:[#allocation19 + $0x9] sm:$0x1] %vm830_vm4, %v1482_v48 }
 0x3cb   :  { %3080 = vmatmul.f32.vlgmr.msra.gmra.mxu3 %v2594_v29  ;;  %3120 = vmatmul.f32.vlgmr.msrb.gmra.mxu1 %v2894_v0 }
 0x3cc   :  { %3140 = vmatmul.f32.vlgmr.msrb.gmra.mxu2 %v2894_v0  ;;  %3148 = vmatpush.msrb.mxu3 %v2942_v12 }
 0x3cd   :  { %3180 = vmatmul.f32.vlgmr.msra.gmra.mxu0 %v2894_v0  ;;  %3527 = vmatpush.msra.mxu2 %v3514_v9 }
 0x3ce   :  { %3149 = vmatpush.msrb.mxu3 %v2938_v25  ;;  %v1471_v15 = vpop.permute.xlu1 %1470 }
 0x3cf   :  { %3528 = vmatpush.msra.mxu2 %v3513_v45  ;;  %v1485_v16 = vperm.slane %v1471_v15, %v7148_v33  ;;  %v3274_v15 = vld [vmem:[#allocation17 + $0x68] sm:$0xff] }
 0x3d0   :  { %3150 = vmatpush.msrb.mxu3 %v2934_v2 }
 0x3d1   :  { %3529 = vmatpush.msra.mxu2 %v3512_v51  ;;  %1501 = vst.msk [vmem:[#allocation19 + $0x21] sm:$0x1] %vm830_vm4, %v1485_v16  ;;  %v3687_v51 = vld [vmem:[#allocation16 + $0x1e8] sm:$0xff]  ;;  %v7341_v16 = vld [vmem:[#allocation16 + $0x1e0] sm:$0xff] }
 0x3d2   :  { %3151 = vmatpush.msrb.mxu3 %v2930_v1  ;;  %3710 = vmatpush.msrb.mxu0 %v3687_v51  ;;  %v3679_v1 = vld [vmem:[#allocation16 + $0x1a8] sm:$0xff] }
 0x3d3   :  { %3530 = vmatpush.msra.mxu2 %v3511_v37  ;;  %v3671_v37 = vld [vmem:[#allocation16 + $0x168] sm:$0xff] }
 0x3d4   :  { %3152 = vmatpush.msrb.mxu3 %v2926_v38  ;;  %v7344_v38 = vld [vmem:[#allocation16 + $0x1f8] sm:$0xff] }
 0x3d5   :  { %3531 = vmatpush.msra.mxu2 %v3510_v24  ;;  %v3271_v24 = vld [vmem:[#allocation17 + $0x50] sm:$0xff] }
 0x3d6   :  { %3153 = vmatpush.msrb.mxu3 %v2922_v31  ;;  %v1480_v14 = vpop.permute.xlu1 %1479  ;;  %v3682_v31 = vld [vmem:[#allocation16 + $0x1c0] sm:$0xff] }
 0x3d7   :  { %3532 = vmatpush.msra.mxu2 %v3509_v27  ;;  %v1488_v29 = vperm.slane %v1480_v14, %v7148_v33  ;;  %v1477_v13 = vpop.permute.xlu0 %1476  ;;  %v3667_v27 = vld [vmem:[#allocation16 + $0x148] sm:$0xff]  ;;  %v3678_v14 = vld [vmem:[#allocation16 + $0x1a0] sm:$0xff] }
 0x3d8   :  { %3154 = vmatpush.msrb.mxu3 %v2918_v41  ;;  %v1487_v59 = vperm.slane %v1477_v13, %v7148_v33  ;;  %v3685_v41 = vld [vmem:[#allocation16 + $0x1d8] sm:$0xff]  ;;  %v3269_v13 = vld [vmem:[#allocation17 + $0x40] sm:$0xff] }
 0x3d9   :  { %3533 = vmatpush.msra.mxu2 %v3508_v7  ;;  %1504 = vst.msk [vmem:[#allocation19 + $0x39] sm:$0x1] %vm830_vm4, %v1488_v29  ;;  %v3270_v7 = vld [vmem:[#allocation17 + $0x48] sm:$0xff]  ;;  %v3681_v29 = vld [vmem:[#allocation16 + $0x1b8] sm:$0xff] }
 0x3da   :  { %3155 = vmatpush.msrb.mxu3 %v2914_v36  ;;  %1503 = vst.msk [vmem:[#allocation19 + $0x31] sm:$0x1] %vm830_vm4, %v1487_v59  ;;  %v3663_v36 = vld [vmem:[#allocation16 + $0x128] sm:$0xff] }
 0x3db   :  { %3534 = vmatpush.msra.mxu2 %v3507_v60  ;;  %v3674_v60 = vld [vmem:[#allocation16 + $0x180] sm:$0xff]  ;;  %v3659_v59 = vld [vmem:[#allocation16 + $0x108] sm:$0xff] }
 0x3dc   :  { %3156 = vmatpush.msrb.mxu3 %v2910_v32  ;;  %v3677_v32 = vld [vmem:[#allocation16 + $0x198] sm:$0xff] }
 0x3dd   :  { %3535 = vmatpush.msra.mxu2 %v3506_v4  ;;  %v3268_v4 = vld [vmem:[#allocation17 + $0x38] sm:$0xff] }
 0x3de   :  { %3157 = vmatpush.msrb.mxu3 %v2906_v11  ;;  %v3670_v11 = vld [vmem:[#allocation16 + $0x160] sm:$0xff] }
 0x3df   :  { %3536 = vmatpush.msra.mxu2 %v3505_v19  ;;  %v3655_v19 = vld [vmem:[#allocation16 + $0xe8] sm:$0xff] }
 0x3e0   :  { %3158 = vmatpush.msrb.mxu3 %v2902_v21  ;;  %v3673_v21 = vld [vmem:[#allocation16 + $0x178] sm:$0xff] }
 0x3e1   :  { %3537 = vmatpush.msra.mxu2 %v3504_v30  ;;  %v3267_v30 = vld [vmem:[#allocation17 + $0x30] sm:$0xff] }
 0x3e2   :  { %3159 = vmatpush.msrb.mxu3 %v2898_v26  ;;  %v3666_v26 = vld [vmem:[#allocation16 + $0x140] sm:$0xff] }
 0x3e3   :  { %3538 = vmatpush.msra.mxu2 %v3503_v55  ;;  %3160 = vmatmul.f32.vlgmr.msrb.gmra.mxu3 %v2894_v0  ;;  %v3651_v55 = vld [vmem:[#allocation16 + $0xc8] sm:$0xff] }
 0x3e4   :  { %3539 = vmatmul.f32.vlgmr.msra.gmra.mxu2 %v2894_v0  ;;  %3690 = vmatpush.msra.mxu3 %v7341_v16 }
 0x3e5   :  { %3750 = vmatpush.msrb.mxu2 %v7344_v38 }
 0x3e6   :  { %3691 = vmatpush.msra.mxu3 %v3682_v31  ;;  %v3688_v31 = vld [vmem:[#allocation16 + $0x1f0] sm:$0xff] }
 0x3e7   :  { %3751 = vmatpush.msrb.mxu2 %v3685_v41  ;;  %v7352_v41 = vld [vmem:[%s7877_s8] sm:$0xf] }
 0x3e8   :  { %3692 = vmatpush.msra.mxu3 %v3678_v14  ;;  %v3641_v14 = vld [vmem:[#allocation16 + $0x78] sm:$0xff] }
 0x3e9   :  { %3752 = vmatpush.msrb.mxu2 %v3681_v29  ;;  %v2631_v29 = vld [vmem:[#allocation5] sm:$0xff] }
 0x3ea   :  { %3693 = vmatpush.msra.mxu3 %v3674_v60 }
 0x3eb   :  { %3753 = vmatpush.msrb.mxu2 %v3677_v32 }
 0x3ec   :  { %3694 = vmatpush.msra.mxu3 %v3670_v11  ;;  %v5903_v11 = vld [vmem:[#allocation16 + $0x1d0] sm:$0xff] }
 0x3ed   :  { %3754 = vmatpush.msrb.mxu2 %v3673_v21  ;;  %v3186_v21 = vperm.slane %v7352_v41, 0 }
 0x3ee   :  { %3695 = vmatpush.msra.mxu3 %v3666_v26  ;;  %v2633_v26 = vld [vmem:[#allocation5 + $0x10] sm:$0xff] }
 0x406   :  { %v2026_v20 = vpop.xlane.xlu2 %2025 }
 0x407   :  { %v2107_v18 = vadd.f32 %v6866_v61, %v2026_v20  ;;  %v3669_v20 = vld [vmem:[#allocation16 + $0x158] sm:$0xff] }
 0x408   :  { %v2028_v23 = vpop.xlane.xlu0 %2027  ;;  %3755 = vmatpush.msrb.mxu2 %v3669_v20 }
 0x409   :  { %v2030_v44 = vpop.xlane.xlu1 %2029  ;;  %v2108_v8 = vadd.f32 %v6852_v52, %v2028_v23  ;;  %2124 = vperm.xlu2 %5578, %v2107_v18   ;;  %v3266_v18 = vld [vmem:[#allocation17 + $0x28] sm:$0xff]  ;;  %v3662_v23 = vld [vmem:[#allocation16 + $0x120] sm:$0xff] }
 0x40a   :  { %v2109_v57 = vadd.f32 %v7036_v58, %v2030_v44  ;;  %v3276_v58 = vld [vmem:[#allocation17 + $0x78] sm:$0xff]  ;;  %v3647_v44 = vld [vmem:[#allocation16 + $0xa8] sm:$0xff]  ;;  %3696 = vmatpush.msra.mxu3 %v3662_v23 }
 0x40b   :  { %2127 = vperm.xlu0 %5577, %v2108_v8   ;;  %3277 = vmatpush.msra.mxu1 %v3276_v58  ;;  %v3665_v8 = vld [vmem:[#allocation16 + $0x138] sm:$0xff] }
 0x40c   :  { %2130 = vperm.xlu1 %5579, %v2109_v57   ;;  %3756 = vmatpush.msrb.mxu2 %v3665_v8  ;;  %v3265_v57 = vld [vmem:[#allocation17 + $0x20] sm:$0xff]  ;;  %v3653_v58 = vld [vmem:[#allocation16 + $0xd8] sm:$0xff] }
 0x40d   :  { %v5906_v23 = vld [vmem:[#allocation16 + $0x58] sm:$0xff] }
 0x40e   :  { %v2032_v48 = vpop.xlane.xlu2 %2031 }
 0x40f   :  { %v2110_v6 = vadd.f32 %v6871_v46, %v2032_v48  ;;  %v3275_v46 = vld [vmem:[#allocation17 + $0x70] sm:$0xff]  ;;  %v3658_v48 = vld [vmem:[#allocation16 + $0x100] sm:$0xff] }
 0x410   :  { %v2034_v12 = vpop.xlane.xlu0 %2033  ;;  %3278 = vmatpush.msra.mxu1 %v3275_v46  ;;  %3697 = vmatpush.msra.mxu3 %v3658_v48  ;;  %v3262_v46 = vld [vmem:[#allocation17 + $0x8] sm:$0xff] }
 0x411   :  { %v2111_v9 = vadd.f32 %v6859_v63, %v2034_v12  ;;  %2133 = vperm.xlu2 %5578, %v2110_v6   ;;  %v2036_v0 = vpop.xlane.xlu1 %2035  ;;  %v3683_v63 = vld [vmem:[#allocation16 + $0x1c8] sm:$0xff]  ;;  %v3661_v12 = vld [vmem:[#allocation16 + $0x118] sm:$0xff] }
 0x412   :  { %v2112_v61 = vadd.f32 %v6875_v10, %v2036_v0  ;;  %3711 = vmatpush.msrb.mxu0 %v3683_v63  ;;  %3279 = vmatpush.msra.mxu1 %v3274_v15  ;;  %v3273_v10 = vld [vmem:[#allocation17 + $0x60] sm:$0xff]  ;;  %v3643_v6 = vld [vmem:[#allocation16 + $0x88] sm:$0xff] }
 0x413   :  { %3757 = vmatpush.msrb.mxu2 %v3661_v12  ;;  %v3654_v0 = vld [vmem:[#allocation16 + $0xe0] sm:$0xff]  ;;  %v3631_v15 = vld [vmem:[#allocation16 + $0x28] sm:$0xff]  ;;  %v5907_v12 = vld [vmem:[#allocation16 + $0x1b0] sm:$0xff] }
 0x414   :  { %2136 = vperm.xlu1 %5579, %v2111_v9   ;;  %3712 = vmatpush.msrb.mxu0 %v3679_v1  ;;  %v3264_v9 = vld [vmem:[#allocation17 + $0x18] sm:$0xff]  ;;  %v3646_v63 = vld [vmem:[#allocation16 + $0xa0] sm:$0xff] }
 0x415   :  { %3280 = vmatpush.msra.mxu1 %v3273_v10  ;;  %3698 = vmatpush.msra.mxu3 %v3654_v0  ;;  %v3649_v10 = vld [vmem:[#allocation16 + $0xb8] sm:$0xff] }
 0x416   :  { %v2038_v25 = vpop.xlane.xlu2 %2037 }
 0x417   :  { %v2113_v45 = vadd.f32 %v6864_v49, %v2038_v25  ;;  %v3675_v49 = vld [vmem:[#allocation16 + $0x188] sm:$0xff] }
 0x418   :  { %v2040_v52 = vpop.xlane.xlu0 %2039  ;;  %3713 = vmatpush.msrb.mxu0 %v3675_v49  ;;  %v3639_v25 = vld [vmem:[#allocation16 + $0x68] sm:$0xff]  ;;  %v3261_v49 = vld [vmem:[#allocation17] sm:$0xff] }
 0x419   :  { %v2114_v2 = vadd.f32 %v6879_v34, %v2040_v52  ;;  %2139 = vperm.xlu2 %5578, %v2112_v61   ;;  %2142 = vperm.xlu0 %5577, %v2113_v45   ;;  %v3272_v34 = vld [vmem:[#allocation17 + $0x58] sm:$0xff]  ;;  %v3263_v45 = vld [vmem:[#allocation17 + $0x10] sm:$0xff]  ;;  %v3650_v52 = vld [vmem:[#allocation16 + $0xc0] sm:$0xff] }
 0x41a   :  { %3281 = vmatpush.msra.mxu1 %v3272_v34  ;;  %3714 = vmatpush.msrb.mxu0 %v3671_v37  ;;  %v3657_v61 = vld [vmem:[#allocation16 + $0xf8] sm:$0xff]  ;;  %v3642_v34 = vld [vmem:[#allocation16 + $0x80] sm:$0xff]  ;;  %v3627_v37 = vld [vmem:[#allocation16 + $0x8] sm:$0xff] }
 0x41b   :  { %3758 = vmatpush.msrb.mxu2 %v3657_v61  ;;  %3699 = vmatpush.msra.mxu3 %v3650_v52  ;;  %v2634_v61 = vld [vmem:[#allocation5 + $0x18] sm:$0xff] }
 0x41c   :  { %2145 = vperm.xlu1 %5579, %v2114_v2   ;;  %3282 = vmatpush.msra.mxu1 %v3271_v24  ;;  %v3635_v2 = vld [vmem:[#allocation16 + $0x48] sm:$0xff]  ;;  %v3645_v24 = vld [vmem:[#allocation16 + $0x98] sm:$0xff]  ;;  %v5909_v52 = vld [vmem:[#allocation16 + $0x20] sm:$0xff] }
 0x41d   :  { %3715 = vmatpush.msrb.mxu0 %v3667_v27  ;;  %3759 = vmatpush.msrb.mxu2 %v3653_v58  ;;  %v3623_v27 = vld [vmem:[#allocation14 + $0x1e8] sm:$0xff] }
 0x41e   :  { %3283 = vmatpush.msra.mxu1 %v3270_v7  ;;  %3700 = vmatpush.msra.mxu3 %v3646_v63  ;;  %v3638_v7 = vld [vmem:[#allocation16 + $0x60] sm:$0xff] }
 0x41f   :  { %3716 = vmatpush.msrb.mxu0 %v3663_v36  ;;  %3760 = vmatpush.msrb.mxu2 %v3649_v10  ;;  %v3676_v10 = vld [vmem:[#allocation16 + $0x190] sm:$0xff] }
 0x420   :  { %3284 = vmatpush.msra.mxu1 %v3269_v13  ;;  %3701 = vmatpush.msra.mxu3 %v3642_v34 }
 0x421   :  { %3717 = vmatpush.msrb.mxu0 %v3659_v59  ;;  %3761 = vmatpush.msrb.mxu2 %v3645_v24 }
 0x422   :  { %3285 = vmatpush.msra.mxu1 %v3268_v4  ;;  %3702 = vmatpush.msra.mxu3 %v3638_v7  ;;  %v7371_v7 = vld [vmem:[%s7879_s10] ss:$0 sm:$0xff] }
 0x423   :  { %3718 = vmatpush.msrb.mxu0 %v3655_v19  ;;  %3762 = vmatpush.msrb.mxu2 %v3641_v14  ;;  %v5904_v19 = vld [vmem:[#allocation14 + $0x1c8] sm:$0xff] }
 0x424   :  { %3286 = vmatpush.msra.mxu1 %v3267_v30  ;;  %v2632_v30 = vld [vmem:[#allocation5 + $0x8] sm:$0xff] }
 0x425   :  { %3719 = vmatpush.msrb.mxu0 %v3651_v55  ;;  %3763 = vmatpush.msrb.mxu2 %v5906_v23  ;;  %v3668_v23 = vld [vmem:[#allocation16 + $0x150] sm:$0xff] }
 0x426   :  { %3287 = vmatpush.msra.mxu1 %v3266_v18  ;;  %v5905_v18 = vld [vmem:[#allocation16 + $0x40] sm:$0xff] }
 0x427   :  { %3720 = vmatpush.msrb.mxu0 %v3647_v44  ;;  %3703 = vmatpush.msra.mxu3 %v5905_v18 }
 0x428   :  { %3288 = vmatpush.msra.mxu1 %v3265_v57 }
 0x429   :  { %3721 = vmatpush.msrb.mxu0 %v3643_v6  ;;  %3704 = vmatpush.msra.mxu3 %v5909_v52  ;;  %v2638_v52 = vld [vmem:[#allocation5 + $0x38] sm:$0xff] }
 0x42a   :  { %3289 = vmatpush.msra.mxu1 %v3264_v9  ;;  %v5908_v9 = vld [vmem:[#allocation14 + $0x1a8] sm:$0xff] }
 0x42b   :  { %3722 = vmatpush.msrb.mxu0 %v3639_v25  ;;  %v3189_v25 = vperm.slane %v7352_v41, 3 }
 0x42c   :  { %3290 = vmatpush.msra.mxu1 %v3263_v45 }
 0x42d   :  { %3723 = vmatpush.msrb.mxu0 %v3635_v2  ;;  %v5910_v2 = vld [vmem:[#allocation16 + $0x38] sm:$0xff] }
 0x42e   :  { %3291 = vmatpush.msra.mxu1 %v3262_v46  ;;  %3764 = vmatpush.msrb.mxu2 %v5910_v2 }
 0x42f   :  { %3724 = vmatpush.msrb.mxu0 %v3631_v15  ;;  %v2635_v15 = vld [vmem:[#allocation5 + $0x20] sm:$0xff] }
 0x430   :  { %3292 = vmatpush.msra.mxu1 %v3261_v49  ;;  %v3611_v49 = vld [vmem:[#allocation14 + $0x188] sm:$0xff] }
 0x431   :  { %3725 = vmatpush.msrb.mxu0 %v3627_v37 }
 0x432   :  { %3730 = vmatpush.msrb.mxu1 %v3688_v31  ;;  %v3626_v31 = vld [vmem:[#allocation16] sm:$0xff] }
 0x433   :  { %3790 = vmatpush.msra.mxu0 %v3623_v27  ;;  %v3629_v27 = vld [vmem:[#allocation16 + $0x18] sm:$0xff]  ;;  %3705 = vmatpush.msra.mxu3 %v3626_v31  ;;  %v3656_v31 = vld [vmem:[#allocation16 + $0xf0] sm:$0xff] }
 0x434   :  { %3731 = vmatpush.msrb.mxu1 %v5903_v11  ;;  %3765 = vmatpush.msrb.mxu2 %v3629_v27  ;;  %v3607_v11 = vld [vmem:[#allocation14 + $0x168] sm:$0xff]  ;;  %v3606_v27 = vld [vmem:[#allocation14 + $0x160] sm:$0xff] }
 0x435   :  { %3791 = vmatpush.msra.mxu0 %v5904_v19  ;;  %v3187_v19 = vperm.slane %v7352_v41, 1 }
 0x436   :  { %3732 = vmatpush.msrb.mxu1 %v5907_v12 }
 0x437   :  { %3792 = vmatpush.msra.mxu0 %v5908_v9  ;;  %v3664_v9 = vld [vmem:[#allocation16 + $0x130] sm:$0xff] }
 0x438   :  { %3733 = vmatpush.msrb.mxu1 %v3676_v10  ;;  %v3610_v10 = vld [vmem:[#allocation14 + $0x180] sm:$0xff] }
 0x439   :  { %3793 = vmatpush.msra.mxu0 %v3611_v49  ;;  %v3595_v49 = vld [vmem:[#allocation14 + $0x108] sm:$0xff] }
 0x43b   :  { %3794 = vmatpush.msra.mxu0 %v3607_v11  ;;  %v3602_v11 = vld [vmem:[#allocation14 + $0x140] sm:$0xff] }
 0x43f   :  { %v3041_v51 = vpop.f32.mrf.mxu1 }
 0x440   :  { %v7347_v1 = vpop.f32.mrf.mxu0 }
 0x445   :  { %v7354_v36 = vpop.f32.mrf.mxu3 }
 0x446   :  { %v7356_v13 = vpop.f32.mrf.mxu2  ;;  %v2647_v60 = vperm.slane %v7354_v36, 0  ;;  %v2640_v59 = vrot.slane %v7354_v36, 1  ;;  %v2641_v32 = vrot.slane %v7354_v36, 2  ;;  %v2642_v4 = vrot.slane %v7354_v36, 3 }
 0x447   :  { %v2643_v55 = vrot.slane %v7354_v36, 4  ;;  %v2644_v20 = vrot.slane %v7354_v36, 5 }
 0x448   :  { %v3121_v44 = vpop.f32.mrf.mxu1  ;;  %v2663_v8 = vadd.f32 %v2647_v60, %v2631_v29  ;;  %v2648_v57 = vperm.slane %v2640_v59, 0  ;;  %v2649_v48 = vperm.slane %v2641_v32, 0  ;;  %v2650_v6 = vperm.slane %v2642_v4, 0  ;;  %v2636_v29 = vld [vmem:[#allocation5 + $0x28] sm:$0xff]  ;;  %v3622_v4 = vld [vmem:[#allocation14 + $0x1e0] sm:$0xff] }
 0x449   :  { %v3122_v0 = vadd.f32 %v3121_v44, %v3041_v51  ;;  %v2651_v45 = vperm.slane %v2643_v55, 0  ;;  %v2652_v24 = vperm.slane %v2644_v20, 0  ;;  %v2645_v51 = vrot.slane %v7354_v36, 6  ;;  %v3672_v32 = vld [vmem:[#allocation16 + $0x170] sm:$0xff]  ;;  %3770 = vmatpush.msrb.mxu3 %v3622_v4  ;;  %v3618_v44 = vld [vmem:[#allocation14 + $0x1c0] sm:$0xff] }
 0x44a   :  { %v3181_v58 = vpop.f32.mrf.mxu0  ;;  %5728 = vtanh.f32 %v2663_v8  ;;  %v2664_v46 = vadd.f32 %v2648_v57, %v2632_v30  ;;  %v2665_v63 = vadd.f32 %v2649_v48, %v2633_v26  ;;  %v2666_v14 = vadd.f32 %v2650_v6, %v2634_v61  ;;  %3734 = vmatpush.msrb.mxu1 %v3672_v32  ;;  %v3625_v30 = vld [vmem:[#allocation14 + $0x1f8] sm:$0xff]  ;;  %v3603_v8 = vld [vmem:[#allocation14 + $0x148] sm:$0xff]  ;;  %v3652_v4 = vld [vmem:[#allocation16 + $0xd0] sm:$0xff] }
 0x44b   :  { %v3194_v34 = vadd.f32 %v3186_v21, %v3122_v0  ;;  %v3182_v37 = vadd.f32 %v3181_v58, %v7347_v1  ;;  %v2667_v1 = vadd.f32 %v2651_v45, %v2635_v15  ;;  %v2646_v21 = vrot.slane %v7354_v36, 7  ;;  %3830 = vmatpush.msra.mxu2 %v3625_v30  ;;  %v2637_v6 = vld [vmem:[#allocation5 + $0x30] sm:$0xff]  ;;  %3771 = vmatpush.msrb.mxu3 %v3618_v44  ;;  %v3614_v0 = vld [vmem:[#allocation14 + $0x1a0] sm:$0xff]  ;;  %v3660_v15 = vld [vmem:[#allocation16 + $0x110] sm:$0xff] }
 0x44c   :  { %5730 = vtanh.f32 %v2664_v46  ;;  %v2668_v20 = vadd.f32 %v2652_v24, %v2636_v29  ;;  %v2653_v18 = vperm.slane %v2645_v51, 0  ;;  %3735 = vmatpush.msrb.mxu1 %v3668_v23  ;;  %v3621_v36 = vld [vmem:[#allocation14 + $0x1d8] sm:$0xff]  ;;  %3795 = vmatpush.msra.mxu0 %v3603_v8  ;;  %v3583_v23 = vld [vmem:[#allocation14 + $0xa8] sm:$0xff] }
 0x44d   :  { %v5544_v60 = vmul.f32 -1.442695, %v3194_v34  ;;  %v3197_v59 = vadd.f32 %v3189_v25, %v3182_v37  ;;  %5732 = vtanh.f32 %v2665_v63  ;;  %3831 = vmatpush.msra.mxu2 %v3621_v36  ;;  %v3599_v25 = vld [vmem:[#allocation14 + $0x128] sm:$0xff]  ;;  %v2654_v2 = vperm.slane %v2646_v21, 0  ;;  %3772 = vmatpush.msrb.mxu3 %v3614_v0  ;;  %v3613_v24 = vld [vmem:[#allocation14 + $0x198] sm:$0xff]  ;;  %v3644_v36 = vld [vmem:[#allocation16 + $0x90] sm:$0xff] }
 0x44e   :  { %3736 = vmatpush.msrb.mxu1 %v3664_v9  ;;  %v2669_v63 = vadd.f32 %v2653_v18, %v2637_v6  ;;  %3796 = vmatpush.msra.mxu0 %v3599_v25  ;;  %v3605_v30 = vld [vmem:[#allocation14 + $0x158] sm:$0xff]  ;;  %v3598_v18 = vld [vmem:[#allocation14 + $0x120] sm:$0xff]  ;;  %v3579_v25 = vld [vmem:[#allocation14 + $0x88] sm:$0xff] }
 0x44f   :  { %5734 = vpow2.f32 %v5544_v60  ;;  %v5546_v26 = vmul.f32 -1.442695, %v3197_v59  ;;  %v3141_v55 = vpop.f32.mrf.mxu2  ;;  %3773 = vmatpush.msrb.mxu3 %v3610_v10  ;;  %v2670_v59 = vadd.f32 %v2654_v2, %v2638_v52  ;;  %v3601_v8 = vld [vmem:[#allocation14 + $0x138] sm:$0xff]  ;;  %v3081_v52 = vpop.f32.mrf.mxu3  ;;  %v3640_v2 = vld [vmem:[#allocation16 + $0x70] sm:$0xff] }
 0x450   :  { %v5729_v57 = vpop.eup %5728  ;;  %v3142_v48 = vadd.f32 %v3141_v55, %v7356_v13  ;;  %5736 = vtanh.f32 %v2666_v14  ;;  %v3617_v13 = vld [vmem:[#allocation14 + $0x1b8] sm:$0xff]  ;;  %3737 = vmatpush.msrb.mxu1 %v3660_v15  ;;  %v3591_v14 = vld [vmem:[#allocation14 + $0xe8] sm:$0xff]  ;;  %3797 = vmatpush.msra.mxu0 %v3595_v49  ;;  %v3636_v10 = vld [vmem:[#allocation16 + $0x50] sm:$0xff] }
 0x451   :  { %v2683_v12 = vmul.f32 %v5729_v57, %v7371_v7  ;;  %5738 = vtanh.f32 %v2667_v1  ;;  %3832 = vmatpush.msra.mxu2 %v3617_v13  ;;  %v3609_v1 = vld [vmem:[#allocation14 + $0x178] sm:$0xff]  ;;  %3774 = vmatpush.msrb.mxu3 %v3606_v27  ;;  %v3590_v13 = vld [vmem:[#allocation14 + $0xe0] sm:$0xff] }
 0x452   :  { %v5731_v61 = vpop.eup %5730  ;;  %5740 = vpow2.f32 %v5546_v26  ;;  %v3195_v45 = vadd.f32 %v3187_v19, %v3142_v48  ;;  %3738 = vmatpush.msrb.mxu1 %v3656_v31  ;;  %v3587_v19 = vld [vmem:[#allocation14 + $0xc8] sm:$0xff]  ;;  %3798 = vmatpush.msra.mxu0 %v3591_v14  ;;  %v3632_v14 = vld [vmem:[#allocation16 + $0x30] sm:$0xff] }
 0x453   :  { %v5733_v58 = vpop.eup %5732  ;;  %2691 = vadd.xlane.f32.xlu2 %v2683_v12  ;;  %v2684_v46 = vmul.f32 %v5731_v61, %v7371_v7  ;;  %5742 = vtanh.f32 %v2668_v20  ;;  %3833 = vmatpush.msra.mxu2 %v3613_v24  ;;  %v3648_v20 = vld [vmem:[#allocation16 + $0xb0] sm:$0xff]  ;;  %v3594_v12 = vld [vmem:[#allocation14 + $0x100] sm:$0xff]  ;;  %v3597_v61 = vld [vmem:[#allocation14 + $0x118] sm:$0xff] }
 0x454   :  { %v5545_v34 = vmul.f32 -1.442695, %v3195_v45  ;;  %v2685_v37 = vmul.f32 %v5733_v58, %v7371_v7  ;;  %3739 = vmatpush.msrb.mxu1 %v3652_v4  ;;  %3775 = vmatpush.msrb.mxu3 %v3602_v11  ;;  %v3585_v4 = vld [vmem:[#allocation14 + $0xb8] sm:$0xff] }
 0x455   :  { %v5735_v51 = vpop.eup %5734  ;;  %2693 = vadd.xlane.f32.xlu0 %v2684_v46  ;;  %3834 = vmatpush.msra.mxu2 %v3609_v1  ;;  %v3575_v46 = vld [vmem:[#allocation14 + $0x68] sm:$0xff] }
 0x456   :  { %v5737_v29 = vpop.eup %5736  ;;  %v7379_v60 = vadd.f32 1.0, %v5735_v51  ;;  %5744 = vpow2.f32 %v5545_v34  ;;  %2695 = vadd.xlane.f32.xlu1 %v2685_v37  ;;  %3799 = vmatpush.msra.mxu0 %v3587_v19  ;;  %v3586_v34 = vld [vmem:[#allocation14 + $0xc0] sm:$0xff]  ;;  %v3571_v37 = vld [vmem:[#allocation14 + $0x48] sm:$0xff]  ;;  %v3589_v51 = vld [vmem:[#allocation14 + $0xd8] sm:$0xff]  ;;  %v3188_v19 = vperm.slane %v7352_v41, 2 }
 0x457   :  { %v5739_v32 = vpop.eup %5738  ;;  %5746 = vtanh.f32 %v2669_v63  ;;  %v2686_v55 = vmul.f32 %v5737_v29, %v7371_v7  ;;  %3835 = vmatpush.msra.mxu2 %v3605_v30  ;;  %3740 = vmatpush.msrb.mxu1 %v3648_v20  ;;  %v3593_v63 = vld [vmem:[#allocation14 + $0xf8] sm:$0xff]  ;;  %v3582_v29 = vld [vmem:[#allocation14 + $0xa0] sm:$0xff] }
 0x458   :  { %v5741_v21 = vpop.eup %5740  ;;  %5748 = vrcp.f32 %v7379_v60  ;;  %v2687_v44 = vmul.f32 %v5739_v32, %v7371_v7  ;;  %3776 = vmatpush.msrb.mxu3 %v3598_v18  ;;  %3800 = vmatpush.msra.mxu0 %v3583_v23  ;;  %v3567_v32 = vld [vmem:[#allocation14 + $0x28] sm:$0xff]  ;;  %v3581_v23 = vld [vmem:[#allocation14 + $0x98] sm:$0xff]  ;;  %vm3207_vm9 = vweird.f32 %v7379_v60 }
 0x459   :  { %v5743_v26 = vpop.eup %5742  ;;  %5750 = vtanh.f32 %v2670_v59  ;;  %v7384_v48 = vadd.f32 1.0, %v5741_v21  ;;  %3836 = vmatpush.msra.mxu2 %v3601_v8  ;;  %3741 = vmatpush.msrb.mxu1 %v3644_v36  ;;  %v5589_v59 = vld [vmem:[%s7874_s5] ss:$0 sm:$0xff]  ;;  %v3578_v21 = vld [vmem:[#allocation14 + $0x80] sm:$0xff] }
 0x45a   :  { %v2688_v6 = vmul.f32 %v5743_v26, %v7371_v7  ;;  %3777 = vmatpush.msrb.mxu3 %v3594_v12  ;;  %3801 = vmatpush.msra.mxu0 %v3579_v25  ;;  %v3563_v18 = vld [vmem:[#allocation14 + $0x8] sm:$0xff]  ;;  %v3574_v8 = vld [vmem:[#allocation14 + $0x60] sm:$0xff]  ;;  %v3577_v12 = vld [vmem:[#allocation14 + $0x78] sm:$0xff] }
 0x45b   :  { %2697 = vadd.xlane.f32.xlu2 %v2686_v55  ;;  %3837 = vmatpush.msra.mxu2 %v3597_v61  ;;  %vm3246_vm0 = vweird.f32 %v7384_v48 }
 0x45c   :  { %v5745_v57 = vpop.eup %5744  ;;  %3742 = vmatpush.msrb.mxu1 %v3640_v2  ;;  %3778 = vmatpush.msrb.mxu3 %v3590_v13 }
 0x45d   :  { %v5747_v9 = vpop.eup %5746  ;;  %v7387_v0 = vadd.f32 1.0, %v5745_v57  ;;  %2699 = vadd.xlane.f32.xlu0 %v2687_v44  ;;  %3802 = vmatpush.msra.mxu0 %v3575_v46  ;;  %v3573_v46 = vld [vmem:[#allocation14 + $0x58] sm:$0xff] }
 0x45e   :  { %v7389_v45 = vpop.eup %5748  ;;  %2701 = vadd.xlane.f32.xlu1 %v2688_v6  ;;  %v2689_v49 = vmul.f32 %v5747_v9, %v7371_v7  ;;  %3838 = vmatpush.msra.mxu2 %v3593_v63  ;;  %v3211_v63 = vand.u32 2147483647, %v7379_v60 }
 0x45f   :  { %v3203_v58 = vmul.f32 %v7389_v45, %v7379_v60  ;;  %5752 = vrcp.f32 %v7387_v0  ;;  %v5751_v15 = vpop.eup %5750  ;;  %3743 = vmatpush.msrb.mxu1 %v3636_v10  ;;  %3779 = vmatpush.msrb.mxu3 %v3586_v34  ;;  %v3232_v6 = vand.u32 2147483648, %v7387_v0  ;;  %vm3208_vm7 = vweird.f32 %v7389_v45 }
 0x460   :  { %5754 = vrcp.f32 %v7384_v48  ;;  %v2690_v27 = vmul.f32 %v5751_v15, %v7371_v7  ;;  %3803 = vmatpush.msra.mxu0 %v3571_v37  ;;  %3839 = vmatpush.msra.mxu2 %v3589_v51  ;;  %v3628_v7 = vld [vmem:[#allocation16 + $0x10] sm:$0xff]  ;;  %v3230_v61 = vand.u32 2147483647, %v7387_v0  ;;  %v3213_v15 = vand.u32 2147483648, %v7379_v60  ;;  %vm7424_vm11 = vmor %vm3207_vm9, %vm3208_vm7  ;;  %v3569_v51 = vld [vmem:[#allocation14 + $0x38] sm:$0xff] }
 0x461   :  { %v3204_v24 = vsub.f32 1.0, %v3203_v58  ;;  %3744 = vmatpush.msrb.mxu1 %v3632_v14  ;;  %3780 = vmatpush.msrb.mxu3 %v3582_v29  ;;  %vm3226_vm10 = vweird.f32 %v7387_v0  ;;  %v3565_v29 = vld [vmem:[#allocation14 + $0x18] sm:$0xff]  ;;  %vm3212_vm14 = vcmp.eq.f32.partialorder %v3211_v63, 8.507059e+37 }
 0x462   :  { %3804 = vmatpush.msra.mxu0 %v3567_v32  ;;  %3840 = vmatpush.msra.mxu2 %v3585_v4  ;;  %vm3231_vm13 = vcmp.eq.f32.partialorder %v3230_v61, 8.507059e+37  ;;  %v3624_v61 = vld [vmem:[#allocation14 + $0x1f0] sm:$0xff] }
 0x463   :  { %2703 = vadd.xlane.f32.xlu2 %v2689_v49  ;;  %v2125_v31 = vpop.permute.xlu2 %2124  ;;  %v3205_v20 = vmul.f32 %v7389_v45, %v3204_v24  ;;  %3745 = vmatpush.msrb.mxu1 %v3628_v7  ;;  %v3566_v49 = vld [vmem:[#allocation14 + $0x20] sm:$0xff] }
 0x464   :  { %v2147_v1 = vperm.slane %v2125_v31, %v7148_v33  ;;  %3781 = vmatpush.msrb.mxu3 %v3578_v21  ;;  %3805 = vmatpush.msra.mxu0 %v3563_v18  ;;  %v3233_v31 = vor.u32 1.1754944e-38, %v3232_v6 }
 0x465   :  { %v7401_v11 = vpop.eup %5752  ;;  %2705 = vadd.xlane.f32.xlu0 %v2690_v27  ;;  %3841 = vmatpush.msra.mxu2 %v3581_v23  ;;  %v3206_v13 = vadd.f32 %v7389_v45, %v3205_v20  ;;  %v3252_v23 = vand.u32 2147483648, %v7384_v48 }
 0x466   :  { %v7404_v30 = vpop.eup %5754  ;;  %v3222_v26 = vmul.f32 %v7401_v11, %v7387_v0  ;;  %v3161_v55 = vpop.f32.mrf.mxu3  ;;  %2163 = vst.msk [vmem:[#allocation19 + $0x2] sm:$0x1] %vm830_vm4, %v2147_v1  ;;  %vm3227_vm8 = vweird.f32 %v7401_v11  ;;  %3782 = vmatpush.msrb.mxu3 %v3574_v8  ;;  %v3562_v0 = vld [vmem:[#allocation14] sm:$0xff] }
 0x467   :  { %v3162_v44 = vadd.f32 %v3161_v55, %v3081_v52  ;;  %v3540_v41 = vpop.f32.mrf.mxu2  ;;  %v3242_v9 = vmul.f32 %v7404_v30, %v7384_v48  ;;  %v3570_v52 = vld [vmem:[#allocation14 + $0x40] sm:$0xff]  ;;  %3842 = vmatpush.msra.mxu2 %v3577_v12  ;;  %vm3228_vm12 = vmor %vm3226_vm10, %vm3227_vm8  ;;  %v3210_v27 = vsel %vm7424_vm11, %v7389_v45, %v3206_v13  ;;  %vm3247_vm15 = vweird.f32 %v7404_v30 }
 0x468   :  { %v3223_v57 = vsub.f32 1.0, %v3222_v26  ;;  %v3541_v36 = vadd.f32 %v5589_v59, %v3540_v41  ;;  %3783 = vmatpush.msrb.mxu3 %v3570_v52  ;;  %v3214_v59 = vor.u32 1.1754944e-38, %v3213_v15  ;;  %vm3248_vm1 = vmor %vm3246_vm0, %vm3247_vm15  ;;  %v3253_v41 = vor.u32 1.1754944e-38, %v3252_v23  ;;  %v4184_v52 = vld [vmem:[#allocation13 + $0x78] sm:$0xff]  ;;  %v3616_v15 = vld [vmem:[#allocation14 + $0x1b0] sm:$0xff] }
 0x469   :  { %v3196_v25 = vadd.f32 %v3188_v19, %v3162_v44  ;;  %v3243_v60 = vsub.f32 1.0, %v3242_v9  ;;  %3843 = vmatpush.msra.mxu2 %v3573_v46  ;;  %v3588_v23 = vld [vmem:[#allocation14 + $0xd0] sm:$0xff] }
 0x46a   :  { %v3224_v2 = vmul.f32 %v7401_v11, %v3223_v57  ;;  %v5547_v58 = vmul.f32 -1.442695, %v3541_v36  ;;  %3784 = vmatpush.msrb.mxu3 %v3566_v49  ;;  %v3215_v19 = vsel %vm3212_vm14, %v3214_v59, %v3210_v27  ;;  %v3604_v59 = vld [vmem:[#allocation14 + $0x150] sm:$0xff] }
 0x46b   :  { %5756 = vtanh.f32 %v3196_v25  ;;  %v2134_v10 = vpop.permute.xlu2 %2133  ;;  %3844 = vmatpush.msra.mxu2 %v3569_v51  ;;  %v3244_v4 = vmul.f32 %v7404_v30, %v3243_v60 }
 0x46c   :  { %v3225_v37 = vadd.f32 %v7401_v11, %v3224_v2  ;;  %5758 = vpow2.f32 %v5547_v58  ;;  %v2150_v24 = vperm.slane %v2134_v10, %v7148_v33  ;;  %3785 = vmatpush.msrb.mxu3 %v3562_v0  ;;  %v4183_v58 = vld [vmem:[#allocation13 + $0x70] sm:$0xff]  ;;  %v4182_v10 = vld [vmem:[#allocation13 + $0x68] sm:$0xff] }
 0x46d   :  { %3845 = vmatpush.msra.mxu2 %v3565_v29  ;;  %v3245_v18 = vadd.f32 %v7404_v30, %v3244_v4  ;;  %v4178_v4 = vld [vmem:[#allocation13 + $0x48] sm:$0xff] }
 0x46e   :  { %v3229_v14 = vsel %vm3228_vm12, %v7401_v11, %v3225_v37  ;;  %2166 = vst.msk [vmem:[#allocation19 + $0x1a] sm:$0x1] %vm830_vm4, %v2150_v24  ;;  %v3612_v37 = vld [vmem:[#allocation14 + $0x190] sm:$0xff]  ;;  %v4181_v24 = vld [vmem:[#allocation13 + $0x60] sm:$0xff] }
 0x46f   :  { %v3234_v1 = vsel %vm3231_vm13, %v3233_v31, %v3229_v14  ;;  %v3249_v44 = vsel %vm3248_vm1, %v7404_v30, %v3245_v18  ;;  %v3620_v30 = vld [vmem:[#allocation14 + $0x1d0] sm:$0xff]  ;;  %v4180_v14 = vld [vmem:[#allocation13 + $0x58] sm:$0xff] }
 0x470   :  { %v3256_v45 = vmul.f32 %v3234_v1, %v7300_v56  ;;  %v3250_v56 = vand.u32 2147483647, %v7384_v48  ;;  %v3608_v31 = vld [vmem:[#allocation14 + $0x170] sm:$0xff] }
 0x471   :  { %v5757_v32 = vpop.eup %5756  ;;  %v4179_v1 = vld [vmem:[#allocation13 + $0x50] sm:$0xff] }
 0x472   :  { %v5759_v7 = vpop.eup %5758  ;;  %v3257_v21 = vmul.f32 %v5757_v32, %v3215_v19  ;;  %vm3251_vm2 = vcmp.eq.f32.partialorder %v3250_v56, 8.507059e+37  ;;  %v3600_v32 = vld [vmem:[#allocation14 + $0x130] sm:$0xff] }
 0x473   :  { %v3546_v11 = vadd.f32 1.0, %v5759_v7  ;;  %v2140_v26 = vpop.permute.xlu2 %2139  ;;  %v3254_v36 = vsel %vm3251_vm2, %v3253_v41, %v3249_v44  ;;  %v3596_v7 = vld [vmem:[#allocation14 + $0x110] sm:$0xff]  ;;  %v4174_v41 = vld [vmem:[#allocation13 + $0x28] sm:$0xff] }
 0x474   :  { %v7439_v55 = vadd.f32 %v3257_v21, %v3256_v45  ;;  %v2152_v20 = vperm.slane %v2140_v26, %v7148_v33  ;;  %v4177_v21 = vld [vmem:[#allocation13 + $0x40] sm:$0xff]  ;;  %v4175_v56 = vld [vmem:[#allocation13 + $0x30] sm:$0xff] }
 0x475   :  { %5760 = vrcp.f32 %v3546_v11  ;;  %v3558_v63 = vand.u32 2147483648, %v3546_v11  ;;  %vm3552_vm5 = vweird.f32 %v3546_v11  ;;  %v3556_v34 = vand.u32 2147483647, %v3546_v11  ;;  %v3584_v44 = vld [vmem:[#allocation14 + $0xb0] sm:$0xff] }
 0x476   :  { %5762 = vtanh.f32 %v7439_v55  ;;  %2168 = vst.msk [vmem:[#allocation19 + $0x2a] sm:$0x1] %vm830_vm4, %v2152_v20  ;;  %v4176_v20 = vld [vmem:[#allocation13 + $0x38] sm:$0xff] }
 0x477   :  { %v3559_v60 = vor.u32 1.1754944e-38, %v3558_v63  ;;  %vm3557_vm7 = vcmp.eq.f32.partialorder %v3556_v34, 8.507059e+37 }
 0x47b   :  { %v5761_v8 = vpop.eup %5760 }
 0x47c   :  { %v5763_v57 = vpop.eup %5762  ;;  %v3548_v6 = vmul.f32 %v5761_v8, %v3546_v11  ;;  %vm3553_vm3 = vweird.f32 %v5761_v8  ;;  %v3592_v11 = vld [vmem:[#allocation14 + $0xf0] sm:$0xff] }
 0x47d   :  { %v3260_v12 = vmul.f32 %v5763_v57, %v3254_v36  ;;  %v2128_v9 = vpop.permute.xlu0 %2127  ;;  %vm3554_vm6 = vmor %vm3552_vm5, %vm3553_vm3  ;;  %v4173_v57 = vld [vmem:[#allocation13 + $0x20] sm:$0xff]  ;;  %v4172_v36 = vld [vmem:[#allocation13 + $0x18] sm:$0xff] }
 0x47e   :  { %v3549_v25 = vsub.f32 1.0, %v3548_v6  ;;  %v2131_v2 = vpop.permute.xlu1 %2130  ;;  %v2148_v13 = vperm.slane %v2128_v9, %v7148_v33  ;;  %v3576_v6 = vld [vmem:[#allocation14 + $0x70] sm:$0xff] }
 0x47f   :  { %3293 = vmatmul.f32.vlgmr.msra.gmra.mxu1 %v3260_v12  ;;  %3706 = vmatmul.f32.vlgmr.msra.gmra.mxu3 %v3260_v12  ;;  %v2149_v48 = vperm.slane %v2131_v2, %v7148_v33  ;;  %v4171_v9 = vld [vmem:[#allocation13 + $0x10] sm:$0xff]  ;;  %v4169_v2 = vld [vmem:[#allocation13] sm:$0xff] }
 0x480   :  { %3726 = vmatmul.f32.vlgmr.msrb.gmra.mxu0 %v3260_v12  ;;  %3766 = vmatmul.f32.vlgmr.msrb.gmra.mxu2 %v3260_v12  ;;  %2164 = vst.msk [vmem:[#allocation19 + $0xa] sm:$0x1] %vm830_vm4, %v2148_v13  ;;  %v3550_v46 = vmul.f32 %v5761_v8, %v3549_v25  ;;  %v3568_v25 = vld [vmem:[#allocation14 + $0x30] sm:$0xff]  ;;  %v3942_v13 = vld [vmem:[#allocation17 + $0x78] sm:$0xff] }
 0x481   :  { %3810 = vmatpush.msra.mxu1 %v3624_v61  ;;  %4189 = vmatpush.msrb.mxu0 %v4184_v52  ;;  %2165 = vst.msk [vmem:[#allocation19 + $0x12] sm:$0x1] %vm830_vm4, %v2149_v48  ;;  %v4170_v61 = vld [vmem:[#allocation13 + $0x8] sm:$0xff]  ;;  %v3564_v52 = vld [vmem:[#allocation14 + $0x10] sm:$0xff] }
 0x482   :  { %v3551_v49 = vadd.f32 %v5761_v8, %v3550_v46  ;;  %v4353_v48 = vld [vmem:[#allocation16 + $0x1e8] sm:$0xff]  ;;  %3943 = vmatpush.msra.mxu3 %v3942_v13  ;;  %v4320_v13 = vld [vmem:[#allocation16 + $0xe0] sm:$0xff] }
 0x483   :  { %3811 = vmatpush.msra.mxu1 %v3620_v30  ;;  %4190 = vmatpush.msrb.mxu0 %v4183_v58 }
 0x484   :  { %v3555_v51 = vsel %vm3554_vm6, %v5761_v8, %v3551_v49  ;;  %v3580_v8 = vld [vmem:[#allocation14 + $0x90] sm:$0xff]  ;;  %4376 = vmatpush.msrb.mxu2 %v4353_v48  ;;  %v4305_v48 = vld [vmem:[#allocation16 + $0x68] sm:$0xff] }
 0x485   :  { %3812 = vmatpush.msra.mxu1 %v3616_v15  ;;  %4191 = vmatpush.msrb.mxu0 %v4182_v10  ;;  %v3560_v27 = vsel %vm3557_vm7, %v3559_v60, %v3555_v51 }
 0x486   :  { %v2137_v0 = vpop.permute.xlu1 %2136 }
 0x487   :  { %3813 = vmatpush.msra.mxu1 %v3612_v37  ;;  %4192 = vmatpush.msrb.mxu0 %v4181_v24  ;;  %v2151_v29 = vperm.slane %v2137_v0, %v7148_v33  ;;  %v3939_v0 = vld [vmem:[#allocation17 + $0x60] sm:$0xff] }
 0x488   :  { %3746 = vmatmul.f32.vlgmr.msrb.gmra.mxu1 %v3260_v12  ;;  %3786 = vmatmul.f32.vlgmr.msrb.gmra.mxu3 %v3560_v27  ;;  %v3572_v12 = vld [vmem:[#allocation14 + $0x50] sm:$0xff] }
 0x489   :  { %3806 = vmatmul.f32.vlgmr.msra.gmra.mxu0 %v3560_v27  ;;  %3814 = vmatpush.msra.mxu1 %v3608_v31  ;;  %2167 = vst.msk [vmem:[#allocation19 + $0x22] sm:$0x1] %vm830_vm4, %v2151_v29  ;;  %v4349_v31 = vld [vmem:[#allocation16 + $0x1c8] sm:$0xff] }
 0x48a   :  { %3846 = vmatmul.f32.vlgmr.msra.gmra.mxu2 %v3560_v27  ;;  %4193 = vmatpush.msrb.mxu0 %v4180_v14  ;;  %v4348_v14 = vld [vmem:[#allocation16 + $0x1c0] sm:$0xff]  ;;  %v4333_v29 = vld [vmem:[#allocation16 + $0x148] sm:$0xff] }
 0x48b   :  { %3815 = vmatpush.msra.mxu1 %v3604_v59  ;;  %v2143_v19 = vpop.permute.xlu0 %2142  ;;  %4377 = vmatpush.msrb.mxu2 %v4349_v31  ;;  %v4351_v59 = vld [vmem:[#allocation16 + $0x1d8] sm:$0xff] }
 0x48c   :  { %4194 = vmatpush.msrb.mxu0 %v4179_v1  ;;  %v2153_v45 = vperm.slane %v2143_v19, %v7148_v33  ;;  %v3936_v1 = vld [vmem:[#allocation17 + $0x48] sm:$0xff]  ;;  %v4347_v19 = vld [vmem:[#allocation16 + $0x1b8] sm:$0xff] }
 0x48d   :  { %3816 = vmatpush.msra.mxu1 %v3600_v32  ;;  %v4344_v32 = vld [vmem:[#allocation16 + $0x1a0] sm:$0xff] }
 0x48e   :  { %4195 = vmatpush.msrb.mxu0 %v4178_v4  ;;  %2169 = vst.msk [vmem:[#allocation19 + $0x32] sm:$0x1] %vm830_vm4, %v2153_v45  ;;  %v2146_v26 = vpop.permute.xlu1 %2145  ;;  %v4329_v4 = vld [vmem:[#allocation16 + $0x128] sm:$0xff]  ;;  %v5914_v45 = vld [vmem:[#allocation16 + $0x180] sm:$0xff] }
 0x48f   :  { %3817 = vmatpush.msra.mxu1 %v3596_v7  ;;  %v2154_v18 = vperm.slane %v2146_v26, %v7148_v33  ;;  %v5913_v7 = vld [vmem:[#allocation17 + $0x40] sm:$0xff]  ;;  %v3934_v26 = vld [vmem:[#allocation17 + $0x38] sm:$0xff] }
 0x490   :  { %4196 = vmatpush.msrb.mxu0 %v4177_v21  ;;  %v5915_v21 = vld [vmem:[#allocation16 + $0x108] sm:$0xff] }
 0x491   :  { %3818 = vmatpush.msra.mxu1 %v3592_v11  ;;  %2170 = vst.msk [vmem:[#allocation19 + $0x3a] sm:$0x1] %vm830_vm4, %v2154_v18  ;;  %v5916_v11 = vld [vmem:[#allocation16 + $0x198] sm:$0xff]  ;;  %v4321_v18 = vld [vmem:[#allocation16 + $0xe8] sm:$0xff] }
 0x492   :  { %4197 = vmatpush.msrb.mxu0 %v4176_v20  ;;  %v4336_v20 = vld [vmem:[#allocation16 + $0x160] sm:$0xff] }
 0x493   :  { %3819 = vmatpush.msra.mxu1 %v3588_v23  ;;  %v4339_v23 = vld [vmem:[#allocation16 + $0x178] sm:$0xff] }
 0x494   :  { %4198 = vmatpush.msrb.mxu0 %v4175_v56  ;;  %v3933_v56 = vld [vmem:[#allocation17 + $0x30] sm:$0xff] }
 0x495   :  { %3820 = vmatpush.msra.mxu1 %v3584_v44  ;;  %v4332_v44 = vld [vmem:[#allocation16 + $0x140] sm:$0xff] }
 0x496   :  { %4199 = vmatpush.msrb.mxu0 %v4174_v41  ;;  %v4317_v41 = vld [vmem:[#allocation16 + $0xc8] sm:$0xff] }
 0x497   :  { %3821 = vmatpush.msra.mxu1 %v3580_v8  ;;  %v4335_v8 = vld [vmem:[#allocation16 + $0x158] sm:$0xff] }
 0x498   :  { %4200 = vmatpush.msrb.mxu0 %v4173_v57  ;;  %v3932_v57 = vld [vmem:[#allocation17 + $0x28] sm:$0xff] }
 0x499   :  { %3822 = vmatpush.msra.mxu1 %v3576_v6  ;;  %v4328_v6 = vld [vmem:[#allocation16 + $0x120] sm:$0xff] }
 0x49a   :  { %4201 = vmatpush.msrb.mxu0 %v4172_v36  ;;  %v4313_v36 = vld [vmem:[#allocation16 + $0xa8] sm:$0xff] }
 0x49b   :  { %3823 = vmatpush.msra.mxu1 %v3572_v12  ;;  %v4331_v12 = vld [vmem:[#allocation16 + $0x138] sm:$0xff] }
 0x49c   :  { %4202 = vmatpush.msrb.mxu0 %v4171_v9  ;;  %v3931_v9 = vld [vmem:[#allocation17 + $0x20] sm:$0xff] }
 0x49d   :  { %3824 = vmatpush.msra.mxu1 %v3568_v25  ;;  %v4324_v25 = vld [vmem:[#allocation16 + $0x100] sm:$0xff] }
 0x49e   :  { %4203 = vmatpush.msrb.mxu0 %v4170_v61  ;;  %v4309_v61 = vld [vmem:[#allocation16 + $0x88] sm:$0xff] }
 0x49f   :  { %3825 = vmatpush.msra.mxu1 %v3564_v52  ;;  %v4327_v52 = vld [vmem:[#allocation16 + $0x118] sm:$0xff] }
 0x4a0   :  { %4204 = vmatpush.msrb.mxu0 %v4169_v2  ;;  %3826 = vmatmul.f32.vlgmr.msra.gmra.mxu1 %v3560_v27  ;;  %v3930_v2 = vld [vmem:[#allocation17 + $0x18] sm:$0xff] }
 0x4a1   :  { %4205 = vmatmul.f32.vlgmr.msrb.gmra.mxu0 %v3560_v27  ;;  %4356 = vmatpush.msrb.mxu1 %v7341_v16  ;;  %v4341_v27 = vld [vmem:[#allocation16 + $0x188] sm:$0xff] }
 0x4a2   :  { %4416 = vmatpush.msra.mxu0 %v7344_v38 }
 0x4a3   :  { %4357 = vmatpush.msrb.mxu1 %v4348_v14 }
 0x4a4   :  { %4417 = vmatpush.msra.mxu0 %v4351_v59 }
 0x4a5   :  { %4358 = vmatpush.msrb.mxu1 %v4344_v32  ;;  %v4289_v32 = vld [vmem:[#allocation14 + $0x1e8] sm:$0xff] }
 0x4a6   :  { %4418 = vmatpush.msra.mxu0 %v4347_v19  ;;  %v4307_v19 = vld [vmem:[#allocation16 + $0x78] sm:$0xff] }
 0x4a7   :  { %4359 = vmatpush.msrb.mxu1 %v5914_v45  ;;  %v3300_v45 = vld [vmem:[#allocation5 + $0x18] sm:$0xff] }
 0x4a8   :  { %4419 = vmatpush.msra.mxu0 %v5916_v11 }
 0x4a9   :  { %4360 = vmatpush.msrb.mxu1 %v4336_v20 }
 0x4aa   :  { %4420 = vmatpush.msra.mxu0 %v4339_v23  ;;  %v4300_v23 = vld [vmem:[#allocation16 + $0x40] sm:$0xff] }
 0x4ab   :  { %4361 = vmatpush.msrb.mxu1 %v4332_v44 }
 0x4ac   :  { %4421 = vmatpush.msra.mxu0 %v4335_v8 }
 0x4ad   :  { %4362 = vmatpush.msrb.mxu1 %v4328_v6  ;;  %v4281_v6 = vld [vmem:[#allocation14 + $0x1a8] sm:$0xff] }
 0x4ae   :  { %4422 = vmatpush.msra.mxu0 %v4331_v12 }
 0x4af   :  { %4363 = vmatpush.msrb.mxu1 %v4324_v25 }
 0x4b0   :  { %4423 = vmatpush.msra.mxu0 %v4327_v52  ;;  %v4299_v52 = vld [vmem:[#allocation16 + $0x38] sm:$0xff] }
 0x4b1   :  { %4364 = vmatpush.msrb.mxu1 %v4320_v13  ;;  %v4342_v13 = vld [vmem:[#allocation16 + $0x190] sm:$0xff] }
 0x4c6   :  { %v2692_v30 = vpop.xlane.xlu2 %2691 }
 0x4c7   :  { %v2773_v58 = vadd.f32 %v6883_v17, %v2692_v30  ;;  %v4323_v30 = vld [vmem:[#allocation16 + $0xf8] sm:$0xff] }
 0x4c8   :  { %v2694_v46 = vpop.xlane.xlu0 %2693  ;;  %4424 = vmatpush.msra.mxu0 %v4323_v30 }
 0x4c9   :  { %v2696_v63 = vpop.xlane.xlu1 %2695  ;;  %v2774_v15 = vadd.f32 %v6869_v35, %v2694_v46  ;;  %2790 = vperm.xlu2 %5578, %v2773_v58   ;;  %v3929_v58 = vld [vmem:[#allocation17 + $0x10] sm:$0xff]  ;;  %v4316_v46 = vld [vmem:[#allocation16 + $0xc0] sm:$0xff] }
 0x4ca   :  { %v2775_v10 = vadd.f32 %v7042_v5, %v2696_v63  ;;  %v3941_v5 = vld [vmem:[#allocation17 + $0x70] sm:$0xff]  ;;  %v4301_v63 = vld [vmem:[#allocation16 + $0x48] sm:$0xff]  ;;  %4365 = vmatpush.msrb.mxu1 %v4316_v46 }
 0x4cb   :  { %2793 = vperm.xlu0 %5577, %v2774_v15   ;;  %3944 = vmatpush.msra.mxu3 %v3941_v5  ;;  %v3297_v15 = vld [vmem:[#allocation5] sm:$0xff] }
 0x4cc   :  { %2796 = vperm.xlu1 %5579, %v2775_v10   ;;  %v4319_v10 = vld [vmem:[#allocation16 + $0xd8] sm:$0xff] }
 0x4cd   :  { %4425 = vmatpush.msra.mxu0 %v4319_v10 }
 0x4ce   :  { %v2698_v49 = vpop.xlane.xlu2 %2697 }
 0x4cf   :  { %v2776_v16 = vadd.f32 %v6887_v39, %v2698_v49  ;;  %v3940_v39 = vld [vmem:[#allocation17 + $0x68] sm:$0xff] }
 0x4d0   :  { %v2700_v38 = vpop.xlane.xlu0 %2699  ;;  %3945 = vmatpush.msra.mxu3 %v3940_v39  ;;  %v3928_v49 = vld [vmem:[#allocation17 + $0x8] sm:$0xff]  ;;  %v3927_v39 = vld [vmem:[#allocation17] sm:$0xff] }
 0x4d1   :  { %v2777_v34 = vadd.f32 %v6873_v22, %v2700_v38  ;;  %2799 = vperm.xlu2 %5578, %v2776_v16   ;;  %v2702_v37 = vpop.xlane.xlu1 %2701  ;;  %v4345_v22 = vld [vmem:[#allocation16 + $0x1a8] sm:$0xff]  ;;  %v4312_v16 = vld [vmem:[#allocation16 + $0xa0] sm:$0xff] }
 0x4d2   :  { %v2778_v17 = vadd.f32 %v6896_v50, %v2702_v37  ;;  %4378 = vmatpush.msrb.mxu2 %v4345_v22  ;;  %3946 = vmatpush.msra.mxu3 %v3939_v0  ;;  %v5911_v50 = vld [vmem:[#allocation17 + $0x58] sm:$0xff]  ;;  %v4297_v38 = vld [vmem:[#allocation16 + $0x28] sm:$0xff]  ;;  %v3298_v37 = vld [vmem:[#allocation5 + $0x8] sm:$0xff] }
 0x4d3   :  { %4366 = vmatpush.msrb.mxu1 %v4312_v16  ;;  %v4308_v22 = vld [vmem:[#allocation16 + $0x80] sm:$0xff]  ;;  %v4338_v16 = vld [vmem:[#allocation16 + $0x170] sm:$0xff] }
 0x4d4   :  { %2802 = vperm.xlu1 %5579, %v2777_v34   ;;  %4379 = vmatpush.msrb.mxu2 %v4341_v27 }
 0x4d5   :  { %3947 = vmatpush.msra.mxu3 %v5911_v50  ;;  %4367 = vmatpush.msrb.mxu1 %v4308_v22  ;;  %v4293_v50 = vld [vmem:[#allocation16 + $0x8] sm:$0xff] }
 0x4d6   :  { %v2704_v24 = vpop.xlane.xlu2 %2703  ;;  %v4269_v22 = vld [vmem:[#allocation14 + $0x148] sm:$0xff] }
 0x4d7   :  { %v2779_v51 = vadd.f32 %v6877_v42, %v2704_v24  ;;  %v5912_v42 = vld [vmem:[#allocation16 + $0x168] sm:$0xff]  ;;  %v3299_v24 = vld [vmem:[#allocation5 + $0x10] sm:$0xff] }
 0x4d8   :  { %v2706_v35 = vpop.xlane.xlu0 %2705  ;;  %4380 = vmatpush.msrb.mxu2 %v5912_v42  ;;  %v4311_v42 = vld [vmem:[#allocation16 + $0x98] sm:$0xff] }
 0x4d9   :  { %v2780_v60 = vadd.f32 %v6924_v43, %v2706_v35  ;;  %2805 = vperm.xlu2 %5578, %v2778_v17   ;;  %2808 = vperm.xlu0 %5577, %v2779_v51   ;;  %v3937_v43 = vld [vmem:[#allocation17 + $0x50] sm:$0xff]  ;;  %v4315_v17 = vld [vmem:[#allocation16 + $0xb8] sm:$0xff] }
 0x4da   :  { %3948 = vmatpush.msra.mxu3 %v3937_v43  ;;  %4381 = vmatpush.msrb.mxu2 %v4333_v29  ;;  %v4354_v43 = vld [vmem:[#allocation16 + $0x1f0] sm:$0xff] }
 0x4db   :  { %4426 = vmatpush.msra.mxu0 %v4315_v17 }
 0x4dc   :  { %2811 = vperm.xlu1 %5579, %v2780_v60   ;;  %3949 = vmatpush.msra.mxu3 %v3936_v1 }
 0x4dd   :  { %4382 = vmatpush.msrb.mxu2 %v4329_v4  ;;  %4427 = vmatpush.msra.mxu0 %v4311_v42  ;;  %v4304_v4 = vld [vmem:[#allocation16 + $0x60] sm:$0xff] }
 0x4de   :  { %3950 = vmatpush.msra.mxu3 %v5913_v7  ;;  %v7483_v7 = vld [vmem:[%s7877_s8] sm:$0xf]  ;;  %4368 = vmatpush.msrb.mxu1 %v4304_v4 }
 0x4df   :  { %4383 = vmatpush.msrb.mxu2 %v5915_v21  ;;  %v4350_v21 = vld [vmem:[#allocation16 + $0x1d0] sm:$0xff]  ;;  %4428 = vmatpush.msra.mxu0 %v4307_v19  ;;  %v3853_v30 = vperm.slane %v7483_v7, 1 }
 0x4e0   :  { %3951 = vmatpush.msra.mxu3 %v3934_v26  ;;  %4369 = vmatpush.msrb.mxu1 %v4300_v23 }
 0x4e1   :  { %4384 = vmatpush.msrb.mxu2 %v4321_v18  ;;  %v4285_v18 = vld [vmem:[#allocation14 + $0x1c8] sm:$0xff] }
 0x4e2   :  { %3952 = vmatpush.msra.mxu3 %v3933_v56  ;;  %v4303_v56 = vld [vmem:[#allocation16 + $0x58] sm:$0xff] }
 0x4e3   :  { %4385 = vmatpush.msrb.mxu2 %v4317_v41  ;;  %v3301_v41 = vld [vmem:[#allocation5 + $0x20] sm:$0xff]  ;;  %4429 = vmatpush.msra.mxu0 %v4303_v56 }
 0x4e4   :  { %3953 = vmatpush.msra.mxu3 %v3932_v57  ;;  %v4346_v57 = vld [vmem:[#allocation16 + $0x1b0] sm:$0xff] }
 0x4e5   :  { %4386 = vmatpush.msrb.mxu2 %v4313_v36  ;;  %4430 = vmatpush.msra.mxu0 %v4299_v52 }
 0x4e6   :  { %3954 = vmatpush.msra.mxu3 %v3931_v9  ;;  %v3302_v9 = vld [vmem:[#allocation5 + $0x28] sm:$0xff] }
 0x4e7   :  { %4387 = vmatpush.msrb.mxu2 %v4309_v61  ;;  %v4296_v61 = vld [vmem:[#allocation16 + $0x20] sm:$0xff] }
 0x4e8   :  { %3955 = vmatpush.msra.mxu3 %v3930_v2  ;;  %v7493_v2 = vld [vmem:[%s7879_s10] ss:$0 sm:$0xff]  ;;  %4370 = vmatpush.msrb.mxu1 %v4296_v61  ;;  %v4272_v61 = vld [vmem:[#allocation14 + $0x160] sm:$0xff] }
 0x4e9   :  { %4388 = vmatpush.msrb.mxu2 %v4305_v48  ;;  %v4277_v48 = vld [vmem:[#allocation14 + $0x188] sm:$0xff] }
 0x4ea   :  { %3956 = vmatpush.msra.mxu3 %v3929_v58 }
 0x4eb   :  { %4389 = vmatpush.msrb.mxu2 %v4301_v63  ;;  %v4292_v63 = vld [vmem:[#allocation16] sm:$0xff] }
 0x4ec   :  { %3957 = vmatpush.msra.mxu3 %v3928_v49  ;;  %4371 = vmatpush.msrb.mxu1 %v4292_v63 }
 0x4ed   :  { %4390 = vmatpush.msrb.mxu2 %v4297_v38  ;;  %v4288_v38 = vld [vmem:[#allocation14 + $0x1e0] sm:$0xff] }
 0x4ee   :  { %3958 = vmatpush.msra.mxu3 %v3927_v39  ;;  %4436 = vmatpush.msra.mxu1 %v4288_v38  ;;  %v4284_v39 = vld [vmem:[#allocation14 + $0x1c0] sm:$0xff]  ;;  %v4253_v38 = vld [vmem:[#allocation14 + $0xc8] sm:$0xff] }
 0x4ef   :  { %4391 = vmatpush.msrb.mxu2 %v4293_v50 }
 0x4f0   :  { %4396 = vmatpush.msrb.mxu3 %v4354_v43  ;;  %v3852_v43 = vperm.slane %v7483_v7, 0  ;;  %4437 = vmatpush.msra.mxu1 %v4284_v39  ;;  %v4310_v39 = vld [vmem:[#allocation16 + $0x90] sm:$0xff] }
 0x4f1   :  { %4456 = vmatpush.msra.mxu2 %v4289_v32 }
 0x4f2   :  { %4397 = vmatpush.msrb.mxu3 %v4350_v21  ;;  %v4265_v21 = vld [vmem:[#allocation14 + $0x128] sm:$0xff] }
 0x4f3   :  { %4457 = vmatpush.msra.mxu2 %v4285_v18  ;;  %v4326_v18 = vld [vmem:[#allocation16 + $0x110] sm:$0xff] }
 0x4f4   :  { %4398 = vmatpush.msrb.mxu3 %v4346_v57  ;;  %v4261_v57 = vld [vmem:[#allocation14 + $0x108] sm:$0xff] }
 0x4f5   :  { %4458 = vmatpush.msra.mxu2 %v4281_v6 }
 0x4f6   :  { %4399 = vmatpush.msrb.mxu3 %v4342_v13 }
 0x4f7   :  { %4459 = vmatpush.msra.mxu2 %v4277_v48 }
 0x4f8   :  { %4400 = vmatpush.msrb.mxu3 %v4338_v16 }
 0x4fc   :  { %v7470_v34 = vpop.f32.mrf.mxu1 }
 0x4fd   :  { %v7472_v51 = vpop.f32.mrf.mxu0  ;;  %v3313_v35 = vperm.slane %v7470_v34, 0  ;;  %v3306_v60 = vrot.slane %v7470_v34, 1  ;;  %v3307_v5 = vrot.slane %v7470_v34, 2  ;;  %v3308_v31 = vrot.slane %v7470_v34, 3 }
 0x4fe   :  { %v3309_v0 = vrot.slane %v7470_v34, 4  ;;  %v3310_v27 = vrot.slane %v7470_v34, 5  ;;  %v3311_v25 = vrot.slane %v7470_v34, 6  ;;  %v3312_v46 = vrot.slane %v7470_v34, 7  ;;  %v4291_v34 = vld [vmem:[#allocation14 + $0x1f8] sm:$0xff] }
 0x4ff   :  { %v3329_v14 = vadd.f32 %v3313_v35, %v3297_v15  ;;  %v3314_v29 = vperm.slane %v3306_v60, 0  ;;  %v3315_v59 = vperm.slane %v3307_v5, 0  ;;  %v3316_v1 = vperm.slane %v3308_v31, 0  ;;  %v4295_v15 = vld [vmem:[#allocation16 + $0x18] sm:$0xff]  ;;  %v4334_v31 = vld [vmem:[#allocation16 + $0x150] sm:$0xff] }
 0x500   :  { %v3317_v20 = vperm.slane %v3309_v0, 0  ;;  %v3318_v8 = vperm.slane %v3310_v27, 0  ;;  %v3303_v35 = vld [vmem:[#allocation5 + $0x30] sm:$0xff]  ;;  %v3319_v60 = vperm.slane %v3311_v25, 0  ;;  %4431 = vmatpush.msra.mxu0 %v4295_v15  ;;  %v3320_v50 = vperm.slane %v3312_v46, 0  ;;  %4401 = vmatpush.msrb.mxu3 %v4334_v31 }
 0x501   :  { %5764 = vtanh.f32 %v3329_v14  ;;  %v3330_v11 = vadd.f32 %v3314_v29, %v3298_v37  ;;  %v3331_v26 = vadd.f32 %v3315_v59, %v3299_v24  ;;  %v3332_v12 = vadd.f32 %v3316_v1, %v3300_v45  ;;  %v4273_v37 = vld [vmem:[#allocation14 + $0x168] sm:$0xff]  ;;  %v3304_v29 = vld [vmem:[#allocation5 + $0x38] sm:$0xff]  ;;  %v4330_v59 = vld [vmem:[#allocation16 + $0x130] sm:$0xff] }
 0x502   :  { %v7485_v44 = vpop.f32.mrf.mxu3  ;;  %v3333_v58 = vadd.f32 %v3317_v20, %v3301_v41  ;;  %v3334_v49 = vadd.f32 %v3318_v8, %v3302_v9  ;;  %4460 = vmatpush.msra.mxu2 %v4273_v37  ;;  %4496 = vmatpush.msrb.mxu0 %v4291_v34  ;;  %v3335_v19 = vadd.f32 %v3319_v60, %v3303_v35  ;;  %v4280_v45 = vld [vmem:[#allocation14 + $0x1a0] sm:$0xff]  ;;  %v4283_v20 = vld [vmem:[#allocation14 + $0x1b8] sm:$0xff]  ;;  %v4322_v9 = vld [vmem:[#allocation16 + $0xf0] sm:$0xff] }
 0x503   :  { %v7487_v36 = vpop.f32.mrf.mxu2  ;;  %5766 = vtanh.f32 %v3330_v11  ;;  %v3336_v41 = vadd.f32 %v3320_v50, %v3304_v29  ;;  %4402 = vmatpush.msrb.mxu3 %v4330_v59  ;;  %v4276_v8 = vld [vmem:[#allocation14 + $0x180] sm:$0xff]  ;;  %4438 = vmatpush.msra.mxu1 %v4280_v45  ;;  %v4275_v46 = vld [vmem:[#allocation14 + $0x178] sm:$0xff]  ;;  %v5591_v45 = vld [vmem:[%s7874_s5] ss:$0 sm:$0xff] }
 0x504   :  { %5768 = vtanh.f32 %v3331_v26  ;;  %4461 = vmatpush.msra.mxu2 %v4269_v22  ;;  %v3855_v26 = vperm.slane %v7483_v7, 3  ;;  %v4271_v37 = vld [vmem:[#allocation14 + $0x158] sm:$0xff]  ;;  %v4264_v35 = vld [vmem:[#allocation14 + $0x120] sm:$0xff] }
 0x505   :  { %5770 = vtanh.f32 %v3332_v12  ;;  %4403 = vmatpush.msrb.mxu3 %v4326_v18  ;;  %4439 = vmatpush.msra.mxu1 %v4276_v8  ;;  %v3747_v34 = vpop.f32.mrf.mxu1  ;;  %v4267_v31 = vld [vmem:[#allocation14 + $0x138] sm:$0xff]  ;;  %v4260_v22 = vld [vmem:[#allocation14 + $0x100] sm:$0xff] }
 0x506   :  { %v3807_v10 = vpop.f32.mrf.mxu0  ;;  %5772 = vtanh.f32 %v3333_v58  ;;  %4462 = vmatpush.msra.mxu2 %v4265_v21  ;;  %v4257_v58 = vld [vmem:[#allocation14 + $0xe8] sm:$0xff]  ;;  %v4256_v29 = vld [vmem:[#allocation14 + $0xe0] sm:$0xff]  ;;  %v4302_v21 = vld [vmem:[#allocation16 + $0x50] sm:$0xff] }
 0x507   :  { %v5765_v24 = vpop.eup %5764  ;;  %v3808_v17 = vadd.f32 %v3807_v10, %v7472_v51  ;;  %v4287_v51 = vld [vmem:[#allocation14 + $0x1d8] sm:$0xff]  ;;  %5774 = vtanh.f32 %v3334_v49  ;;  %4404 = vmatpush.msrb.mxu3 %v4322_v9  ;;  %4440 = vmatpush.msra.mxu1 %v4272_v61  ;;  %v4268_v10 = vld [vmem:[#allocation14 + $0x140] sm:$0xff]  ;;  %v4294_v61 = vld [vmem:[#allocation16 + $0x10] sm:$0xff] }
 0x508   :  { %v3349_v5 = vmul.f32 %v5765_v24, %v7493_v2  ;;  %4497 = vmatpush.msrb.mxu0 %v4287_v51  ;;  %4463 = vmatpush.msra.mxu2 %v4261_v57  ;;  %v4248_v8 = vld [vmem:[#allocation14 + $0xa0] sm:$0xff] }
 0x509   :  { %v5767_v0 = vpop.eup %5766  ;;  %v3861_v27 = vadd.f32 %v3853_v30, %v3808_v17  ;;  %v4314_v17 = vld [vmem:[#allocation16 + $0xb0] sm:$0xff]  ;;  %4441 = vmatpush.msra.mxu1 %v4268_v10 }
 0x50a   :  { %v5769_v42 = vpop.eup %5768  ;;  %3357 = vadd.xlane.f32.xlu2 %v3349_v5  ;;  %v3350_v14 = vmul.f32 %v5767_v0, %v7493_v2  ;;  %4498 = vmatpush.msrb.mxu0 %v4283_v20  ;;  %v4249_v5 = vld [vmem:[#allocation14 + $0xa8] sm:$0xff]  ;;  %v4255_v20 = vld [vmem:[#allocation14 + $0xd8] sm:$0xff] }
 0x50b   :  { %v5549_v1 = vmul.f32 -1.442695, %v3861_v27  ;;  %v3787_v32 = vpop.f32.mrf.mxu3  ;;  %v3351_v4 = vmul.f32 %v5769_v42, %v7493_v2  ;;  %v5771_v23 = vpop.eup %5770  ;;  %4464 = vmatpush.msra.mxu2 %v4257_v58  ;;  %4442 = vmatpush.msra.mxu1 %v4264_v35  ;;  %v4245_v27 = vld [vmem:[#allocation14 + $0x88] sm:$0xff]  ;;  %v4263_v42 = vld [vmem:[#allocation14 + $0x118] sm:$0xff] }
 0x50c   :  { %v3788_v11 = vadd.f32 %v3787_v32, %v7485_v44  ;;  %3359 = vadd.xlane.f32.xlu0 %v3350_v14  ;;  %v4279_v44 = vld [vmem:[#allocation14 + $0x198] sm:$0xff]  ;;  %v5773_v25 = vpop.eup %5772  ;;  %v3352_v30 = vmul.f32 %v5771_v23, %v7493_v2  ;;  %v4241_v32 = vld [vmem:[#allocation14 + $0x68] sm:$0xff] }
 0x50d   :  { %5776 = vpow2.f32 %v5549_v1  ;;  %v3847_v56 = vpop.f32.mrf.mxu2  ;;  %3361 = vadd.xlane.f32.xlu1 %v3351_v4  ;;  %v5775_v52 = vpop.eup %5774  ;;  %4499 = vmatpush.msrb.mxu0 %v4279_v44  ;;  %v3353_v15 = vmul.f32 %v5773_v25, %v7493_v2  ;;  %v4259_v4 = vld [vmem:[#allocation14 + $0xf8] sm:$0xff] }
 0x50e   :  { %v3860_v6 = vadd.f32 %v3852_v43, %v3788_v11  ;;  %v3848_v12 = vadd.f32 %v3847_v56, %v7487_v36  ;;  %5778 = vtanh.f32 %v3335_v19  ;;  %v4318_v36 = vld [vmem:[#allocation16 + $0xd0] sm:$0xff]  ;;  %v3354_v16 = vmul.f32 %v5775_v52, %v7493_v2  ;;  %4465 = vmatpush.msra.mxu2 %v4253_v38  ;;  %4443 = vmatpush.msra.mxu1 %v4260_v22  ;;  %v4252_v11 = vld [vmem:[#allocation14 + $0xc0] sm:$0xff]  ;;  %v4251_v44 = vld [vmem:[#allocation14 + $0xb8] sm:$0xff] }
 0x50f   :  { %5780 = vtanh.f32 %v3336_v41  ;;  %4500 = vmatpush.msrb.mxu0 %v4275_v46  ;;  %4405 = vmatpush.msrb.mxu3 %v4318_v36  ;;  %v4306_v43 = vld [vmem:[#allocation16 + $0x70] sm:$0xff]  ;;  %v3854_v56 = vperm.slane %v7483_v7, 2  ;;  %v4244_v52 = vld [vmem:[#allocation14 + $0x80] sm:$0xff]  ;;  %v4247_v7 = vld [vmem:[#allocation14 + $0x98] sm:$0xff] }
 0x510   :  { %v5548_v13 = vmul.f32 -1.442695, %v3860_v6  ;;  %v3863_v48 = vadd.f32 %v3855_v26, %v3848_v12  ;;  %4466 = vmatpush.msra.mxu2 %v4249_v5  ;;  %4444 = vmatpush.msra.mxu1 %v4256_v29  ;;  %v4298_v41 = vld [vmem:[#allocation16 + $0x30] sm:$0xff]  ;;  %v4233_v12 = vld [vmem:[#allocation14 + $0x28] sm:$0xff]  ;;  %v4240_v36 = vld [vmem:[#allocation14 + $0x60] sm:$0xff] }
 0x511   :  { %4501 = vmatpush.msrb.mxu0 %v4271_v37  ;;  %4406 = vmatpush.msrb.mxu3 %v4314_v17  ;;  %v4236_v37 = vld [vmem:[#allocation14 + $0x40] sm:$0xff]  ;;  %v4239_v5 = vld [vmem:[#allocation14 + $0x58] sm:$0xff] }
 0x512   :  { %5782 = vpow2.f32 %v5548_v13  ;;  %v5550_v63 = vmul.f32 -1.442695, %v3863_v48  ;;  %3363 = vadd.xlane.f32.xlu2 %v3352_v30  ;;  %4467 = vmatpush.msra.mxu2 %v4245_v27  ;;  %v4229_v13 = vld [vmem:[#allocation14 + $0x8] sm:$0xff]  ;;  %v4232_v22 = vld [vmem:[#allocation14 + $0x20] sm:$0xff] }
 0x513   :  { %v5777_v49 = vpop.eup %5776  ;;  %4502 = vmatpush.msrb.mxu0 %v4267_v31  ;;  %4407 = vmatpush.msrb.mxu3 %v4310_v39 }
 0x514   :  { %v7508_v24 = vadd.f32 1.0, %v5777_v49  ;;  %5784 = vpow2.f32 %v5550_v63  ;;  %3365 = vadd.xlane.f32.xlu0 %v3353_v15  ;;  %v5779_v60 = vpop.eup %5778  ;;  %4468 = vmatpush.msra.mxu2 %v4241_v32  ;;  %v4243_v15 = vld [vmem:[#allocation14 + $0x78] sm:$0xff] }
 0x515   :  { %3367 = vadd.xlane.f32.xlu1 %v3354_v16  ;;  %v5781_v0 = vpop.eup %5780  ;;  %v3355_v51 = vmul.f32 %v5779_v60, %v7493_v2  ;;  %4503 = vmatpush.msrb.mxu0 %v4263_v42 }
 0x516   :  { %5786 = vrcp.f32 %v7508_v24  ;;  %v3356_v1 = vmul.f32 %v5781_v0, %v7493_v2  ;;  %4408 = vmatpush.msrb.mxu3 %v4306_v43  ;;  %v4237_v2 = vld [vmem:[#allocation14 + $0x48] sm:$0xff]  ;;  %4445 = vmatpush.msra.mxu1 %v4252_v11  ;;  %vm3892_vm9 = vweird.f32 %v7508_v24  ;;  %v3898_v49 = vand.u32 2147483648, %v7508_v24  ;;  %v4228_v43 = vld [vmem:[#allocation14] sm:$0xff] }
 0x517   :  { %4504 = vmatpush.msrb.mxu0 %v4259_v4  ;;  %4469 = vmatpush.msra.mxu2 %v4237_v2  ;;  %v3896_v60 = vand.u32 2147483647, %v7508_v24 }
 0x518   :  { %v5783_v50 = vpop.eup %5782  ;;  %4409 = vmatpush.msrb.mxu3 %v4302_v21  ;;  %4446 = vmatpush.msra.mxu1 %v4248_v8 }
 0x519   :  { %v7512_v14 = vadd.f32 1.0, %v5783_v50  ;;  %4505 = vmatpush.msrb.mxu0 %v4255_v20  ;;  %4470 = vmatpush.msra.mxu2 %v4233_v12  ;;  %v4235_v50 = vld [vmem:[#allocation14 + $0x38] sm:$0xff]  ;;  %vm3897_vm13 = vcmp.eq.f32.partialorder %v3896_v60, 8.507059e+37 }
 0x51a   :  { %v5785_v59 = vpop.eup %5784  ;;  %3369 = vadd.xlane.f32.xlu2 %v3355_v51  ;;  %4410 = vmatpush.msrb.mxu3 %v4298_v41  ;;  %v3899_v51 = vor.u32 1.1754944e-38, %v3898_v49 }
 0x51b   :  { %5788 = vrcp.f32 %v7512_v14  ;;  %v7516_v19 = vadd.f32 1.0, %v5785_v59  ;;  %4506 = vmatpush.msrb.mxu0 %v4251_v44  ;;  %4447 = vmatpush.msra.mxu1 %v4244_v52  ;;  %v3879_v39 = vand.u32 2147483648, %v7512_v14  ;;  %v3877_v27 = vand.u32 2147483647, %v7512_v14  ;;  %v4231_v59 = vld [vmem:[#allocation14 + $0x18] sm:$0xff] }
 0x51c   :  { %v7521_v26 = vpop.eup %5786  ;;  %3371 = vadd.xlane.f32.xlu0 %v3356_v1  ;;  %4411 = vmatpush.msrb.mxu3 %v4294_v61  ;;  %vm3873_vm12 = vweird.f32 %v7512_v14 }
 0x51d   :  { %v3888_v18 = vmul.f32 %v7521_v26, %v7508_v24  ;;  %5790 = vrcp.f32 %v7516_v19  ;;  %v3827_v23 = vpop.f32.mrf.mxu1  ;;  %vm3893_vm8 = vweird.f32 %v7521_v26  ;;  %4471 = vmatpush.msra.mxu2 %v4229_v13  ;;  %4507 = vmatpush.msrb.mxu0 %v4247_v7  ;;  %v3880_v32 = vor.u32 1.1754944e-38, %v3879_v39  ;;  %v4274_v39 = vld [vmem:[#allocation14 + $0x170] sm:$0xff] }
 0x51e   :  { %v3828_v57 = vadd.f32 %v3827_v23, %v3747_v34  ;;  %v4206_v6 = vpop.f32.mrf.mxu0  ;;  %4448 = vmatpush.msra.mxu1 %v4240_v36  ;;  %vm7541_vm10 = vmor %vm3892_vm9, %vm3893_vm8  ;;  %vm3878_vm15 = vcmp.eq.f32.partialorder %v3877_v27, 8.507059e+37  ;;  %v3918_v8 = vand.u32 2147483648, %v7516_v19  ;;  %vm3912_vm1 = vweird.f32 %v7516_v19  ;;  %v4270_v27 = vld [vmem:[#allocation14 + $0x150] sm:$0xff] }
 0x51f   :  { %v3889_v9 = vsub.f32 1.0, %v3888_v18  ;;  %v4207_v25 = vadd.f32 %v5591_v45, %v4206_v6  ;;  %4508 = vmatpush.msrb.mxu0 %v4243_v15  ;;  %v4282_v15 = vld [vmem:[#allocation14 + $0x1b0] sm:$0xff] }
 0x520   :  { %v3862_v58 = vadd.f32 %v3854_v56, %v3828_v57  ;;  %4449 = vmatpush.msra.mxu1 %v4236_v37  ;;  %v4278_v37 = vld [vmem:[#allocation14 + $0x190] sm:$0xff] }
 0x521   :  { %v5789_v48 = vpop.eup %5788  ;;  %v3890_v30 = vmul.f32 %v7521_v26, %v3889_v9  ;;  %v5551_v46 = vmul.f32 -1.442695, %v4207_v25  ;;  %4509 = vmatpush.msrb.mxu0 %v4239_v5  ;;  %v3919_v25 = vor.u32 1.1754944e-38, %v3918_v8  ;;  %v4838_v8 = vld [vmem:[#allocation13 + $0x18] sm:$0xff] }
 0x522   :  { %v3869_v63 = vmul.f32 %v5789_v48, %v7512_v14  ;;  %vm3874_vm11 = vweird.f32 %v5789_v48  ;;  %4450 = vmatpush.msra.mxu1 %v4232_v22 }
 0x523   :  { %v7530_v10 = vpop.eup %5790  ;;  %v3891_v16 = vadd.f32 %v7521_v26, %v3890_v30  ;;  %5792 = vpow2.f32 %v5551_v46  ;;  %v2791_v38 = vpop.permute.xlu2 %2790  ;;  %vm3875_vm14 = vmor %vm3873_vm12, %vm3874_vm11  ;;  %4510 = vmatpush.msrb.mxu0 %v4235_v50  ;;  %v4290_v30 = vld [vmem:[#allocation14 + $0x1f0] sm:$0xff] }
 0x524   :  { %v3870_v17 = vsub.f32 1.0, %v3869_v63  ;;  %v3908_v35 = vmul.f32 %v7530_v10, %v7516_v19  ;;  %v2813_v34 = vperm.slane %v2791_v38, %v7148_v33  ;;  %5794 = vtanh.f32 %v3862_v58  ;;  %4451 = vmatpush.msra.mxu1 %v4228_v43  ;;  %v4286_v58 = vld [vmem:[#allocation14 + $0x1d0] sm:$0xff]  ;;  %v4604_v38 = vld [vmem:[#allocation17 + $0x58] sm:$0xff] }
 0x525   :  { %v3895_v24 = vsel %vm7541_vm10, %v7521_v26, %v3891_v16  ;;  %4511 = vmatpush.msrb.mxu0 %v4231_v59  ;;  %vm3913_vm0 = vweird.f32 %v7530_v10  ;;  %v4849_v46 = vld [vmem:[#allocation13 + $0x70] sm:$0xff] }
 0x526   :  { %v3871_v0 = vmul.f32 %v5789_v48, %v3870_v17  ;;  %2829 = vst.msk [vmem:[#allocation19 + $0x3] sm:$0x1] %vm830_vm4, %v2813_v34  ;;  %v3909_v42 = vsub.f32 1.0, %v3908_v35  ;;  %v3900_v4 = vsel %vm3897_vm13, %v3899_v51, %v3895_v24  ;;  %vm3914_vm2 = vmor %vm3912_vm1, %vm3913_vm0  ;;  %v4847_v17 = vld [vmem:[#allocation13 + $0x60] sm:$0xff]  ;;  %v4845_v24 = vld [vmem:[#allocation13 + $0x50] sm:$0xff] }
 0x527   :  { %v3922_v14 = vmul.f32 %v3900_v4, %v7439_v55  ;;  %v3916_v55 = vand.u32 2147483647, %v7516_v19  ;;  %v4850_v19 = vld [vmem:[#allocation13 + $0x78] sm:$0xff]  ;;  %v4266_v50 = vld [vmem:[#allocation14 + $0x130] sm:$0xff]  ;;  %v4844_v51 = vld [vmem:[#allocation13 + $0x48] sm:$0xff] }
 0x528   :  { %v3872_v29 = vadd.f32 %v5789_v48, %v3871_v0  ;;  %v3910_v26 = vmul.f32 %v7530_v10, %v3909_v42  ;;  %v4846_v0 = vld [vmem:[#allocation13 + $0x58] sm:$0xff]  ;;  %v4262_v42 = vld [vmem:[#allocation14 + $0x110] sm:$0xff] }
 0x529   :  { %v5793_v1 = vpop.eup %5792  ;;  %vm3917_vm3 = vcmp.eq.f32.partialorder %v3916_v55, 8.507059e+37  ;;  %v4254_v4 = vld [vmem:[#allocation14 + $0xd0] sm:$0xff] }
 0x52a   :  { %v3876_v45 = vsel %vm3875_vm14, %v5789_v48, %v3872_v29  ;;  %v7553_v21 = vadd.f32 1.0, %v5793_v1  ;;  %v5795_v11 = vpop.eup %5794  ;;  %v3911_v41 = vadd.f32 %v7530_v10, %v3910_v26  ;;  %v4843_v29 = vld [vmem:[#allocation13 + $0x40] sm:$0xff]  ;;  %v4258_v1 = vld [vmem:[#allocation14 + $0xf0] sm:$0xff] }
 0x52b   :  { %v3881_v2 = vsel %vm3878_vm15, %v3880_v32, %v3876_v45  ;;  %v2800_v20 = vpop.permute.xlu2 %2799  ;;  %v4842_v32 = vld [vmem:[#allocation13 + $0x38] sm:$0xff]  ;;  %v4841_v45 = vld [vmem:[#allocation13 + $0x30] sm:$0xff] }
 0x52c   :  { %v3923_v18 = vmul.f32 %v5795_v11, %v3881_v2  ;;  %5796 = vrcp.f32 %v7553_v21  ;;  %v2816_v23 = vperm.slane %v2800_v20, %v7148_v33  ;;  %v3915_v44 = vsel %vm3914_vm2, %v7530_v10, %v3911_v41  ;;  %v4848_v10 = vld [vmem:[#allocation13 + $0x68] sm:$0xff]  ;;  %v4250_v11 = vld [vmem:[#allocation14 + $0xb0] sm:$0xff] }
 0x52d   :  { %v3920_v13 = vsel %vm3917_vm3, %v3919_v25, %v3915_v44  ;;  %v4224_v63 = vand.u32 2147483648, %v7553_v21  ;;  %vm4218_vm6 = vweird.f32 %v7553_v21  ;;  %v4222_v49 = vand.u32 2147483647, %v7553_v21  ;;  %v4840_v2 = vld [vmem:[#allocation13 + $0x28] sm:$0xff]  ;;  %v4246_v20 = vld [vmem:[#allocation14 + $0x90] sm:$0xff] }
 0x52e   :  { %v7559_v56 = vadd.f32 %v3923_v18, %v3922_v14  ;;  %2832 = vst.msk [vmem:[#allocation19 + $0x1b] sm:$0x1] %vm830_vm4, %v2816_v23  ;;  %v4839_v18 = vld [vmem:[#allocation13 + $0x20] sm:$0xff]  ;;  %v4242_v41 = vld [vmem:[#allocation14 + $0x70] sm:$0xff] }
 0x52f   :  { %v4225_v31 = vor.u32 1.1754944e-38, %v4224_v63  ;;  %vm4223_vm8 = vcmp.eq.f32.partialorder %v4222_v49, 8.507059e+37  ;;  %v4238_v55 = vld [vmem:[#allocation14 + $0x50] sm:$0xff] }
 0x530   :  { %5798 = vtanh.f32 %v7559_v56  ;;  %v7593_v44 = vld [vmem:[#allocation14 + $0x10] sm:$0xff] }
 0x532   :  { %v5797_v57 = vpop.eup %5796 }
 0x533   :  { %v4214_v6 = vmul.f32 %v5797_v57, %v7553_v21  ;;  %v2806_v12 = vpop.permute.xlu2 %2805  ;;  %vm4219_vm5 = vweird.f32 %v5797_v57 }
 0x534   :  { %v2818_v9 = vperm.slane %v2806_v12, %v7148_v33  ;;  %vm7575_vm7 = vmor %vm4218_vm6, %vm4219_vm5  ;;  %v4836_v12 = vld [vmem:[#allocation13 + $0x8] sm:$0xff] }
 0x535   :  { %v4215_v61 = vsub.f32 1.0, %v4214_v6  ;;  %v7591_v6 = vld [vmem:[#allocation14 + $0x30] sm:$0xff] }
 0x536   :  { %v5799_v52 = vpop.eup %5798  ;;  %2834 = vst.msk [vmem:[#allocation19 + $0x2b] sm:$0x1] %vm830_vm4, %v2818_v9  ;;  %v4835_v9 = vld [vmem:[#allocation13] sm:$0xff] }
 0x537   :  { %v3926_v7 = vmul.f32 %v5799_v52, %v3920_v13  ;;  %v4216_v48 = vmul.f32 %v5797_v57, %v4215_v61 }
 0x539   :  { %3959 = vmatmul.f32.vlgmr.msra.gmra.mxu3 %v3926_v7  ;;  %4372 = vmatmul.f32.vlgmr.msrb.gmra.mxu1 %v3926_v7  ;;  %v4217_v36 = vadd.f32 %v5797_v57, %v4216_v48 }
 0x53a   :  { %4392 = vmatmul.f32.vlgmr.msrb.gmra.mxu2 %v3926_v7  ;;  %4432 = vmatmul.f32.vlgmr.msra.gmra.mxu0 %v3926_v7 }
 0x53b   :  { %4476 = vmatpush.msra.mxu3 %v4290_v30  ;;  %4855 = vmatpush.msrb.mxu2 %v4850_v19  ;;  %v4221_v34 = vsel %vm7575_vm7, %v5797_v57, %v4217_v36  ;;  %v4837_v57 = vld [vmem:[#allocation13 + $0x10] sm:$0xff] }
 0x53c   :  { %v4226_v22 = vsel %vm4223_vm8, %v4225_v31, %v4221_v34  ;;  %v5017_v34 = vld [vmem:[#allocation16 + $0x1d8] sm:$0xff]  ;;  %v5010_v31 = vld [vmem:[#allocation16 + $0x1a0] sm:$0xff] }
 0x53d   :  { %4477 = vmatpush.msra.mxu3 %v4286_v58  ;;  %4856 = vmatpush.msrb.mxu2 %v4849_v46  ;;  %v2794_v16 = vpop.permute.xlu0 %2793 }
 0x53e   :  { %v2797_v35 = vpop.permute.xlu1 %2796  ;;  %v2814_v60 = vperm.slane %v2794_v16, %v7148_v33  ;;  %v4607_v16 = vld [vmem:[#allocation17 + $0x70] sm:$0xff] }
 0x53f   :  { %4478 = vmatpush.msra.mxu3 %v4282_v15  ;;  %4857 = vmatpush.msrb.mxu2 %v4848_v10  ;;  %v2815_v5 = vperm.slane %v2797_v35, %v7148_v33  ;;  %v7990_v10 = vld [vmem:[#allocation26_spill] sm:$0xff] }
 0x540   :  { %2830 = vst.msk [vmem:[#allocation19 + $0xb] sm:$0x1] %vm830_vm4, %v2814_v60  ;;  %v5014_v35 = vld [vmem:[#allocation16 + $0x1c0] sm:$0xff]  ;;  %v5015_v60 = vld [vmem:[#allocation16 + $0x1c8] sm:$0xff] }
 0x541   :  { %4479 = vmatpush.msra.mxu3 %v4278_v37  ;;  %4858 = vmatpush.msrb.mxu2 %v4847_v17  ;;  %2831 = vst.msk [vmem:[#allocation19 + $0x13] sm:$0x1] %vm830_vm4, %v2815_v5  ;;  %v5018_v37 = vld [vmem:[#allocation16 + $0x1e0] sm:$0xff]  ;;  %v5019_v17 = vld [vmem:[#allocation16 + $0x1e8] sm:$0xff] }
 0x542   :  { %4412 = vmatmul.f32.vlgmr.msrb.gmra.mxu3 %v3926_v7  ;;  %4452 = vmatmul.f32.vlgmr.msra.gmra.mxu1 %v4226_v22  ;;  %v4602_v5 = vld [vmem:[#allocation17 + $0x48] sm:$0xff] }
 0x543   :  { %4472 = vmatmul.f32.vlgmr.msra.gmra.mxu2 %v4226_v22  ;;  %4480 = vmatpush.msra.mxu3 %v4274_v39  ;;  %v5011_v39 = vld [vmem:[#allocation16 + $0x1a8] sm:$0xff] }
 0x544   :  { %4512 = vmatmul.f32.vlgmr.msrb.gmra.mxu0 %v4226_v22  ;;  %4859 = vmatpush.msrb.mxu2 %v4846_v0  ;;  %v4601_v0 = vld [vmem:[#allocation17 + $0x40] sm:$0xff] }
 0x545   :  { %4481 = vmatpush.msra.mxu3 %v4270_v27  ;;  %5042 = vmatpush.msra.mxu0 %v5019_v17  ;;  %v5006_v27 = vld [vmem:[#allocation16 + $0x180] sm:$0xff]  ;;  %v5923_v17 = vld [vmem:[#allocation16 + $0x1d0] sm:$0xff] }
 0x546   :  { %4860 = vmatpush.msrb.mxu2 %v4845_v24  ;;  %v2803_v43 = vpop.permute.xlu1 %2802  ;;  %v5007_v24 = vld [vmem:[#allocation16 + $0x188] sm:$0xff] }
 0x547   :  { %4482 = vmatpush.msra.mxu3 %v4266_v50  ;;  %v2817_v59 = vperm.slane %v2803_v43, %v7148_v33  ;;  %5043 = vmatpush.msra.mxu0 %v5015_v60  ;;  %v5009_v50 = vld [vmem:[#allocation16 + $0x198] sm:$0xff]  ;;  %v5003_v43 = vld [vmem:[#allocation16 + $0x168] sm:$0xff] }
 0x548   :  { %4861 = vmatpush.msrb.mxu2 %v4844_v51  ;;  %v4600_v51 = vld [vmem:[#allocation17 + $0x38] sm:$0xff] }
 0x549   :  { %4483 = vmatpush.msra.mxu3 %v4262_v42  ;;  %2833 = vst.msk [vmem:[#allocation19 + $0x23] sm:$0x1] %vm830_vm4, %v2817_v59  ;;  %5044 = vmatpush.msra.mxu0 %v5011_v39  ;;  %v5002_v42 = vld [vmem:[#allocation16 + $0x160] sm:$0xff]  ;;  %v4599_v59 = vld [vmem:[#allocation17 + $0x30] sm:$0xff]  ;;  %v7625_v60 = vld [vmem:[#allocation5 + $0x10] sm:$0xff] }
 0x54a   :  { %4862 = vmatpush.msrb.mxu2 %v4843_v29  ;;  %v5005_v29 = vld [vmem:[#allocation16 + $0x178] sm:$0xff] }
 0x54b   :  { %4484 = vmatpush.msra.mxu3 %v4258_v1  ;;  %v2809_v21 = vpop.permute.xlu0 %2808  ;;  %5045 = vmatpush.msra.mxu0 %v5007_v24  ;;  %v4998_v1 = vld [vmem:[#allocation16 + $0x140] sm:$0xff] }
 0x54c   :  { %4863 = vmatpush.msrb.mxu2 %v4842_v32  ;;  %v2819_v26 = vperm.slane %v2809_v21, %v7148_v33  ;;  %v4999_v32 = vld [vmem:[#allocation16 + $0x148] sm:$0xff] }
 0x54d   :  { %4485 = vmatpush.msra.mxu3 %v4254_v4  ;;  %5046 = vmatpush.msra.mxu0 %v5003_v43  ;;  %v5001_v4 = vld [vmem:[#allocation16 + $0x158] sm:$0xff]  ;;  %v5917_v21 = vld [vmem:[#allocation17 + $0x28] sm:$0xff] }
 0x54e   :  { %4864 = vmatpush.msrb.mxu2 %v4841_v45  ;;  %2835 = vst.msk [vmem:[#allocation19 + $0x33] sm:$0x1] %vm830_vm4, %v2819_v26  ;;  %v2812_v14 = vpop.permute.xlu1 %2811  ;;  %v4995_v45 = vld [vmem:[#allocation16 + $0x128] sm:$0xff]  ;;  %v5919_v26 = vld [vmem:[#allocation16 + $0x138] sm:$0xff] }
 0x54f   :  { %4486 = vmatpush.msra.mxu3 %v4250_v11  ;;  %v2820_v23 = vperm.slane %v2812_v14, %v7148_v33  ;;  %5047 = vmatpush.msra.mxu0 %v4999_v32  ;;  %v5918_v11 = vld [vmem:[#allocation16 + $0x120] sm:$0xff]  ;;  %v4991_v14 = vld [vmem:[#allocation16 + $0x108] sm:$0xff] }
 0x550   :  { %4865 = vmatpush.msrb.mxu2 %v4840_v2  ;;  %v4597_v2 = vld [vmem:[#allocation17 + $0x20] sm:$0xff] }
 0x551   :  { %4487 = vmatpush.msra.mxu3 %v4246_v20  ;;  %2836 = vst.msk [vmem:[#allocation19 + $0x3b] sm:$0x1] %vm830_vm4, %v2820_v23  ;;  %5048 = vmatpush.msra.mxu0 %v4995_v45  ;;  %v4990_v20 = vld [vmem:[#allocation16 + $0x100] sm:$0xff]  ;;  %v4596_v23 = vld [vmem:[#allocation17 + $0x18] sm:$0xff] }
 0x552   :  { %4866 = vmatpush.msrb.mxu2 %v4839_v18  ;;  %v4993_v18 = vld [vmem:[#allocation16 + $0x118] sm:$0xff]  ;;  %v5927_v32 = vld [vmem:[#allocation16 + $0x20] sm:$0xff] }
 0x553   :  { %4488 = vmatpush.msra.mxu3 %v4242_v41  ;;  %5049 = vmatpush.msra.mxu0 %v4991_v14  ;;  %v4986_v41 = vld [vmem:[#allocation16 + $0xe0] sm:$0xff] }
 0x554   :  { %4867 = vmatpush.msrb.mxu2 %v4838_v8  ;;  %v4987_v8 = vld [vmem:[#allocation16 + $0xe8] sm:$0xff] }
 0x555   :  { %4489 = vmatpush.msra.mxu3 %v4238_v55  ;;  %v4989_v55 = vld [vmem:[#allocation16 + $0xf8] sm:$0xff]  ;;  %5050 = vmatpush.msra.mxu0 %v4987_v8  ;;  %v4959_v8 = vld [vmem:[#allocation16 + $0x8] sm:$0xff] }
 0x556   :  { %4868 = vmatpush.msrb.mxu2 %v4837_v57  ;;  %v4595_v57 = vld [vmem:[#allocation17 + $0x10] sm:$0xff] }
 0x557   :  { %4490 = vmatpush.msra.mxu3 %v7591_v6 }
 0x558   :  { %4869 = vmatpush.msrb.mxu2 %v4836_v12  ;;  %v4982_v12 = vld [vmem:[#allocation16 + $0xc0] sm:$0xff] }
 0x559   :  { %4491 = vmatpush.msra.mxu3 %v7593_v44 }
 0x55a   :  { %4870 = vmatpush.msrb.mxu2 %v4835_v9  ;;  %4492 = vmatmul.f32.vlgmr.msra.gmra.mxu3 %v4226_v22  ;;  %v4983_v9 = vld [vmem:[#allocation16 + $0xc8] sm:$0xff] }
 0x55b   :  { %4871 = vmatmul.f32.vlgmr.msrb.gmra.mxu2 %v4226_v22  ;;  %5022 = vmatpush.msrb.mxu3 %v5018_v37  ;;  %v5013_v22 = vld [vmem:[#allocation16 + $0x1b8] sm:$0xff] }
 0x55c   :  { %5051 = vmatpush.msra.mxu0 %v4983_v9  ;;  %v7645_v9 = vld [vmem:[#allocation5 + $0x28] sm:$0xff] }
 0x55d   :  { %5023 = vmatpush.msrb.mxu3 %v5014_v35  ;;  %v7623_v35 = vld [vmem:[#allocation5 + $0x8] sm:$0xff] }
 0x55f   :  { %5024 = vmatpush.msrb.mxu3 %v5010_v31  ;;  %v5924_v31 = vld [vmem:[#allocation16 + $0x40] sm:$0xff] }
 0x561   :  { %5025 = vmatpush.msrb.mxu3 %v5006_v27 }
 0x563   :  { %5026 = vmatpush.msrb.mxu3 %v5002_v42  ;;  %v4963_v42 = vld [vmem:[#allocation16 + $0x28] sm:$0xff] }
 0x565   :  { %5027 = vmatpush.msrb.mxu3 %v4998_v1 }
 0x567   :  { %5028 = vmatpush.msrb.mxu3 %v5918_v11  ;;  %v7635_v11 = vld [vmem:[#allocation5 + $0x20] sm:$0xff] }
 0x569   :  { %5029 = vmatpush.msrb.mxu3 %v4990_v20 }
 0x56b   :  { %5030 = vmatpush.msrb.mxu3 %v4986_v41  ;;  %v4958_v41 = vld [vmem:[#allocation16] sm:$0xff] }
 0x56d   :  { %5031 = vmatpush.msrb.mxu3 %v4982_v12 }
 0x57d   :  { %v3358_v25 = vpop.xlane.xlu2 %3357 }
 0x57e   :  { %v3439_v61 = vadd.f32 %v6947_v28, %v3358_v25  ;;  %v4985_v25 = vld [vmem:[#allocation16 + $0xd8] sm:$0xff] }
 0x57f   :  { %v3360_v52 = vpop.xlane.xlu0 %3359 }
 0x580   :  { %v3362_v13 = vpop.xlane.xlu1 %3361  ;;  %v3440_v7 = vadd.f32 %v6881_v54, %v3360_v52  ;;  %3456 = vperm.xlu1 %5579, %v3439_v61   ;;  %v4979_v52 = vld [vmem:[#allocation16 + $0xa8] sm:$0xff] }
 0x581   :  { %v3441_v48 = vadd.f32 %v7048_v40, %v3362_v13  ;;  %v4608_v40 = vld [vmem:[#allocation17 + $0x78] sm:$0xff]  ;;  %5052 = vmatpush.msra.mxu0 %v4979_v52 }
 0x582   :  { %3459 = vperm.xlu0 %5577, %v3440_v7   ;;  %4609 = vmatpush.msrb.mxu1 %v4608_v40  ;;  %v5920_v7 = vld [vmem:[#allocation17 + $0x8] sm:$0xff] }
 0x583   :  { %3462 = vperm.xlu2 %5578, %v3441_v48   ;;  %v5921_v48 = vld [vmem:[#allocation16 + $0xa0] sm:$0xff]  ;;  %v7614_v40 = vld [vmem:[#allocation5] sm:$0xff] }
 0x584   :  { %4610 = vmatpush.msrb.mxu1 %v4607_v16  ;;  %5032 = vmatpush.msrb.mxu3 %v5921_v48  ;;  %v4955_v48 = vld [vmem:[#allocation14 + $0x1e8] sm:$0xff] }
 0x585   :  { %v3364_v30 = vpop.xlane.xlu2 %3363 }
 0x586   :  { %v3442_v19 = vadd.f32 %v6885_v3, %v3364_v30  ;;  %v4606_v3 = vld [vmem:[#allocation17 + $0x68] sm:$0xff]  ;;  %v5922_v30 = vld [vmem:[#allocation16 + $0xb8] sm:$0xff] }
 0x587   :  { %v3366_v58 = vpop.xlane.xlu0 %3365  ;;  %4611 = vmatpush.msrb.mxu1 %v4606_v3 }
 0x588   :  { %v3443_v46 = vadd.f32 %v6960_v53, %v3366_v58  ;;  %3465 = vperm.xlu1 %5579, %v3442_v19   ;;  %v3368_v36 = vpop.xlane.xlu1 %3367  ;;  %v4605_v53 = vld [vmem:[#allocation17 + $0x60] sm:$0xff] }
 0x589   :  { %v3444_v28 = vadd.f32 %v6893_v47, %v3368_v36  ;;  %4612 = vmatpush.msrb.mxu1 %v4605_v53  ;;  %v5021_v47 = vld [vmem:[#allocation16 + $0x1f8] sm:$0xff]  ;;  %v4593_v19 = vld [vmem:[#allocation17] sm:$0xff] }
 0x58a   :  { %5082 = vmatpush.msra.mxu2 %v5021_v47  ;;  %v4974_v58 = vld [vmem:[#allocation16 + $0x80] sm:$0xff]  ;;  %v4977_v36 = vld [vmem:[#allocation16 + $0x98] sm:$0xff]  ;;  %v4967_v47 = vld [vmem:[#allocation16 + $0x48] sm:$0xff] }
 0x58b   :  { %3468 = vperm.xlu2 %5578, %v3443_v46   ;;  %4613 = vmatpush.msrb.mxu1 %v4604_v38  ;;  %v4975_v46 = vld [vmem:[#allocation16 + $0x88] sm:$0xff] }
 0x58c   :  { %5083 = vmatpush.msra.mxu2 %v5017_v34  ;;  %5033 = vmatpush.msrb.mxu3 %v4974_v58  ;;  %v4957_v58 = vld [vmem:[#allocation14 + $0x1f8] sm:$0xff] }
 0x58d   :  { %v3370_v63 = vpop.xlane.xlu2 %3369  ;;  %5053 = vmatpush.msra.mxu0 %v4975_v46 }
 0x58e   :  { %v3445_v15 = vadd.f32 %v6983_v62, %v3370_v63  ;;  %v4603_v62 = vld [vmem:[#allocation17 + $0x50] sm:$0xff]  ;;  %5084 = vmatpush.msra.mxu2 %v5013_v22  ;;  %v7610_v63 = vld [vmem:[%s7877_s8] sm:$0xf] }
 0x58f   :  { %v3372_v54 = vpop.xlane.xlu0 %3371  ;;  %4614 = vmatpush.msrb.mxu1 %v4603_v62  ;;  %v4518_v62 = vperm.slane %v7610_v63, 0 }
 0x590   :  { %v3446_v49 = vadd.f32 %v7990_v10, %v3372_v54  ;;  %3471 = vperm.xlu1 %5579, %v3444_v28   ;;  %3474 = vperm.xlu0 %5577, %v3445_v15   ;;  %v5020_v28 = vld [vmem:[#allocation16 + $0x1f0] sm:$0xff]  ;;  %v4970_v15 = vld [vmem:[#allocation16 + $0x60] sm:$0xff]  ;;  %v4971_v54 = vld [vmem:[#allocation16 + $0x68] sm:$0xff] }
 0x591   :  { %4615 = vmatpush.msrb.mxu1 %v4602_v5  ;;  %5085 = vmatpush.msra.mxu2 %v5009_v50  ;;  %v4973_v10 = vld [vmem:[#allocation16 + $0x78] sm:$0xff] }
 0x592   :  { %5034 = vmatpush.msrb.mxu3 %v4970_v15  ;;  %5054 = vmatpush.msra.mxu0 %v4971_v54  ;;  %v5925_v50 = vld [vmem:[#allocation16 + $0x58] sm:$0xff]  ;;  %v5000_v54 = vld [vmem:[#allocation16 + $0x150] sm:$0xff] }
 0x593   :  { %3477 = vperm.xlu2 %5578, %v3446_v49   ;;  %4616 = vmatpush.msrb.mxu1 %v4601_v0 }
 0x594   :  { %5086 = vmatpush.msra.mxu2 %v5005_v29  ;;  %5035 = vmatpush.msrb.mxu3 %v5924_v31  ;;  %v4521_v29 = vperm.slane %v7610_v63, 3 }
 0x595   :  { %4617 = vmatpush.msrb.mxu1 %v4600_v51  ;;  %5055 = vmatpush.msra.mxu0 %v4967_v47  ;;  %v5926_v51 = vld [vmem:[#allocation16 + $0x1b0] sm:$0xff] }
 0x596   :  { %5087 = vmatpush.msra.mxu2 %v5001_v4  ;;  %5036 = vmatpush.msrb.mxu3 %v5927_v32  ;;  %v4996_v47 = vld [vmem:[#allocation16 + $0x130] sm:$0xff] }
 0x597   :  { %4618 = vmatpush.msrb.mxu1 %v4599_v59  ;;  %v7631_v59 = vld [vmem:[#allocation5 + $0x18] sm:$0xff]  ;;  %5056 = vmatpush.msra.mxu0 %v4963_v42  ;;  %v4943_v42 = vld [vmem:[#allocation14 + $0x188] sm:$0xff] }
 0x598   :  { %5088 = vmatpush.msra.mxu2 %v5919_v26  ;;  %v5928_v26 = vld [vmem:[#allocation16 + $0x38] sm:$0xff]  ;;  %5037 = vmatpush.msrb.mxu3 %v4958_v41  ;;  %v4934_v41 = vld [vmem:[#allocation14 + $0x140] sm:$0xff] }
 0x599   :  { %4619 = vmatpush.msrb.mxu1 %v5917_v21  ;;  %5057 = vmatpush.msra.mxu0 %v4959_v8  ;;  %v4935_v8 = vld [vmem:[#allocation14 + $0x148] sm:$0xff] }
 0x59a   :  { %5089 = vmatpush.msra.mxu2 %v4993_v18 }
 0x59b   :  { %4620 = vmatpush.msrb.mxu1 %v4597_v2  ;;  %v5008_v2 = vld [vmem:[#allocation16 + $0x190] sm:$0xff]  ;;  %5122 = vmatpush.msrb.mxu0 %v4955_v48 }
 0x59c   :  { %5090 = vmatpush.msra.mxu2 %v4989_v55  ;;  %v4961_v55 = vld [vmem:[#allocation16 + $0x18] sm:$0xff] }
 0x59d   :  { %4621 = vmatpush.msrb.mxu1 %v4596_v23 }
 0x59e   :  { %5091 = vmatpush.msra.mxu2 %v4985_v25 }
 0x59f   :  { %4622 = vmatpush.msrb.mxu1 %v4595_v57  ;;  %v7642_v57 = vld [vmem:[%s7879_s10] ss:$0 sm:$0xff] }
 0x5a0   :  { %5092 = vmatpush.msra.mxu2 %v5922_v30  ;;  %v4519_v30 = vperm.slane %v7610_v63, 1 }
 0x5a1   :  { %4623 = vmatpush.msrb.mxu1 %v5920_v7  ;;  %v4954_v7 = vld [vmem:[#allocation14 + $0x1e0] sm:$0xff] }
 0x5a2   :  { %5093 = vmatpush.msra.mxu2 %v4977_v36  ;;  %5102 = vmatpush.msra.mxu3 %v4954_v7  ;;  %v4931_v7 = vld [vmem:[#allocation14 + $0x128] sm:$0xff] }
 0x5a3   :  { %4624 = vmatpush.msrb.mxu1 %v4593_v19 }
 0x5a4   :  { %5094 = vmatpush.msra.mxu2 %v4973_v10  ;;  %v4950_v10 = vld [vmem:[#allocation14 + $0x1c0] sm:$0xff] }
 0x5a5   :  { %5062 = vmatpush.msra.mxu1 %v5020_v28  ;;  %5103 = vmatpush.msra.mxu3 %v4950_v10  ;;  %v4927_v10 = vld [vmem:[#allocation14 + $0x108] sm:$0xff] }
 0x5a6   :  { %5095 = vmatpush.msra.mxu2 %v5925_v50  ;;  %v4992_v50 = vld [vmem:[#allocation16 + $0x110] sm:$0xff] }
 0x5a7   :  { %5063 = vmatpush.msra.mxu1 %v5923_v17 }
 0x5a8   :  { %5096 = vmatpush.msra.mxu2 %v5928_v26 }
 0x5a9   :  { %5064 = vmatpush.msra.mxu1 %v5926_v51  ;;  %v4942_v51 = vld [vmem:[#allocation14 + $0x180] sm:$0xff] }
 0x5aa   :  { %5097 = vmatpush.msra.mxu2 %v4961_v55 }
 0x5ab   :  { %5065 = vmatpush.msra.mxu1 %v5008_v2 }
 0x5ac   :  { %5162 = vmatpush.msrb.mxu2 %v4957_v58 }
 0x5b6   :  { %v4373_v61 = vpop.f32.mrf.mxu1 }
 0x5b7   :  { %v7605_v13 = vpop.f32.mrf.mxu0 }
 0x5bc   :  { %v7612_v49 = vpop.f32.mrf.mxu3 }
 0x5bd   :  { %v7616_v16 = vpop.f32.mrf.mxu2  ;;  %v3979_v3 = vperm.slane %v7612_v49, 0  ;;  %v3972_v53 = vrot.slane %v7612_v49, 1  ;;  %v3973_v38 = vrot.slane %v7612_v49, 2  ;;  %v3974_v37 = vrot.slane %v7612_v49, 3 }
 0x5be   :  { %v3975_v34 = vrot.slane %v7612_v49, 4  ;;  %v3976_v5 = vrot.slane %v7612_v49, 5  ;;  %v3977_v23 = vrot.slane %v7612_v49, 6  ;;  %v3978_v19 = vrot.slane %v7612_v49, 7  ;;  %v4953_v49 = vld [vmem:[#allocation14 + $0x1d8] sm:$0xff] }
 0x5bf   :  { %v4453_v39 = vpop.f32.mrf.mxu1  ;;  %v3995_v22 = vadd.f32 %v3979_v3, %v7614_v40  ;;  %v3980_v0 = vperm.slane %v3972_v53, 0  ;;  %v3981_v27 = vperm.slane %v3973_v38, 0  ;;  %v3982_v24 = vperm.slane %v3974_v37, 0  ;;  %v4951_v3 = vld [vmem:[#allocation14 + $0x1c8] sm:$0xff]  ;;  %v7652_v37 = vld [vmem:[#allocation5 + $0x30] sm:$0xff]  ;;  %5163 = vmatpush.msrb.mxu2 %v4953_v49  ;;  %v4972_v49 = vld [vmem:[#allocation16 + $0x70] sm:$0xff] }
 0x5c0   :  { %v4454_v43 = vadd.f32 %v4453_v39, %v4373_v61  ;;  %v3983_v1 = vperm.slane %v3975_v34, 0  ;;  %v3984_v18 = vperm.slane %v3976_v5, 0  ;;  %v3985_v15 = vperm.slane %v3977_v23, 0  ;;  %5123 = vmatpush.msrb.mxu0 %v4951_v3  ;;  %v4947_v34 = vld [vmem:[#allocation14 + $0x1a8] sm:$0xff]  ;;  %v7655_v39 = vld [vmem:[#allocation5 + $0x38] sm:$0xff]  ;;  %v4929_v3 = vld [vmem:[#allocation14 + $0x118] sm:$0xff] }
 0x5c1   :  { %v4513_v4 = vpop.f32.mrf.mxu0  ;;  %5800 = vtanh.f32 %v3995_v22  ;;  %v3996_v45 = vadd.f32 %v3980_v0, %v7623_v35  ;;  %v3997_v21 = vadd.f32 %v3981_v27, %v7625_v60  ;;  %v3998_v12 = vadd.f32 %v3982_v24, %v7631_v59  ;;  %v4949_v22 = vld [vmem:[#allocation14 + $0x1b8] sm:$0xff] }
 0x5c2   :  { %v4526_v20 = vadd.f32 %v4518_v62, %v4454_v43  ;;  %v4514_v14 = vadd.f32 %v4513_v4, %v7605_v13  ;;  %v3999_v52 = vadd.f32 %v3983_v1, %v7635_v11  ;;  %v5004_v13 = vld [vmem:[#allocation16 + $0x170] sm:$0xff]  ;;  %v4000_v28 = vadd.f32 %v3984_v18, %v7645_v9  ;;  %v4946_v62 = vld [vmem:[#allocation14 + $0x1a0] sm:$0xff]  ;;  %5124 = vmatpush.msrb.mxu0 %v4947_v34  ;;  %v4945_v1 = vld [vmem:[#allocation14 + $0x198] sm:$0xff] }
 0x5c3   :  { %5802 = vtanh.f32 %v3996_v45  ;;  %5066 = vmatpush.msra.mxu1 %v5004_v13  ;;  %5104 = vmatpush.msra.mxu3 %v4946_v62  ;;  %v4001_v24 = vadd.f32 %v3985_v15, %v7652_v37  ;;  %v4988_v4 = vld [vmem:[#allocation16 + $0xf0] sm:$0xff]  ;;  %v4938_v45 = vld [vmem:[#allocation14 + $0x160] sm:$0xff]  ;;  %v4923_v62 = vld [vmem:[#allocation14 + $0xe8] sm:$0xff] }
 0x5c4   :  { %v5552_v25 = vmul.f32 -1.442695, %v4526_v20  ;;  %v4529_v61 = vadd.f32 %v4521_v29, %v4514_v14  ;;  %5804 = vtanh.f32 %v3997_v21  ;;  %5164 = vmatpush.msrb.mxu2 %v4949_v22  ;;  %v4939_v21 = vld [vmem:[#allocation14 + $0x168] sm:$0xff]  ;;  %5125 = vmatpush.msrb.mxu0 %v4943_v42  ;;  %v4941_v14 = vld [vmem:[#allocation14 + $0x178] sm:$0xff]  ;;  %v4984_v18 = vld [vmem:[#allocation16 + $0xd0] sm:$0xff] }
 0x5c5   :  { %5067 = vmatpush.msra.mxu1 %v5000_v54  ;;  %5105 = vmatpush.msra.mxu3 %v4942_v51  ;;  %v4930_v13 = vld [vmem:[#allocation14 + $0x120] sm:$0xff]  ;;  %v4925_v34 = vld [vmem:[#allocation14 + $0xf8] sm:$0xff]  ;;  %v4964_v51 = vld [vmem:[#allocation16 + $0x30] sm:$0xff] }
 0x5c6   :  { %5806 = vpow2.f32 %v5552_v25  ;;  %v5554_v46 = vmul.f32 -1.442695, %v4529_v61  ;;  %v4473_v36 = vpop.f32.mrf.mxu2  ;;  %5165 = vmatpush.msrb.mxu2 %v4945_v1  ;;  %5126 = vmatpush.msrb.mxu0 %v4939_v21  ;;  %v4918_v22 = vld [vmem:[#allocation14 + $0xc0] sm:$0xff]  ;;  %v4917_v1 = vld [vmem:[#allocation14 + $0xb8] sm:$0xff] }
 0x5c7   :  { %v5801_v53 = vpop.eup %5800  ;;  %v4474_v38 = vadd.f32 %v4473_v36, %v7616_v16  ;;  %5808 = vtanh.f32 %v3998_v12  ;;  %v3986_v16 = vperm.slane %v3978_v19, 0  ;;  %5068 = vmatpush.msra.mxu1 %v4996_v47  ;;  %5106 = vmatpush.msra.mxu3 %v4938_v45  ;;  %v4937_v12 = vld [vmem:[#allocation14 + $0x158] sm:$0xff]  ;;  %v4976_v36 = vld [vmem:[#allocation16 + $0x90] sm:$0xff]  ;;  %v4914_v42 = vld [vmem:[#allocation14 + $0xa0] sm:$0xff] }
 0x5c8   :  { %v4015_v17 = vmul.f32 %v5801_v53, %v7642_v57  ;;  %5810 = vtanh.f32 %v3999_v52  ;;  %5166 = vmatpush.msrb.mxu2 %v4941_v14  ;;  %v4980_v52 = vld [vmem:[#allocation16 + $0xb0] sm:$0xff]  ;;  %5127 = vmatpush.msrb.mxu0 %v4935_v8  ;;  %v4910_v21 = vld [vmem:[#allocation14 + $0x80] sm:$0xff] }
 0x5c9   :  { %v5803_v5 = vpop.eup %5802  ;;  %5812 = vpow2.f32 %v5554_v46  ;;  %v4527_v31 = vadd.f32 %v4519_v30, %v4474_v38  ;;  %5069 = vmatpush.msra.mxu1 %v4992_v50  ;;  %v4002_v20 = vadd.f32 %v3986_v16, %v7655_v39  ;;  %5107 = vmatpush.msra.mxu3 %v4934_v41  ;;  %v4933_v30 = vld [vmem:[#allocation14 + $0x138] sm:$0xff]  ;;  %v4413_v38 = vpop.f32.mrf.mxu3  ;;  %v4960_v45 = vld [vmem:[#allocation16 + $0x10] sm:$0xff] }
 0x5ca   :  { %v5805_v0 = vpop.eup %5804  ;;  %4023 = vadd.xlane.f32.xlu1 %v4015_v17  ;;  %v4016_v27 = vmul.f32 %v5803_v5, %v7642_v57  ;;  %5814 = vtanh.f32 %v4000_v28  ;;  %5167 = vmatpush.msrb.mxu2 %v4937_v12  ;;  %v4926_v28 = vld [vmem:[#allocation14 + $0x100] sm:$0xff]  ;;  %v4913_v41 = vld [vmem:[#allocation14 + $0x98] sm:$0xff] }
 0x5cb   :  { %v5553_v43 = vmul.f32 -1.442695, %v4527_v31  ;;  %v4017_v29 = vmul.f32 %v5805_v0, %v7642_v57  ;;  %5070 = vmatpush.msra.mxu1 %v4988_v4  ;;  %5108 = vmatpush.msra.mxu3 %v4930_v13  ;;  %v4922_v17 = vld [vmem:[#allocation14 + $0xe0] sm:$0xff]  ;;  %v4968_v31 = vld [vmem:[#allocation16 + $0x50] sm:$0xff]  ;;  %v4919_v0 = vld [vmem:[#allocation14 + $0xc8] sm:$0xff]  ;;  %v4520_v4 = vperm.slane %v7610_v63, 2 }
 0x5cc   :  { %v5807_v32 = vpop.eup %5806  ;;  %4025 = vadd.xlane.f32.xlu0 %v4016_v27  ;;  %5128 = vmatpush.msrb.mxu0 %v4931_v7  ;;  %v4906_v12 = vld [vmem:[#allocation14 + $0x60] sm:$0xff]  ;;  %v4907_v13 = vld [vmem:[#allocation14 + $0x68] sm:$0xff]  ;;  %v4909_v7 = vld [vmem:[#allocation14 + $0x78] sm:$0xff] }
 0x5cd   :  { %v5809_v26 = vpop.eup %5808  ;;  %v7660_v2 = vadd.f32 1.0, %v5807_v32  ;;  %5816 = vpow2.f32 %v5553_v43  ;;  %4027 = vadd.xlane.f32.xlu2 %v4017_v29  ;;  %5071 = vmatpush.msra.mxu1 %v4984_v18  ;;  %v5593_v43 = vld [vmem:[%s7874_s5] ss:$0 sm:$0xff] }
 0x5ce   :  { %v5811_v23 = vpop.eup %5810  ;;  %5818 = vtanh.f32 %v4001_v24  ;;  %v4018_v61 = vmul.f32 %v5809_v26, %v7642_v57  ;;  %5168 = vmatpush.msrb.mxu2 %v4933_v30  ;;  %5109 = vmatpush.msra.mxu3 %v4926_v28  ;;  %v4921_v24 = vld [vmem:[#allocation14 + $0xd8] sm:$0xff]  ;;  %v4915_v29 = vld [vmem:[#allocation14 + $0xa8] sm:$0xff] }
 0x5cf   :  { %v5813_v55 = vpop.eup %5812  ;;  %5820 = vrcp.f32 %v7660_v2  ;;  %v4019_v48 = vmul.f32 %v5811_v23, %v7642_v57  ;;  %5072 = vmatpush.msra.mxu1 %v4980_v52  ;;  %5129 = vmatpush.msrb.mxu0 %v4927_v10  ;;  %v4911_v23 = vld [vmem:[#allocation14 + $0x88] sm:$0xff]  ;;  %vm4539_vm11 = vweird.f32 %v7660_v2 }
 0x5d0   :  { %v5815_v25 = vpop.eup %5814  ;;  %5822 = vtanh.f32 %v4002_v20  ;;  %v7666_v58 = vadd.f32 1.0, %v5813_v55  ;;  %5169 = vmatpush.msrb.mxu2 %v4929_v3  ;;  %5110 = vmatpush.msra.mxu3 %v4922_v17  ;;  %v4903_v10 = vld [vmem:[#allocation14 + $0x48] sm:$0xff]  ;;  %v4905_v3 = vld [vmem:[#allocation14 + $0x58] sm:$0xff] }
 0x5d1   :  { %v4020_v46 = vmul.f32 %v5815_v25, %v7642_v57  ;;  %5073 = vmatpush.msra.mxu1 %v4976_v36  ;;  %5130 = vmatpush.msrb.mxu0 %v4923_v62 }
 0x5d2   :  { %4029 = vadd.xlane.f32.xlu1 %v4018_v61  ;;  %5170 = vmatpush.msrb.mxu2 %v4925_v34  ;;  %v4899_v34 = vld [vmem:[#allocation14 + $0x28] sm:$0xff]  ;;  %vm4578_vm2 = vweird.f32 %v7666_v58 }
 0x5d3   :  { %v5817_v19 = vpop.eup %5816  ;;  %5074 = vmatpush.msra.mxu1 %v4972_v49  ;;  %5111 = vmatpush.msra.mxu3 %v4918_v22  ;;  %v4898_v49 = vld [vmem:[#allocation14 + $0x20] sm:$0xff] }
 0x5d4   :  { %v5819_v15 = vpop.eup %5818  ;;  %v7669_v54 = vadd.f32 1.0, %v5817_v19  ;;  %4031 = vadd.xlane.f32.xlu0 %v4019_v48  ;;  %5131 = vmatpush.msrb.mxu0 %v4919_v0 }
 0x5d5   :  { %v7671_v53 = vpop.eup %5820  ;;  %4033 = vadd.xlane.f32.xlu2 %v4020_v46  ;;  %v4021_v16 = vmul.f32 %v5819_v15, %v7642_v57  ;;  %5075 = vmatpush.msra.mxu1 %v4968_v31  ;;  %v4902_v46 = vld [vmem:[#allocation14 + $0x40] sm:$0xff] }
 0x5d6   :  { %v4535_v47 = vmul.f32 %v7671_v53, %v7660_v2  ;;  %5824 = vrcp.f32 %v7669_v54  ;;  %v5823_v5 = vpop.eup %5822  ;;  %5171 = vmatpush.msrb.mxu2 %v4921_v24  ;;  %5112 = vmatpush.msra.mxu3 %v4914_v42  ;;  %v4564_v61 = vand.u32 2147483648, %v7669_v54  ;;  %vm4540_vm9 = vweird.f32 %v7671_v53  ;;  %v4897_v24 = vld [vmem:[#allocation14 + $0x18] sm:$0xff] }
 0x5d7   :  { %5826 = vrcp.f32 %v7666_v58  ;;  %v4022_v50 = vmul.f32 %v5823_v5, %v7642_v57  ;;  %5076 = vmatpush.msra.mxu1 %v4964_v51  ;;  %5132 = vmatpush.msrb.mxu0 %v4915_v29  ;;  %v4562_v19 = vand.u32 2147483647, %v7669_v54  ;;  %vm4558_vm12 = vweird.f32 %v7669_v54  ;;  %vm7705_vm13 = vmor %vm4539_vm11, %vm4540_vm9  ;;  %v4901_v5 = vld [vmem:[#allocation14 + $0x38] sm:$0xff] }
 0x5d8   :  { %v4536_v27 = vsub.f32 1.0, %v4535_v47  ;;  %5172 = vmatpush.msrb.mxu2 %v4917_v1  ;;  %5113 = vmatpush.msra.mxu3 %v4910_v21  ;;  %v4543_v47 = vand.u32 2147483647, %v7660_v2 }
 0x5d9   :  { %5077 = vmatpush.msra.mxu1 %v4960_v45  ;;  %5133 = vmatpush.msrb.mxu0 %v4911_v23  ;;  %vm4563_vm15 = vcmp.eq.f32.partialorder %v4562_v19, 8.507059e+37 }
 0x5da   :  { %4035 = vadd.xlane.f32.xlu1 %v4021_v16  ;;  %v4537_v14 = vmul.f32 %v7671_v53, %v4536_v27  ;;  %5173 = vmatpush.msrb.mxu2 %v4913_v41  ;;  %v4565_v16 = vor.u32 1.1754944e-38, %v4564_v61  ;;  %v4895_v27 = vld [vmem:[#allocation14 + $0x8] sm:$0xff]  ;;  %vm4544_vm0 = vcmp.eq.f32.partialorder %v4543_v47, 8.507059e+37  ;;  %v4940_v47 = vld [vmem:[#allocation14 + $0x170] sm:$0xff] }
 0x5db   :  { %5114 = vmatpush.msra.mxu3 %v4906_v12  ;;  %5134 = vmatpush.msrb.mxu0 %v4907_v13 }
 0x5dc   :  { %v7682_v32 = vpop.eup %5824  ;;  %4037 = vadd.xlane.f32.xlu0 %v4022_v50  ;;  %v4538_v28 = vadd.f32 %v7671_v53, %v4537_v14  ;;  %5174 = vmatpush.msrb.mxu2 %v4909_v7  ;;  %v4956_v7 = vld [vmem:[#allocation14 + $0x1f0] sm:$0xff] }
 0x5dd   :  { %v7685_v57 = vpop.eup %5826  ;;  %v4554_v26 = vmul.f32 %v7682_v32, %v7669_v54  ;;  %v4493_v20 = vpop.f32.mrf.mxu3  ;;  %vm4559_vm10 = vweird.f32 %v7682_v32  ;;  %5115 = vmatpush.msra.mxu3 %v4902_v46  ;;  %5135 = vmatpush.msrb.mxu0 %v4903_v10  ;;  %v4894_v54 = vld [vmem:[#allocation14] sm:$0xff]  ;;  %v4944_v10 = vld [vmem:[#allocation14 + $0x190] sm:$0xff] }
 0x5de   :  { %v3463_v18 = vpop.permute.xlu2 %3462  ;;  %v4494_v8 = vadd.f32 %v4493_v20, %v4413_v38  ;;  %v4872_v55 = vpop.f32.mrf.mxu2  ;;  %v4574_v48 = vmul.f32 %v7685_v57, %v7666_v58  ;;  %v4545_v38 = vand.u32 2147483648, %v7660_v2  ;;  %vm4560_vm14 = vmor %vm4558_vm12, %vm4559_vm10  ;;  %5175 = vmatpush.msrb.mxu2 %v4905_v3  ;;  %v4542_v22 = vsel %vm7705_vm13, %v7671_v53, %v4538_v28 }
 0x5df   :  { %v3481_v63 = vperm.slane %v3463_v18, %v7148_v33  ;;  %v4555_v25 = vsub.f32 1.0, %v4554_v26  ;;  %v4873_v52 = vadd.f32 %v5593_v43, %v4872_v55  ;;  %5116 = vmatpush.msra.mxu3 %v4898_v49  ;;  %5136 = vmatpush.msrb.mxu0 %v4899_v34  ;;  %vm4579_vm1 = vweird.f32 %v7685_v57  ;;  %v4932_v34 = vld [vmem:[#allocation14 + $0x130] sm:$0xff] }
 0x5e0   :  { %v4528_v30 = vadd.f32 %v4520_v4, %v4494_v8  ;;  %v4575_v31 = vsub.f32 1.0, %v4574_v48  ;;  %v4546_v50 = vor.u32 1.1754944e-38, %v4545_v38  ;;  %5176 = vmatpush.msrb.mxu2 %v4901_v5  ;;  %v4584_v20 = vand.u32 2147483648, %v7666_v58  ;;  %vm4580_vm3 = vmor %vm4578_vm2, %vm4579_vm1 }
 0x5e1   :  { %3497 = vst.msk [vmem:[#allocation19 + $0x14] sm:$0x1] %vm830_vm4, %v3481_v63  ;;  %v4556_v36 = vmul.f32 %v7682_v32, %v4555_v25  ;;  %v5555_v15 = vmul.f32 -1.442695, %v4873_v52  ;;  %5117 = vmatpush.msra.mxu3 %v4894_v54  ;;  %5137 = vmatpush.msrb.mxu0 %v4895_v27  ;;  %v4916_v27 = vld [vmem:[#allocation14 + $0xb0] sm:$0xff] }
 0x5e2   :  { %5828 = vtanh.f32 %v4528_v30  ;;  %v4576_v29 = vmul.f32 %v7685_v57, %v4575_v31  ;;  %v4547_v1 = vsel %vm4544_vm0, %v4546_v50, %v4542_v22  ;;  %5177 = vmatpush.msrb.mxu2 %v4897_v24  ;;  %v4585_v41 = vor.u32 1.1754944e-38, %v4584_v20  ;;  %v4912_v24 = vld [vmem:[#allocation14 + $0x90] sm:$0xff] }
 0x5e3   :  { %v4557_v62 = vadd.f32 %v7682_v32, %v4556_v36  ;;  %5830 = vpow2.f32 %v5555_v15  ;;  %v4948_v36 = vld [vmem:[#allocation14 + $0x1b0] sm:$0xff] }
 0x5e4   :  { %v4577_v26 = vadd.f32 %v7685_v57, %v4576_v29  ;;  %v5929_v50 = vld [vmem:[#allocation14 + $0x70] sm:$0xff] }
 0x5e5   :  { %v4561_v2 = vsel %vm4560_vm14, %v7682_v32, %v4557_v62  ;;  %v4936_v62 = vld [vmem:[#allocation14 + $0x150] sm:$0xff] }
 0x5e6   :  { %v3469_v0 = vpop.permute.xlu2 %3468  ;;  %v4566_v51 = vsel %vm4563_vm15, %v4565_v16, %v4561_v2  ;;  %v4581_v23 = vsel %vm4580_vm3, %v7685_v57, %v4577_v26  ;;  %v4952_v57 = vld [vmem:[#allocation14 + $0x1d0] sm:$0xff] }
 0x5e7   :  { %v3483_v42 = vperm.slane %v3469_v0, %v7148_v33  ;;  %v4588_v32 = vmul.f32 %v4566_v51, %v7559_v56  ;;  %v4582_v56 = vand.u32 2147483647, %v7666_v58  ;;  %v4928_v16 = vld [vmem:[#allocation14 + $0x110] sm:$0xff] }
 0x5e8   :  { %v5829_v43 = vpop.eup %5828  ;;  %v4924_v2 = vld [vmem:[#allocation14 + $0xf0] sm:$0xff] }
 0x5e9   :  { %3499 = vst.msk [vmem:[#allocation19 + $0x24] sm:$0x1] %vm830_vm4, %v3483_v42  ;;  %v5831_v53 = vpop.eup %5830  ;;  %v4589_v4 = vmul.f32 %v5829_v43, %v4547_v1  ;;  %vm4583_vm5 = vcmp.eq.f32.partialorder %v4582_v56, 8.507059e+37  ;;  %v4920_v0 = vld [vmem:[#allocation14 + $0xd0] sm:$0xff]  ;;  %v7993_v43 = vld [vmem:[#allocation27_spill] sm:$0xff] }
 0x5ea   :  { %v4878_v45 = vadd.f32 1.0, %v5831_v53  ;;  %v4586_v25 = vsel %vm4583_vm5, %v4585_v41, %v4581_v23  ;;  %v5930_v51 = vld [vmem:[#allocation14 + $0x50] sm:$0xff] }
 0x5eb   :  { %v7721_v21 = vadd.f32 %v4589_v4, %v4588_v32  ;;  %v7994_v32 = vld [vmem:[#allocation31_spill] sm:$0xff] }
 0x5ec   :  { %5832 = vrcp.f32 %v4878_v45  ;;  %v4890_v19 = vand.u32 2147483648, %v4878_v45  ;;  %v4888_v46 = vand.u32 2147483647, %v4878_v45  ;;  %vm4884_vm7 = vweird.f32 %v4878_v45 }
 0x5ed   :  { %5834 = vtanh.f32 %v7721_v21 }
 0x5ee   :  { %v3478_v14 = vpop.permute.xlu2 %3477  ;;  %v4891_v49 = vor.u32 1.1754944e-38, %v4890_v19  ;;  %vm4889_vm9 = vcmp.eq.f32.partialorder %v4888_v46, 8.507059e+37 }
 0x5ef   :  { %v3486_v18 = vperm.slane %v3478_v14, %v7148_v33  ;;  %v7996_v14 = vld [vmem:[#allocation28_spill] sm:$0xff] }
 0x5f1   :  { %3502 = vst.msk [vmem:[#allocation19 + $0x3c] sm:$0x1] %vm830_vm4, %v3486_v18 }
 0x5f2   :  { %v5833_v8 = vpop.eup %5832  ;;  %v3457_v55 = vpop.permute.xlu1 %3456 }
 0x5f3   :  { %v5835_v63 = vpop.eup %5834  ;;  %v3479_v12 = vperm.slane %v3457_v55, %v7148_v33  ;;  %v4880_v61 = vmul.f32 %v5833_v8, %v4878_v45  ;;  %vm4885_vm6 = vweird.f32 %v5833_v8  ;;  %v7995_v45 = vld [vmem:[#allocation43_spill] sm:$0xff] }
 0x5f4   :  { %v4592_v52 = vmul.f32 %v5835_v63, %v4586_v25  ;;  %v3460_v13 = vpop.permute.xlu0 %3459  ;;  %vm4886_vm8 = vmor %vm4884_vm7, %vm4885_vm6  ;;  %v7999_v63 = vld [vmem:[#allocation35_spill] sm:$0xff] }
 0x5f5   :  { %3495 = vst.msk [vmem:[#allocation19 + $0x4] sm:$0x1] %vm830_vm4, %v3479_v12  ;;  %v3480_v58 = vperm.slane %v3460_v13, %v7148_v33  ;;  %v4881_v48 = vsub.f32 1.0, %v4880_v61  ;;  %v8000_v61 = vld [vmem:[#allocation30_spill] sm:$0xff] }
 0x5f6   :  { %4625 = vmatmul.f32.vlgmr.msrb.gmra.mxu1 %v4592_v52  ;;  %5038 = vmatmul.f32.vlgmr.msrb.gmra.mxu3 %v4592_v52 }
 0x5f7   :  { %5058 = vmatmul.f32.vlgmr.msra.gmra.mxu0 %v4592_v52  ;;  %5098 = vmatmul.f32.vlgmr.msra.gmra.mxu2 %v4592_v52  ;;  %3496 = vst.msk [vmem:[#allocation19 + $0xc] sm:$0x1] %vm830_vm4, %v3480_v58  ;;  %v4882_v30 = vmul.f32 %v5833_v8, %v4881_v48 }
 0x5f8   :  { %5142 = vmatpush.msrb.mxu1 %v4956_v7 }
 0x5f9   :  { %v4883_v28 = vadd.f32 %v5833_v8, %v4882_v30 }
 0x5fa   :  { %5143 = vmatpush.msrb.mxu1 %v4952_v57  ;;  %v3466_v15 = vpop.permute.xlu1 %3465 }
 0x5fb   :  { %v3482_v3 = vperm.slane %v3466_v15, %v7148_v33  ;;  %v4887_v38 = vsel %vm4886_vm8, %v5833_v8, %v4883_v28  ;;  %v7998_v8 = vld [vmem:[#allocation29_spill] sm:$0xff] }
 0x5fc   :  { %5144 = vmatpush.msrb.mxu1 %v4948_v36  ;;  %v4892_v17 = vsel %vm4889_vm9, %v4891_v49, %v4887_v38  ;;  %v5274_v36 = vld [vmem:[#allocation17 + $0x78] sm:$0xff]  ;;  %v5273_v38 = vld [vmem:[#allocation17 + $0x70] sm:$0xff]  ;;  %v7756_v49 = vld [vmem:[%s7877_s8] sm:$0xf] }
 0x5fd   :  { %3498 = vst.msk [vmem:[#allocation19 + $0x1c] sm:$0x1] %vm830_vm4, %v3482_v3  ;;  %5275 = vmatpush.msrb.mxu3 %v5274_v36  ;;  %v5262_v36 = vld [vmem:[#allocation17 + $0x18] sm:$0xff] }
 0x5fe   :  { %5145 = vmatpush.msrb.mxu1 %v4944_v10  ;;  %5118 = vmatmul.f32.vlgmr.msra.gmra.mxu3 %v4892_v17 }
 0x5ff   :  { %5078 = vmatmul.f32.vlgmr.msra.gmra.mxu1 %v4592_v52  ;;  %5138 = vmatmul.f32.vlgmr.msrb.gmra.mxu0 %v4892_v17 }
 0x600   :  { %5146 = vmatpush.msrb.mxu1 %v4940_v47  ;;  %5178 = vmatmul.f32.vlgmr.msrb.gmra.mxu2 %v4892_v17 }
 0x601   :  { %5276 = vmatpush.msrb.mxu3 %v5273_v38 }
 0x602   :  { %5147 = vmatpush.msrb.mxu1 %v4936_v62  ;;  %v3472_v5 = vpop.permute.xlu1 %3471  ;;  %v3475_v31 = vpop.permute.xlu0 %3474 }
 0x603   :  { %v3484_v54 = vperm.slane %v3472_v5, %v7148_v33  ;;  %v3485_v22 = vperm.slane %v3475_v31, %v7148_v33 }
 0x604   :  { %5148 = vmatpush.msrb.mxu1 %v4932_v34 }
 0x605   :  { %3500 = vst.msk [vmem:[#allocation19 + $0x2c] sm:$0x1] %vm830_vm4, %v3484_v54 }
 0x606   :  { %5149 = vmatpush.msrb.mxu1 %v4928_v16  ;;  %3501 = vst.msk [vmem:[#allocation19 + $0x34] sm:$0x1] %vm830_vm4, %v3485_v22  ;;  %v5185_v22 = vperm.slane %v7756_v49, 1 }
 0x608   :  { %5150 = vmatpush.msrb.mxu1 %v4924_v2  ;;  %v7765_v2 = vld [vmem:[%s7879_s10] ss:$0 sm:$0xff] }
 0x60a   :  { %5151 = vmatpush.msrb.mxu1 %v4920_v0 }
 0x60c   :  { %5152 = vmatpush.msrb.mxu1 %v4916_v27 }
 0x60e   :  { %5153 = vmatpush.msrb.mxu1 %v4912_v24 }
 0x610   :  { %5154 = vmatpush.msrb.mxu1 %v5929_v50 }
 0x612   :  { %5155 = vmatpush.msrb.mxu1 %v5930_v51 }
 0x614   :  { %5156 = vmatpush.msrb.mxu1 %v7591_v6  ;;  %v7997_v6 = vld [vmem:[#allocation33_spill] sm:$0xff] }
 0x616   :  { %5157 = vmatpush.msrb.mxu1 %v7593_v44 }
 0x617   :  { %5158 = vmatmul.f32.vlgmr.msrb.gmra.mxu1 %v4892_v17 }
 0x63d   :  { %v4024_v42 = vpop.xlane.xlu1 %4023 }
 0x63e   :  { %v4105_v29 = vadd.f32 %v7993_v43, %v4024_v42 }
 0x63f   :  { %v4026_v1 = vpop.xlane.xlu0 %4025 }
 0x640   :  { %v4028_v53 = vpop.xlane.xlu2 %4027  ;;  %v4106_v4 = vadd.f32 %v7994_v32, %v4026_v1  ;;  %4122 = vperm.xlu1 %5579, %v4105_v29  }
 0x641   :  { %v4107_v26 = vadd.f32 %v7995_v45, %v4028_v53  ;;  %v5269_v53 = vld [vmem:[#allocation17 + $0x50] sm:$0xff] }
 0x642   :  { %4125 = vperm.xlu0 %5577, %v4106_v4   ;;  %v5184_v4 = vperm.slane %v7756_v49, 0 }
 0x643   :  { %4128 = vperm.xlu2 %5578, %v4107_v26  }
 0x645   :  { %v4030_v20 = vpop.xlane.xlu1 %4029 }
 0x646   :  { %v4108_v18 = vadd.f32 %v7996_v14, %v4030_v20  ;;  %v5268_v20 = vld [vmem:[#allocation17 + $0x48] sm:$0xff] }
 0x647   :  { %v4032_v56 = vpop.xlane.xlu0 %4031 }
 0x648   :  { %v4109_v23 = vadd.f32 %v7997_v6, %v4032_v56  ;;  %4131 = vperm.xlu1 %5579, %v4108_v18   ;;  %v4034_v44 = vpop.xlane.xlu2 %4033  ;;  %v5187_v18 = vperm.slane %v7756_v49, 3 }
 0x649   :  { %v4110_v55 = vadd.f32 %v7998_v8, %v4034_v44 }
 0x64b   :  { %4134 = vperm.xlu2 %5578, %v4109_v23  }
 0x64d   :  { %v4036_v41 = vpop.xlane.xlu1 %4035 }
 0x64e   :  { %v4111_v12 = vadd.f32 %v7999_v63, %v4036_v41  ;;  %v5267_v41 = vld [vmem:[#allocation17 + $0x40] sm:$0xff] }
 0x64f   :  { %v4038_v25 = vpop.xlane.xlu0 %4037 }
 0x650   :  { %v4112_v52 = vadd.f32 %v8000_v61, %v4038_v25  ;;  %4137 = vperm.xlu1 %5579, %v4110_v55   ;;  %4140 = vperm.xlu0 %5577, %v4111_v12   ;;  %v5266_v12 = vld [vmem:[#allocation17 + $0x38] sm:$0xff] }
 0x653   :  { %4143 = vperm.xlu2 %5578, %v4112_v52  }
 0x673   :  { %v4626_v13 = vpop.f32.mrf.mxu1 }
 0x674   :  { %v5059_v7 = vpop.f32.mrf.mxu0  ;;  %v4645_v58 = vperm.slane %v4626_v13, 0  ;;  %v4638_v48 = vrot.slane %v4626_v13, 1  ;;  %v4639_v57 = vrot.slane %v4626_v13, 2  ;;  %v4640_v30 = vrot.slane %v4626_v13, 3 }
 0x675   :  { %v4641_v19 = vrot.slane %v4626_v13, 4  ;;  %v4642_v46 = vrot.slane %v4626_v13, 5  ;;  %v4643_v54 = vrot.slane %v4626_v13, 6 }
 0x676   :  { %v4661_v28 = vadd.f32 %v4645_v58, %v7614_v40  ;;  %v4646_v15 = vperm.slane %v4638_v48, 0  ;;  %v4647_v10 = vperm.slane %v4639_v57, 0  ;;  %v4648_v3 = vperm.slane %v4640_v30, 0  ;;  %v5272_v40 = vld [vmem:[#allocation17 + $0x68] sm:$0xff]  ;;  %v5263_v30 = vld [vmem:[#allocation17 + $0x20] sm:$0xff] }
 0x677   :  { %v4649_v62 = vperm.slane %v4641_v19, 0  ;;  %v4650_v5 = vperm.slane %v4642_v46, 0  ;;  %5277 = vmatpush.msrb.mxu3 %v5272_v40  ;;  %v4651_v42 = vperm.slane %v4643_v54, 0  ;;  %v5264_v58 = vld [vmem:[#allocation17 + $0x28] sm:$0xff]  ;;  %v5186_v54 = vperm.slane %v7756_v49, 2  ;;  %v8010_v49 = vld [vmem:[#allocation38_spill] sm:$0xff] }
 0x678   :  { %5836 = vtanh.f32 %v4661_v28  ;;  %v4662_v17 = vadd.f32 %v4646_v15, %v7623_v35  ;;  %v4663_v47 = vadd.f32 %v4647_v10, %v7625_v60  ;;  %v4664_v16 = vadd.f32 %v4648_v3, %v7631_v59  ;;  %v5271_v60 = vld [vmem:[#allocation17 + $0x60] sm:$0xff]  ;;  %v5270_v59 = vld [vmem:[#allocation17 + $0x58] sm:$0xff] }
 0x679   :  { %v5039_v34 = vpop.f32.mrf.mxu3  ;;  %v4644_v35 = vrot.slane %v4626_v13, 7  ;;  %v4665_v27 = vadd.f32 %v4649_v62, %v7635_v11  ;;  %5278 = vmatpush.msrb.mxu3 %v5271_v60  ;;  %v4666_v50 = vadd.f32 %v4650_v5, %v7645_v9  ;;  %v4667_v6 = vadd.f32 %v4651_v42, %v7652_v37  ;;  %v5265_v13 = vld [vmem:[#allocation17 + $0x30] sm:$0xff] }
 0x67a   :  { %v5099_v31 = vpop.f32.mrf.mxu2  ;;  %5838 = vtanh.f32 %v4662_v17 }
 0x67b   :  { %5840 = vtanh.f32 %v4663_v47  ;;  %5279 = vmatpush.msrb.mxu3 %v5270_v59  ;;  %v4652_v1 = vperm.slane %v4644_v35, 0  ;;  %v5260_v47 = vld [vmem:[#allocation17 + $0x8] sm:$0xff]  ;;  %v5932_v35 = vld [vmem:[#allocation17] sm:$0xff] }
 0x67c   :  { %v5139_v0 = vpop.f32.mrf.mxu0  ;;  %5842 = vtanh.f32 %v4664_v16  ;;  %v5079_v15 = vpop.f32.mrf.mxu1 }
 0x67d   :  { %v5140_v24 = vadd.f32 %v5139_v0, %v5059_v7  ;;  %5844 = vtanh.f32 %v4665_v27  ;;  %5280 = vmatpush.msrb.mxu3 %v5269_v53  ;;  %v4668_v44 = vadd.f32 %v4652_v1, %v7655_v39 }
 0x67e   :  { %v5837_v51 = vpop.eup %5836  ;;  %5846 = vtanh.f32 %v4666_v50 }
 0x67f   :  { %v5193_v43 = vadd.f32 %v5185_v22, %v5140_v24  ;;  %v4681_v29 = vmul.f32 %v5837_v51, %v7765_v2  ;;  %5281 = vmatpush.msrb.mxu3 %v5268_v20 }
 0x680   :  { %v5839_v32 = vpop.eup %5838 }
 0x681   :  { %v5841_v11 = vpop.eup %5840  ;;  %v5557_v45 = vmul.f32 -1.442695, %v5193_v43  ;;  %v5119_v26 = vpop.f32.mrf.mxu3  ;;  %4689 = vadd.xlane.f32.xlu1 %v4681_v29  ;;  %v4682_v9 = vmul.f32 %v5839_v32, %v7765_v2  ;;  %5282 = vmatpush.msrb.mxu3 %v5267_v41 }
 0x682   :  { %v5120_v14 = vadd.f32 %v5119_v26, %v5039_v34  ;;  %v4683_v56 = vmul.f32 %v5841_v11, %v7765_v2  ;;  %v5843_v8 = vpop.eup %5842  ;;  %v5931_v34 = vld [vmem:[#allocation17 + $0x10] sm:$0xff] }
 0x683   :  { %5848 = vpow2.f32 %v5557_v45  ;;  %v5179_v23 = vpop.f32.mrf.mxu2  ;;  %4691 = vadd.xlane.f32.xlu0 %v4682_v9  ;;  %v5845_v25 = vpop.eup %5844  ;;  %5283 = vmatpush.msrb.mxu3 %v5266_v12  ;;  %v4684_v7 = vmul.f32 %v5843_v8, %v7765_v2 }
 0x684   :  { %v5192_v55 = vadd.f32 %v5184_v4, %v5120_v14  ;;  %v5180_v63 = vadd.f32 %v5179_v23, %v5099_v31  ;;  %4693 = vadd.xlane.f32.xlu2 %v4683_v56  ;;  %5850 = vtanh.f32 %v4667_v6  ;;  %v5847_v37 = vpop.eup %5846  ;;  %v4685_v57 = vmul.f32 %v5845_v25, %v7765_v2 }
 0x685   :  { %5852 = vtanh.f32 %v4668_v44  ;;  %5284 = vmatpush.msrb.mxu3 %v5265_v13  ;;  %v4686_v46 = vmul.f32 %v5847_v37, %v7765_v2 }
 0x686   :  { %v5556_v61 = vmul.f32 -1.442695, %v5192_v55  ;;  %v5195_v52 = vadd.f32 %v5187_v18, %v5180_v63 }
 0x687   :  { %5285 = vmatpush.msrb.mxu3 %v5264_v58 }
 0x688   :  { %5854 = vpow2.f32 %v5556_v61  ;;  %v5558_v39 = vmul.f32 -1.442695, %v5195_v52 }
 0x689   :  { %v5849_v48 = vpop.eup %5848  ;;  %4695 = vadd.xlane.f32.xlu1 %v4684_v7  ;;  %5286 = vmatpush.msrb.mxu3 %v5263_v30 }
 0x68a   :  { %v5218_v19 = vadd.f32 1.0, %v5849_v48  ;;  %5856 = vpow2.f32 %v5558_v39  ;;  %v5851_v28 = vpop.eup %5850 }
 0x68b   :  { %4697 = vadd.xlane.f32.xlu0 %v4685_v57  ;;  %v5853_v10 = vpop.eup %5852  ;;  %5287 = vmatpush.msrb.mxu3 %v5262_v36  ;;  %v4687_v17 = vmul.f32 %v5851_v28, %v7765_v2 }
 0x68c   :  { %5858 = vrcp.f32 %v5218_v19  ;;  %4699 = vadd.xlane.f32.xlu2 %v4686_v46  ;;  %v4688_v40 = vmul.f32 %v5853_v10, %v7765_v2  ;;  %v5230_v2 = vand.u32 2147483648, %v5218_v19  ;;  %vm5224_vm11 = vweird.f32 %v5218_v19 }
 0x68d   :  { %5288 = vmatpush.msrb.mxu3 %v5931_v34  ;;  %v5228_v1 = vand.u32 2147483647, %v5218_v19 }
 0x68e   :  { %v5855_v3 = vpop.eup %5854  ;;  %v5231_v45 = vor.u32 1.1754944e-38, %v5230_v2  ;;  %v8008_v2 = vld [vmem:[#allocation37_spill] sm:$0xff] }
 0x68f   :  { %v5199_v38 = vadd.f32 1.0, %v5855_v3  ;;  %5289 = vmatpush.msrb.mxu3 %v5260_v47  ;;  %vm5229_vm15 = vcmp.eq.f32.partialorder %v5228_v1, 8.507059e+37 }
 0x690   :  { %v5857_v62 = vpop.eup %5856 }
 0x691   :  { %5860 = vrcp.f32 %v5199_v38  ;;  %v7780_v5 = vadd.f32 1.0, %v5857_v62  ;;  %4701 = vadd.xlane.f32.xlu1 %v4687_v17  ;;  %5290 = vmatpush.msrb.mxu3 %v5932_v35  ;;  %v5211_v53 = vand.u32 2147483648, %v5199_v38  ;;  %v5209_v4 = vand.u32 2147483647, %v5199_v38  ;;  %v8003_v62 = vld [vmem:[#allocation32_spill] sm:$0xff] }
 0x692   :  { %v5859_v31 = vpop.eup %5858  ;;  %vm5205_vm14 = vweird.f32 %v5199_v38 }
 0x693   :  { %v5220_v16 = vmul.f32 %v5859_v31, %v5218_v19  ;;  %5862 = vrcp.f32 %v7780_v5  ;;  %4703 = vadd.xlane.f32.xlu0 %v4688_v40  ;;  %vm5225_vm10 = vweird.f32 %v5859_v31  ;;  %v5212_v18 = vor.u32 1.1754944e-38, %v5211_v53 }
 0x694   :  { %v5159_v22 = vpop.f32.mrf.mxu1  ;;  %vm7786_vm12 = vmor %vm5224_vm11, %vm5225_vm10  ;;  %vm5210_vm1 = vcmp.eq.f32.partialorder %v5209_v4, 8.507059e+37  ;;  %v5250_v52 = vand.u32 2147483648, %v7780_v5  ;;  %vm5244_vm3 = vweird.f32 %v7780_v5  ;;  %v5248_v13 = vand.u32 2147483647, %v7780_v5  ;;  %v5295_v4 = vld [vmem:[#allocation5] sm:$0xff] }
 0x695   :  { %v5221_v60 = vsub.f32 1.0, %v5220_v16  ;;  %v5160_v0 = vadd.f32 %v5159_v22, %v5079_v15 }
 0x696   :  { %v5251_v7 = vor.u32 1.1754944e-38, %v5250_v52  ;;  %vm5249_vm6 = vcmp.eq.f32.partialorder %v5248_v13, 8.507059e+37  ;;  %v5300_v13 = vld [vmem:[#allocation5 + $0x28] sm:$0xff] }
 0x697   :  { %v5861_v27 = vpop.eup %5860  ;;  %v5222_v24 = vmul.f32 %v5859_v31, %v5221_v60  ;;  %v5194_v50 = vadd.f32 %v5186_v54, %v5160_v0  ;;  %v8005_v54 = vld [vmem:[#allocation45_spill] sm:$0xff]  ;;  %v8006_v60 = vld [vmem:[#allocation34_spill] sm:$0xff] }
 0x698   :  { %v5201_v59 = vmul.f32 %v5861_v27, %v5199_v38  ;;  %vm5206_vm13 = vweird.f32 %v5861_v27 }
 0x699   :  { %v5863_v51 = vpop.eup %5862  ;;  %v5223_v42 = vadd.f32 %v5859_v31, %v5222_v24  ;;  %5864 = vtanh.f32 %v5194_v50  ;;  %vm5207_vm0 = vmor %vm5205_vm14, %vm5206_vm13  ;;  %v8007_v24 = vld [vmem:[#allocation40_spill] sm:$0xff] }
 0x69a   :  { %v5202_v43 = vsub.f32 1.0, %v5201_v59  ;;  %v5240_v29 = vmul.f32 %v5863_v51, %v7780_v5  ;;  %vm5245_vm2 = vweird.f32 %v5863_v51 }
 0x69b   :  { %v5227_v11 = vsel %vm7786_vm12, %v5859_v31, %v5223_v42  ;;  %vm5246_vm5 = vmor %vm5244_vm3, %vm5245_vm2  ;;  %v8004_v31 = vld [vmem:[#allocation36_spill] sm:$0xff] }
 0x69c   :  { %v5203_v32 = vmul.f32 %v5861_v27, %v5202_v43  ;;  %v5241_v26 = vsub.f32 1.0, %v5240_v29  ;;  %v5232_v56 = vsel %vm5229_vm15, %v5231_v45, %v5227_v11  ;;  %v8009_v43 = vld [vmem:[#allocation41_spill] sm:$0xff] }
 0x69d   :  { %v4129_v9 = vpop.permute.xlu2 %4128  ;;  %v5254_v8 = vmul.f32 %v5232_v56, %v7721_v21 }
 0x69e   :  { %v5204_v20 = vadd.f32 %v5861_v27, %v5203_v32  ;;  %v4147_v14 = vperm.slane %v4129_v9, %v7148_v33  ;;  %v5242_v41 = vmul.f32 %v5863_v51, %v5241_v26 }
 0x69f   :  { %v5865_v23 = vpop.eup %5864 }
 0x6a0   :  { %v5208_v6 = vsel %vm5207_vm0, %v5861_v27, %v5204_v20  ;;  %4163 = vst.msk [vmem:[#allocation19 + $0x15] sm:$0x1] %vm830_vm4, %v4147_v14  ;;  %v5243_v25 = vadd.f32 %v5863_v51, %v5242_v41  ;;  %v5296_v20 = vld [vmem:[#allocation5 + $0x8] sm:$0xff]  ;;  %v5297_v14 = vld [vmem:[#allocation5 + $0x10] sm:$0xff] }
 0x6a1   :  { %v5213_v44 = vsel %vm5210_vm1, %v5212_v18, %v5208_v6 }
 0x6a2   :  { %v5255_v55 = vmul.f32 %v5865_v23, %v5213_v44  ;;  %v5247_v37 = vsel %vm5246_vm5, %v5863_v51, %v5243_v25  ;;  %v5299_v25 = vld [vmem:[#allocation5 + $0x20] sm:$0xff] }
 0x6a3   :  { %v5252_v58 = vsel %vm5249_vm6, %v5251_v7, %v5247_v37  ;;  %v5595_v7 = vld [vmem:[%s7879_s10] ss:$0 sm:$0xff]  ;;  %s6176_s10 = smov [#allocation19]  }
 0x6a4   :  { %v5256_v63 = vadd.f32 %v5255_v55, %v5254_v8  ;;  %v5298_v8 = vld [vmem:[#allocation5 + $0x18] sm:$0xff]  ;;  %s5508_s13 = sshll.u32 %s6176_s10, 4  ;;  %s5509_s13 = int_to_ptr.vmem [resolvable:$true] %s5508_s13 }
 0x6a5   :  { %v4135_v12 = vpop.permute.xlu2 %4134 }
 0x6a6   :  { %5866 = vtanh.f32 %v5256_v63  ;;  %v4149_v61 = vperm.slane %v4135_v12, %v7148_v33 }
 0x6a8   :  { %4165 = vst.msk [vmem:[#allocation19 + $0x25] sm:$0x1] %vm830_vm4, %v4149_v61 }
 0x6ac   :  { %v5867_v21 = vpop.eup %5866 }
 0x6ad   :  { %v4144_v39 = vpop.permute.xlu2 %4143  ;;  %v5258_v48 = vmul.f32 %v5867_v21, %v5252_v58 }
 0x6ae   :  { %v4152_v57 = vperm.slane %v4144_v39, %v7148_v33 }
 0x6af   :  { %5291 = vmatmul.f32.vlgmr.msrb.gmra.mxu3 %v5258_v48 }
 0x6b0   :  { %4168 = vst.msk [vmem:[#allocation19 + $0x3d] sm:$0x1] %vm830_vm4, %v4152_v57 }
 0x6b2   :  { %v4123_v30 = vpop.permute.xlu1 %4122 }
 0x6b3   :  { %v4145_v19 = vperm.slane %v4123_v30, %v7148_v33 }
 0x6b4   :  { %v4126_v46 = vpop.permute.xlu0 %4125 }
 0x6b5   :  { %4161 = vst.msk [vmem:[#allocation19 + $0x5] sm:$0x1] %vm830_vm4, %v4145_v19  ;;  %v4146_v36 = vperm.slane %v4126_v46, %v7148_v33  ;;  %v5301_v19 = vld [vmem:[#allocation5 + $0x30] sm:$0xff] }
 0x6b7   :  { %4162 = vst.msk [vmem:[#allocation19 + $0xd] sm:$0x1] %vm830_vm4, %v4146_v36 }
 0x6ba   :  { %v4132_v28 = vpop.permute.xlu1 %4131 }
 0x6bb   :  { %v4148_v15 = vperm.slane %v4132_v28, %v7148_v33 }
 0x6bd   :  { %4164 = vst.msk [vmem:[#allocation19 + $0x1d] sm:$0x1] %vm830_vm4, %v4148_v15 }
 0x6c2   :  { %v4138_v10 = vpop.permute.xlu1 %4137  ;;  %v4141_v3 = vpop.permute.xlu0 %4140 }
 0x6c3   :  { %v4150_v38 = vperm.slane %v4138_v10, %v7148_v33  ;;  %v4151_v17 = vperm.slane %v4141_v3, %v7148_v33 }
 0x6c5   :  { %4166 = vst.msk [vmem:[#allocation19 + $0x2d] sm:$0x1] %vm830_vm4, %v4150_v38 }
 0x6c6   :  { %4167 = vst.msk [vmem:[#allocation19 + $0x35] sm:$0x1] %vm830_vm4, %v4151_v17  ;;  %v5933_v17 = vld [vmem:[#allocation5 + $0x38] sm:$0xff] }
 0x6f4   :  { %v4690_v47 = vpop.xlane.xlu1 %4689 }
 0x6f5   :  { %v4771_v34 = vadd.f32 %v8003_v62, %v4690_v47 }
 0x6f6   :  { %v4692_v5 = vpop.xlane.xlu0 %4691 }
 0x6f7   :  { %v4694_v40 = vpop.xlane.xlu2 %4693  ;;  %v4772_v16 = vadd.f32 %v8004_v31, %v4692_v5  ;;  %4788 = vperm.xlu1 %5579, %v4771_v34  }
 0x6f8   :  { %v4773_v22 = vadd.f32 %v8005_v54, %v4694_v40 }
 0x6f9   :  { %4791 = vperm.xlu0 %5577, %v4772_v16  }
 0x6fa   :  { %4794 = vperm.xlu2 %5578, %v4773_v22  }
 0x6fc   :  { %v4696_v35 = vpop.xlane.xlu1 %4695 }
 0x6fd   :  { %v4774_v0 = vadd.f32 %v8006_v60, %v4696_v35 }
 0x6fe   :  { %v4698_v27 = vpop.xlane.xlu0 %4697 }
 0x6ff   :  { %v4775_v50 = vadd.f32 %v8007_v24, %v4698_v27  ;;  %4797 = vperm.xlu1 %5579, %v4774_v0   ;;  %v4700_v59 = vpop.xlane.xlu2 %4699 }
 0x700   :  { %v4776_v42 = vadd.f32 %v8008_v2, %v4700_v59 }
 0x702   :  { %4800 = vperm.xlu2 %5578, %v4775_v50  }
 0x704   :  { %v4702_v51 = vpop.xlane.xlu1 %4701 }
 0x705   :  { %v4777_v29 = vadd.f32 %v8009_v43, %v4702_v51 }
 0x706   :  { %v4704_v1 = vpop.xlane.xlu0 %4703 }
 0x707   :  { %v4778_v53 = vadd.f32 %v8010_v49, %v4704_v1  ;;  %4803 = vperm.xlu1 %5579, %v4776_v42   ;;  %4806 = vperm.xlu0 %5577, %v4777_v29  }
 0x70a   :  { %4809 = vperm.xlu2 %5578, %v4778_v53  }
 0x732   :  { %v5292_v32 = vpop.f32.mrf.mxu3 }
 0x733   :  { %v5311_v11 = vperm.slane %v5292_v32, 0  ;;  %v5304_v45 = vrot.slane %v5292_v32, 1  ;;  %v5305_v26 = vrot.slane %v5292_v32, 2  ;;  %v5306_v9 = vrot.slane %v5292_v32, 3 }
 0x734   :  { %v5307_v18 = vrot.slane %v5292_v32, 4  ;;  %v5308_v56 = vrot.slane %v5292_v32, 5  ;;  %v5309_v37 = vrot.slane %v5292_v32, 6  ;;  %v5310_v58 = vrot.slane %v5292_v32, 7 }
 0x735   :  { %v5327_v6 = vadd.f32 %v5311_v11, %v5295_v4  ;;  %v5312_v23 = vperm.slane %v5304_v45, 0  ;;  %v5313_v44 = vperm.slane %v5305_v26, 0  ;;  %v5314_v41 = vperm.slane %v5306_v9, 0  ;;  %v8011_v45 = vld [vmem:[#allocation39_spill] sm:$0xff] }
 0x736   :  { %v5315_v12 = vperm.slane %v5307_v18, 0  ;;  %v5316_v61 = vperm.slane %v5308_v56, 0  ;;  %v5317_v57 = vperm.slane %v5309_v37, 0  ;;  %v5318_v36 = vperm.slane %v5310_v58, 0  ;;  %v8013_v56 = vld [vmem:[#allocation48_spill] sm:$0xff]  ;;  %v8017_v37 = vld [vmem:[#allocation50_spill] sm:$0xff] }
 0x737   :  { %5868 = vtanh.f32 %v5327_v6  ;;  %v5328_v55 = vadd.f32 %v5312_v23, %v5296_v20  ;;  %v5329_v63 = vadd.f32 %v5313_v44, %v5297_v14  ;;  %v5330_v52 = vadd.f32 %v5314_v41, %v5298_v8  ;;  %v8012_v14 = vld [vmem:[#allocation44_spill] sm:$0xff]  ;;  %v8014_v41 = vld [vmem:[#allocation42_spill] sm:$0xff] }
 0x738   :  { %v5331_v21 = vadd.f32 %v5315_v12, %v5299_v25  ;;  %v5332_v39 = vadd.f32 %v5316_v61, %v5300_v13  ;;  %v5333_v3 = vadd.f32 %v5317_v57, %v5301_v19  ;;  %v5334_v47 = vadd.f32 %v5933_v17, %v5318_v36  ;;  %v8016_v25 = vld [vmem:[#allocation46_spill] sm:$0xff] }
 0x739   :  { %5870 = vtanh.f32 %v5328_v55 }
 0x73a   :  { %5872 = vtanh.f32 %v5329_v63  ;;  %v8015_v63 = vld [vmem:[#allocation47_spill] sm:$0xff] }
 0x73b   :  { %5874 = vtanh.f32 %v5330_v52 }
 0x73c   :  { %5876 = vtanh.f32 %v5331_v21  ;;  %v8018_v21 = vld [vmem:[#allocation49_spill] sm:$0xff] }
 0x73d   :  { %v5869_v48 = vpop.eup %5868  ;;  %5878 = vtanh.f32 %v5332_v39 }
 0x73e   :  { %v5347_v30 = vmul.f32 %v5869_v48, %v5595_v7  ;;  %5880 = vtanh.f32 %v5333_v3 }
 0x73f   :  { %v5871_v46 = vpop.eup %5870  ;;  %5882 = vtanh.f32 %v5334_v47 }
 0x740   :  { %v5873_v28 = vpop.eup %5872  ;;  %5355 = vadd.xlane.f32.xlu1 %v5347_v30  ;;  %v5348_v15 = vmul.f32 %v5871_v46, %v5595_v7 }
 0x741   :  { %v5349_v10 = vmul.f32 %v5873_v28, %v5595_v7  ;;  %v5875_v38 = vpop.eup %5874 }
 0x742   :  { %5357 = vadd.xlane.f32.xlu0 %v5348_v15  ;;  %v5877_v62 = vpop.eup %5876  ;;  %v5350_v5 = vmul.f32 %v5875_v38, %v5595_v7 }
 0x743   :  { %5359 = vadd.xlane.f32.xlu2 %v5349_v10  ;;  %v5879_v34 = vpop.eup %5878  ;;  %v5351_v40 = vmul.f32 %v5877_v62, %v5595_v7 }
 0x744   :  { %v5352_v31 = vmul.f32 %v5879_v34, %v5595_v7  ;;  %v5881_v16 = vpop.eup %5880 }
 0x745   :  { %v5883_v54 = vpop.eup %5882  ;;  %v5353_v22 = vmul.f32 %v5881_v16, %v5595_v7 }
 0x746   :  { %v5354_v35 = vmul.f32 %v5883_v54, %v5595_v7 }
 0x748   :  { %5361 = vadd.xlane.f32.xlu1 %v5350_v5 }
 0x74a   :  { %5363 = vadd.xlane.f32.xlu0 %v5351_v40 }
 0x74b   :  { %5365 = vadd.xlane.f32.xlu2 %v5352_v31 }
 0x750   :  { %5367 = vadd.xlane.f32.xlu1 %v5353_v22 }
 0x752   :  { %5369 = vadd.xlane.f32.xlu0 %v5354_v35 }
 0x754   :  { %v4795_v60 = vpop.permute.xlu2 %4794 }
 0x755   :  { %v4813_v0 = vperm.slane %v4795_v60, %v7148_v33 }
 0x757   :  { %4829 = vst.msk [vmem:[#allocation19 + $0x16] sm:$0x1] %vm830_vm4, %v4813_v0 }
 0x75c   :  { %v4801_v27 = vpop.permute.xlu2 %4800 }
 0x75d   :  { %v4815_v24 = vperm.slane %v4801_v27, %v7148_v33 }
 0x75f   :  { %4831 = vst.msk [vmem:[#allocation19 + $0x26] sm:$0x1] %vm830_vm4, %v4815_v24 }
 0x764   :  { %v4810_v50 = vpop.permute.xlu2 %4809 }
 0x765   :  { %v4818_v59 = vperm.slane %v4810_v50, %v7148_v33 }
 0x767   :  { %4834 = vst.msk [vmem:[#allocation19 + $0x3e] sm:$0x1] %vm830_vm4, %v4818_v59 }
 0x769   :  { %v4789_v51 = vpop.permute.xlu1 %4788 }
 0x76a   :  { %v4811_v2 = vperm.slane %v4789_v51, %v7148_v33 }
 0x76b   :  { %v4792_v42 = vpop.permute.xlu0 %4791 }
 0x76c   :  { %4827 = vst.msk [vmem:[#allocation19 + $0x6] sm:$0x1] %vm830_vm4, %v4811_v2  ;;  %v4812_v43 = vperm.slane %v4792_v42, %v7148_v33 }
 0x76e   :  { %4828 = vst.msk [vmem:[#allocation19 + $0xe] sm:$0x1] %vm830_vm4, %v4812_v43 }
 0x771   :  { %v4798_v29 = vpop.permute.xlu1 %4797 }
 0x772   :  { %v4814_v1 = vperm.slane %v4798_v29, %v7148_v33 }
 0x774   :  { %4830 = vst.msk [vmem:[#allocation19 + $0x1e] sm:$0x1] %vm830_vm4, %v4814_v1 }
 0x779   :  { %v4804_v49 = vpop.permute.xlu1 %4803  ;;  %v4807_v53 = vpop.permute.xlu0 %4806 }
 0x77a   :  { %v4816_v32 = vperm.slane %v4804_v49, %v7148_v33  ;;  %v4817_v4 = vperm.slane %v4807_v53, %v7148_v33 }
 0x77c   :  { %4832 = vst.msk [vmem:[#allocation19 + $0x2e] sm:$0x1] %vm830_vm4, %v4816_v32 }
 0x77d   :  { %4833 = vst.msk [vmem:[#allocation19 + $0x36] sm:$0x1] %vm830_vm4, %v4817_v4 }
 0x7b3   :  { %v5356_v11 = vpop.xlane.xlu1 %5355 }
 0x7b4   :  { %v5437_v26 = vadd.f32 %v8011_v45, %v5356_v11 }
 0x7b5   :  { %v5358_v9 = vpop.xlane.xlu0 %5357 }
 0x7b6   :  { %v5360_v20 = vpop.xlane.xlu2 %5359  ;;  %v5438_v18 = vadd.f32 %v8012_v14, %v5358_v9  ;;  %5454 = vperm.xlu0 %5577, %v5437_v26  }
 0x7b7   :  { %v5439_v6 = vadd.f32 %v8013_v56, %v5360_v20 }
 0x7b8   :  { %5457 = vperm.xlu1 %5579, %v5438_v18  }
 0x7b9   :  { %5460 = vperm.xlu2 %5578, %v5439_v6  }
 0x7bb   :  { %v5362_v23 = vpop.xlane.xlu1 %5361 }
 0x7bc   :  { %v5440_v8 = vadd.f32 %v8014_v41, %v5362_v23 }
 0x7bd   :  { %v5364_v44 = vpop.xlane.xlu0 %5363 }
 0x7be   :  { %v5366_v55 = vpop.xlane.xlu2 %5365  ;;  %v5441_v12 = vadd.f32 %v8015_v63, %v5364_v44 }
 0x7bf   :  { %v5442_v61 = vadd.f32 %v8016_v25, %v5366_v55 }
 0x7c0   :  { %5463 = vperm.xlu1 %5579, %v5440_v8  }
 0x7c1   :  { %5469 = vperm.xlu0 %5577, %v5442_v61   ;;  %5466 = vperm.xlu2 %5578, %v5441_v12  }
 0x7c3   :  { %v5368_v52 = vpop.xlane.xlu1 %5367 }
 0x7c4   :  { %v5443_v7 = vadd.f32 %v8017_v37, %v5368_v52 }
 0x7c5   :  { %v5370_v13 = vpop.xlane.xlu0 %5369 }
 0x7c6   :  { %v5444_v58 = vadd.f32 %v8018_v21, %v5370_v13 }
 0x7c8   :  { %5472 = vperm.xlu1 %5579, %v5443_v7  }
 0x7c9   :  { %5475 = vperm.xlu2 %5578, %v5444_v58  }
 0x813   :  { %v5461_v39 = vpop.permute.xlu2 %5460 }
 0x814   :  { %v5479_v48 = vperm.slane %v5461_v39, %v7148_v33 }
 0x816   :  { %5495 = vst.msk [vmem:[#allocation19 + $0x17] sm:$0x1] %vm830_vm4, %v5479_v48 }
 0x81b   :  { %v5467_v57 = vpop.permute.xlu2 %5466 }
 0x81c   :  { %v5481_v30 = vperm.slane %v5467_v57, %v7148_v33 }
 0x81e   :  { %5497 = vst.msk [vmem:[#allocation19 + $0x27] sm:$0x1] %vm830_vm4, %v5481_v30 }
 0x823   :  { %v5476_v19 = vpop.permute.xlu2 %5475 }
 0x824   :  { %v5484_v46 = vperm.slane %v5476_v19, %v7148_v33 }
 0x826   :  { %5500 = vst.msk [vmem:[#allocation19 + $0x3f] sm:$0x1] %vm830_vm4, %v5484_v46 }
 0x828   :  { %v5455_v36 = vpop.permute.xlu0 %5454 }
 0x829   :  { %v5477_v28 = vperm.slane %v5455_v36, %v7148_v33 }
 0x82a   :  { %v5458_v15 = vpop.permute.xlu1 %5457 }
 0x82b   :  { %5493 = vst.msk [vmem:[#allocation19 + $0x7] sm:$0x1] %vm830_vm4, %v5477_v28  ;;  %v5478_v10 = vperm.slane %v5458_v15, %v7148_v33 }
 0x82d   :  { %5494 = vst.msk [vmem:[#allocation19 + $0xf] sm:$0x1] %vm830_vm4, %v5478_v10 }
 0x832   :  { %v5464_v3 = vpop.permute.xlu1 %5463 }
 0x833   :  { %v5480_v38 = vperm.slane %v5464_v3, %v7148_v33  ;;  %v5470_v17 = vpop.permute.xlu0 %5469 }
 0x834   :  { %v5482_v47 = vperm.slane %v5470_v17, %v7148_v33 }
 0x835   :  { %5496 = vst.msk [vmem:[#allocation19 + $0x1f] sm:$0x1] %vm830_vm4, %v5480_v38 }
 0x836   :  { %5498 = vst.msk [vmem:[#allocation19 + $0x2f] sm:$0x1] %vm830_vm4, %v5482_v47 }
 0x83a   :  { %v5473_v62 = vpop.permute.xlu1 %5472 }
 0x83b   :  { %v5483_v34 = vperm.slane %v5473_v62, %v7148_v33 }
 0x83d   :  { %5499 = vst.msk [vmem:[#allocation19 + $0x37] sm:$0x1] %vm830_vm4, %v5483_v34 }
 0x83e   :  { %5516 = dma.vmem_to_hbm [thread:$0]  %s5509_s13, 1024, %s5511_s7, [#allocation7], %s6168_s6, %s6168_s6, %s6169_s18  }
 0x83f   :  { %6160 = dma.done.wait [#allocation7], 1024  }
 0x840   :  { %6161 = vsyncadd [#allocation7], 4294966272 }
 0x841   :  { %5521 = vsyncpa [#allocation6], 1 }
 0x842   :  { %5522 = vsyncpa [#allocation9], 1 }
 0x843   :  { %5523 = vsyncpa [#allocation12], 1 }
 0x844   :  { %5524 = vsyncpa [#allocation15], 1 }
 0x845   :  { %5525 = vsyncpa [#allocation18], 1 }
 0x846   :  { %5526 = vsyncpa [#allocation7], 1 }

</bundles_post_ra>
